<compile_context>
chip_gen: v6e
topology: v6e:2x2x1
jax: 0.10.0
libtpu: 0.0.40
codegen_flags: <defaults>
</compile_context>

<pallas_src>
import functools

import jax
import jax.numpy as jnp
from jax import lax
from jax.experimental import pallas as pl
from jax.experimental.pallas import tpu as pltpu


# ----------------------------- Encoder kernel -----------------------------
def _encoder_kernel(x_ref, wuv_ref, enc_ref, scaled_ref, *, N):
    x = x_ref[...]                                             # (rows, L)
    nrm = jnp.sqrt(jnp.sum(x * x, axis=-1, keepdims=True))     # (rows, 1) = ||x||_2
    xn = x / (nrm + 1e-9)
    uv = jnp.dot(xn, wuv_ref[...], preferred_element_type=jnp.float32)  # (rows, 2N)
    enc = jax.nn.sigmoid(uv[:, :N]) * jnp.maximum(uv[:, N:], 0.0)
    enc_ref[...] = enc                      # separator input
    scaled_ref[...] = enc * nrm             # decoder input (enc * ||x||), lane-dense


def _row_tile(rows):
    # >=2 row blocks keep both TensorCores busy on multi-core chips while staying
    # sublane (8) aligned; fall back to a single full block otherwise.
    for t in (512, 256, 128, rows // 2):
        if t and rows % t == 0 and t % 8 == 0:
            return t
    return rows


def encoder(x_rows, wuv_t, N):
    R, L = x_rows.shape
    rt = _row_tile(R)
    kern = functools.partial(_encoder_kernel, N=N)
    return pl.pallas_call(
        kern,
        out_shape=(jax.ShapeDtypeStruct((R, N), jnp.float32),
                   jax.ShapeDtypeStruct((R, N), jnp.float32)),
        grid=(R // rt,),
        in_specs=[pl.BlockSpec((rt, L), lambda i: (i, 0)),
                  pl.BlockSpec((L, 2 * N), lambda i: (0, 0))],
        out_specs=(pl.BlockSpec((rt, N), lambda i: (i, 0)),
                   pl.BlockSpec((rt, N), lambda i: (i, 0))),
        compiler_params=pltpu.CompilerParams(dimension_semantics=("parallel",)),
    )(x_rows, wuv_t)


# ---------------- Fused bidirectional LSTM layer (one pallas_call) ----------------
def _bilstm_kernel(x_ref, wih_ref, whh_ref, b_ref, out_ref,
                   xw_ref, h_ref, c_ref, *, B, K, H):
    d = pl.program_id(0)                      # 0 = forward, 1 = backward direction
    # Input projection for every timestep of this direction: one big MXU matmul.
    xw_ref[...] = (jnp.dot(x_ref[...], wih_ref[0],
                           preferred_element_type=jnp.float32) + b_ref[0])  # (K*B, 4H)
    h_ref[...] = jnp.zeros_like(h_ref)
    c_ref[...] = jnp.zeros_like(c_ref)
    H3 = 3 * H

    def step(t, carry):
        tt = (1 - d) * t + d * (K - 1 - t)    # forward walks t, backward walks K-1-t
        row = pl.multiple_of(tt * B, B)       # time-major rows: [tt*B, tt*B + B)
        gates = xw_ref[pl.ds(row, B), :] + jnp.dot(
            h_ref[...], whh_ref[0], preferred_element_type=jnp.float32)     # (B, 4H)
        # Gate layout [i | f | o | g]: one sigmoid over the 3H slab, one tanh over H.
        sig = jax.nn.sigmoid(gates[:, :H3])
        g = jnp.tanh(gates[:, H3:])
        c_new = sig[:, H:2 * H] * c_ref[...] + sig[:, :H] * g
        h_new = sig[:, 2 * H:H3] * jnp.tanh(c_new)
        c_ref[...] = c_new
        h_ref[...] = h_new
        out_ref[pl.ds(row, B), :] = h_new     # lane-dense (B, H) store
        return carry

    lax.fori_loop(0, K, step, 0, unroll=True if K <= 16 else 8)


def bilstm_layer(x_rows, wih, whh, b, *, B, K):
    R, Din = x_rows.shape                      # R = K*B, time-major rows
    H = whh.shape[1]
    kern = functools.partial(_bilstm_kernel, B=B, K=K, H=H)
    return pl.pallas_call(
        kern,
        out_shape=jax.ShapeDtypeStruct((R, 2 * H), jnp.float32),
        grid=(2,),                             # one program per direction
        in_specs=[pl.BlockSpec((R, Din), lambda d: (0, 0)),
                  pl.BlockSpec((1, Din, 4 * H), lambda d: (d, 0, 0)),
                  pl.BlockSpec((1, H, 4 * H), lambda d: (d, 0, 0)),
                  pl.BlockSpec((1, 1, 4 * H), lambda d: (d, 0, 0))],
        out_specs=pl.BlockSpec((R, H), lambda d: (0, d)),   # fwd | bwd column halves
        scratch_shapes=[pltpu.VMEM((R, 4 * H), jnp.float32),   # xw (all timesteps)
                        pltpu.VMEM((B, H), jnp.float32),       # h
                        pltpu.VMEM((B, H), jnp.float32)],      # c
        compiler_params=pltpu.CompilerParams(dimension_semantics=("parallel",)),
    )(x_rows, wih, whh, b)


# ------------- Fused separator head + softmax + mask + basis decoder -------------
def _head_decoder_kernel(rnn_ref, scaled_ref, wh_ref, bh_ref, wdec_ref, out_ref):
    # Head logits for this source only (grid is over sources).
    logits = (jnp.dot(rnn_ref[...], wh_ref[...],
                      preferred_element_type=jnp.float32) + bh_ref[...])    # (rows, N)
    m = jnp.max(logits, axis=-1, keepdims=True)
    e = jnp.exp(logits - m)
    mask = e / jnp.sum(e, axis=-1, keepdims=True)       # softmax over basis dim N
    masked = scaled_ref[...] * mask                     # (enc * ||x||) * mask
    out_ref[0] = jnp.dot(masked, wdec_ref[...], preferred_element_type=jnp.float32)


def head_decoder(rnn, enc_scaled, w_head_t, b_head, w_dec_t, S):
    R, Drnn = rnn.shape
    N = enc_scaled.shape[1]
    L = w_dec_t.shape[1]
    return pl.pallas_call(
        _head_decoder_kernel,
        out_shape=jax.ShapeDtypeStruct((S, R, L), jnp.float32),
        grid=(S,),
        in_specs=[pl.BlockSpec((R, Drnn), lambda s: (0, 0)),
                  pl.BlockSpec((R, N), lambda s: (0, 0)),
                  pl.BlockSpec((Drnn, N), lambda s: (0, s)),  # head columns of source s
                  pl.BlockSpec((1, N), lambda s: (0, s)),
                  pl.BlockSpec((N, L), lambda s: (0, 0))],
        out_specs=pl.BlockSpec((1, R, L), lambda s: (s, 0, 0)),
        compiler_params=pltpu.CompilerParams(dimension_semantics=("parallel",)),
    )(rnn, enc_scaled, w_head_t, b_head, w_dec_t)


# ------------------------------- Full forward -------------------------------
def tasnet_forward(mix, params):
    B, T = mix.shape
    L = params["wuv_t"].shape[0]
    N = params["wuv_t"].shape[1] // 2
    S = params["w_head_t"].shape[1] // N
    K = T // L

    # Time-major 2-D rows (row = k*B + b): one small XLA transpose of the framed
    # input; every kernel then works on lane-dense (K*B, feature) slabs.
    x_rows = jnp.transpose(mix.reshape(B, K, L), (1, 0, 2)).reshape(K * B, L)

    enc, enc_scaled = encoder(x_rows, params["wuv_t"], N)

    x_proc = enc
    skip = None
    for li, layer in enumerate(params["lstm"]):
        new_skip = x_proc
        x_proc = bilstm_layer(x_proc, layer["wih"], layer["whh"], layer["b"], B=B, K=K)
        if li - 3 >= 1:   # never fires for num_layers=4; kept for fidelity
            x_proc = x_proc + skip
        skip = new_skip

    dec = head_decoder(x_proc, enc_scaled, params["w_head_t"], params["b_head"],
                       params["w_dec_t"], S)                        # (S, K*B, L)
    predict = jnp.transpose(dec.reshape(S, K, B, L), (2, 0, 1, 3)).reshape(B, S, K * L)
    return {"predict": predict}


# --------------------------- Parameter construction --------------------------
def init_params(key, L, N, hidden, n_sources, num_layers):
    def nrm(k, shape, scale=0.1):
        return scale * jax.random.normal(k, shape, dtype=jnp.float32)

    keys = iter(jax.random.split(key, 8 + 4 * num_layers))
    rnn_out = 2 * hidden
    # Conv1d(L, N, k=1, bias=False) weights (N, L, 1) stored transposed and fused:
    # columns [0:N) are U, columns [N:2N) are V.
    wuv_t = jnp.concatenate([nrm(next(keys), (L, N)), nrm(next(keys), (L, N))], axis=1)
    params = {
        "wuv_t": wuv_t,                                        # (L, 2N)
        # head: Linear(2*hidden, n_sources*N), stored transposed, bias kept
        "w_head_t": nrm(next(keys), (rnn_out, n_sources * N)),
        "b_head": nrm(next(keys), (1, n_sources * N)),
        # basis_decoder: Linear(N, L, bias=False) stored transposed (N, L)
        "w_dec_t": nrm(next(keys), (N, L)),
        "lstm": [],
    }
    d_in = N
    for _ in range(num_layers):
        # Gate column order is [i | f | o | g]; a PyTorch [i, f, g, o] checkpoint
        # would need its 4H columns permuted when importing.
        wih = jnp.stack([nrm(next(keys), (d_in, 4 * hidden)),
                         nrm(next(keys), (d_in, 4 * hidden))])       # (2, Din, 4H)
        whh = jnp.stack([nrm(next(keys), (hidden, 4 * hidden)),
                         nrm(next(keys), (hidden, 4 * hidden))])     # (2, H, 4H)
        # The Separator zero-initialises all LSTM biases, so b_ih + b_hh = 0.
        b = jnp.zeros((2, 1, 4 * hidden), dtype=jnp.float32)
        params["lstm"].append({"wih": wih, "whh": whh, "b": b})
        d_in = rnn_out
    return params


if __name__ == "__main__":
    # Small, lane/sublane-aligned shapes (module defaults are L=40, N=500,
    # hidden=500; 128s keep every gate slice and store vreg-aligned).
    B, K = 8, 8
    L, N, hidden, n_sources, num_layers = 128, 128, 128, 2, 4
    T = K * L   # mix length must be divisible by L

    key = jax.random.PRNGKey(0)
    k_mix, k_par = jax.random.split(key)
    mix = jax.random.normal(k_mix, (B, T), dtype=jnp.float32)
    params = init_params(k_par, L, N, hidden, n_sources, num_layers)

    fwd = jax.jit(tasnet_forward)
    out = fwd(mix, params)
    jax.block_until_ready(out["predict"])
    assert out["predict"].shape == (B, n_sources, T), out["predict"].shape
    assert bool(jnp.all(jnp.isfinite(out["predict"])))
    print("KERNEL_OK")
</pallas_src>

<mosaic_0001>
module attributes {stable_mosaic.version = 11 : i64} {
  func.func @_encoder_kernel(%arg0: i32, %arg1: memref<32x128xf32, #tpu.memory_space<vmem>>, %arg2: memref<128x256xf32, #tpu.memory_space<vmem>>, %arg3: memref<32x128xf32, #tpu.memory_space<vmem>>, %arg4: memref<32x128xf32, #tpu.memory_space<vmem>>) attributes {dimension_semantics = [#tpu.dimension_semantics<parallel>], iteration_bounds = array<i64: 2>, scalar_prefetch = 0 : i64, scratch_operands = 0 : i64, tpu.core_type = #tpu.core_type<tc>, window_params = [{transform_indices = @transform_0, window_bounds = array<i64: 32, 128>}, {pipeline_mode = #tpu.pipeline_mode<synchronous>, transform_indices = @transform_1, window_bounds = array<i64: 128, 256>}, {transform_indices = @transform_2, window_bounds = array<i64: 32, 128>}, {transform_indices = @transform_3, window_bounds = array<i64: 32, 128>}]} {
    %c0 = arith.constant 0 : index
    %c0_0 = arith.constant 0 : index
    %0 = vector.load %arg1[%c0, %c0_0] : memref<32x128xf32, #tpu.memory_space<vmem>>, vector<32x128xf32>
    %1 = arith.mulf %0, %0 : vector<32x128xf32>
    %cst = arith.constant dense<0.000000e+00> : vector<32xf32>
    %2 = vector.multi_reduction <add>, %1, %cst [1] : vector<32x128xf32> to vector<32xf32>
    %3 = vector.shape_cast %2 : vector<32xf32> to vector<32x1xf32>
    %4 = math.sqrt %3 : vector<32x1xf32>
    %cst_1 = arith.constant 9.99999971E-10 : f32
    %5 = vector.broadcast %cst_1 : f32 to vector<32x1xf32>
    %6 = arith.addf %4, %5 : vector<32x1xf32>
    %7 = vector.broadcast %6 : vector<32x1xf32> to vector<32x128xf32>
    %8 = arith.divf %0, %7 : vector<32x128xf32>
    %c0_2 = arith.constant 0 : index
    %c0_3 = arith.constant 0 : index
    %9 = vector.load %arg2[%c0_2, %c0_3] : memref<128x256xf32, #tpu.memory_space<vmem>>, vector<128x256xf32>
    %cst_4 = arith.constant dense<0.000000e+00> : vector<32x256xf32>
    %10 = tpu.matmul %8, %9, %cst_4 {dimension_numbers = #tpu.dot_dimension_numbers<[1], [0], [0], [1], [0, 0, 1, 1], [], []>} : vector<32x128xf32>, vector<128x256xf32>, vector<32x256xf32> -> vector<32x256xf32>
    %11 = vector.extract_strided_slice %10 {offsets = [0, 0], sizes = [32, 128], strides = [1, 1]} : vector<32x256xf32> to vector<32x128xf32>
    %12 = arith.negf %11 : vector<32x128xf32>
    %13 = math.exp %12 : vector<32x128xf32>
    %cst_5 = arith.constant 1.000000e+00 : f32
    %14 = vector.broadcast %cst_5 : f32 to vector<32x128xf32>
    %15 = arith.addf %14, %13 : vector<32x128xf32>
    %16 = arith.divf %14, %15 : vector<32x128xf32>
    %17 = vector.extract_strided_slice %10 {offsets = [0, 128], sizes = [32, 128], strides = [1, 1]} : vector<32x256xf32> to vector<32x128xf32>
    %cst_6 = arith.constant 0.000000e+00 : f32
    %18 = vector.broadcast %cst_6 : f32 to vector<32x128xf32>
    %19 = arith.maximumf %17, %18 : vector<32x128xf32>
    %20 = arith.mulf %16, %19 : vector<32x128xf32>
    %c0_7 = arith.constant 0 : index
    %c0_8 = arith.constant 0 : index
    %21 = vector.load %arg3[%c0_7, %c0_8] : memref<32x128xf32, #tpu.memory_space<vmem>>, vector<32x128xf32>
    tpu.vector_store %arg3[%c0_7, %c0_8], %20 {strides = array<i32>} : memref<32x128xf32, #tpu.memory_space<vmem>>, vector<32x128xf32>,
    %22 = vector.broadcast %4 : vector<32x1xf32> to vector<32x128xf32>
    %23 = arith.mulf %20, %22 : vector<32x128xf32>
    %c0_9 = arith.constant 0 : index
    %c0_10 = arith.constant 0 : index
    %24 = vector.load %arg4[%c0_9, %c0_10] : memref<32x128xf32, #tpu.memory_space<vmem>>, vector<32x128xf32>
    tpu.vector_store %arg4[%c0_9, %c0_10], %23 {strides = array<i32>} : memref<32x128xf32, #tpu.memory_space<vmem>>, vector<32x128xf32>,
    return
  }
  func.func @transform_0(%arg0: i32) -> (i32, i32) {
    %c0_i32 = arith.constant 0 : i32
    %c0_i32_0 = arith.constant 0 : i32
    return %arg0, %c0_i32 : i32, i32
  }
  func.func @transform_1(%arg0: i32) -> (i32, i32) {
    %c0_i32 = arith.constant 0 : i32
    %c0_i32_0 = arith.constant 0 : i32
    %c0_i32_1 = arith.constant 0 : i32
    return %c0_i32, %c0_i32_0 : i32, i32
  }
  func.func @transform_2(%arg0: i32) -> (i32, i32) {
    %c0_i32 = arith.constant 0 : i32
    %c0_i32_0 = arith.constant 0 : i32
    return %arg0, %c0_i32 : i32, i32
  }
  func.func @transform_3(%arg0: i32) -> (i32, i32) {
    %c0_i32 = arith.constant 0 : i32
    %c0_i32_0 = arith.constant 0 : i32
    return %arg0, %c0_i32 : i32, i32
  }
}

module attributes {stable_mosaic.version = 11 : i64} {
  func.func @_bilstm_kernel(%arg0: i32, %arg1: memref<64x256xf32, #tpu.memory_space<vmem>>, %arg2: memref<1x256x512xf32, #tpu.memory_space<vmem>>, %arg3: memref<1x128x512xf32, #tpu.memory_space<vmem>>, %arg4: memref<1x1x512xf32, #tpu.memory_space<vmem>>, %arg5: memref<64x128xf32, #tpu.memory_space<vmem>>, %arg6: memref<64x512xf32, #tpu.memory_space<vmem>>, %arg7: memref<8x128xf32, #tpu.memory_space<vmem>>, %arg8: memref<8x128xf32, #tpu.memory_space<vmem>>) attributes {dimension_semantics = [#tpu.dimension_semantics<parallel>], iteration_bounds = array<i64: 2>, scalar_prefetch = 0 : i64, scratch_operands = 3 : i64, tpu.core_type = #tpu.core_type<tc>, window_params = [{pipeline_mode = #tpu.pipeline_mode<synchronous>, transform_indices = @transform_0, window_bounds = array<i64: 64, 256>}, {transform_indices = @transform_1, window_bounds = array<i64: 1, 256, 512>}, {transform_indices = @transform_2, window_bounds = array<i64: 1, 128, 512>}, {transform_indices = @transform_3, window_bounds = array<i64: 1, 1, 512>}, {transform_indices = @transform_4, window_bounds = array<i64: 64, 128>}]} {
    %c0 = arith.constant 0 : index
    %c0_0 = arith.constant 0 : index
    %0 = vector.load %arg1[%c0, %c0_0] : memref<64x256xf32, #tpu.memory_space<vmem>>, vector<64x256xf32>
    %c0_1 = arith.constant 0 : index
    %c0_2 = arith.constant 0 : index
    %c0_3 = arith.constant 0 : index
    %1 = vector.load %arg2[%c0_1, %c0_2, %c0_3] : memref<1x256x512xf32, #tpu.memory_space<vmem>>, vector<1x256x512xf32>
    %2 = vector.shape_cast %1 : vector<1x256x512xf32> to vector<256x512xf32>
    %cst = arith.constant dense<0.000000e+00> : vector<64x512xf32>
    %3 = tpu.matmul %0, %2, %cst {dimension_numbers = #tpu.dot_dimension_numbers<[1], [0], [0], [1], [0, 0, 1, 1], [], []>} : vector<64x256xf32>, vector<256x512xf32>, vector<64x512xf32> -> vector<64x512xf32>
    %c0_4 = arith.constant 0 : index
    %c0_5 = arith.constant 0 : index
    %c0_6 = arith.constant 0 : index
    %4 = vector.load %arg4[%c0_4, %c0_5, %c0_6] : memref<1x1x512xf32, #tpu.memory_space<vmem>>, vector<1x1x512xf32>
    %5 = vector.shape_cast %4 : vector<1x1x512xf32> to vector<1x512xf32>
    %6 = vector.broadcast %5 : vector<1x512xf32> to vector<64x512xf32>
    %7 = arith.addf %3, %6 : vector<64x512xf32>
    %c0_7 = arith.constant 0 : index
    %c0_8 = arith.constant 0 : index
    %8 = vector.load %arg6[%c0_7, %c0_8] : memref<64x512xf32, #tpu.memory_space<vmem>>, vector<64x512xf32>
    tpu.vector_store %arg6[%c0_7, %c0_8], %7 {strides = array<i32>} : memref<64x512xf32, #tpu.memory_space<vmem>>, vector<64x512xf32>,
    %cst_9 = arith.constant 0.000000e+00 : f32
    %9 = vector.broadcast %cst_9 : f32 to vector<8x128xf32>
    %c0_10 = arith.constant 0 : index
    %c0_11 = arith.constant 0 : index
    %10 = vector.load %arg7[%c0_10, %c0_11] : memref<8x128xf32, #tpu.memory_space<vmem>>, vector<8x128xf32>
    tpu.vector_store %arg7[%c0_10, %c0_11], %9 {strides = array<i32>} : memref<8x128xf32, #tpu.memory_space<vmem>>, vector<8x128xf32>,
    %cst_12 = arith.constant 0.000000e+00 : f32
    %11 = vector.broadcast %cst_12 : f32 to vector<8x128xf32>
    %c0_13 = arith.constant 0 : index
    %c0_14 = arith.constant 0 : index
    %12 = vector.load %arg8[%c0_13, %c0_14] : memref<8x128xf32, #tpu.memory_space<vmem>>, vector<8x128xf32>
    tpu.vector_store %arg8[%c0_13, %c0_14], %11 {strides = array<i32>} : memref<8x128xf32, #tpu.memory_space<vmem>>, vector<8x128xf32>,
    %c0_i32 = arith.constant 0 : i32
    %c1_i32 = arith.constant 1 : i32
    %13 = arith.subi %c1_i32, %arg0 : i32
    %14 = arith.muli %13, %c0_i32 : i32
    %c7_i32 = arith.constant 7 : i32
    %15 = arith.subi %c7_i32, %c0_i32 : i32
    %16 = arith.muli %arg0, %15 : i32
    %17 = arith.addi %14, %16 : i32
    %c8_i32 = arith.constant 8 : i32
    %18 = arith.muli %17, %c8_i32 : i32
    %19 = tpu.assume_multiple %18, 8 : i32
    %20 = arith.index_cast %19 : i32 to index
    %c0_15 = arith.constant 0 : index
    %21 = vector.load %arg6[%20, %c0_15] : memref<64x512xf32, #tpu.memory_space<vmem>>, vector<8x512xf32>
    %c0_16 = arith.constant 0 : index
    %c0_17 = arith.constant 0 : index
    %22 = vector.load %arg7[%c0_16, %c0_17] : memref<8x128xf32, #tpu.memory_space<vmem>>, vector<8x128xf32>
    %c0_18 = arith.constant 0 : index
    %c0_19 = arith.constant 0 : index
    %c0_20 = arith.constant 0 : index
    %23 = vector.load %arg3[%c0_18, %c0_19, %c0_20] : memref<1x128x512xf32, #tpu.memory_space<vmem>>, vector<1x128x512xf32>
    %24 = vector.shape_cast %23 : vector<1x128x512xf32> to vector<128x512xf32>
    %cst_21 = arith.constant dense<0.000000e+00> : vector<8x512xf32>
    %25 = tpu.matmul %22, %24, %cst_21 {dimension_numbers = #tpu.dot_dimension_numbers<[1], [0], [0], [1], [0, 0, 1, 1], [], []>} : vector<8x128xf32>, vector<128x512xf32>, vector<8x512xf32> -> vector<8x512xf32>
    %26 = arith.addf %21, %25 : vector<8x512xf32>
    %27 = vector.extract_strided_slice %26 {offsets = [0, 0], sizes = [8, 384], strides = [1, 1]} : vector<8x512xf32> to vector<8x384xf32>
    %28 = arith.negf %27 : vector<8x384xf32>
    %29 = math.exp %28 : vector<8x384xf32>
    %cst_22 = arith.constant 1.000000e+00 : f32
    %30 = vector.broadcast %cst_22 : f32 to vector<8x384xf32>
    %31 = arith.addf %30, %29 : vector<8x384xf32>
    %32 = arith.divf %30, %31 : vector<8x384xf32>
    %33 = vector.extract_strided_slice %26 {offsets = [0, 384], sizes = [8, 128], strides = [1, 1]} : vector<8x512xf32> to vector<8x128xf32>
    %34 = math.tanh %33 : vector<8x128xf32>
    %35 = vector.extract_strided_slice %32 {offsets = [0, 128], sizes = [8, 128], strides = [1, 1]} : vector<8x384xf32> to vector<8x128xf32>
    %c0_23 = arith.constant 0 : index
    %c0_24 = arith.constant 0 : index
    %36 = vector.load %arg8[%c0_23, %c0_24] : memref<8x128xf32, #tpu.memory_space<vmem>>, vector<8x128xf32>
    %37 = arith.mulf %35, %36 : vector<8x128xf32>
    %38 = vector.extract_strided_slice %32 {offsets = [0, 0], sizes = [8, 128], strides = [1, 1]} : vector<8x384xf32> to vector<8x128xf32>
    %39 = arith.mulf %38, %34 : vector<8x128xf32>
    %40 = arith.addf %37, %39 : vector<8x128xf32>
    %41 = vector.extract_strided_slice %32 {offsets = [0, 256], sizes = [8, 128], strides = [1, 1]} : vector<8x384xf32> to vector<8x128xf32>
    %42 = math.tanh %40 : vector<8x128xf32>
    %43 = arith.mulf %41, %42 : vector<8x128xf32>
    %c0_25 = arith.constant 0 : index
    %c0_26 = arith.constant 0 : index
    %44 = vector.load %arg8[%c0_25, %c0_26] : memref<8x128xf32, #tpu.memory_space<vmem>>, vector<8x128xf32>
    tpu.vector_store %arg8[%c0_25, %c0_26], %40 {strides = array<i32>} : memref<8x128xf32, #tpu.memory_space<vmem>>, vector<8x128xf32>,
    %c0_27 = arith.constant 0 : index
    %c0_28 = arith.constant 0 : index
    %45 = vector.load %arg7[%c0_27, %c0_28] : memref<8x128xf32, #tpu.memory_space<vmem>>, vector<8x128xf32>
    tpu.vector_store %arg7[%c0_27, %c0_28], %43 {strides = array<i32>} : memref<8x128xf32, #tpu.memory_space<vmem>>, vector<8x128xf32>,
    %46 = arith.index_cast %19 : i32 to index
    %c0_29 = arith.constant 0 : index
    %47 = vector.load %arg5[%46, %c0_29] : memref<64x128xf32, #tpu.memory_space<vmem>>, vector<8x128xf32>
    tpu.vector_store %arg5[%46, %c0_29], %43 {strides = array<i32>} : memref<64x128xf32, #tpu.memory_space<vmem>>, vector<8x128xf32>,
    %c1_i32_30 = arith.constant 1 : i32
    %c1_i32_31 = arith.constant 1 : i32
    %48 = arith.subi %c1_i32_31, %arg0 : i32
    %49 = arith.muli %48, %c1_i32_30 : i32
    %c7_i32_32 = arith.constant 7 : i32
    %50 = arith.subi %c7_i32_32, %c1_i32_30 : i32
    %51 = arith.muli %arg0, %50 : i32
    %52 = arith.addi %49, %51 : i32
    %c8_i32_33 = arith.constant 8 : i32
    %53 = arith.muli %52, %c8_i32_33 : i32
    %54 = tpu.assume_multiple %53, 8 : i32
    %55 = arith.index_cast %54 : i32 to index
    %c0_34 = arith.constant 0 : index
    %56 = vector.load %arg6[%55, %c0_34] : memref<64x512xf32, #tpu.memory_space<vmem>>, vector<8x512xf32>
    %c0_35 = arith.constant 0 : index
    %c0_36 = arith.constant 0 : index
    %57 = vector.load %arg7[%c0_35, %c0_36] : memref<8x128xf32, #tpu.memory_space<vmem>>, vector<8x128xf32>
    %c0_37 = arith.constant 0 : index
    %c0_38 = arith.constant 0 : index
    %c0_39 = arith.constant 0 : index
    %58 = vector.load %arg3[%c0_37, %c0_38, %c0_39] : memref<1x128x512xf32, #tpu.memory_space<vmem>>, vector<1x128x512xf32>
    %59 = vector.shape_cast %58 : vector<1x128x512xf32> to vector<128x512xf32>
    %cst_40 = arith.constant dense<0.000000e+00> : vector<8x512xf32>
    %60 = tpu.matmul %57, %59, %cst_40 {dimension_numbers = #tpu.dot_dimension_numbers<[1], [0], [0], [1], [0, 0, 1, 1], [], []>} : vector<8x128xf32>, vector<128x512xf32>, vector<8x512xf32> -> vector<8x512xf32>
    %61 = arith.addf %56, %60 : vector<8x512xf32>
    %62 = vector.extract_strided_slice %61 {offsets = [0, 0], sizes = [8, 384], strides = [1, 1]} : vector<8x512xf32> to vector<8x384xf32>
    %63 = arith.negf %62 : vector<8x384xf32>
    %64 = math.exp %63 : vector<8x384xf32>
    %cst_41 = arith.constant 1.000000e+00 : f32
    %65 = vector.broadcast %cst_41 : f32 to vector<8x384xf32>
    %66 = arith.addf %65, %64 : vector<8x384xf32>
    %67 = arith.divf %65, %66 : vector<8x384xf32>
    %68 = vector.extract_strided_slice %61 {offsets = [0, 384], sizes = [8, 128], strides = [1, 1]} : vector<8x512xf32> to vector<8x128xf32>
    %69 = math.tanh %68 : vector<8x128xf32>
    %70 = vector.extract_strided_slice %67 {offsets = [0, 128], sizes = [8, 128], strides = [1, 1]} : vector<8x384xf32> to vector<8x128xf32>
    %c0_42 = arith.constant 0 : index
    %c0_43 = arith.constant 0 : index
    %71 = vector.load %arg8[%c0_42, %c0_43] : memref<8x128xf32, #tpu.memory_space<vmem>>, vector<8x128xf32>
    %72 = arith.mulf %70, %71 : vector<8x128xf32>
    %73 = vector.extract_strided_slice %67 {offsets = [0, 0], sizes = [8, 128], strides = [1, 1]} : vector<8x384xf32> to vector<8x128xf32>
    %74 = arith.mulf %73, %69 : vector<8x128xf32>
    %75 = arith.addf %72, %74 : vector<8x128xf32>
    %76 = vector.extract_strided_slice %67 {offsets = [0, 256], sizes = [8, 128], strides = [1, 1]} : vector<8x384xf32> to vector<8x128xf32>
    %77 = math.tanh %75 : vector<8x128xf32>
    %78 = arith.mulf %76, %77 : vector<8x128xf32>
    %c0_44 = arith.constant 0 : index
    %c0_45 = arith.constant 0 : index
    %79 = vector.load %arg8[%c0_44, %c0_45] : memref<8x128xf32, #tpu.memory_space<vmem>>, vector<8x128xf32>
    tpu.vector_store %arg8[%c0_44, %c0_45], %75 {strides = array<i32>} : memref<8x128xf32, #tpu.memory_space<vmem>>, vector<8x128xf32>,
    %c0_46 = arith.constant 0 : index
    %c0_47 = arith.constant 0 : index
    %80 = vector.load %arg7[%c0_46, %c0_47] : memref<8x128xf32, #tpu.memory_space<vmem>>, vector<8x128xf32>
    tpu.vector_store %arg7[%c0_46, %c0_47], %78 {strides = array<i32>} : memref<8x128xf32, #tpu.memory_space<vmem>>, vector<8x128xf32>,
    %81 = arith.index_cast %54 : i32 to index
    %c0_48 = arith.constant 0 : index
    %82 = vector.load %arg5[%81, %c0_48] : memref<64x128xf32, #tpu.memory_space<vmem>>, vector<8x128xf32>
    tpu.vector_store %arg5[%81, %c0_48], %78 {strides = array<i32>} : memref<64x128xf32, #tpu.memory_space<vmem>>, vector<8x128xf32>,
    %c2_i32 = arith.constant 2 : i32
    %c1_i32_49 = arith.constant 1 : i32
    %83 = arith.subi %c1_i32_49, %arg0 : i32
    %84 = arith.muli %83, %c2_i32 : i32
    %c7_i32_50 = arith.constant 7 : i32
    %85 = arith.subi %c7_i32_50, %c2_i32 : i32
    %86 = arith.muli %arg0, %85 : i32
    %87 = arith.addi %84, %86 : i32
    %c8_i32_51 = arith.constant 8 : i32
    %88 = arith.muli %87, %c8_i32_51 : i32
    %89 = tpu.assume_multiple %88, 8 : i32
    %90 = arith.index_cast %89 : i32 to index
    %c0_52 = arith.constant 0 : index
    %91 = vector.load %arg6[%90, %c0_52] : memref<64x512xf32, #tpu.memory_space<vmem>>, vector<8x512xf32>
    %c0_53 = arith.constant 0 : index
    %c0_54 = arith.constant 0 : index
    %92 = vector.load %arg7[%c0_53, %c0_54] : memref<8x128xf32, #tpu.memory_space<vmem>>, vector<8x128xf32>
    %c0_55 = arith.constant 0 : index
    %c0_56 = arith.constant 0 : index
    %c0_57 = arith.constant 0 : index
    %93 = vector.load %arg3[%c0_55, %c0_56, %c0_57] : memref<1x128x512xf32, #tpu.memory_space<vmem>>, vector<1x128x512xf32>
    %94 = vector.shape_cast %93 : vector<1x128x512xf32> to vector<128x512xf32>
    %cst_58 = arith.constant dense<0.000000e+00> : vector<8x512xf32>
    %95 = tpu.matmul %92, %94, %cst_58 {dimension_numbers = #tpu.dot_dimension_numbers<[1], [0], [0], [1], [0, 0, 1, 1], [], []>} : vector<8x128xf32>, vector<128x512xf32>, vector<8x512xf32> -> vector<8x512xf32>
    %96 = arith.addf %91, %95 : vector<8x512xf32>
    %97 = vector.extract_strided_slice %96 {offsets = [0, 0], sizes = [8, 384], strides = [1, 1]} : vector<8x512xf32> to vector<8x384xf32>
    %98 = arith.negf %97 : vector<8x384xf32>
    %99 = math.exp %98 : vector<8x384xf32>
    %cst_59 = arith.constant 1.000000e+00 : f32
    %100 = vector.broadcast %cst_59 : f32 to vector<8x384xf32>
    %101 = arith.addf %100, %99 : vector<8x384xf32>
    %102 = arith.divf %100, %101 : vector<8x384xf32>
    %103 = vector.extract_strided_slice %96 {offsets = [0, 384], sizes = [8, 128], strides = [1, 1]} : vector<8x512xf32> to vector<8x128xf32>
    %104 = math.tanh %103 : vector<8x128xf32>
    %105 = vector.extract_strided_slice %102 {offsets = [0, 128], sizes = [8, 128], strides = [1, 1]} : vector<8x384xf32> to vector<8x128xf32>
    %c0_60 = arith.constant 0 : index
    %c0_61 = arith.constant 0 : index
    %106 = vector.load %arg8[%c0_60, %c0_61] : memref<8x128xf32, #tpu.memory_space<vmem>>, vector<8x128xf32>
    %107 = arith.mulf %105, %106 : vector<8x128xf32>
    %108 = vector.extract_strided_slice %102 {offsets = [0, 0], sizes = [8, 128], strides = [1, 1]} : vector<8x384xf32> to vector<8x128xf32>
    %109 = arith.mulf %108, %104 : vector<8x128xf32>
    %110 = arith.addf %107, %109 : vector<8x128xf32>
    %111 = vector.extract_strided_slice %102 {offsets = [0, 256], sizes = [8, 128], strides = [1, 1]} : vector<8x384xf32> to vector<8x128xf32>
    %112 = math.tanh %110 : vector<8x128xf32>
    %113 = arith.mulf %111, %112 : vector<8x128xf32>
    %c0_62 = arith.constant 0 : index
    %c0_63 = arith.constant 0 : index
    %114 = vector.load %arg8[%c0_62, %c0_63] : memref<8x128xf32, #tpu.memory_space<vmem>>, vector<8x128xf32>
    tpu.vector_store %arg8[%c0_62, %c0_63], %110 {strides = array<i32>} : memref<8x128xf32, #tpu.memory_space<vmem>>, vector<8x128xf32>,
    %c0_64 = arith.constant 0 : index
    %c0_65 = arith.constant 0 : index
    %115 = vector.load %arg7[%c0_64, %c0_65] : memref<8x128xf32, #tpu.memory_space<vmem>>, vector<8x128xf32>
    tpu.vector_store %arg7[%c0_64, %c0_65], %113 {strides = array<i32>} : memref<8x128xf32, #tpu.memory_space<vmem>>, vector<8x128xf32>,
    %116 = arith.index_cast %89 : i32 to index
    %c0_66 = arith.constant 0 : index
    %117 = vector.load %arg5[%116, %c0_66] : memref<64x128xf32, #tpu.memory_space<vmem>>, vector<8x128xf32>
    tpu.vector_store %arg5[%116, %c0_66], %113 {strides = array<i32>} : memref<64x128xf32, #tpu.memory_space<vmem>>, vector<8x128xf32>,
    %c3_i32 = arith.constant 3 : i32
    %c1_i32_67 = arith.constant 1 : i32
    %118 = arith.subi %c1_i32_67, %arg0 : i32
    %119 = arith.muli %118, %c3_i32 : i32
    %c7_i32_68 = arith.constant 7 : i32
    %120 = arith.subi %c7_i32_68, %c3_i32 : i32
    %121 = arith.muli %arg0, %120 : i32
    %122 = arith.addi %119, %121 : i32
    %c8_i32_69 = arith.constant 8 : i32
    %123 = arith.muli %122, %c8_i32_69 : i32
    %124 = tpu.assume_multiple %123, 8 : i32
    %125 = arith.index_cast %124 : i32 to index
    %c0_70 = arith.constant 0 : index
    %126 = vector.load %arg6[%125, %c0_70] : memref<64x512xf32, #tpu.memory_space<vmem>>, vector<8x512xf32>
    %c0_71 = arith.constant 0 : index
    %c0_72 = arith.constant 0 : index
    %127 = vector.load %arg7[%c0_71, %c0_72] : memref<8x128xf32, #tpu.memory_space<vmem>>, vector<8x128xf32>
    %c0_73 = arith.constant 0 : index
    %c0_74 = arith.constant 0 : index
    %c0_75 = arith.constant 0 : index
    %128 = vector.load %arg3[%c0_73, %c0_74, %c0_75] : memref<1x128x512xf32, #tpu.memory_space<vmem>>, vector<1x128x512xf32>
    %129 = vector.shape_cast %128 : vector<1x128x512xf32> to vector<128x512xf32>
    %cst_76 = arith.constant dense<0.000000e+00> : vector<8x512xf32>
    %130 = tpu.matmul %127, %129, %cst_76 {dimension_numbers = #tpu.dot_dimension_numbers<[1], [0], [0], [1], [0, 0, 1, 1], [], []>} : vector<8x128xf32>, vector<128x512xf32>, vector<8x512xf32> -> vector<8x512xf32>
    %131 = arith.addf %126, %130 : vector<8x512xf32>
    %132 = vector.extract_strided_slice %131 {offsets = [0, 0], sizes = [8, 384], strides = [1, 1]} : vector<8x512xf32> to vector<8x384xf32>
    %133 = arith.negf %132 : vector<8x384xf32>
    %134 = math.exp %133 : vector<8x384xf32>
    %cst_77 = arith.constant 1.000000e+00 : f32
    %135 = vector.broadcast %cst_77 : f32 to vector<8x384xf32>
    %136 = arith.addf %135, %134 : vector<8x384xf32>
    %137 = arith.divf %135, %136 : vector<8x384xf32>
    %138 = vector.extract_strided_slice %131 {offsets = [0, 384], sizes = [8, 128], strides = [1, 1]} : vector<8x512xf32> to vector<8x128xf32>
    %139 = math.tanh %138 : vector<8x128xf32>
    %140 = vector.extract_strided_slice %137 {offsets = [0, 128], sizes = [8, 128], strides = [1, 1]} : vector<8x384xf32> to vector<8x128xf32>
    %c0_78 = arith.constant 0 : index
    %c0_79 = arith.constant 0 : index
    %141 = vector.load %arg8[%c0_78, %c0_79] : memref<8x128xf32, #tpu.memory_space<vmem>>, vector<8x128xf32>
    %142 = arith.mulf %140, %141 : vector<8x128xf32>
    %143 = vector.extract_strided_slice %137 {offsets = [0, 0], sizes = [8, 128], strides = [1, 1]} : vector<8x384xf32> to vector<8x128xf32>
    %144 = arith.mulf %143, %139 : vector<8x128xf32>
    %145 = arith.addf %142, %144 : vector<8x128xf32>
    %146 = vector.extract_strided_slice %137 {offsets = [0, 256], sizes = [8, 128], strides = [1, 1]} : vector<8x384xf32> to vector<8x128xf32>
    %147 = math.tanh %145 : vector<8x128xf32>
    %148 = arith.mulf %146, %147 : vector<8x128xf32>
    %c0_80 = arith.constant 0 : index
    %c0_81 = arith.constant 0 : index
    %149 = vector.load %arg8[%c0_80, %c0_81] : memref<8x128xf32, #tpu.memory_space<vmem>>, vector<8x128xf32>
    tpu.vector_store %arg8[%c0_80, %c0_81], %145 {strides = array<i32>} : memref<8x128xf32, #tpu.memory_space<vmem>>, vector<8x128xf32>,
    %c0_82 = arith.constant 0 : index
    %c0_83 = arith.constant 0 : index
    %150 = vector.load %arg7[%c0_82, %c0_83] : memref<8x128xf32, #tpu.memory_space<vmem>>, vector<8x128xf32>
    tpu.vector_store %arg7[%c0_82, %c0_83], %148 {strides = array<i32>} : memref<8x128xf32, #tpu.memory_space<vmem>>, vector<8x128xf32>,
    %151 = arith.index_cast %124 : i32 to index
    %c0_84 = arith.constant 0 : index
    %152 = vector.load %arg5[%151, %c0_84] : memref<64x128xf32, #tpu.memory_space<vmem>>, vector<8x128xf32>
    tpu.vector_store %arg5[%151, %c0_84], %148 {strides = array<i32>} : memref<64x128xf32, #tpu.memory_space<vmem>>, vector<8x128xf32>,
    %c4_i32 = arith.constant 4 : i32
    %c1_i32_85 = arith.constant 1 : i32
    %153 = arith.subi %c1_i32_85, %arg0 : i32
    %154 = arith.muli %153, %c4_i32 : i32
    %c7_i32_86 = arith.constant 7 : i32
    %155 = arith.subi %c7_i32_86, %c4_i32 : i32
    %156 = arith.muli %arg0, %155 : i32
    %157 = arith.addi %154, %156 : i32
    %c8_i32_87 = arith.constant 8 : i32
    %158 = arith.muli %157, %c8_i32_87 : i32
    %159 = tpu.assume_multiple %158, 8 : i32
    %160 = arith.index_cast %159 : i32 to index
    %c0_88 = arith.constant 0 : index
    %161 = vector.load %arg6[%160, %c0_88] : memref<64x512xf32, #tpu.memory_space<vmem>>, vector<8x512xf32>
    %c0_89 = arith.constant 0 : index
    %c0_90 = arith.constant 0 : index
    %162 = vector.load %arg7[%c0_89, %c0_90] : memref<8x128xf32, #tpu.memory_space<vmem>>, vector<8x128xf32>
    %c0_91 = arith.constant 0 : index
    %c0_92 = arith.constant 0 : index
    %c0_93 = arith.constant 0 : index
    %163 = vector.load %arg3[%c0_91, %c0_92, %c0_93] : memref<1x128x512xf32, #tpu.memory_space<vmem>>, vector<1x128x512xf32>
    %164 = vector.shape_cast %163 : vector<1x128x512xf32> to vector<128x512xf32>
    %cst_94 = arith.constant dense<0.000000e+00> : vector<8x512xf32>
    %165 = tpu.matmul %162, %164, %cst_94 {dimension_numbers = #tpu.dot_dimension_numbers<[1], [0], [0], [1], [0, 0, 1, 1], [], []>} : vector<8x128xf32>, vector<128x512xf32>, vector<8x512xf32> -> vector<8x512xf32>
    %166 = arith.addf %161, %165 : vector<8x512xf32>
    %167 = vector.extract_strided_slice %166 {offsets = [0, 0], sizes = [8, 384], strides = [1, 1]} : vector<8x512xf32> to vector<8x384xf32>
    %168 = arith.negf %167 : vector<8x384xf32>
    %169 = math.exp %168 : vector<8x384xf32>
    %cst_95 = arith.constant 1.000000e+00 : f32
    %170 = vector.broadcast %cst_95 : f32 to vector<8x384xf32>
    %171 = arith.addf %170, %169 : vector<8x384xf32>
    %172 = arith.divf %170, %171 : vector<8x384xf32>
    %173 = vector.extract_strided_slice %166 {offsets = [0, 384], sizes = [8, 128], strides = [1, 1]} : vector<8x512xf32> to vector<8x128xf32>
    %174 = math.tanh %173 : vector<8x128xf32>
    %175 = vector.extract_strided_slice %172 {offsets = [0, 128], sizes = [8, 128], strides = [1, 1]} : vector<8x384xf32> to vector<8x128xf32>
    %c0_96 = arith.constant 0 : index
    %c0_97 = arith.constant 0 : index
    %176 = vector.load %arg8[%c0_96, %c0_97] : memref<8x128xf32, #tpu.memory_space<vmem>>, vector<8x128xf32>
    %177 = arith.mulf %175, %176 : vector<8x128xf32>
    %178 = vector.extract_strided_slice %172 {offsets = [0, 0], sizes = [8, 128], strides = [1, 1]} : vector<8x384xf32> to vector<8x128xf32>
    %179 = arith.mulf %178, %174 : vector<8x128xf32>
    %180 = arith.addf %177, %179 : vector<8x128xf32>
    %181 = vector.extract_strided_slice %172 {offsets = [0, 256], sizes = [8, 128], strides = [1, 1]} : vector<8x384xf32> to vector<8x128xf32>
    %182 = math.tanh %180 : vector<8x128xf32>
    %183 = arith.mulf %181, %182 : vector<8x128xf32>
    %c0_98 = arith.constant 0 : index
    %c0_99 = arith.constant 0 : index
    %184 = vector.load %arg8[%c0_98, %c0_99] : memref<8x128xf32, #tpu.memory_space<vmem>>, vector<8x128xf32>
    tpu.vector_store %arg8[%c0_98, %c0_99], %180 {strides = array<i32>} : memref<8x128xf32, #tpu.memory_space<vmem>>, vector<8x128xf32>,
    %c0_100 = arith.constant 0 : index
    %c0_101 = arith.constant 0 : index
    %185 = vector.load %arg7[%c0_100, %c0_101] : memref<8x128xf32, #tpu.memory_space<vmem>>, vector<8x128xf32>
    tpu.vector_store %arg7[%c0_100, %c0_101], %183 {strides = array<i32>} : memref<8x128xf32, #tpu.memory_space<vmem>>, vector<8x128xf32>,
    %186 = arith.index_cast %159 : i32 to index
    %c0_102 = arith.constant 0 : index
    %187 = vector.load %arg5[%186, %c0_102] : memref<64x128xf32, #tpu.memory_space<vmem>>, vector<8x128xf32>
    tpu.vector_store %arg5[%186, %c0_102], %183 {strides = array<i32>} : memref<64x128xf32, #tpu.memory_space<vmem>>, vector<8x128xf32>,
    %c5_i32 = arith.constant 5 : i32
    %c1_i32_103 = arith.constant 1 : i32
    %188 = arith.subi %c1_i32_103, %arg0 : i32
    %189 = arith.muli %188, %c5_i32 : i32
    %c7_i32_104 = arith.constant 7 : i32
    %190 = arith.subi %c7_i32_104, %c5_i32 : i32
    %191 = arith.muli %arg0, %190 : i32
    %192 = arith.addi %189, %191 : i32
    %c8_i32_105 = arith.constant 8 : i32
    %193 = arith.muli %192, %c8_i32_105 : i32
    %194 = tpu.assume_multiple %193, 8 : i32
    %195 = arith.index_cast %194 : i32 to index
    %c0_106 = arith.constant 0 : index
    %196 = vector.load %arg6[%195, %c0_106] : memref<64x512xf32, #tpu.memory_space<vmem>>, vector<8x512xf32>
    %c0_107 = arith.constant 0 : index
    %c0_108 = arith.constant 0 : index
    %197 = vector.load %arg7[%c0_107, %c0_108] : memref<8x128xf32, #tpu.memory_space<vmem>>, vector<8x128xf32>
    %c0_109 = arith.constant 0 : index
    %c0_110 = arith.constant 0 : index
    %c0_111 = arith.constant 0 : index
    %198 = vector.load %arg3[%c0_109, %c0_110, %c0_111] : memref<1x128x512xf32, #tpu.memory_space<vmem>>, vector<1x128x512xf32>
    %199 = vector.shape_cast %198 : vector<1x128x512xf32> to vector<128x512xf32>
    %cst_112 = arith.constant dense<0.000000e+00> : vector<8x512xf32>
    %200 = tpu.matmul %197, %199, %cst_112 {dimension_numbers = #tpu.dot_dimension_numbers<[1], [0], [0], [1], [0, 0, 1, 1], [], []>} : vector<8x128xf32>, vector<128x512xf32>, vector<8x512xf32> -> vector<8x512xf32>
    %201 = arith.addf %196, %200 : vector<8x512xf32>
    %202 = vector.extract_strided_slice %201 {offsets = [0, 0], sizes = [8, 384], strides = [1, 1]} : vector<8x512xf32> to vector<8x384xf32>
    %203 = arith.negf %202 : vector<8x384xf32>
    %204 = math.exp %203 : vector<8x384xf32>
    %cst_113 = arith.constant 1.000000e+00 : f32
    %205 = vector.broadcast %cst_113 : f32 to vector<8x384xf32>
    %206 = arith.addf %205, %204 : vector<8x384xf32>
    %207 = arith.divf %205, %206 : vector<8x384xf32>
    %208 = vector.extract_strided_slice %201 {offsets = [0, 384], sizes = [8, 128], strides = [1, 1]} : vector<8x512xf32> to vector<8x128xf32>
    %209 = math.tanh %208 : vector<8x128xf32>
    %210 = vector.extract_strided_slice %207 {offsets = [0, 128], sizes = [8, 128], strides = [1, 1]} : vector<8x384xf32> to vector<8x128xf32>
    %c0_114 = arith.constant 0 : index
    %c0_115 = arith.constant 0 : index
    %211 = vector.load %arg8[%c0_114, %c0_115] : memref<8x128xf32, #tpu.memory_space<vmem>>, vector<8x128xf32>
    %212 = arith.mulf %210, %211 : vector<8x128xf32>
    %213 = vector.extract_strided_slice %207 {offsets = [0, 0], sizes = [8, 128], strides = [1, 1]} : vector<8x384xf32> to vector<8x128xf32>
    %214 = arith.mulf %213, %209 : vector<8x128xf32>
    %215 = arith.addf %212, %214 : vector<8x128xf32>
    %216 = vector.extract_strided_slice %207 {offsets = [0, 256], sizes = [8, 128], strides = [1, 1]} : vector<8x384xf32> to vector<8x128xf32>
    %217 = math.tanh %215 : vector<8x128xf32>
    %218 = arith.mulf %216, %217 : vector<8x128xf32>
    %c0_116 = arith.constant 0 : index
    %c0_117 = arith.constant 0 : index
    %219 = vector.load %arg8[%c0_116, %c0_117] : memref<8x128xf32, #tpu.memory_space<vmem>>, vector<8x128xf32>
    tpu.vector_store %arg8[%c0_116, %c0_117], %215 {strides = array<i32>} : memref<8x128xf32, #tpu.memory_space<vmem>>, vector<8x128xf32>,
    %c0_118 = arith.constant 0 : index
    %c0_119 = arith.constant 0 : index
    %220 = vector.load %arg7[%c0_118, %c0_119] : memref<8x128xf32, #tpu.memory_space<vmem>>, vector<8x128xf32>
    tpu.vector_store %arg7[%c0_118, %c0_119], %218 {strides = array<i32>} : memref<8x128xf32, #tpu.memory_space<vmem>>, vector<8x128xf32>,
    %221 = arith.index_cast %194 : i32 to index
    %c0_120 = arith.constant 0 : index
    %222 = vector.load %arg5[%221, %c0_120] : memref<64x128xf32, #tpu.memory_space<vmem>>, vector<8x128xf32>
    tpu.vector_store %arg5[%221, %c0_120], %218 {strides = array<i32>} : memref<64x128xf32, #tpu.memory_space<vmem>>, vector<8x128xf32>,
    %c6_i32 = arith.constant 6 : i32
    %c1_i32_121 = arith.constant 1 : i32
    %223 = arith.subi %c1_i32_121, %arg0 : i32
    %224 = arith.muli %223, %c6_i32 : i32
    %c7_i32_122 = arith.constant 7 : i32
    %225 = arith.subi %c7_i32_122, %c6_i32 : i32
    %226 = arith.muli %arg0, %225 : i32
    %227 = arith.addi %224, %226 : i32
    %c8_i32_123 = arith.constant 8 : i32
    %228 = arith.muli %227, %c8_i32_123 : i32
    %229 = tpu.assume_multiple %228, 8 : i32
    %230 = arith.index_cast %229 : i32 to index
    %c0_124 = arith.constant 0 : index
    %231 = vector.load %arg6[%230, %c0_124] : memref<64x512xf32, #tpu.memory_space<vmem>>, vector<8x512xf32>
    %c0_125 = arith.constant 0 : index
    %c0_126 = arith.constant 0 : index
    %232 = vector.load %arg7[%c0_125, %c0_126] : memref<8x128xf32, #tpu.memory_space<vmem>>, vector<8x128xf32>
    %c0_127 = arith.constant 0 : index
    %c0_128 = arith.constant 0 : index
    %c0_129 = arith.constant 0 : index
    %233 = vector.load %arg3[%c0_127, %c0_128, %c0_129] : memref<1x128x512xf32, #tpu.memory_space<vmem>>, vector<1x128x512xf32>
    %234 = vector.shape_cast %233 : vector<1x128x512xf32> to vector<128x512xf32>
    %cst_130 = arith.constant dense<0.000000e+00> : vector<8x512xf32>
    %235 = tpu.matmul %232, %234, %cst_130 {dimension_numbers = #tpu.dot_dimension_numbers<[1], [0], [0], [1], [0, 0, 1, 1], [], []>} : vector<8x128xf32>, vector<128x512xf32>, vector<8x512xf32> -> vector<8x512xf32>
    %236 = arith.addf %231, %235 : vector<8x512xf32>
    %237 = vector.extract_strided_slice %236 {offsets = [0, 0], sizes = [8, 384], strides = [1, 1]} : vector<8x512xf32> to vector<8x384xf32>
    %238 = arith.negf %237 : vector<8x384xf32>
    %239 = math.exp %238 : vector<8x384xf32>
    %cst_131 = arith.constant 1.000000e+00 : f32
    %240 = vector.broadcast %cst_131 : f32 to vector<8x384xf32>
    %241 = arith.addf %240, %239 : vector<8x384xf32>
    %242 = arith.divf %240, %241 : vector<8x384xf32>
    %243 = vector.extract_strided_slice %236 {offsets = [0, 384], sizes = [8, 128], strides = [1, 1]} : vector<8x512xf32> to vector<8x128xf32>
    %244 = math.tanh %243 : vector<8x128xf32>
    %245 = vector.extract_strided_slice %242 {offsets = [0, 128], sizes = [8, 128], strides = [1, 1]} : vector<8x384xf32> to vector<8x128xf32>
    %c0_132 = arith.constant 0 : index
    %c0_133 = arith.constant 0 : index
    %246 = vector.load %arg8[%c0_132, %c0_133] : memref<8x128xf32, #tpu.memory_space<vmem>>, vector<8x128xf32>
    %247 = arith.mulf %245, %246 : vector<8x128xf32>
    %248 = vector.extract_strided_slice %242 {offsets = [0, 0], sizes = [8, 128], strides = [1, 1]} : vector<8x384xf32> to vector<8x128xf32>
    %249 = arith.mulf %248, %244 : vector<8x128xf32>
    %250 = arith.addf %247, %249 : vector<8x128xf32>
    %251 = vector.extract_strided_slice %242 {offsets = [0, 256], sizes = [8, 128], strides = [1, 1]} : vector<8x384xf32> to vector<8x128xf32>
    %252 = math.tanh %250 : vector<8x128xf32>
    %253 = arith.mulf %251, %252 : vector<8x128xf32>
    %c0_134 = arith.constant 0 : index
    %c0_135 = arith.constant 0 : index
    %254 = vector.load %arg8[%c0_134, %c0_135] : memref<8x128xf32, #tpu.memory_space<vmem>>, vector<8x128xf32>
    tpu.vector_store %arg8[%c0_134, %c0_135], %250 {strides = array<i32>} : memref<8x128xf32, #tpu.memory_space<vmem>>, vector<8x128xf32>,
    %c0_136 = arith.constant 0 : index
    %c0_137 = arith.constant 0 : index
    %255 = vector.load %arg7[%c0_136, %c0_137] : memref<8x128xf32, #tpu.memory_space<vmem>>, vector<8x128xf32>
    tpu.vector_store %arg7[%c0_136, %c0_137], %253 {strides = array<i32>} : memref<8x128xf32, #tpu.memory_space<vmem>>, vector<8x128xf32>,
    %256 = arith.index_cast %229 : i32 to index
    %c0_138 = arith.constant 0 : index
    %257 = vector.load %arg5[%256, %c0_138] : memref<64x128xf32, #tpu.memory_space<vmem>>, vector<8x128xf32>
    tpu.vector_store %arg5[%256, %c0_138], %253 {strides = array<i32>} : memref<64x128xf32, #tpu.memory_space<vmem>>, vector<8x128xf32>,
    %c7_i32_139 = arith.constant 7 : i32
    %c1_i32_140 = arith.constant 1 : i32
    %258 = arith.subi %c1_i32_140, %arg0 : i32
    %259 = arith.muli %258, %c7_i32_139 : i32
    %c7_i32_141 = arith.constant 7 : i32
    %260 = arith.subi %c7_i32_141, %c7_i32_139 : i32
    %261 = arith.muli %arg0, %260 : i32
    %262 = arith.addi %259, %261 : i32
    %c8_i32_142 = arith.constant 8 : i32
    %263 = arith.muli %262, %c8_i32_142 : i32
    %264 = tpu.assume_multiple %263, 8 : i32
    %265 = arith.index_cast %264 : i32 to index
    %c0_143 = arith.constant 0 : index
    %266 = vector.load %arg6[%265, %c0_143] : memref<64x512xf32, #tpu.memory_space<vmem>>, vector<8x512xf32>
    %c0_144 = arith.constant 0 : index
    %c0_145 = arith.constant 0 : index
    %267 = vector.load %arg7[%c0_144, %c0_145] : memref<8x128xf32, #tpu.memory_space<vmem>>, vector<8x128xf32>
    %c0_146 = arith.constant 0 : index
    %c0_147 = arith.constant 0 : index
    %c0_148 = arith.constant 0 : index
    %268 = vector.load %arg3[%c0_146, %c0_147, %c0_148] : memref<1x128x512xf32, #tpu.memory_space<vmem>>, vector<1x128x512xf32>
    %269 = vector.shape_cast %268 : vector<1x128x512xf32> to vector<128x512xf32>
    %cst_149 = arith.constant dense<0.000000e+00> : vector<8x512xf32>
    %270 = tpu.matmul %267, %269, %cst_149 {dimension_numbers = #tpu.dot_dimension_numbers<[1], [0], [0], [1], [0, 0, 1, 1], [], []>} : vector<8x128xf32>, vector<128x512xf32>, vector<8x512xf32> -> vector<8x512xf32>
    %271 = arith.addf %266, %270 : vector<8x512xf32>
    %272 = vector.extract_strided_slice %271 {offsets = [0, 0], sizes = [8, 384], strides = [1, 1]} : vector<8x512xf32> to vector<8x384xf32>
    %273 = arith.negf %272 : vector<8x384xf32>
    %274 = math.exp %273 : vector<8x384xf32>
    %cst_150 = arith.constant 1.000000e+00 : f32
    %275 = vector.broadcast %cst_150 : f32 to vector<8x384xf32>
    %276 = arith.addf %275, %274 : vector<8x384xf32>
    %277 = arith.divf %275, %276 : vector<8x384xf32>
    %278 = vector.extract_strided_slice %271 {offsets = [0, 384], sizes = [8, 128], strides = [1, 1]} : vector<8x512xf32> to vector<8x128xf32>
    %279 = math.tanh %278 : vector<8x128xf32>
    %280 = vector.extract_strided_slice %277 {offsets = [0, 128], sizes = [8, 128], strides = [1, 1]} : vector<8x384xf32> to vector<8x128xf32>
    %c0_151 = arith.constant 0 : index
    %c0_152 = arith.constant 0 : index
    %281 = vector.load %arg8[%c0_151, %c0_152] : memref<8x128xf32, #tpu.memory_space<vmem>>, vector<8x128xf32>
    %282 = arith.mulf %280, %281 : vector<8x128xf32>
    %283 = vector.extract_strided_slice %277 {offsets = [0, 0], sizes = [8, 128], strides = [1, 1]} : vector<8x384xf32> to vector<8x128xf32>
    %284 = arith.mulf %283, %279 : vector<8x128xf32>
    %285 = arith.addf %282, %284 : vector<8x128xf32>
    %286 = vector.extract_strided_slice %277 {offsets = [0, 256], sizes = [8, 128], strides = [1, 1]} : vector<8x384xf32> to vector<8x128xf32>
    %287 = math.tanh %285 : vector<8x128xf32>
    %288 = arith.mulf %286, %287 : vector<8x128xf32>
    %c0_153 = arith.constant 0 : index
    %c0_154 = arith.constant 0 : index
    %289 = vector.load %arg8[%c0_153, %c0_154] : memref<8x128xf32, #tpu.memory_space<vmem>>, vector<8x128xf32>
    tpu.vector_store %arg8[%c0_153, %c0_154], %285 {strides = array<i32>} : memref<8x128xf32, #tpu.memory_space<vmem>>, vector<8x128xf32>,
    %c0_155 = arith.constant 0 : index
    %c0_156 = arith.constant 0 : index
    %290 = vector.load %arg7[%c0_155, %c0_156] : memref<8x128xf32, #tpu.memory_space<vmem>>, vector<8x128xf32>
    tpu.vector_store %arg7[%c0_155, %c0_156], %288 {strides = array<i32>} : memref<8x128xf32, #tpu.memory_space<vmem>>, vector<8x128xf32>,
    %291 = arith.index_cast %264 : i32 to index
    %c0_157 = arith.constant 0 : index
    %292 = vector.load %arg5[%291, %c0_157] : memref<64x128xf32, #tpu.memory_space<vmem>>, vector<8x128xf32>
    tpu.vector_store %arg5[%291, %c0_157], %288 {strides = array<i32>} : memref<64x128xf32, #tpu.memory_space<vmem>>, vector<8x128xf32>,
    %c8_i32_158 = arith.constant 8 : i32
    return
  }
  func.func @transform_0(%arg0: i32) -> (i32, i32) {
    %c0_i32 = arith.constant 0 : i32
    %c0_i32_0 = arith.constant 0 : i32
    %c0_i32_1 = arith.constant 0 : i32
    return %c0_i32, %c0_i32_0 : i32, i32
  }
  func.func @transform_1(%arg0: i32) -> (i32, i32, i32) {
    %c0_i32 = arith.constant 0 : i32
    %c0_i32_0 = arith.constant 0 : i32
    %c0_i32_1 = arith.constant 0 : i32
    return %arg0, %c0_i32, %c0_i32_0 : i32, i32, i32
  }
  func.func @transform_2(%arg0: i32) -> (i32, i32, i32) {
    %c0_i32 = arith.constant 0 : i32
    %c0_i32_0 = arith.constant 0 : i32
    %c0_i32_1 = arith.constant 0 : i32
    return %arg0, %c0_i32, %c0_i32_0 : i32, i32, i32
  }
  func.func @transform_3(%arg0: i32) -> (i32, i32, i32) {
    %c0_i32 = arith.constant 0 : i32
    %c0_i32_0 = arith.constant 0 : i32
    %c0_i32_1 = arith.constant 0 : i32
    return %arg0, %c0_i32, %c0_i32_0 : i32, i32, i32
  }
  func.func @transform_4(%arg0: i32) -> (i32, i32) {
    %c0_i32 = arith.constant 0 : i32
    %c0_i32_0 = arith.constant 0 : i32
    return %c0_i32, %arg0 : i32, i32
  }
}

module attributes {stable_mosaic.version = 11 : i64} {
  func.func @_bilstm_kernel(%arg0: i32, %arg1: memref<64x128xf32, #tpu.memory_space<vmem>>, %arg2: memref<1x128x512xf32, #tpu.memory_space<vmem>>, %arg3: memref<1x128x512xf32, #tpu.memory_space<vmem>>, %arg4: memref<1x1x512xf32, #tpu.memory_space<vmem>>, %arg5: memref<64x128xf32, #tpu.memory_space<vmem>>, %arg6: memref<64x512xf32, #tpu.memory_space<vmem>>, %arg7: memref<8x128xf32, #tpu.memory_space<vmem>>, %arg8: memref<8x128xf32, #tpu.memory_space<vmem>>) attributes {dimension_semantics = [#tpu.dimension_semantics<parallel>], iteration_bounds = array<i64: 2>, scalar_prefetch = 0 : i64, scratch_operands = 3 : i64, tpu.core_type = #tpu.core_type<tc>, window_params = [{pipeline_mode = #tpu.pipeline_mode<synchronous>, transform_indices = @transform_0, window_bounds = array<i64: 64, 128>}, {transform_indices = @transform_1, window_bounds = array<i64: 1, 128, 512>}, {transform_indices = @transform_2, window_bounds = array<i64: 1, 128, 512>}, {transform_indices = @transform_3, window_bounds = array<i64: 1, 1, 512>}, {transform_indices = @transform_4, window_bounds = array<i64: 64, 128>}]} {
    %c0 = arith.constant 0 : index
    %c0_0 = arith.constant 0 : index
    %0 = vector.load %arg1[%c0, %c0_0] : memref<64x128xf32, #tpu.memory_space<vmem>>, vector<64x128xf32>
    %c0_1 = arith.constant 0 : index
    %c0_2 = arith.constant 0 : index
    %c0_3 = arith.constant 0 : index
    %1 = vector.load %arg2[%c0_1, %c0_2, %c0_3] : memref<1x128x512xf32, #tpu.memory_space<vmem>>, vector<1x128x512xf32>
    %2 = vector.shape_cast %1 : vector<1x128x512xf32> to vector<128x512xf32>
    %cst = arith.constant dense<0.000000e+00> : vector<64x512xf32>
    %3 = tpu.matmul %0, %2, %cst {dimension_numbers = #tpu.dot_dimension_numbers<[1], [0], [0], [1], [0, 0, 1, 1], [], []>} : vector<64x128xf32>, vector<128x512xf32>, vector<64x512xf32> -> vector<64x512xf32>
    %c0_4 = arith.constant 0 : index
    %c0_5 = arith.constant 0 : index
    %c0_6 = arith.constant 0 : index
    %4 = vector.load %arg4[%c0_4, %c0_5, %c0_6] : memref<1x1x512xf32, #tpu.memory_space<vmem>>, vector<1x1x512xf32>
    %5 = vector.shape_cast %4 : vector<1x1x512xf32> to vector<1x512xf32>
    %6 = vector.broadcast %5 : vector<1x512xf32> to vector<64x512xf32>
    %7 = arith.addf %3, %6 : vector<64x512xf32>
    %c0_7 = arith.constant 0 : index
    %c0_8 = arith.constant 0 : index
    %8 = vector.load %arg6[%c0_7, %c0_8] : memref<64x512xf32, #tpu.memory_space<vmem>>, vector<64x512xf32>
    tpu.vector_store %arg6[%c0_7, %c0_8], %7 {strides = array<i32>} : memref<64x512xf32, #tpu.memory_space<vmem>>, vector<64x512xf32>,
    %cst_9 = arith.constant 0.000000e+00 : f32
    %9 = vector.broadcast %cst_9 : f32 to vector<8x128xf32>
    %c0_10 = arith.constant 0 : index
    %c0_11 = arith.constant 0 : index
    %10 = vector.load %arg7[%c0_10, %c0_11] : memref<8x128xf32, #tpu.memory_space<vmem>>, vector<8x128xf32>
    tpu.vector_store %arg7[%c0_10, %c0_11], %9 {strides = array<i32>} : memref<8x128xf32, #tpu.memory_space<vmem>>, vector<8x128xf32>,
    %cst_12 = arith.constant 0.000000e+00 : f32
    %11 = vector.broadcast %cst_12 : f32 to vector<8x128xf32>
    %c0_13 = arith.constant 0 : index
    %c0_14 = arith.constant 0 : index
    %12 = vector.load %arg8[%c0_13, %c0_14] : memref<8x128xf32, #tpu.memory_space<vmem>>, vector<8x128xf32>
    tpu.vector_store %arg8[%c0_13, %c0_14], %11 {strides = array<i32>} : memref<8x128xf32, #tpu.memory_space<vmem>>, vector<8x128xf32>,
    %c0_i32 = arith.constant 0 : i32
    %c1_i32 = arith.constant 1 : i32
    %13 = arith.subi %c1_i32, %arg0 : i32
    %14 = arith.muli %13, %c0_i32 : i32
    %c7_i32 = arith.constant 7 : i32
    %15 = arith.subi %c7_i32, %c0_i32 : i32
    %16 = arith.muli %arg0, %15 : i32
    %17 = arith.addi %14, %16 : i32
    %c8_i32 = arith.constant 8 : i32
    %18 = arith.muli %17, %c8_i32 : i32
    %19 = tpu.assume_multiple %18, 8 : i32
    %20 = arith.index_cast %19 : i32 to index
    %c0_15 = arith.constant 0 : index
    %21 = vector.load %arg6[%20, %c0_15] : memref<64x512xf32, #tpu.memory_space<vmem>>, vector<8x512xf32>
    %c0_16 = arith.constant 0 : index
    %c0_17 = arith.constant 0 : index
    %22 = vector.load %arg7[%c0_16, %c0_17] : memref<8x128xf32, #tpu.memory_space<vmem>>, vector<8x128xf32>
    %c0_18 = arith.constant 0 : index
    %c0_19 = arith.constant 0 : index
    %c0_20 = arith.constant 0 : index
    %23 = vector.load %arg3[%c0_18, %c0_19, %c0_20] : memref<1x128x512xf32, #tpu.memory_space<vmem>>, vector<1x128x512xf32>
    %24 = vector.shape_cast %23 : vector<1x128x512xf32> to vector<128x512xf32>
    %cst_21 = arith.constant dense<0.000000e+00> : vector<8x512xf32>
    %25 = tpu.matmul %22, %24, %cst_21 {dimension_numbers = #tpu.dot_dimension_numbers<[1], [0], [0], [1], [0, 0, 1, 1], [], []>} : vector<8x128xf32>, vector<128x512xf32>, vector<8x512xf32> -> vector<8x512xf32>
    %26 = arith.addf %21, %25 : vector<8x512xf32>
    %27 = vector.extract_strided_slice %26 {offsets = [0, 0], sizes = [8, 384], strides = [1, 1]} : vector<8x512xf32> to vector<8x384xf32>
    %28 = arith.negf %27 : vector<8x384xf32>
    %29 = math.exp %28 : vector<8x384xf32>
    %cst_22 = arith.constant 1.000000e+00 : f32
    %30 = vector.broadcast %cst_22 : f32 to vector<8x384xf32>
    %31 = arith.addf %30, %29 : vector<8x384xf32>
    %32 = arith.divf %30, %31 : vector<8x384xf32>
    %33 = vector.extract_strided_slice %26 {offsets = [0, 384], sizes = [8, 128], strides = [1, 1]} : vector<8x512xf32> to vector<8x128xf32>
    %34 = math.tanh %33 : vector<8x128xf32>
    %35 = vector.extract_strided_slice %32 {offsets = [0, 128], sizes = [8, 128], strides = [1, 1]} : vector<8x384xf32> to vector<8x128xf32>
    %c0_23 = arith.constant 0 : index
    %c0_24 = arith.constant 0 : index
    %36 = vector.load %arg8[%c0_23, %c0_24] : memref<8x128xf32, #tpu.memory_space<vmem>>, vector<8x128xf32>
    %37 = arith.mulf %35, %36 : vector<8x128xf32>
    %38 = vector.extract_strided_slice %32 {offsets = [0, 0], sizes = [8, 128], strides = [1, 1]} : vector<8x384xf32> to vector<8x128xf32>
    %39 = arith.mulf %38, %34 : vector<8x128xf32>
    %40 = arith.addf %37, %39 : vector<8x128xf32>
    %41 = vector.extract_strided_slice %32 {offsets = [0, 256], sizes = [8, 128], strides = [1, 1]} : vector<8x384xf32> to vector<8x128xf32>
    %42 = math.tanh %40 : vector<8x128xf32>
    %43 = arith.mulf %41, %42 : vector<8x128xf32>
    %c0_25 = arith.constant 0 : index
    %c0_26 = arith.constant 0 : index
    %44 = vector.load %arg8[%c0_25, %c0_26] : memref<8x128xf32, #tpu.memory_space<vmem>>, vector<8x128xf32>
    tpu.vector_store %arg8[%c0_25, %c0_26], %40 {strides = array<i32>} : memref<8x128xf32, #tpu.memory_space<vmem>>, vector<8x128xf32>,
    %c0_27 = arith.constant 0 : index
    %c0_28 = arith.constant 0 : index
    %45 = vector.load %arg7[%c0_27, %c0_28] : memref<8x128xf32, #tpu.memory_space<vmem>>, vector<8x128xf32>
    tpu.vector_store %arg7[%c0_27, %c0_28], %43 {strides = array<i32>} : memref<8x128xf32, #tpu.memory_space<vmem>>, vector<8x128xf32>,
    %46 = arith.index_cast %19 : i32 to index
    %c0_29 = arith.constant 0 : index
    %47 = vector.load %arg5[%46, %c0_29] : memref<64x128xf32, #tpu.memory_space<vmem>>, vector<8x128xf32>
    tpu.vector_store %arg5[%46, %c0_29], %43 {strides = array<i32>} : memref<64x128xf32, #tpu.memory_space<vmem>>, vector<8x128xf32>,
    %c1_i32_30 = arith.constant 1 : i32
    %c1_i32_31 = arith.constant 1 : i32
    %48 = arith.subi %c1_i32_31, %arg0 : i32
    %49 = arith.muli %48, %c1_i32_30 : i32
    %c7_i32_32 = arith.constant 7 : i32
    %50 = arith.subi %c7_i32_32, %c1_i32_30 : i32
    %51 = arith.muli %arg0, %50 : i32
    %52 = arith.addi %49, %51 : i32
    %c8_i32_33 = arith.constant 8 : i32
    %53 = arith.muli %52, %c8_i32_33 : i32
    %54 = tpu.assume_multiple %53, 8 : i32
    %55 = arith.index_cast %54 : i32 to index
    %c0_34 = arith.constant 0 : index
    %56 = vector.load %arg6[%55, %c0_34] : memref<64x512xf32, #tpu.memory_space<vmem>>, vector<8x512xf32>
    %c0_35 = arith.constant 0 : index
    %c0_36 = arith.constant 0 : index
    %57 = vector.load %arg7[%c0_35, %c0_36] : memref<8x128xf32, #tpu.memory_space<vmem>>, vector<8x128xf32>
    %c0_37 = arith.constant 0 : index
    %c0_38 = arith.constant 0 : index
    %c0_39 = arith.constant 0 : index
    %58 = vector.load %arg3[%c0_37, %c0_38, %c0_39] : memref<1x128x512xf32, #tpu.memory_space<vmem>>, vector<1x128x512xf32>
    %59 = vector.shape_cast %58 : vector<1x128x512xf32> to vector<128x512xf32>
    %cst_40 = arith.constant dense<0.000000e+00> : vector<8x512xf32>
    %60 = tpu.matmul %57, %59, %cst_40 {dimension_numbers = #tpu.dot_dimension_numbers<[1], [0], [0], [1], [0, 0, 1, 1], [], []>} : vector<8x128xf32>, vector<128x512xf32>, vector<8x512xf32> -> vector<8x512xf32>
    %61 = arith.addf %56, %60 : vector<8x512xf32>
    %62 = vector.extract_strided_slice %61 {offsets = [0, 0], sizes = [8, 384], strides = [1, 1]} : vector<8x512xf32> to vector<8x384xf32>
    %63 = arith.negf %62 : vector<8x384xf32>
    %64 = math.exp %63 : vector<8x384xf32>
    %cst_41 = arith.constant 1.000000e+00 : f32
    %65 = vector.broadcast %cst_41 : f32 to vector<8x384xf32>
    %66 = arith.addf %65, %64 : vector<8x384xf32>
    %67 = arith.divf %65, %66 : vector<8x384xf32>
    %68 = vector.extract_strided_slice %61 {offsets = [0, 384], sizes = [8, 128], strides = [1, 1]} : vector<8x512xf32> to vector<8x128xf32>
    %69 = math.tanh %68 : vector<8x128xf32>
    %70 = vector.extract_strided_slice %67 {offsets = [0, 128], sizes = [8, 128], strides = [1, 1]} : vector<8x384xf32> to vector<8x128xf32>
    %c0_42 = arith.constant 0 : index
    %c0_43 = arith.constant 0 : index
    %71 = vector.load %arg8[%c0_42, %c0_43] : memref<8x128xf32, #tpu.memory_space<vmem>>, vector<8x128xf32>
    %72 = arith.mulf %70, %71 : vector<8x128xf32>
    %73 = vector.extract_strided_slice %67 {offsets = [0, 0], sizes = [8, 128], strides = [1, 1]} : vector<8x384xf32> to vector<8x128xf32>
    %74 = arith.mulf %73, %69 : vector<8x128xf32>
    %75 = arith.addf %72, %74 : vector<8x128xf32>
    %76 = vector.extract_strided_slice %67 {offsets = [0, 256], sizes = [8, 128], strides = [1, 1]} : vector<8x384xf32> to vector<8x128xf32>
    %77 = math.tanh %75 : vector<8x128xf32>
    %78 = arith.mulf %76, %77 : vector<8x128xf32>
    %c0_44 = arith.constant 0 : index
    %c0_45 = arith.constant 0 : index
    %79 = vector.load %arg8[%c0_44, %c0_45] : memref<8x128xf32, #tpu.memory_space<vmem>>, vector<8x128xf32>
    tpu.vector_store %arg8[%c0_44, %c0_45], %75 {strides = array<i32>} : memref<8x128xf32, #tpu.memory_space<vmem>>, vector<8x128xf32>,
    %c0_46 = arith.constant 0 : index
    %c0_47 = arith.constant 0 : index
    %80 = vector.load %arg7[%c0_46, %c0_47] : memref<8x128xf32, #tpu.memory_space<vmem>>, vector<8x128xf32>
    tpu.vector_store %arg7[%c0_46, %c0_47], %78 {strides = array<i32>} : memref<8x128xf32, #tpu.memory_space<vmem>>, vector<8x128xf32>,
    %81 = arith.index_cast %54 : i32 to index
    %c0_48 = arith.constant 0 : index
    %82 = vector.load %arg5[%81, %c0_48] : memref<64x128xf32, #tpu.memory_space<vmem>>, vector<8x128xf32>
    tpu.vector_store %arg5[%81, %c0_48], %78 {strides = array<i32>} : memref<64x128xf32, #tpu.memory_space<vmem>>, vector<8x128xf32>,
    %c2_i32 = arith.constant 2 : i32
    %c1_i32_49 = arith.constant 1 : i32
    %83 = arith.subi %c1_i32_49, %arg0 : i32
    %84 = arith.muli %83, %c2_i32 : i32
    %c7_i32_50 = arith.constant 7 : i32
    %85 = arith.subi %c7_i32_50, %c2_i32 : i32
    %86 = arith.muli %arg0, %85 : i32
    %87 = arith.addi %84, %86 : i32
    %c8_i32_51 = arith.constant 8 : i32
    %88 = arith.muli %87, %c8_i32_51 : i32
    %89 = tpu.assume_multiple %88, 8 : i32
    %90 = arith.index_cast %89 : i32 to index
    %c0_52 = arith.constant 0 : index
    %91 = vector.load %arg6[%90, %c0_52] : memref<64x512xf32, #tpu.memory_space<vmem>>, vector<8x512xf32>
    %c0_53 = arith.constant 0 : index
    %c0_54 = arith.constant 0 : index
    %92 = vector.load %arg7[%c0_53, %c0_54] : memref<8x128xf32, #tpu.memory_space<vmem>>, vector<8x128xf32>
    %c0_55 = arith.constant 0 : index
    %c0_56 = arith.constant 0 : index
    %c0_57 = arith.constant 0 : index
    %93 = vector.load %arg3[%c0_55, %c0_56, %c0_57] : memref<1x128x512xf32, #tpu.memory_space<vmem>>, vector<1x128x512xf32>
    %94 = vector.shape_cast %93 : vector<1x128x512xf32> to vector<128x512xf32>
    %cst_58 = arith.constant dense<0.000000e+00> : vector<8x512xf32>
    %95 = tpu.matmul %92, %94, %cst_58 {dimension_numbers = #tpu.dot_dimension_numbers<[1], [0], [0], [1], [0, 0, 1, 1], [], []>} : vector<8x128xf32>, vector<128x512xf32>, vector<8x512xf32> -> vector<8x512xf32>
    %96 = arith.addf %91, %95 : vector<8x512xf32>
    %97 = vector.extract_strided_slice %96 {offsets = [0, 0], sizes = [8, 384], strides = [1, 1]} : vector<8x512xf32> to vector<8x384xf32>
    %98 = arith.negf %97 : vector<8x384xf32>
    %99 = math.exp %98 : vector<8x384xf32>
    %cst_59 = arith.constant 1.000000e+00 : f32
    %100 = vector.broadcast %cst_59 : f32 to vector<8x384xf32>
    %101 = arith.addf %100, %99 : vector<8x384xf32>
    %102 = arith.divf %100, %101 : vector<8x384xf32>
    %103 = vector.extract_strided_slice %96 {offsets = [0, 384], sizes = [8, 128], strides = [1, 1]} : vector<8x512xf32> to vector<8x128xf32>
    %104 = math.tanh %103 : vector<8x128xf32>
    %105 = vector.extract_strided_slice %102 {offsets = [0, 128], sizes = [8, 128], strides = [1, 1]} : vector<8x384xf32> to vector<8x128xf32>
    %c0_60 = arith.constant 0 : index
    %c0_61 = arith.constant 0 : index
    %106 = vector.load %arg8[%c0_60, %c0_61] : memref<8x128xf32, #tpu.memory_space<vmem>>, vector<8x128xf32>
    %107 = arith.mulf %105, %106 : vector<8x128xf32>
    %108 = vector.extract_strided_slice %102 {offsets = [0, 0], sizes = [8, 128], strides = [1, 1]} : vector<8x384xf32> to vector<8x128xf32>
    %109 = arith.mulf %108, %104 : vector<8x128xf32>
    %110 = arith.addf %107, %109 : vector<8x128xf32>
    %111 = vector.extract_strided_slice %102 {offsets = [0, 256], sizes = [8, 128], strides = [1, 1]} : vector<8x384xf32> to vector<8x128xf32>
    %112 = math.tanh %110 : vector<8x128xf32>
    %113 = arith.mulf %111, %112 : vector<8x128xf32>
    %c0_62 = arith.constant 0 : index
    %c0_63 = arith.constant 0 : index
    %114 = vector.load %arg8[%c0_62, %c0_63] : memref<8x128xf32, #tpu.memory_space<vmem>>, vector<8x128xf32>
    tpu.vector_store %arg8[%c0_62, %c0_63], %110 {strides = array<i32>} : memref<8x128xf32, #tpu.memory_space<vmem>>, vector<8x128xf32>,
    %c0_64 = arith.constant 0 : index
    %c0_65 = arith.constant 0 : index
    %115 = vector.load %arg7[%c0_64, %c0_65] : memref<8x128xf32, #tpu.memory_space<vmem>>, vector<8x128xf32>
    tpu.vector_store %arg7[%c0_64, %c0_65], %113 {strides = array<i32>} : memref<8x128xf32, #tpu.memory_space<vmem>>, vector<8x128xf32>,
    %116 = arith.index_cast %89 : i32 to index
    %c0_66 = arith.constant 0 : index
    %117 = vector.load %arg5[%116, %c0_66] : memref<64x128xf32, #tpu.memory_space<vmem>>, vector<8x128xf32>
    tpu.vector_store %arg5[%116, %c0_66], %113 {strides = array<i32>} : memref<64x128xf32, #tpu.memory_space<vmem>>, vector<8x128xf32>,
    %c3_i32 = arith.constant 3 : i32
    %c1_i32_67 = arith.constant 1 : i32
    %118 = arith.subi %c1_i32_67, %arg0 : i32
    %119 = arith.muli %118, %c3_i32 : i32
    %c7_i32_68 = arith.constant 7 : i32
    %120 = arith.subi %c7_i32_68, %c3_i32 : i32
    %121 = arith.muli %arg0, %120 : i32
    %122 = arith.addi %119, %121 : i32
    %c8_i32_69 = arith.constant 8 : i32
    %123 = arith.muli %122, %c8_i32_69 : i32
    %124 = tpu.assume_multiple %123, 8 : i32
    %125 = arith.index_cast %124 : i32 to index
    %c0_70 = arith.constant 0 : index
    %126 = vector.load %arg6[%125, %c0_70] : memref<64x512xf32, #tpu.memory_space<vmem>>, vector<8x512xf32>
    %c0_71 = arith.constant 0 : index
    %c0_72 = arith.constant 0 : index
    %127 = vector.load %arg7[%c0_71, %c0_72] : memref<8x128xf32, #tpu.memory_space<vmem>>, vector<8x128xf32>
    %c0_73 = arith.constant 0 : index
    %c0_74 = arith.constant 0 : index
    %c0_75 = arith.constant 0 : index
    %128 = vector.load %arg3[%c0_73, %c0_74, %c0_75] : memref<1x128x512xf32, #tpu.memory_space<vmem>>, vector<1x128x512xf32>
    %129 = vector.shape_cast %128 : vector<1x128x512xf32> to vector<128x512xf32>
    %cst_76 = arith.constant dense<0.000000e+00> : vector<8x512xf32>
    %130 = tpu.matmul %127, %129, %cst_76 {dimension_numbers = #tpu.dot_dimension_numbers<[1], [0], [0], [1], [0, 0, 1, 1], [], []>} : vector<8x128xf32>, vector<128x512xf32>, vector<8x512xf32> -> vector<8x512xf32>
    %131 = arith.addf %126, %130 : vector<8x512xf32>
    %132 = vector.extract_strided_slice %131 {offsets = [0, 0], sizes = [8, 384], strides = [1, 1]} : vector<8x512xf32> to vector<8x384xf32>
    %133 = arith.negf %132 : vector<8x384xf32>
    %134 = math.exp %133 : vector<8x384xf32>
    %cst_77 = arith.constant 1.000000e+00 : f32
    %135 = vector.broadcast %cst_77 : f32 to vector<8x384xf32>
    %136 = arith.addf %135, %134 : vector<8x384xf32>
    %137 = arith.divf %135, %136 : vector<8x384xf32>
    %138 = vector.extract_strided_slice %131 {offsets = [0, 384], sizes = [8, 128], strides = [1, 1]} : vector<8x512xf32> to vector<8x128xf32>
    %139 = math.tanh %138 : vector<8x128xf32>
    %140 = vector.extract_strided_slice %137 {offsets = [0, 128], sizes = [8, 128], strides = [1, 1]} : vector<8x384xf32> to vector<8x128xf32>
    %c0_78 = arith.constant 0 : index
    %c0_79 = arith.constant 0 : index
    %141 = vector.load %arg8[%c0_78, %c0_79] : memref<8x128xf32, #tpu.memory_space<vmem>>, vector<8x128xf32>
    %142 = arith.mulf %140, %141 : vector<8x128xf32>
    %143 = vector.extract_strided_slice %137 {offsets = [0, 0], sizes = [8, 128], strides = [1, 1]} : vector<8x384xf32> to vector<8x128xf32>
    %144 = arith.mulf %143, %139 : vector<8x128xf32>
    %145 = arith.addf %142, %144 : vector<8x128xf32>
    %146 = vector.extract_strided_slice %137 {offsets = [0, 256], sizes = [8, 128], strides = [1, 1]} : vector<8x384xf32> to vector<8x128xf32>
    %147 = math.tanh %145 : vector<8x128xf32>
    %148 = arith.mulf %146, %147 : vector<8x128xf32>
    %c0_80 = arith.constant 0 : index
    %c0_81 = arith.constant 0 : index
    %149 = vector.load %arg8[%c0_80, %c0_81] : memref<8x128xf32, #tpu.memory_space<vmem>>, vector<8x128xf32>
    tpu.vector_store %arg8[%c0_80, %c0_81], %145 {strides = array<i32>} : memref<8x128xf32, #tpu.memory_space<vmem>>, vector<8x128xf32>,
    %c0_82 = arith.constant 0 : index
    %c0_83 = arith.constant 0 : index
    %150 = vector.load %arg7[%c0_82, %c0_83] : memref<8x128xf32, #tpu.memory_space<vmem>>, vector<8x128xf32>
    tpu.vector_store %arg7[%c0_82, %c0_83], %148 {strides = array<i32>} : memref<8x128xf32, #tpu.memory_space<vmem>>, vector<8x128xf32>,
    %151 = arith.index_cast %124 : i32 to index
    %c0_84 = arith.constant 0 : index
    %152 = vector.load %arg5[%151, %c0_84] : memref<64x128xf32, #tpu.memory_space<vmem>>, vector<8x128xf32>
    tpu.vector_store %arg5[%151, %c0_84], %148 {strides = array<i32>} : memref<64x128xf32, #tpu.memory_space<vmem>>, vector<8x128xf32>,
    %c4_i32 = arith.constant 4 : i32
    %c1_i32_85 = arith.constant 1 : i32
    %153 = arith.subi %c1_i32_85, %arg0 : i32
    %154 = arith.muli %153, %c4_i32 : i32
    %c7_i32_86 = arith.constant 7 : i32
    %155 = arith.subi %c7_i32_86, %c4_i32 : i32
    %156 = arith.muli %arg0, %155 : i32
    %157 = arith.addi %154, %156 : i32
    %c8_i32_87 = arith.constant 8 : i32
    %158 = arith.muli %157, %c8_i32_87 : i32
    %159 = tpu.assume_multiple %158, 8 : i32
    %160 = arith.index_cast %159 : i32 to index
    %c0_88 = arith.constant 0 : index
    %161 = vector.load %arg6[%160, %c0_88] : memref<64x512xf32, #tpu.memory_space<vmem>>, vector<8x512xf32>
    %c0_89 = arith.constant 0 : index
    %c0_90 = arith.constant 0 : index
    %162 = vector.load %arg7[%c0_89, %c0_90] : memref<8x128xf32, #tpu.memory_space<vmem>>, vector<8x128xf32>
    %c0_91 = arith.constant 0 : index
    %c0_92 = arith.constant 0 : index
    %c0_93 = arith.constant 0 : index
    %163 = vector.load %arg3[%c0_91, %c0_92, %c0_93] : memref<1x128x512xf32, #tpu.memory_space<vmem>>, vector<1x128x512xf32>
    %164 = vector.shape_cast %163 : vector<1x128x512xf32> to vector<128x512xf32>
    %cst_94 = arith.constant dense<0.000000e+00> : vector<8x512xf32>
    %165 = tpu.matmul %162, %164, %cst_94 {dimension_numbers = #tpu.dot_dimension_numbers<[1], [0], [0], [1], [0, 0, 1, 1], [], []>} : vector<8x128xf32>, vector<128x512xf32>, vector<8x512xf32> -> vector<8x512xf32>
    %166 = arith.addf %161, %165 : vector<8x512xf32>
    %167 = vector.extract_strided_slice %166 {offsets = [0, 0], sizes = [8, 384], strides = [1, 1]} : vector<8x512xf32> to vector<8x384xf32>
    %168 = arith.negf %167 : vector<8x384xf32>
    %169 = math.exp %168 : vector<8x384xf32>
    %cst_95 = arith.constant 1.000000e+00 : f32
    %170 = vector.broadcast %cst_95 : f32 to vector<8x384xf32>
    %171 = arith.addf %170, %169 : vector<8x384xf32>
    %172 = arith.divf %170, %171 : vector<8x384xf32>
    %173 = vector.extract_strided_slice %166 {offsets = [0, 384], sizes = [8, 128], strides = [1, 1]} : vector<8x512xf32> to vector<8x128xf32>
    %174 = math.tanh %173 : vector<8x128xf32>
    %175 = vector.extract_strided_slice %172 {offsets = [0, 128], sizes = [8, 128], strides = [1, 1]} : vector<8x384xf32> to vector<8x128xf32>
    %c0_96 = arith.constant 0 : index
    %c0_97 = arith.constant 0 : index
    %176 = vector.load %arg8[%c0_96, %c0_97] : memref<8x128xf32, #tpu.memory_space<vmem>>, vector<8x128xf32>
    %177 = arith.mulf %175, %176 : vector<8x128xf32>
    %178 = vector.extract_strided_slice %172 {offsets = [0, 0], sizes = [8, 128], strides = [1, 1]} : vector<8x384xf32> to vector<8x128xf32>
    %179 = arith.mulf %178, %174 : vector<8x128xf32>
    %180 = arith.addf %177, %179 : vector<8x128xf32>
    %181 = vector.extract_strided_slice %172 {offsets = [0, 256], sizes = [8, 128], strides = [1, 1]} : vector<8x384xf32> to vector<8x128xf32>
    %182 = math.tanh %180 : vector<8x128xf32>
    %183 = arith.mulf %181, %182 : vector<8x128xf32>
    %c0_98 = arith.constant 0 : index
    %c0_99 = arith.constant 0 : index
    %184 = vector.load %arg8[%c0_98, %c0_99] : memref<8x128xf32, #tpu.memory_space<vmem>>, vector<8x128xf32>
    tpu.vector_store %arg8[%c0_98, %c0_99], %180 {strides = array<i32>} : memref<8x128xf32, #tpu.memory_space<vmem>>, vector<8x128xf32>,
    %c0_100 = arith.constant 0 : index
    %c0_101 = arith.constant 0 : index
    %185 = vector.load %arg7[%c0_100, %c0_101] : memref<8x128xf32, #tpu.memory_space<vmem>>, vector<8x128xf32>
    tpu.vector_store %arg7[%c0_100, %c0_101], %183 {strides = array<i32>} : memref<8x128xf32, #tpu.memory_space<vmem>>, vector<8x128xf32>,
    %186 = arith.index_cast %159 : i32 to index
    %c0_102 = arith.constant 0 : index
    %187 = vector.load %arg5[%186, %c0_102] : memref<64x128xf32, #tpu.memory_space<vmem>>, vector<8x128xf32>
    tpu.vector_store %arg5[%186, %c0_102], %183 {strides = array<i32>} : memref<64x128xf32, #tpu.memory_space<vmem>>, vector<8x128xf32>,
    %c5_i32 = arith.constant 5 : i32
    %c1_i32_103 = arith.constant 1 : i32
    %188 = arith.subi %c1_i32_103, %arg0 : i32
    %189 = arith.muli %188, %c5_i32 : i32
    %c7_i32_104 = arith.constant 7 : i32
    %190 = arith.subi %c7_i32_104, %c5_i32 : i32
    %191 = arith.muli %arg0, %190 : i32
    %192 = arith.addi %189, %191 : i32
    %c8_i32_105 = arith.constant 8 : i32
    %193 = arith.muli %192, %c8_i32_105 : i32
    %194 = tpu.assume_multiple %193, 8 : i32
    %195 = arith.index_cast %194 : i32 to index
    %c0_106 = arith.constant 0 : index
    %196 = vector.load %arg6[%195, %c0_106] : memref<64x512xf32, #tpu.memory_space<vmem>>, vector<8x512xf32>
    %c0_107 = arith.constant 0 : index
    %c0_108 = arith.constant 0 : index
    %197 = vector.load %arg7[%c0_107, %c0_108] : memref<8x128xf32, #tpu.memory_space<vmem>>, vector<8x128xf32>
    %c0_109 = arith.constant 0 : index
    %c0_110 = arith.constant 0 : index
    %c0_111 = arith.constant 0 : index
    %198 = vector.load %arg3[%c0_109, %c0_110, %c0_111] : memref<1x128x512xf32, #tpu.memory_space<vmem>>, vector<1x128x512xf32>
    %199 = vector.shape_cast %198 : vector<1x128x512xf32> to vector<128x512xf32>
    %cst_112 = arith.constant dense<0.000000e+00> : vector<8x512xf32>
    %200 = tpu.matmul %197, %199, %cst_112 {dimension_numbers = #tpu.dot_dimension_numbers<[1], [0], [0], [1], [0, 0, 1, 1], [], []>} : vector<8x128xf32>, vector<128x512xf32>, vector<8x512xf32> -> vector<8x512xf32>
    %201 = arith.addf %196, %200 : vector<8x512xf32>
    %202 = vector.extract_strided_slice %201 {offsets = [0, 0], sizes = [8, 384], strides = [1, 1]} : vector<8x512xf32> to vector<8x384xf32>
    %203 = arith.negf %202 : vector<8x384xf32>
    %204 = math.exp %203 : vector<8x384xf32>
    %cst_113 = arith.constant 1.000000e+00 : f32
    %205 = vector.broadcast %cst_113 : f32 to vector<8x384xf32>
    %206 = arith.addf %205, %204 : vector<8x384xf32>
    %207 = arith.divf %205, %206 : vector<8x384xf32>
    %208 = vector.extract_strided_slice %201 {offsets = [0, 384], sizes = [8, 128], strides = [1, 1]} : vector<8x512xf32> to vector<8x128xf32>
    %209 = math.tanh %208 : vector<8x128xf32>
    %210 = vector.extract_strided_slice %207 {offsets = [0, 128], sizes = [8, 128], strides = [1, 1]} : vector<8x384xf32> to vector<8x128xf32>
    %c0_114 = arith.constant 0 : index
    %c0_115 = arith.constant 0 : index
    %211 = vector.load %arg8[%c0_114, %c0_115] : memref<8x128xf32, #tpu.memory_space<vmem>>, vector<8x128xf32>
    %212 = arith.mulf %210, %211 : vector<8x128xf32>
    %213 = vector.extract_strided_slice %207 {offsets = [0, 0], sizes = [8, 128], strides = [1, 1]} : vector<8x384xf32> to vector<8x128xf32>
    %214 = arith.mulf %213, %209 : vector<8x128xf32>
    %215 = arith.addf %212, %214 : vector<8x128xf32>
    %216 = vector.extract_strided_slice %207 {offsets = [0, 256], sizes = [8, 128], strides = [1, 1]} : vector<8x384xf32> to vector<8x128xf32>
    %217 = math.tanh %215 : vector<8x128xf32>
    %218 = arith.mulf %216, %217 : vector<8x128xf32>
    %c0_116 = arith.constant 0 : index
    %c0_117 = arith.constant 0 : index
    %219 = vector.load %arg8[%c0_116, %c0_117] : memref<8x128xf32, #tpu.memory_space<vmem>>, vector<8x128xf32>
    tpu.vector_store %arg8[%c0_116, %c0_117], %215 {strides = array<i32>} : memref<8x128xf32, #tpu.memory_space<vmem>>, vector<8x128xf32>,
    %c0_118 = arith.constant 0 : index
    %c0_119 = arith.constant 0 : index
    %220 = vector.load %arg7[%c0_118, %c0_119] : memref<8x128xf32, #tpu.memory_space<vmem>>, vector<8x128xf32>
    tpu.vector_store %arg7[%c0_118, %c0_119], %218 {strides = array<i32>} : memref<8x128xf32, #tpu.memory_space<vmem>>, vector<8x128xf32>,
    %221 = arith.index_cast %194 : i32 to index
    %c0_120 = arith.constant 0 : index
    %222 = vector.load %arg5[%221, %c0_120] : memref<64x128xf32, #tpu.memory_space<vmem>>, vector<8x128xf32>
    tpu.vector_store %arg5[%221, %c0_120], %218 {strides = array<i32>} : memref<64x128xf32, #tpu.memory_space<vmem>>, vector<8x128xf32>,
    %c6_i32 = arith.constant 6 : i32
    %c1_i32_121 = arith.constant 1 : i32
    %223 = arith.subi %c1_i32_121, %arg0 : i32
    %224 = arith.muli %223, %c6_i32 : i32
    %c7_i32_122 = arith.constant 7 : i32
    %225 = arith.subi %c7_i32_122, %c6_i32 : i32
    %226 = arith.muli %arg0, %225 : i32
    %227 = arith.addi %224, %226 : i32
    %c8_i32_123 = arith.constant 8 : i32
    %228 = arith.muli %227, %c8_i32_123 : i32
    %229 = tpu.assume_multiple %228, 8 : i32
    %230 = arith.index_cast %229 : i32 to index
    %c0_124 = arith.constant 0 : index
    %231 = vector.load %arg6[%230, %c0_124] : memref<64x512xf32, #tpu.memory_space<vmem>>, vector<8x512xf32>
    %c0_125 = arith.constant 0 : index
    %c0_126 = arith.constant 0 : index
    %232 = vector.load %arg7[%c0_125, %c0_126] : memref<8x128xf32, #tpu.memory_space<vmem>>, vector<8x128xf32>
    %c0_127 = arith.constant 0 : index
    %c0_128 = arith.constant 0 : index
    %c0_129 = arith.constant 0 : index
    %233 = vector.load %arg3[%c0_127, %c0_128, %c0_129] : memref<1x128x512xf32, #tpu.memory_space<vmem>>, vector<1x128x512xf32>
    %234 = vector.shape_cast %233 : vector<1x128x512xf32> to vector<128x512xf32>
    %cst_130 = arith.constant dense<0.000000e+00> : vector<8x512xf32>
    %235 = tpu.matmul %232, %234, %cst_130 {dimension_numbers = #tpu.dot_dimension_numbers<[1], [0], [0], [1], [0, 0, 1, 1], [], []>} : vector<8x128xf32>, vector<128x512xf32>, vector<8x512xf32> -> vector<8x512xf32>
    %236 = arith.addf %231, %235 : vector<8x512xf32>
    %237 = vector.extract_strided_slice %236 {offsets = [0, 0], sizes = [8, 384], strides = [1, 1]} : vector<8x512xf32> to vector<8x384xf32>
    %238 = arith.negf %237 : vector<8x384xf32>
    %239 = math.exp %238 : vector<8x384xf32>
    %cst_131 = arith.constant 1.000000e+00 : f32
    %240 = vector.broadcast %cst_131 : f32 to vector<8x384xf32>
    %241 = arith.addf %240, %239 : vector<8x384xf32>
    %242 = arith.divf %240, %241 : vector<8x384xf32>
    %243 = vector.extract_strided_slice %236 {offsets = [0, 384], sizes = [8, 128], strides = [1, 1]} : vector<8x512xf32> to vector<8x128xf32>
    %244 = math.tanh %243 : vector<8x128xf32>
    %245 = vector.extract_strided_slice %242 {offsets = [0, 128], sizes = [8, 128], strides = [1, 1]} : vector<8x384xf32> to vector<8x128xf32>
    %c0_132 = arith.constant 0 : index
    %c0_133 = arith.constant 0 : index
    %246 = vector.load %arg8[%c0_132, %c0_133] : memref<8x128xf32, #tpu.memory_space<vmem>>, vector<8x128xf32>
    %247 = arith.mulf %245, %246 : vector<8x128xf32>
    %248 = vector.extract_strided_slice %242 {offsets = [0, 0], sizes = [8, 128], strides = [1, 1]} : vector<8x384xf32> to vector<8x128xf32>
    %249 = arith.mulf %248, %244 : vector<8x128xf32>
    %250 = arith.addf %247, %249 : vector<8x128xf32>
    %251 = vector.extract_strided_slice %242 {offsets = [0, 256], sizes = [8, 128], strides = [1, 1]} : vector<8x384xf32> to vector<8x128xf32>
    %252 = math.tanh %250 : vector<8x128xf32>
    %253 = arith.mulf %251, %252 : vector<8x128xf32>
    %c0_134 = arith.constant 0 : index
    %c0_135 = arith.constant 0 : index
    %254 = vector.load %arg8[%c0_134, %c0_135] : memref<8x128xf32, #tpu.memory_space<vmem>>, vector<8x128xf32>
    tpu.vector_store %arg8[%c0_134, %c0_135], %250 {strides = array<i32>} : memref<8x128xf32, #tpu.memory_space<vmem>>, vector<8x128xf32>,
    %c0_136 = arith.constant 0 : index
    %c0_137 = arith.constant 0 : index
    %255 = vector.load %arg7[%c0_136, %c0_137] : memref<8x128xf32, #tpu.memory_space<vmem>>, vector<8x128xf32>
    tpu.vector_store %arg7[%c0_136, %c0_137], %253 {strides = array<i32>} : memref<8x128xf32, #tpu.memory_space<vmem>>, vector<8x128xf32>,
    %256 = arith.index_cast %229 : i32 to index
    %c0_138 = arith.constant 0 : index
    %257 = vector.load %arg5[%256, %c0_138] : memref<64x128xf32, #tpu.memory_space<vmem>>, vector<8x128xf32>
    tpu.vector_store %arg5[%256, %c0_138], %253 {strides = array<i32>} : memref<64x128xf32, #tpu.memory_space<vmem>>, vector<8x128xf32>,
    %c7_i32_139 = arith.constant 7 : i32
    %c1_i32_140 = arith.constant 1 : i32
    %258 = arith.subi %c1_i32_140, %arg0 : i32
    %259 = arith.muli %258, %c7_i32_139 : i32
    %c7_i32_141 = arith.constant 7 : i32
    %260 = arith.subi %c7_i32_141, %c7_i32_139 : i32
    %261 = arith.muli %arg0, %260 : i32
    %262 = arith.addi %259, %261 : i32
    %c8_i32_142 = arith.constant 8 : i32
    %263 = arith.muli %262, %c8_i32_142 : i32
    %264 = tpu.assume_multiple %263, 8 : i32
    %265 = arith.index_cast %264 : i32 to index
    %c0_143 = arith.constant 0 : index
    %266 = vector.load %arg6[%265, %c0_143] : memref<64x512xf32, #tpu.memory_space<vmem>>, vector<8x512xf32>
    %c0_144 = arith.constant 0 : index
    %c0_145 = arith.constant 0 : index
    %267 = vector.load %arg7[%c0_144, %c0_145] : memref<8x128xf32, #tpu.memory_space<vmem>>, vector<8x128xf32>
    %c0_146 = arith.constant 0 : index
    %c0_147 = arith.constant 0 : index
    %c0_148 = arith.constant 0 : index
    %268 = vector.load %arg3[%c0_146, %c0_147, %c0_148] : memref<1x128x512xf32, #tpu.memory_space<vmem>>, vector<1x128x512xf32>
    %269 = vector.shape_cast %268 : vector<1x128x512xf32> to vector<128x512xf32>
    %cst_149 = arith.constant dense<0.000000e+00> : vector<8x512xf32>
    %270 = tpu.matmul %267, %269, %cst_149 {dimension_numbers = #tpu.dot_dimension_numbers<[1], [0], [0], [1], [0, 0, 1, 1], [], []>} : vector<8x128xf32>, vector<128x512xf32>, vector<8x512xf32> -> vector<8x512xf32>
    %271 = arith.addf %266, %270 : vector<8x512xf32>
    %272 = vector.extract_strided_slice %271 {offsets = [0, 0], sizes = [8, 384], strides = [1, 1]} : vector<8x512xf32> to vector<8x384xf32>
    %273 = arith.negf %272 : vector<8x384xf32>
    %274 = math.exp %273 : vector<8x384xf32>
    %cst_150 = arith.constant 1.000000e+00 : f32
    %275 = vector.broadcast %cst_150 : f32 to vector<8x384xf32>
    %276 = arith.addf %275, %274 : vector<8x384xf32>
    %277 = arith.divf %275, %276 : vector<8x384xf32>
    %278 = vector.extract_strided_slice %271 {offsets = [0, 384], sizes = [8, 128], strides = [1, 1]} : vector<8x512xf32> to vector<8x128xf32>
    %279 = math.tanh %278 : vector<8x128xf32>
    %280 = vector.extract_strided_slice %277 {offsets = [0, 128], sizes = [8, 128], strides = [1, 1]} : vector<8x384xf32> to vector<8x128xf32>
    %c0_151 = arith.constant 0 : index
    %c0_152 = arith.constant 0 : index
    %281 = vector.load %arg8[%c0_151, %c0_152] : memref<8x128xf32, #tpu.memory_space<vmem>>, vector<8x128xf32>
    %282 = arith.mulf %280, %281 : vector<8x128xf32>
    %283 = vector.extract_strided_slice %277 {offsets = [0, 0], sizes = [8, 128], strides = [1, 1]} : vector<8x384xf32> to vector<8x128xf32>
    %284 = arith.mulf %283, %279 : vector<8x128xf32>
    %285 = arith.addf %282, %284 : vector<8x128xf32>
    %286 = vector.extract_strided_slice %277 {offsets = [0, 256], sizes = [8, 128], strides = [1, 1]} : vector<8x384xf32> to vector<8x128xf32>
    %287 = math.tanh %285 : vector<8x128xf32>
    %288 = arith.mulf %286, %287 : vector<8x128xf32>
    %c0_153 = arith.constant 0 : index
    %c0_154 = arith.constant 0 : index
    %289 = vector.load %arg8[%c0_153, %c0_154] : memref<8x128xf32, #tpu.memory_space<vmem>>, vector<8x128xf32>
    tpu.vector_store %arg8[%c0_153, %c0_154], %285 {strides = array<i32>} : memref<8x128xf32, #tpu.memory_space<vmem>>, vector<8x128xf32>,
    %c0_155 = arith.constant 0 : index
    %c0_156 = arith.constant 0 : index
    %290 = vector.load %arg7[%c0_155, %c0_156] : memref<8x128xf32, #tpu.memory_space<vmem>>, vector<8x128xf32>
    tpu.vector_store %arg7[%c0_155, %c0_156], %288 {strides = array<i32>} : memref<8x128xf32, #tpu.memory_space<vmem>>, vector<8x128xf32>,
    %291 = arith.index_cast %264 : i32 to index
    %c0_157 = arith.constant 0 : index
    %292 = vector.load %arg5[%291, %c0_157] : memref<64x128xf32, #tpu.memory_space<vmem>>, vector<8x128xf32>
    tpu.vector_store %arg5[%291, %c0_157], %288 {strides = array<i32>} : memref<64x128xf32, #tpu.memory_space<vmem>>, vector<8x128xf32>,
    %c8_i32_158 = arith.constant 8 : i32
    return
  }
  func.func @transform_0(%arg0: i32) -> (i32, i32) {
    %c0_i32 = arith.constant 0 : i32
    %c0_i32_0 = arith.constant 0 : i32
    %c0_i32_1 = arith.constant 0 : i32
    return %c0_i32, %c0_i32_0 : i32, i32
  }
  func.func @transform_1(%arg0: i32) -> (i32, i32, i32) {
    %c0_i32 = arith.constant 0 : i32
    %c0_i32_0 = arith.constant 0 : i32
    %c0_i32_1 = arith.constant 0 : i32
    return %arg0, %c0_i32, %c0_i32_0 : i32, i32, i32
  }
  func.func @transform_2(%arg0: i32) -> (i32, i32, i32) {
    %c0_i32 = arith.constant 0 : i32
    %c0_i32_0 = arith.constant 0 : i32
    %c0_i32_1 = arith.constant 0 : i32
    return %arg0, %c0_i32, %c0_i32_0 : i32, i32, i32
  }
  func.func @transform_3(%arg0: i32) -> (i32, i32, i32) {
    %c0_i32 = arith.constant 0 : i32
    %c0_i32_0 = arith.constant 0 : i32
    %c0_i32_1 = arith.constant 0 : i32
    return %arg0, %c0_i32, %c0_i32_0 : i32, i32, i32
  }
  func.func @transform_4(%arg0: i32) -> (i32, i32) {
    %c0_i32 = arith.constant 0 : i32
    %c0_i32_0 = arith.constant 0 : i32
    return %c0_i32, %arg0 : i32, i32
  }
}

module attributes {stable_mosaic.version = 11 : i64} {
  func.func @_bilstm_kernel(%arg0: i32, %arg1: memref<64x256xf32, #tpu.memory_space<vmem>>, %arg2: memref<1x256x512xf32, #tpu.memory_space<vmem>>, %arg3: memref<1x128x512xf32, #tpu.memory_space<vmem>>, %arg4: memref<1x1x512xf32, #tpu.memory_space<vmem>>, %arg5: memref<64x128xf32, #tpu.memory_space<vmem>>, %arg6: memref<64x512xf32, #tpu.memory_space<vmem>>, %arg7: memref<8x128xf32, #tpu.memory_space<vmem>>, %arg8: memref<8x128xf32, #tpu.memory_space<vmem>>) attributes {dimension_semantics = [#tpu.dimension_semantics<parallel>], iteration_bounds = array<i64: 2>, scalar_prefetch = 0 : i64, scratch_operands = 3 : i64, tpu.core_type = #tpu.core_type<tc>, window_params = [{pipeline_mode = #tpu.pipeline_mode<synchronous>, transform_indices = @transform_0, window_bounds = array<i64: 64, 256>}, {transform_indices = @transform_1, window_bounds = array<i64: 1, 256, 512>}, {transform_indices = @transform_2, window_bounds = array<i64: 1, 128, 512>}, {transform_indices = @transform_3, window_bounds = array<i64: 1, 1, 512>}, {transform_indices = @transform_4, window_bounds = array<i64: 64, 128>}]} {
    %c0 = arith.constant 0 : index
    %c0_0 = arith.constant 0 : index
    %0 = vector.load %arg1[%c0, %c0_0] : memref<64x256xf32, #tpu.memory_space<vmem>>, vector<64x256xf32>
    %c0_1 = arith.constant 0 : index
    %c0_2 = arith.constant 0 : index
    %c0_3 = arith.constant 0 : index
    %1 = vector.load %arg2[%c0_1, %c0_2, %c0_3] : memref<1x256x512xf32, #tpu.memory_space<vmem>>, vector<1x256x512xf32>
    %2 = vector.shape_cast %1 : vector<1x256x512xf32> to vector<256x512xf32>
    %cst = arith.constant dense<0.000000e+00> : vector<64x512xf32>
    %3 = tpu.matmul %0, %2, %cst {dimension_numbers = #tpu.dot_dimension_numbers<[1], [0], [0], [1], [0, 0, 1, 1], [], []>} : vector<64x256xf32>, vector<256x512xf32>, vector<64x512xf32> -> vector<64x512xf32>
    %c0_4 = arith.constant 0 : index
    %c0_5 = arith.constant 0 : index
    %c0_6 = arith.constant 0 : index
    %4 = vector.load %arg4[%c0_4, %c0_5, %c0_6] : memref<1x1x512xf32, #tpu.memory_space<vmem>>, vector<1x1x512xf32>
    %5 = vector.shape_cast %4 : vector<1x1x512xf32> to vector<1x512xf32>
    %6 = vector.broadcast %5 : vector<1x512xf32> to vector<64x512xf32>
    %7 = arith.addf %3, %6 : vector<64x512xf32>
    %c0_7 = arith.constant 0 : index
    %c0_8 = arith.constant 0 : index
    %8 = vector.load %arg6[%c0_7, %c0_8] : memref<64x512xf32, #tpu.memory_space<vmem>>, vector<64x512xf32>
    tpu.vector_store %arg6[%c0_7, %c0_8], %7 {strides = array<i32>} : memref<64x512xf32, #tpu.memory_space<vmem>>, vector<64x512xf32>,
    %cst_9 = arith.constant 0.000000e+00 : f32
    %9 = vector.broadcast %cst_9 : f32 to vector<8x128xf32>
    %c0_10 = arith.constant 0 : index
    %c0_11 = arith.constant 0 : index
    %10 = vector.load %arg7[%c0_10, %c0_11] : memref<8x128xf32, #tpu.memory_space<vmem>>, vector<8x128xf32>
    tpu.vector_store %arg7[%c0_10, %c0_11], %9 {strides = array<i32>} : memref<8x128xf32, #tpu.memory_space<vmem>>, vector<8x128xf32>,
    %cst_12 = arith.constant 0.000000e+00 : f32
    %11 = vector.broadcast %cst_12 : f32 to vector<8x128xf32>
    %c0_13 = arith.constant 0 : index
    %c0_14 = arith.constant 0 : index
    %12 = vector.load %arg8[%c0_13, %c0_14] : memref<8x128xf32, #tpu.memory_space<vmem>>, vector<8x128xf32>
    tpu.vector_store %arg8[%c0_13, %c0_14], %11 {strides = array<i32>} : memref<8x128xf32, #tpu.memory_space<vmem>>, vector<8x128xf32>,
    %c0_i32 = arith.constant 0 : i32
    %c1_i32 = arith.constant 1 : i32
    %13 = arith.subi %c1_i32, %arg0 : i32
    %14 = arith.muli %13, %c0_i32 : i32
    %c7_i32 = arith.constant 7 : i32
    %15 = arith.subi %c7_i32, %c0_i32 : i32
    %16 = arith.muli %arg0, %15 : i32
    %17 = arith.addi %14, %16 : i32
    %c8_i32 = arith.constant 8 : i32
    %18 = arith.muli %17, %c8_i32 : i32
    %19 = tpu.assume_multiple %18, 8 : i32
    %20 = arith.index_cast %19 : i32 to index
    %c0_15 = arith.constant 0 : index
    %21 = vector.load %arg6[%20, %c0_15] : memref<64x512xf32, #tpu.memory_space<vmem>>, vector<8x512xf32>
    %c0_16 = arith.constant 0 : index
    %c0_17 = arith.constant 0 : index
    %22 = vector.load %arg7[%c0_16, %c0_17] : memref<8x128xf32, #tpu.memory_space<vmem>>, vector<8x128xf32>
    %c0_18 = arith.constant 0 : index
    %c0_19 = arith.constant 0 : index
    %c0_20 = arith.constant 0 : index
    %23 = vector.load %arg3[%c0_18, %c0_19, %c0_20] : memref<1x128x512xf32, #tpu.memory_space<vmem>>, vector<1x128x512xf32>
    %24 = vector.shape_cast %23 : vector<1x128x512xf32> to vector<128x512xf32>
    %cst_21 = arith.constant dense<0.000000e+00> : vector<8x512xf32>
    %25 = tpu.matmul %22, %24, %cst_21 {dimension_numbers = #tpu.dot_dimension_numbers<[1], [0], [0], [1], [0, 0, 1, 1], [], []>} : vector<8x128xf32>, vector<128x512xf32>, vector<8x512xf32> -> vector<8x512xf32>
    %26 = arith.addf %21, %25 : vector<8x512xf32>
    %27 = vector.extract_strided_slice %26 {offsets = [0, 0], sizes = [8, 384], strides = [1, 1]} : vector<8x512xf32> to vector<8x384xf32>
    %28 = arith.negf %27 : vector<8x384xf32>
    %29 = math.exp %28 : vector<8x384xf32>
    %cst_22 = arith.constant 1.000000e+00 : f32
    %30 = vector.broadcast %cst_22 : f32 to vector<8x384xf32>
    %31 = arith.addf %30, %29 : vector<8x384xf32>
    %32 = arith.divf %30, %31 : vector<8x384xf32>
    %33 = vector.extract_strided_slice %26 {offsets = [0, 384], sizes = [8, 128], strides = [1, 1]} : vector<8x512xf32> to vector<8x128xf32>
    %34 = math.tanh %33 : vector<8x128xf32>
    %35 = vector.extract_strided_slice %32 {offsets = [0, 128], sizes = [8, 128], strides = [1, 1]} : vector<8x384xf32> to vector<8x128xf32>
    %c0_23 = arith.constant 0 : index
    %c0_24 = arith.constant 0 : index
    %36 = vector.load %arg8[%c0_23, %c0_24] : memref<8x128xf32, #tpu.memory_space<vmem>>, vector<8x128xf32>
    %37 = arith.mulf %35, %36 : vector<8x128xf32>
    %38 = vector.extract_strided_slice %32 {offsets = [0, 0], sizes = [8, 128], strides = [1, 1]} : vector<8x384xf32> to vector<8x128xf32>
    %39 = arith.mulf %38, %34 : vector<8x128xf32>
    %40 = arith.addf %37, %39 : vector<8x128xf32>
    %41 = vector.extract_strided_slice %32 {offsets = [0, 256], sizes = [8, 128], strides = [1, 1]} : vector<8x384xf32> to vector<8x128xf32>
    %42 = math.tanh %40 : vector<8x128xf32>
    %43 = arith.mulf %41, %42 : vector<8x128xf32>
    %c0_25 = arith.constant 0 : index
    %c0_26 = arith.constant 0 : index
    %44 = vector.load %arg8[%c0_25, %c0_26] : memref<8x128xf32, #tpu.memory_space<vmem>>, vector<8x128xf32>
    tpu.vector_store %arg8[%c0_25, %c0_26], %40 {strides = array<i32>} : memref<8x128xf32, #tpu.memory_space<vmem>>, vector<8x128xf32>,
    %c0_27 = arith.constant 0 : index
    %c0_28 = arith.constant 0 : index
    %45 = vector.load %arg7[%c0_27, %c0_28] : memref<8x128xf32, #tpu.memory_space<vmem>>, vector<8x128xf32>
    tpu.vector_store %arg7[%c0_27, %c0_28], %43 {strides = array<i32>} : memref<8x128xf32, #tpu.memory_space<vmem>>, vector<8x128xf32>,
    %46 = arith.index_cast %19 : i32 to index
    %c0_29 = arith.constant 0 : index
    %47 = vector.load %arg5[%46, %c0_29] : memref<64x128xf32, #tpu.memory_space<vmem>>, vector<8x128xf32>
    tpu.vector_store %arg5[%46, %c0_29], %43 {strides = array<i32>} : memref<64x128xf32, #tpu.memory_space<vmem>>, vector<8x128xf32>,
    %c1_i32_30 = arith.constant 1 : i32
    %c1_i32_31 = arith.constant 1 : i32
    %48 = arith.subi %c1_i32_31, %arg0 : i32
    %49 = arith.muli %48, %c1_i32_30 : i32
    %c7_i32_32 = arith.constant 7 : i32
    %50 = arith.subi %c7_i32_32, %c1_i32_30 : i32
    %51 = arith.muli %arg0, %50 : i32
    %52 = arith.addi %49, %51 : i32
    %c8_i32_33 = arith.constant 8 : i32
    %53 = arith.muli %52, %c8_i32_33 : i32
    %54 = tpu.assume_multiple %53, 8 : i32
    %55 = arith.index_cast %54 : i32 to index
    %c0_34 = arith.constant 0 : index
    %56 = vector.load %arg6[%55, %c0_34] : memref<64x512xf32, #tpu.memory_space<vmem>>, vector<8x512xf32>
    %c0_35 = arith.constant 0 : index
    %c0_36 = arith.constant 0 : index
    %57 = vector.load %arg7[%c0_35, %c0_36] : memref<8x128xf32, #tpu.memory_space<vmem>>, vector<8x128xf32>
    %c0_37 = arith.constant 0 : index
    %c0_38 = arith.constant 0 : index
    %c0_39 = arith.constant 0 : index
    %58 = vector.load %arg3[%c0_37, %c0_38, %c0_39] : memref<1x128x512xf32, #tpu.memory_space<vmem>>, vector<1x128x512xf32>
    %59 = vector.shape_cast %58 : vector<1x128x512xf32> to vector<128x512xf32>
    %cst_40 = arith.constant dense<0.000000e+00> : vector<8x512xf32>
    %60 = tpu.matmul %57, %59, %cst_40 {dimension_numbers = #tpu.dot_dimension_numbers<[1], [0], [0], [1], [0, 0, 1, 1], [], []>} : vector<8x128xf32>, vector<128x512xf32>, vector<8x512xf32> -> vector<8x512xf32>
    %61 = arith.addf %56, %60 : vector<8x512xf32>
    %62 = vector.extract_strided_slice %61 {offsets = [0, 0], sizes = [8, 384], strides = [1, 1]} : vector<8x512xf32> to vector<8x384xf32>
    %63 = arith.negf %62 : vector<8x384xf32>
    %64 = math.exp %63 : vector<8x384xf32>
    %cst_41 = arith.constant 1.000000e+00 : f32
    %65 = vector.broadcast %cst_41 : f32 to vector<8x384xf32>
    %66 = arith.addf %65, %64 : vector<8x384xf32>
    %67 = arith.divf %65, %66 : vector<8x384xf32>
    %68 = vector.extract_strided_slice %61 {offsets = [0, 384], sizes = [8, 128], strides = [1, 1]} : vector<8x512xf32> to vector<8x128xf32>
    %69 = math.tanh %68 : vector<8x128xf32>
    %70 = vector.extract_strided_slice %67 {offsets = [0, 128], sizes = [8, 128], strides = [1, 1]} : vector<8x384xf32> to vector<8x128xf32>
    %c0_42 = arith.constant 0 : index
    %c0_43 = arith.constant 0 : index
    %71 = vector.load %arg8[%c0_42, %c0_43] : memref<8x128xf32, #tpu.memory_space<vmem>>, vector<8x128xf32>
    %72 = arith.mulf %70, %71 : vector<8x128xf32>
    %73 = vector.extract_strided_slice %67 {offsets = [0, 0], sizes = [8, 128], strides = [1, 1]} : vector<8x384xf32> to vector<8x128xf32>
    %74 = arith.mulf %73, %69 : vector<8x128xf32>
    %75 = arith.addf %72, %74 : vector<8x128xf32>
    %76 = vector.extract_strided_slice %67 {offsets = [0, 256], sizes = [8, 128], strides = [1, 1]} : vector<8x384xf32> to vector<8x128xf32>
    %77 = math.tanh %75 : vector<8x128xf32>
    %78 = arith.mulf %76, %77 : vector<8x128xf32>
    %c0_44 = arith.constant 0 : index
    %c0_45 = arith.constant 0 : index
    %79 = vector.load %arg8[%c0_44, %c0_45] : memref<8x128xf32, #tpu.memory_space<vmem>>, vector<8x128xf32>
    tpu.vector_store %arg8[%c0_44, %c0_45], %75 {strides = array<i32>} : memref<8x128xf32, #tpu.memory_space<vmem>>, vector<8x128xf32>,
    %c0_46 = arith.constant 0 : index
    %c0_47 = arith.constant 0 : index
    %80 = vector.load %arg7[%c0_46, %c0_47] : memref<8x128xf32, #tpu.memory_space<vmem>>, vector<8x128xf32>
    tpu.vector_store %arg7[%c0_46, %c0_47], %78 {strides = array<i32>} : memref<8x128xf32, #tpu.memory_space<vmem>>, vector<8x128xf32>,
    %81 = arith.index_cast %54 : i32 to index
    %c0_48 = arith.constant 0 : index
    %82 = vector.load %arg5[%81, %c0_48] : memref<64x128xf32, #tpu.memory_space<vmem>>, vector<8x128xf32>
    tpu.vector_store %arg5[%81, %c0_48], %78 {strides = array<i32>} : memref<64x128xf32, #tpu.memory_space<vmem>>, vector<8x128xf32>,
    %c2_i32 = arith.constant 2 : i32
    %c1_i32_49 = arith.constant 1 : i32
    %83 = arith.subi %c1_i32_49, %arg0 : i32
    %84 = arith.muli %83, %c2_i32 : i32
    %c7_i32_50 = arith.constant 7 : i32
    %85 = arith.subi %c7_i32_50, %c2_i32 : i32
    %86 = arith.muli %arg0, %85 : i32
    %87 = arith.addi %84, %86 : i32
    %c8_i32_51 = arith.constant 8 : i32
    %88 = arith.muli %87, %c8_i32_51 : i32
    %89 = tpu.assume_multiple %88, 8 : i32
    %90 = arith.index_cast %89 : i32 to index
    %c0_52 = arith.constant 0 : index
    %91 = vector.load %arg6[%90, %c0_52] : memref<64x512xf32, #tpu.memory_space<vmem>>, vector<8x512xf32>
    %c0_53 = arith.constant 0 : index
    %c0_54 = arith.constant 0 : index
    %92 = vector.load %arg7[%c0_53, %c0_54] : memref<8x128xf32, #tpu.memory_space<vmem>>, vector<8x128xf32>
    %c0_55 = arith.constant 0 : index
    %c0_56 = arith.constant 0 : index
    %c0_57 = arith.constant 0 : index
    %93 = vector.load %arg3[%c0_55, %c0_56, %c0_57] : memref<1x128x512xf32, #tpu.memory_space<vmem>>, vector<1x128x512xf32>
    %94 = vector.shape_cast %93 : vector<1x128x512xf32> to vector<128x512xf32>
    %cst_58 = arith.constant dense<0.000000e+00> : vector<8x512xf32>
    %95 = tpu.matmul %92, %94, %cst_58 {dimension_numbers = #tpu.dot_dimension_numbers<[1], [0], [0], [1], [0, 0, 1, 1], [], []>} : vector<8x128xf32>, vector<128x512xf32>, vector<8x512xf32> -> vector<8x512xf32>
    %96 = arith.addf %91, %95 : vector<8x512xf32>
    %97 = vector.extract_strided_slice %96 {offsets = [0, 0], sizes = [8, 384], strides = [1, 1]} : vector<8x512xf32> to vector<8x384xf32>
    %98 = arith.negf %97 : vector<8x384xf32>
    %99 = math.exp %98 : vector<8x384xf32>
    %cst_59 = arith.constant 1.000000e+00 : f32
    %100 = vector.broadcast %cst_59 : f32 to vector<8x384xf32>
    %101 = arith.addf %100, %99 : vector<8x384xf32>
    %102 = arith.divf %100, %101 : vector<8x384xf32>
    %103 = vector.extract_strided_slice %96 {offsets = [0, 384], sizes = [8, 128], strides = [1, 1]} : vector<8x512xf32> to vector<8x128xf32>
    %104 = math.tanh %103 : vector<8x128xf32>
    %105 = vector.extract_strided_slice %102 {offsets = [0, 128], sizes = [8, 128], strides = [1, 1]} : vector<8x384xf32> to vector<8x128xf32>
    %c0_60 = arith.constant 0 : index
    %c0_61 = arith.constant 0 : index
    %106 = vector.load %arg8[%c0_60, %c0_61] : memref<8x128xf32, #tpu.memory_space<vmem>>, vector<8x128xf32>
    %107 = arith.mulf %105, %106 : vector<8x128xf32>
    %108 = vector.extract_strided_slice %102 {offsets = [0, 0], sizes = [8, 128], strides = [1, 1]} : vector<8x384xf32> to vector<8x128xf32>
    %109 = arith.mulf %108, %104 : vector<8x128xf32>
    %110 = arith.addf %107, %109 : vector<8x128xf32>
    %111 = vector.extract_strided_slice %102 {offsets = [0, 256], sizes = [8, 128], strides = [1, 1]} : vector<8x384xf32> to vector<8x128xf32>
    %112 = math.tanh %110 : vector<8x128xf32>
    %113 = arith.mulf %111, %112 : vector<8x128xf32>
    %c0_62 = arith.constant 0 : index
    %c0_63 = arith.constant 0 : index
    %114 = vector.load %arg8[%c0_62, %c0_63] : memref<8x128xf32, #tpu.memory_space<vmem>>, vector<8x128xf32>
    tpu.vector_store %arg8[%c0_62, %c0_63], %110 {strides = array<i32>} : memref<8x128xf32, #tpu.memory_space<vmem>>, vector<8x128xf32>,
    %c0_64 = arith.constant 0 : index
    %c0_65 = arith.constant 0 : index
    %115 = vector.load %arg7[%c0_64, %c0_65] : memref<8x128xf32, #tpu.memory_space<vmem>>, vector<8x128xf32>
    tpu.vector_store %arg7[%c0_64, %c0_65], %113 {strides = array<i32>} : memref<8x128xf32, #tpu.memory_space<vmem>>, vector<8x128xf32>,
    %116 = arith.index_cast %89 : i32 to index
    %c0_66 = arith.constant 0 : index
    %117 = vector.load %arg5[%116, %c0_66] : memref<64x128xf32, #tpu.memory_space<vmem>>, vector<8x128xf32>
    tpu.vector_store %arg5[%116, %c0_66], %113 {strides = array<i32>} : memref<64x128xf32, #tpu.memory_space<vmem>>, vector<8x128xf32>,
    %c3_i32 = arith.constant 3 : i32
    %c1_i32_67 = arith.constant 1 : i32
    %118 = arith.subi %c1_i32_67, %arg0 : i32
    %119 = arith.muli %118, %c3_i32 : i32
    %c7_i32_68 = arith.constant 7 : i32
    %120 = arith.subi %c7_i32_68, %c3_i32 : i32
    %121 = arith.muli %arg0, %120 : i32
    %122 = arith.addi %119, %121 : i32
    %c8_i32_69 = arith.constant 8 : i32
    %123 = arith.muli %122, %c8_i32_69 : i32
    %124 = tpu.assume_multiple %123, 8 : i32
    %125 = arith.index_cast %124 : i32 to index
    %c0_70 = arith.constant 0 : index
    %126 = vector.load %arg6[%125, %c0_70] : memref<64x512xf32, #tpu.memory_space<vmem>>, vector<8x512xf32>
    %c0_71 = arith.constant 0 : index
    %c0_72 = arith.constant 0 : index
    %127 = vector.load %arg7[%c0_71, %c0_72] : memref<8x128xf32, #tpu.memory_space<vmem>>, vector<8x128xf32>
    %c0_73 = arith.constant 0 : index
    %c0_74 = arith.constant 0 : index
    %c0_75 = arith.constant 0 : index
    %128 = vector.load %arg3[%c0_73, %c0_74, %c0_75] : memref<1x128x512xf32, #tpu.memory_space<vmem>>, vector<1x128x512xf32>
    %129 = vector.shape_cast %128 : vector<1x128x512xf32> to vector<128x512xf32>
    %cst_76 = arith.constant dense<0.000000e+00> : vector<8x512xf32>
    %130 = tpu.matmul %127, %129, %cst_76 {dimension_numbers = #tpu.dot_dimension_numbers<[1], [0], [0], [1], [0, 0, 1, 1], [], []>} : vector<8x128xf32>, vector<128x512xf32>, vector<8x512xf32> -> vector<8x512xf32>
    %131 = arith.addf %126, %130 : vector<8x512xf32>
    %132 = vector.extract_strided_slice %131 {offsets = [0, 0], sizes = [8, 384], strides = [1, 1]} : vector<8x512xf32> to vector<8x384xf32>
    %133 = arith.negf %132 : vector<8x384xf32>
    %134 = math.exp %133 : vector<8x384xf32>
    %cst_77 = arith.constant 1.000000e+00 : f32
    %135 = vector.broadcast %cst_77 : f32 to vector<8x384xf32>
    %136 = arith.addf %135, %134 : vector<8x384xf32>
    %137 = arith.divf %135, %136 : vector<8x384xf32>
    %138 = vector.extract_strided_slice %131 {offsets = [0, 384], sizes = [8, 128], strides = [1, 1]} : vector<8x512xf32> to vector<8x128xf32>
    %139 = math.tanh %138 : vector<8x128xf32>
    %140 = vector.extract_strided_slice %137 {offsets = [0, 128], sizes = [8, 128], strides = [1, 1]} : vector<8x384xf32> to vector<8x128xf32>
    %c0_78 = arith.constant 0 : index
    %c0_79 = arith.constant 0 : index
    %141 = vector.load %arg8[%c0_78, %c0_79] : memref<8x128xf32, #tpu.memory_space<vmem>>, vector<8x128xf32>
    %142 = arith.mulf %140, %141 : vector<8x128xf32>
    %143 = vector.extract_strided_slice %137 {offsets = [0, 0], sizes = [8, 128], strides = [1, 1]} : vector<8x384xf32> to vector<8x128xf32>
    %144 = arith.mulf %143, %139 : vector<8x128xf32>
    %145 = arith.addf %142, %144 : vector<8x128xf32>
    %146 = vector.extract_strided_slice %137 {offsets = [0, 256], sizes = [8, 128], strides = [1, 1]} : vector<8x384xf32> to vector<8x128xf32>
    %147 = math.tanh %145 : vector<8x128xf32>
    %148 = arith.mulf %146, %147 : vector<8x128xf32>
    %c0_80 = arith.constant 0 : index
    %c0_81 = arith.constant 0 : index
    %149 = vector.load %arg8[%c0_80, %c0_81] : memref<8x128xf32, #tpu.memory_space<vmem>>, vector<8x128xf32>
    tpu.vector_store %arg8[%c0_80, %c0_81], %145 {strides = array<i32>} : memref<8x128xf32, #tpu.memory_space<vmem>>, vector<8x128xf32>,
    %c0_82 = arith.constant 0 : index
    %c0_83 = arith.constant 0 : index
    %150 = vector.load %arg7[%c0_82, %c0_83] : memref<8x128xf32, #tpu.memory_space<vmem>>, vector<8x128xf32>
    tpu.vector_store %arg7[%c0_82, %c0_83], %148 {strides = array<i32>} : memref<8x128xf32, #tpu.memory_space<vmem>>, vector<8x128xf32>,
    %151 = arith.index_cast %124 : i32 to index
    %c0_84 = arith.constant 0 : index
    %152 = vector.load %arg5[%151, %c0_84] : memref<64x128xf32, #tpu.memory_space<vmem>>, vector<8x128xf32>
    tpu.vector_store %arg5[%151, %c0_84], %148 {strides = array<i32>} : memref<64x128xf32, #tpu.memory_space<vmem>>, vector<8x128xf32>,
    %c4_i32 = arith.constant 4 : i32
    %c1_i32_85 = arith.constant 1 : i32
    %153 = arith.subi %c1_i32_85, %arg0 : i32
    %154 = arith.muli %153, %c4_i32 : i32
    %c7_i32_86 = arith.constant 7 : i32
    %155 = arith.subi %c7_i32_86, %c4_i32 : i32
    %156 = arith.muli %arg0, %155 : i32
    %157 = arith.addi %154, %156 : i32
    %c8_i32_87 = arith.constant 8 : i32
    %158 = arith.muli %157, %c8_i32_87 : i32
    %159 = tpu.assume_multiple %158, 8 : i32
    %160 = arith.index_cast %159 : i32 to index
    %c0_88 = arith.constant 0 : index
    %161 = vector.load %arg6[%160, %c0_88] : memref<64x512xf32, #tpu.memory_space<vmem>>, vector<8x512xf32>
    %c0_89 = arith.constant 0 : index
    %c0_90 = arith.constant 0 : index
    %162 = vector.load %arg7[%c0_89, %c0_90] : memref<8x128xf32, #tpu.memory_space<vmem>>, vector<8x128xf32>
    %c0_91 = arith.constant 0 : index
    %c0_92 = arith.constant 0 : index
    %c0_93 = arith.constant 0 : index
    %163 = vector.load %arg3[%c0_91, %c0_92, %c0_93] : memref<1x128x512xf32, #tpu.memory_space<vmem>>, vector<1x128x512xf32>
    %164 = vector.shape_cast %163 : vector<1x128x512xf32> to vector<128x512xf32>
    %cst_94 = arith.constant dense<0.000000e+00> : vector<8x512xf32>
    %165 = tpu.matmul %162, %164, %cst_94 {dimension_numbers = #tpu.dot_dimension_numbers<[1], [0], [0], [1], [0, 0, 1, 1], [], []>} : vector<8x128xf32>, vector<128x512xf32>, vector<8x512xf32> -> vector<8x512xf32>
    %166 = arith.addf %161, %165 : vector<8x512xf32>
    %167 = vector.extract_strided_slice %166 {offsets = [0, 0], sizes = [8, 384], strides = [1, 1]} : vector<8x512xf32> to vector<8x384xf32>
    %168 = arith.negf %167 : vector<8x384xf32>
    %169 = math.exp %168 : vector<8x384xf32>
    %cst_95 = arith.constant 1.000000e+00 : f32
    %170 = vector.broadcast %cst_95 : f32 to vector<8x384xf32>
    %171 = arith.addf %170, %169 : vector<8x384xf32>
    %172 = arith.divf %170, %171 : vector<8x384xf32>
    %173 = vector.extract_strided_slice %166 {offsets = [0, 384], sizes = [8, 128], strides = [1, 1]} : vector<8x512xf32> to vector<8x128xf32>
    %174 = math.tanh %173 : vector<8x128xf32>
    %175 = vector.extract_strided_slice %172 {offsets = [0, 128], sizes = [8, 128], strides = [1, 1]} : vector<8x384xf32> to vector<8x128xf32>
    %c0_96 = arith.constant 0 : index
    %c0_97 = arith.constant 0 : index
    %176 = vector.load %arg8[%c0_96, %c0_97] : memref<8x128xf32, #tpu.memory_space<vmem>>, vector<8x128xf32>
    %177 = arith.mulf %175, %176 : vector<8x128xf32>
    %178 = vector.extract_strided_slice %172 {offsets = [0, 0], sizes = [8, 128], strides = [1, 1]} : vector<8x384xf32> to vector<8x128xf32>
    %179 = arith.mulf %178, %174 : vector<8x128xf32>
    %180 = arith.addf %177, %179 : vector<8x128xf32>
    %181 = vector.extract_strided_slice %172 {offsets = [0, 256], sizes = [8, 128], strides = [1, 1]} : vector<8x384xf32> to vector<8x128xf32>
    %182 = math.tanh %180 : vector<8x128xf32>
    %183 = arith.mulf %181, %182 : vector<8x128xf32>
    %c0_98 = arith.constant 0 : index
    %c0_99 = arith.constant 0 : index
    %184 = vector.load %arg8[%c0_98, %c0_99] : memref<8x128xf32, #tpu.memory_space<vmem>>, vector<8x128xf32>
    tpu.vector_store %arg8[%c0_98, %c0_99], %180 {strides = array<i32>} : memref<8x128xf32, #tpu.memory_space<vmem>>, vector<8x128xf32>,
    %c0_100 = arith.constant 0 : index
    %c0_101 = arith.constant 0 : index
    %185 = vector.load %arg7[%c0_100, %c0_101] : memref<8x128xf32, #tpu.memory_space<vmem>>, vector<8x128xf32>
    tpu.vector_store %arg7[%c0_100, %c0_101], %183 {strides = array<i32>} : memref<8x128xf32, #tpu.memory_space<vmem>>, vector<8x128xf32>,
    %186 = arith.index_cast %159 : i32 to index
    %c0_102 = arith.constant 0 : index
    %187 = vector.load %arg5[%186, %c0_102] : memref<64x128xf32, #tpu.memory_space<vmem>>, vector<8x128xf32>
    tpu.vector_store %arg5[%186, %c0_102], %183 {strides = array<i32>} : memref<64x128xf32, #tpu.memory_space<vmem>>, vector<8x128xf32>,
    %c5_i32 = arith.constant 5 : i32
    %c1_i32_103 = arith.constant 1 : i32
    %188 = arith.subi %c1_i32_103, %arg0 : i32
    %189 = arith.muli %188, %c5_i32 : i32
    %c7_i32_104 = arith.constant 7 : i32
    %190 = arith.subi %c7_i32_104, %c5_i32 : i32
    %191 = arith.muli %arg0, %190 : i32
    %192 = arith.addi %189, %191 : i32
    %c8_i32_105 = arith.constant 8 : i32
    %193 = arith.muli %192, %c8_i32_105 : i32
    %194 = tpu.assume_multiple %193, 8 : i32
    %195 = arith.index_cast %194 : i32 to index
    %c0_106 = arith.constant 0 : index
    %196 = vector.load %arg6[%195, %c0_106] : memref<64x512xf32, #tpu.memory_space<vmem>>, vector<8x512xf32>
    %c0_107 = arith.constant 0 : index
    %c0_108 = arith.constant 0 : index
    %197 = vector.load %arg7[%c0_107, %c0_108] : memref<8x128xf32, #tpu.memory_space<vmem>>, vector<8x128xf32>
    %c0_109 = arith.constant 0 : index
    %c0_110 = arith.constant 0 : index
    %c0_111 = arith.constant 0 : index
    %198 = vector.load %arg3[%c0_109, %c0_110, %c0_111] : memref<1x128x512xf32, #tpu.memory_space<vmem>>, vector<1x128x512xf32>
    %199 = vector.shape_cast %198 : vector<1x128x512xf32> to vector<128x512xf32>
    %cst_112 = arith.constant dense<0.000000e+00> : vector<8x512xf32>
    %200 = tpu.matmul %197, %199, %cst_112 {dimension_numbers = #tpu.dot_dimension_numbers<[1], [0], [0], [1], [0, 0, 1, 1], [], []>} : vector<8x128xf32>, vector<128x512xf32>, vector<8x512xf32> -> vector<8x512xf32>
    %201 = arith.addf %196, %200 : vector<8x512xf32>
    %202 = vector.extract_strided_slice %201 {offsets = [0, 0], sizes = [8, 384], strides = [1, 1]} : vector<8x512xf32> to vector<8x384xf32>
    %203 = arith.negf %202 : vector<8x384xf32>
    %204 = math.exp %203 : vector<8x384xf32>
    %cst_113 = arith.constant 1.000000e+00 : f32
    %205 = vector.broadcast %cst_113 : f32 to vector<8x384xf32>
    %206 = arith.addf %205, %204 : vector<8x384xf32>
    %207 = arith.divf %205, %206 : vector<8x384xf32>
    %208 = vector.extract_strided_slice %201 {offsets = [0, 384], sizes = [8, 128], strides = [1, 1]} : vector<8x512xf32> to vector<8x128xf32>
    %209 = math.tanh %208 : vector<8x128xf32>
    %210 = vector.extract_strided_slice %207 {offsets = [0, 128], sizes = [8, 128], strides = [1, 1]} : vector<8x384xf32> to vector<8x128xf32>
    %c0_114 = arith.constant 0 : index
    %c0_115 = arith.constant 0 : index
    %211 = vector.load %arg8[%c0_114, %c0_115] : memref<8x128xf32, #tpu.memory_space<vmem>>, vector<8x128xf32>
    %212 = arith.mulf %210, %211 : vector<8x128xf32>
    %213 = vector.extract_strided_slice %207 {offsets = [0, 0], sizes = [8, 128], strides = [1, 1]} : vector<8x384xf32> to vector<8x128xf32>
    %214 = arith.mulf %213, %209 : vector<8x128xf32>
    %215 = arith.addf %212, %214 : vector<8x128xf32>
    %216 = vector.extract_strided_slice %207 {offsets = [0, 256], sizes = [8, 128], strides = [1, 1]} : vector<8x384xf32> to vector<8x128xf32>
    %217 = math.tanh %215 : vector<8x128xf32>
    %218 = arith.mulf %216, %217 : vector<8x128xf32>
    %c0_116 = arith.constant 0 : index
    %c0_117 = arith.constant 0 : index
    %219 = vector.load %arg8[%c0_116, %c0_117] : memref<8x128xf32, #tpu.memory_space<vmem>>, vector<8x128xf32>
    tpu.vector_store %arg8[%c0_116, %c0_117], %215 {strides = array<i32>} : memref<8x128xf32, #tpu.memory_space<vmem>>, vector<8x128xf32>,
    %c0_118 = arith.constant 0 : index
    %c0_119 = arith.constant 0 : index
    %220 = vector.load %arg7[%c0_118, %c0_119] : memref<8x128xf32, #tpu.memory_space<vmem>>, vector<8x128xf32>
    tpu.vector_store %arg7[%c0_118, %c0_119], %218 {strides = array<i32>} : memref<8x128xf32, #tpu.memory_space<vmem>>, vector<8x128xf32>,
    %221 = arith.index_cast %194 : i32 to index
    %c0_120 = arith.constant 0 : index
    %222 = vector.load %arg5[%221, %c0_120] : memref<64x128xf32, #tpu.memory_space<vmem>>, vector<8x128xf32>
    tpu.vector_store %arg5[%221, %c0_120], %218 {strides = array<i32>} : memref<64x128xf32, #tpu.memory_space<vmem>>, vector<8x128xf32>,
    %c6_i32 = arith.constant 6 : i32
    %c1_i32_121 = arith.constant 1 : i32
    %223 = arith.subi %c1_i32_121, %arg0 : i32
    %224 = arith.muli %223, %c6_i32 : i32
    %c7_i32_122 = arith.constant 7 : i32
    %225 = arith.subi %c7_i32_122, %c6_i32 : i32
    %226 = arith.muli %arg0, %225 : i32
    %227 = arith.addi %224, %226 : i32
    %c8_i32_123 = arith.constant 8 : i32
    %228 = arith.muli %227, %c8_i32_123 : i32
    %229 = tpu.assume_multiple %228, 8 : i32
    %230 = arith.index_cast %229 : i32 to index
    %c0_124 = arith.constant 0 : index
    %231 = vector.load %arg6[%230, %c0_124] : memref<64x512xf32, #tpu.memory_space<vmem>>, vector<8x512xf32>
    %c0_125 = arith.constant 0 : index
    %c0_126 = arith.constant 0 : index
    %232 = vector.load %arg7[%c0_125, %c0_126] : memref<8x128xf32, #tpu.memory_space<vmem>>, vector<8x128xf32>
    %c0_127 = arith.constant 0 : index
    %c0_128 = arith.constant 0 : index
    %c0_129 = arith.constant 0 : index
    %233 = vector.load %arg3[%c0_127, %c0_128, %c0_129] : memref<1x128x512xf32, #tpu.memory_space<vmem>>, vector<1x128x512xf32>
    %234 = vector.shape_cast %233 : vector<1x128x512xf32> to vector<128x512xf32>
    %cst_130 = arith.constant dense<0.000000e+00> : vector<8x512xf32>
    %235 = tpu.matmul %232, %234, %cst_130 {dimension_numbers = #tpu.dot_dimension_numbers<[1], [0], [0], [1], [0, 0, 1, 1], [], []>} : vector<8x128xf32>, vector<128x512xf32>, vector<8x512xf32> -> vector<8x512xf32>
    %236 = arith.addf %231, %235 : vector<8x512xf32>
    %237 = vector.extract_strided_slice %236 {offsets = [0, 0], sizes = [8, 384], strides = [1, 1]} : vector<8x512xf32> to vector<8x384xf32>
    %238 = arith.negf %237 : vector<8x384xf32>
    %239 = math.exp %238 : vector<8x384xf32>
    %cst_131 = arith.constant 1.000000e+00 : f32
    %240 = vector.broadcast %cst_131 : f32 to vector<8x384xf32>
    %241 = arith.addf %240, %239 : vector<8x384xf32>
    %242 = arith.divf %240, %241 : vector<8x384xf32>
    %243 = vector.extract_strided_slice %236 {offsets = [0, 384], sizes = [8, 128], strides = [1, 1]} : vector<8x512xf32> to vector<8x128xf32>
    %244 = math.tanh %243 : vector<8x128xf32>
    %245 = vector.extract_strided_slice %242 {offsets = [0, 128], sizes = [8, 128], strides = [1, 1]} : vector<8x384xf32> to vector<8x128xf32>
    %c0_132 = arith.constant 0 : index
    %c0_133 = arith.constant 0 : index
    %246 = vector.load %arg8[%c0_132, %c0_133] : memref<8x128xf32, #tpu.memory_space<vmem>>, vector<8x128xf32>
    %247 = arith.mulf %245, %246 : vector<8x128xf32>
    %248 = vector.extract_strided_slice %242 {offsets = [0, 0], sizes = [8, 128], strides = [1, 1]} : vector<8x384xf32> to vector<8x128xf32>
    %249 = arith.mulf %248, %244 : vector<8x128xf32>
    %250 = arith.addf %247, %249 : vector<8x128xf32>
    %251 = vector.extract_strided_slice %242 {offsets = [0, 256], sizes = [8, 128], strides = [1, 1]} : vector<8x384xf32> to vector<8x128xf32>
    %252 = math.tanh %250 : vector<8x128xf32>
    %253 = arith.mulf %251, %252 : vector<8x128xf32>
    %c0_134 = arith.constant 0 : index
    %c0_135 = arith.constant 0 : index
    %254 = vector.load %arg8[%c0_134, %c0_135] : memref<8x128xf32, #tpu.memory_space<vmem>>, vector<8x128xf32>
    tpu.vector_store %arg8[%c0_134, %c0_135], %250 {strides = array<i32>} : memref<8x128xf32, #tpu.memory_space<vmem>>, vector<8x128xf32>,
    %c0_136 = arith.constant 0 : index
    %c0_137 = arith.constant 0 : index
    %255 = vector.load %arg7[%c0_136, %c0_137] : memref<8x128xf32, #tpu.memory_space<vmem>>, vector<8x128xf32>
    tpu.vector_store %arg7[%c0_136, %c0_137], %253 {strides = array<i32>} : memref<8x128xf32, #tpu.memory_space<vmem>>, vector<8x128xf32>,
    %256 = arith.index_cast %229 : i32 to index
    %c0_138 = arith.constant 0 : index
    %257 = vector.load %arg5[%256, %c0_138] : memref<64x128xf32, #tpu.memory_space<vmem>>, vector<8x128xf32>
    tpu.vector_store %arg5[%256, %c0_138], %253 {strides = array<i32>} : memref<64x128xf32, #tpu.memory_space<vmem>>, vector<8x128xf32>,
    %c7_i32_139 = arith.constant 7 : i32
    %c1_i32_140 = arith.constant 1 : i32
    %258 = arith.subi %c1_i32_140, %arg0 : i32
    %259 = arith.muli %258, %c7_i32_139 : i32
    %c7_i32_141 = arith.constant 7 : i32
    %260 = arith.subi %c7_i32_141, %c7_i32_139 : i32
    %261 = arith.muli %arg0, %260 : i32
    %262 = arith.addi %259, %261 : i32
    %c8_i32_142 = arith.constant 8 : i32
    %263 = arith.muli %262, %c8_i32_142 : i32
    %264 = tpu.assume_multiple %263, 8 : i32
    %265 = arith.index_cast %264 : i32 to index
    %c0_143 = arith.constant 0 : index
    %266 = vector.load %arg6[%265, %c0_143] : memref<64x512xf32, #tpu.memory_space<vmem>>, vector<8x512xf32>
    %c0_144 = arith.constant 0 : index
    %c0_145 = arith.constant 0 : index
    %267 = vector.load %arg7[%c0_144, %c0_145] : memref<8x128xf32, #tpu.memory_space<vmem>>, vector<8x128xf32>
    %c0_146 = arith.constant 0 : index
    %c0_147 = arith.constant 0 : index
    %c0_148 = arith.constant 0 : index
    %268 = vector.load %arg3[%c0_146, %c0_147, %c0_148] : memref<1x128x512xf32, #tpu.memory_space<vmem>>, vector<1x128x512xf32>
    %269 = vector.shape_cast %268 : vector<1x128x512xf32> to vector<128x512xf32>
    %cst_149 = arith.constant dense<0.000000e+00> : vector<8x512xf32>
    %270 = tpu.matmul %267, %269, %cst_149 {dimension_numbers = #tpu.dot_dimension_numbers<[1], [0], [0], [1], [0, 0, 1, 1], [], []>} : vector<8x128xf32>, vector<128x512xf32>, vector<8x512xf32> -> vector<8x512xf32>
    %271 = arith.addf %266, %270 : vector<8x512xf32>
    %272 = vector.extract_strided_slice %271 {offsets = [0, 0], sizes = [8, 384], strides = [1, 1]} : vector<8x512xf32> to vector<8x384xf32>
    %273 = arith.negf %272 : vector<8x384xf32>
    %274 = math.exp %273 : vector<8x384xf32>
    %cst_150 = arith.constant 1.000000e+00 : f32
    %275 = vector.broadcast %cst_150 : f32 to vector<8x384xf32>
    %276 = arith.addf %275, %274 : vector<8x384xf32>
    %277 = arith.divf %275, %276 : vector<8x384xf32>
    %278 = vector.extract_strided_slice %271 {offsets = [0, 384], sizes = [8, 128], strides = [1, 1]} : vector<8x512xf32> to vector<8x128xf32>
    %279 = math.tanh %278 : vector<8x128xf32>
    %280 = vector.extract_strided_slice %277 {offsets = [0, 128], sizes = [8, 128], strides = [1, 1]} : vector<8x384xf32> to vector<8x128xf32>
    %c0_151 = arith.constant 0 : index
    %c0_152 = arith.constant 0 : index
    %281 = vector.load %arg8[%c0_151, %c0_152] : memref<8x128xf32, #tpu.memory_space<vmem>>, vector<8x128xf32>
    %282 = arith.mulf %280, %281 : vector<8x128xf32>
    %283 = vector.extract_strided_slice %277 {offsets = [0, 0], sizes = [8, 128], strides = [1, 1]} : vector<8x384xf32> to vector<8x128xf32>
    %284 = arith.mulf %283, %279 : vector<8x128xf32>
    %285 = arith.addf %282, %284 : vector<8x128xf32>
    %286 = vector.extract_strided_slice %277 {offsets = [0, 256], sizes = [8, 128], strides = [1, 1]} : vector<8x384xf32> to vector<8x128xf32>
    %287 = math.tanh %285 : vector<8x128xf32>
    %288 = arith.mulf %286, %287 : vector<8x128xf32>
    %c0_153 = arith.constant 0 : index
    %c0_154 = arith.constant 0 : index
    %289 = vector.load %arg8[%c0_153, %c0_154] : memref<8x128xf32, #tpu.memory_space<vmem>>, vector<8x128xf32>
    tpu.vector_store %arg8[%c0_153, %c0_154], %285 {strides = array<i32>} : memref<8x128xf32, #tpu.memory_space<vmem>>, vector<8x128xf32>,
    %c0_155 = arith.constant 0 : index
    %c0_156 = arith.constant 0 : index
    %290 = vector.load %arg7[%c0_155, %c0_156] : memref<8x128xf32, #tpu.memory_space<vmem>>, vector<8x128xf32>
    tpu.vector_store %arg7[%c0_155, %c0_156], %288 {strides = array<i32>} : memref<8x128xf32, #tpu.memory_space<vmem>>, vector<8x128xf32>,
    %291 = arith.index_cast %264 : i32 to index
    %c0_157 = arith.constant 0 : index
    %292 = vector.load %arg5[%291, %c0_157] : memref<64x128xf32, #tpu.memory_space<vmem>>, vector<8x128xf32>
    tpu.vector_store %arg5[%291, %c0_157], %288 {strides = array<i32>} : memref<64x128xf32, #tpu.memory_space<vmem>>, vector<8x128xf32>,
    %c8_i32_158 = arith.constant 8 : i32
    return
  }
  func.func @transform_0(%arg0: i32) -> (i32, i32) {
    %c0_i32 = arith.constant 0 : i32
    %c0_i32_0 = arith.constant 0 : i32
    %c0_i32_1 = arith.constant 0 : i32
    return %c0_i32, %c0_i32_0 : i32, i32
  }
  func.func @transform_1(%arg0: i32) -> (i32, i32, i32) {
    %c0_i32 = arith.constant 0 : i32
    %c0_i32_0 = arith.constant 0 : i32
    %c0_i32_1 = arith.constant 0 : i32
    return %arg0, %c0_i32, %c0_i32_0 : i32, i32, i32
  }
  func.func @transform_2(%arg0: i32) -> (i32, i32, i32) {
    %c0_i32 = arith.constant 0 : i32
    %c0_i32_0 = arith.constant 0 : i32
    %c0_i32_1 = arith.constant 0 : i32
    return %arg0, %c0_i32, %c0_i32_0 : i32, i32, i32
  }
  func.func @transform_3(%arg0: i32) -> (i32, i32, i32) {
    %c0_i32 = arith.constant 0 : i32
    %c0_i32_0 = arith.constant 0 : i32
    %c0_i32_1 = arith.constant 0 : i32
    return %arg0, %c0_i32, %c0_i32_0 : i32, i32, i32
  }
  func.func @transform_4(%arg0: i32) -> (i32, i32) {
    %c0_i32 = arith.constant 0 : i32
    %c0_i32_0 = arith.constant 0 : i32
    return %c0_i32, %arg0 : i32, i32
  }
}

module attributes {stable_mosaic.version = 11 : i64} {
  func.func @_head_decoder_kernel(%arg0: i32, %arg1: memref<64x256xf32, #tpu.memory_space<vmem>>, %arg2: memref<64x128xf32, #tpu.memory_space<vmem>>, %arg3: memref<256x128xf32, #tpu.memory_space<vmem>>, %arg4: memref<1x128xf32, #tpu.memory_space<vmem>>, %arg5: memref<128x128xf32, #tpu.memory_space<vmem>>, %arg6: memref<1x64x128xf32, #tpu.memory_space<vmem>>) attributes {dimension_semantics = [#tpu.dimension_semantics<parallel>], iteration_bounds = array<i64: 2>, scalar_prefetch = 0 : i64, scratch_operands = 0 : i64, tpu.core_type = #tpu.core_type<tc>, window_params = [{pipeline_mode = #tpu.pipeline_mode<synchronous>, transform_indices = @transform_0, window_bounds = array<i64: 64, 256>}, {pipeline_mode = #tpu.pipeline_mode<synchronous>, transform_indices = @transform_1, window_bounds = array<i64: 64, 128>}, {transform_indices = @transform_2, window_bounds = array<i64: 256, 128>}, {transform_indices = @transform_3, window_bounds = array<i64: 1, 128>}, {pipeline_mode = #tpu.pipeline_mode<synchronous>, transform_indices = @transform_4, window_bounds = array<i64: 128, 128>}, {transform_indices = @transform_5, window_bounds = array<i64: 1, 64, 128>}]} {
    %c0 = arith.constant 0 : index
    %c0_0 = arith.constant 0 : index
    %0 = vector.load %arg1[%c0, %c0_0] : memref<64x256xf32, #tpu.memory_space<vmem>>, vector<64x256xf32>
    %c0_1 = arith.constant 0 : index
    %c0_2 = arith.constant 0 : index
    %1 = vector.load %arg3[%c0_1, %c0_2] : memref<256x128xf32, #tpu.memory_space<vmem>>, vector<256x128xf32>
    %cst = arith.constant dense<0.000000e+00> : vector<64x128xf32>
    %2 = tpu.matmul %0, %1, %cst {dimension_numbers = #tpu.dot_dimension_numbers<[1], [0], [0], [1], [0, 0, 1, 1], [], []>} : vector<64x256xf32>, vector<256x128xf32>, vector<64x128xf32> -> vector<64x128xf32>
    %c0_3 = arith.constant 0 : index
    %c0_4 = arith.constant 0 : index
    %3 = vector.load %arg4[%c0_3, %c0_4] : memref<1x128xf32, #tpu.memory_space<vmem>>, vector<1x128xf32>
    %4 = vector.broadcast %3 : vector<1x128xf32> to vector<64x128xf32>
    %5 = arith.addf %2, %4 : vector<64x128xf32>
    %cst_5 = arith.constant dense<0xFF800000> : vector<64xf32>
    %6 = vector.multi_reduction <maximumf>, %5, %cst_5 [1] : vector<64x128xf32> to vector<64xf32>
    %7 = vector.shape_cast %6 : vector<64xf32> to vector<64x1xf32>
    %8 = vector.broadcast %7 : vector<64x1xf32> to vector<64x128xf32>
    %9 = arith.subf %5, %8 : vector<64x128xf32>
    %10 = math.exp %9 : vector<64x128xf32>
    %cst_6 = arith.constant dense<0.000000e+00> : vector<64xf32>
    %11 = vector.multi_reduction <add>, %10, %cst_6 [1] : vector<64x128xf32> to vector<64xf32>
    %12 = vector.shape_cast %11 : vector<64xf32> to vector<64x1xf32>
    %13 = vector.broadcast %12 : vector<64x1xf32> to vector<64x128xf32>
    %14 = arith.divf %10, %13 : vector<64x128xf32>
    %c0_7 = arith.constant 0 : index
    %c0_8 = arith.constant 0 : index
    %15 = vector.load %arg2[%c0_7, %c0_8] : memref<64x128xf32, #tpu.memory_space<vmem>>, vector<64x128xf32>
    %16 = arith.mulf %15, %14 : vector<64x128xf32>
    %c0_9 = arith.constant 0 : index
    %c0_10 = arith.constant 0 : index
    %17 = vector.load %arg5[%c0_9, %c0_10] : memref<128x128xf32, #tpu.memory_space<vmem>>, vector<128x128xf32>
    %cst_11 = arith.constant dense<0.000000e+00> : vector<64x128xf32>
    %18 = tpu.matmul %16, %17, %cst_11 {dimension_numbers = #tpu.dot_dimension_numbers<[1], [0], [0], [1], [0, 0, 1, 1], [], []>} : vector<64x128xf32>, vector<128x128xf32>, vector<64x128xf32> -> vector<64x128xf32>
    %c0_12 = arith.constant 0 : index
    %c0_13 = arith.constant 0 : index
    %c0_14 = arith.constant 0 : index
    %19 = vector.load %arg6[%c0_12, %c0_13, %c0_14] : memref<1x64x128xf32, #tpu.memory_space<vmem>>, vector<1x64x128xf32>
    %20 = vector.shape_cast %19 : vector<1x64x128xf32> to vector<64x128xf32>
    %21 = vector.shape_cast %18 : vector<64x128xf32> to vector<1x64x128xf32>
    tpu.vector_store %arg6[%c0_12, %c0_13, %c0_14], %21 {strides = array<i32>} : memref<1x64x128xf32, #tpu.memory_space<vmem>>, vector<1x64x128xf32>,
    return
  }
  func.func @transform_0(%arg0: i32) -> (i32, i32) {
    %c0_i32 = arith.constant 0 : i32
    %c0_i32_0 = arith.constant 0 : i32
    %c0_i32_1 = arith.constant 0 : i32
    return %c0_i32, %c0_i32_0 : i32, i32
  }
  func.func @transform_1(%arg0: i32) -> (i32, i32) {
    %c0_i32 = arith.constant 0 : i32
    %c0_i32_0 = arith.constant 0 : i32
    %c0_i32_1 = arith.constant 0 : i32
    return %c0_i32, %c0_i32_0 : i32, i32
  }
  func.func @transform_2(%arg0: i32) -> (i32, i32) {
    %c0_i32 = arith.constant 0 : i32
    %c0_i32_0 = arith.constant 0 : i32
    return %c0_i32, %arg0 : i32, i32
  }
  func.func @transform_3(%arg0: i32) -> (i32, i32) {
    %c0_i32 = arith.constant 0 : i32
    %c0_i32_0 = arith.constant 0 : i32
    return %c0_i32, %arg0 : i32, i32
  }
  func.func @transform_4(%arg0: i32) -> (i32, i32) {
    %c0_i32 = arith.constant 0 : i32
    %c0_i32_0 = arith.constant 0 : i32
    %c0_i32_1 = arith.constant 0 : i32
    return %c0_i32, %c0_i32_0 : i32, i32
  }
  func.func @transform_5(%arg0: i32) -> (i32, i32, i32) {
    %c0_i32 = arith.constant 0 : i32
    %c0_i32_0 = arith.constant 0 : i32
    %c0_i32_1 = arith.constant 0 : i32
    return %arg0, %c0_i32, %c0_i32_0 : i32, i32, i32
  }
}

</mosaic_0001>

<bundles_post_ra>
// kernel: tasnet_forward.6
= control target key start
LH: loop header
LB: loop body
LE: loop exit
PB: predicated region body
PF: predicated region fallthrough
CT: control target
= control target key end

     0   :  { %9 = vsyncpa [#allocation3], 0  ;;  %s988_s0 = inlined_call_operand.hbm [shape: f32[64,128], index: 0, kind: input, shape index: {}]   ;;  %s989_s1 = inlined_call_operand.hbm [shape: f32[128,256], index: 1, kind: input, shape index: {}]   ;;  %s990_s2 = inlined_call_operand.vmem [shape: f32[64,128], index: 2, kind: output, shape index: {0}]   ;;  %s991_s3 = inlined_call_operand.vmem [shape: f32[64,128], index: 3, kind: output, shape index: {1}]  }
   0x1   :  { %11 = vsyncpa [#allocation3 + $0x1], 0 }
   0x2   :  { %12 = vsyncpa [#allocation5], 0  ;;  %s816_s12 = smov 0   ;;  %s818_s13 = smov 0  }
   0x3   :  { %s820_s14 = smov 0   ;;  %s822_s15 = smov 0  }
   0x4 LB: > { %s554_s16 = sadd.s32 4294967295, %s787_s15   ;;  %p38_p0 = scmp.ne.s32.totalorder %s779_s13, %s775_s12  ;;  %s787_s15 = sphi %s822_s15, %s1007_s15   ;;  %s783_s14 = sphi %s820_s14, %s1006_s14   ;;  %s779_s13 = sphi %s818_s13, %s1005_s13   ;;  %s775_s12 = sphi %s816_s12, %s1004_s12  }
   0x5   : > { %p838_p1 = scmp.eq.s32.totalorder %s554_s16, 0  ;;  %p556_p2 = scmp.ge.s32.totalorder %s787_s15, 1 }
   0x6   : > { %p122_p3 = scmp.lt.s32.totalorder %s787_s15, 3  ;;  %s789_s20 = smov [#allocation4]  }
   0x7   : > { %s996_s17 = scalar_select %p838_p1, 1, 0 }
   0x8   : > { %p846_p4 = por %p838_p1, %p38_p0  ;;  %p850_p5 = pnand %p556_p2, %p122_p3 }
   0x9   : > { %s134_s21 = sshll.u32 %s789_s20, 4  ;;  %s863_s23 = sadd.s32 1, %s787_s15   ;;  %s135_s21 = int_to_ptr.vmem [resolvable:$true] %s134_s21 }
   0xa   : > { %s997_s18 = scalar_select %p846_p4, 1, 0 }
   0xb   : > { %s998_s19 = scalar_select %p850_p5, 1, 0 }
   0xc   : > { %p614_p6 = pneg %p850_p5  ;;  %s25_s24 = sadd.s32 1, %s783_s14 }
   0xd   : > { %s22_s25 = ssub.s32 %s787_s15, %s863_s23  ;;  %s706_s26 = scalar_lea.vmem %s135_s21, 4096 }
   0xe   : > { %p858_p7 = pnand %p614_p6, %p838_p1  ;;  %p707_p9 = scmp.ne.s32.totalorder %s135_s21, %s706_s26 }
   0xf   : > { %p714_p12 = scmp.lt.s32.totalorder %s135_s21, %s135_s21  ;;  %p715_p13 = scmp.lt.s32.totalorder %s706_s26, %s706_s26 }
  0x10   : > { %p697_p8 = pneg %p858_p7 }
  0x11   : > { %p716_p0 = por %p715_p13, %p714_p12 }
  0x12   : > { %p709_p10 = pnand %p707_p9, %p697_p8 }
  0x14   : > { %p710_p11 = pneg %p709_p10 }
  0x16   : > { %p717_p2 = pnand %p716_p0, %p710_p11 }
  0x18   : > { %720 = shalt.err (!%p717_p2)
}
  0x19   : > { %s790_s27 = smov 256   ;;  %s791_s28 = smov 16  }
  0x1a   : > { %617 = dma.hbm_to_vmem [thread:$0]  (!%p858_p7), %s989_s1, 4096, %s135_s21, [#allocation5], %s790_s27, %s790_s27, %s791_s28  }
  0x1b   : > { %p23_p3 = scmp.eq.s32.totalorder %s22_s25, 0  ;;  %p32_p6 = scmp.ne.s32.totalorder %s783_s14, %s779_s13 }
  0x1c   : > { %p33_p8 = scmp.eq.s32.totalorder %s787_s15, 0  ;;  %p623_p9 = scmp.lt.s32.totalorder %s787_s15, 2 }
  0x1d   : > { %s880_s4 = scalar_select %p23_p3, %s783_s14, %s25_s24  }
  0x1e   : > { %p34_p10 = por %p33_p8, %p32_p6  ;;  %s148_s5 = sand.u32 1, %s783_s14  }
  0x1f   : > { %s559_s6 = sshll.u32 %s148_s5, 5  ;;  %s575_s7 = sshll.u32 %s787_s15, 9 }
  0x20   : > { %s887_s10 = scalar_lea.hbm %s988_s0, %s575_s7  ;;  %s152_s11 = scalar_lea.vmem [#allocation2], %s559_s6 }
  0x21   : > { %s159_s12 = sshll.u32 %s152_s11, 4  ;;  %p891_p7 = pnand %p623_p9, %p34_p10  ;;  %s889_s12 = int_to_ptr.vmem [resolvable:$true] %s159_s12 }
  0x22   : > { %s895_s21 = scalar_lea.sflag [#allocation3], %s148_s5  ;;  %s721_s22 = scalar_lea.hbm %s887_s10, 512 }
  0x23   : > { %p722_p11 = scmp.ne.s32.totalorder %s887_s10, %s721_s22  ;;  %p723_p12 = pneg %p891_p7 }
  0x24   : > { %s726_s26 = scalar_lea.hbm %s988_s0, 1024  ;;  %p727_p2 = scmp.lt.s32.totalorder %s887_s10, %s988_s0 }
  0x25   : > { %p724_p13 = pnand %p723_p12, %p722_p11  ;;  %p728_p3 = scmp.lt.s32.totalorder %s726_s26, %s721_s22 }
  0x27   : > { %p725_p0 = pneg %p724_p13  ;;  %p729_p6 = por %p728_p3, %p727_p2 }
  0x29   : > { %p730_p8 = pnand %p729_p6, %p725_p0 }
  0x2b   : > { %733 = shalt.err (!%p730_p8)
}
  0x2c   : > { %s734_s29 = scalar_lea.vmem %s889_s12, 512  ;;  %s792_s30 = smov [#allocation2]  }
  0x2d   : > { %p735_p9 = scmp.ne.s32.totalorder %s889_s12, %s734_s29  ;;  %s739_s5 = sshll.u32 %s792_s30, 4  ;;  %s740_s5 = int_to_ptr.vmem [resolvable:$false] %s739_s5 }
  0x2e   : > { %s741_s6 = scalar_lea.vmem %s740_s5, 1024  ;;  %p742_p13 = scmp.lt.s32.totalorder %s889_s12, %s740_s5 }
  0x2f   : > { %p737_p10 = pnand %p735_p9, %p723_p12  ;;  %p743_p1 = scmp.lt.s32.totalorder %s741_s6, %s734_s29 }
  0x31   : > { %p738_p11 = pneg %p737_p10  ;;  %p744_p4 = por %p743_p1, %p742_p13 }
  0x33   : > { %p745_p5 = pnand %p744_p4, %p738_p11 }
  0x35   : > { %748 = shalt.err (!%p745_p5)
}
  0x36   : > { %s793_s7 = smov 128   ;;  %s794_s8 = smov 8  }
  0x37   : > { %621 = dma.hbm_to_vmem [thread:$0]  (!%p891_p7), %s887_s10, 512, %s889_s12, %s895_s21, %s793_s7, %s793_s7, %s794_s8  }
  0x38   : > { %p1001_p12 = scmp.ne.s32.totalorder %s998_s19, 0 }
  0x39   : > { %s173_s9 = sand.u32 (!%p1001_p12), 1, %s779_s13   ;;  %p1002_p1 = scmp.ne.s32.totalorder (!%p1001_p12), %s997_s18, 0 }
  0x3a   : > { %171 = sbr.rel (%p1001_p12) target bundleno = 483 (0x1e3), region = 28  ;;  %s563_s11 = sshll.u32 (!%p1001_p12), %s173_s9, 5 }
  0x3b   : > { %s174_s22 = scalar_lea.sflag (!%p1001_p12), [#allocation3], %s173_s9  ;;  %s177_s24 = scalar_lea.vmem (!%p1001_p12), [#allocation2], %s563_s11 }
  0x3f   : > { %766 = dma.done.wait (%p1002_p1), %s174_s22, 512  }
  0x40   : > { %768 = vsyncadd (%p1002_p1), %s174_s22, 4294966784  ;;  %p1003_p4 = scmp.ne.s32.totalorder %s996_s17, 0 }
  0x42   : > { %770 = dma.done.wait (%p1003_p4), [#allocation5], 4096  }
  0x43   : > { %772 = vsyncadd (%p1003_p4), [#allocation5], 4294963200  ;;  %v927_v0 = vld [vmem:[%s177_s24 + $0x8] sm:$0xff]  ;;  %v929_v1 = vld [vmem:[%s177_s24] sm:$0xff]  ;;  %v795_v40 = vmov 0.0   ;;  %s565_s17 = sshll.u32 %s554_s16, 2 }
  0x44   : > { %v931_v2 = vld [vmem:[%s177_s24 + $0x18] sm:$0xff]  ;;  %v227_v3 = vmul.f32 %v927_v0, %v927_v0  ;;  %v226_v4 = vmul.f32 %v929_v1, %v929_v1  ;;  %v937_v5 = vld [vmem:[%s177_s24 + $0x10] sm:$0xff]  ;;  %v307_v10 = vld [vmem:[#allocation4 + $0xe8] sm:$0xff]  ;;  %374 = vmatprep.mubr.f32.mxu0 %v795_v40  ;;  %386 = vmatprep.mubr.f32.mxu1 %v795_v40  ;;  %p211_p5 = scmp.lt.s32.totalorder %s565_s17, 7 }
  0x45   : > { %v229_v6 = vmul.f32 %v931_v2, %v931_v2  ;;  %v228_v7 = vmul.f32 %v937_v5, %v937_v5  ;;  %v309_v8 = vld [vmem:[#allocation4 + $0xf8] sm:$0xff]  ;;  %v308_v9 = vld [vmem:[#allocation4 + $0xf0] sm:$0xff]  ;;  %v306_v11 = vld [vmem:[#allocation4 + $0xe0] sm:$0xff] }
  0x46   : > { %232 = vadd.xlane.f32.xlu1 %v227_v3  ;;  %230 = vadd.xlane.f32.xlu0 %v226_v4  ;;  %v305_v12 = vld [vmem:[#allocation4 + $0xd8] sm:$0xff]  ;;  %v304_v13 = vld [vmem:[#allocation4 + $0xd0] sm:$0xff]  ;;  %v303_v14 = vld [vmem:[#allocation4 + $0xc8] sm:$0xff]  ;;  %s1009_s17 = smov (!%p211_p5, %s565_s17), 7 }
  0x47   : > { %310 = vmatprep.subr.mxu0 %v309_v8  ;;  %576 = vmatprep.subr.mxu1 %v309_v8  ;;  %v302_v15 = vld [vmem:[#allocation4 + $0xc0] sm:$0xff]  ;;  %v301_v16 = vld [vmem:[#allocation4 + $0xb8] sm:$0xff]  ;;  %v300_v17 = vld [vmem:[#allocation4 + $0xb0] sm:$0xff]  ;;  %s566_s18 = sshll.u32 %s1009_s17, 3 }
  0x48   : > { %311 = vmatpush1.msra.mxu0 %v308_v9  ;;  %592 = vmatpush1.msra.mxu1 %v308_v9  ;;  %v299_v18 = vld [vmem:[#allocation4 + $0xa8] sm:$0xff]  ;;  %v298_v19 = vld [vmem:[#allocation4 + $0xa0] sm:$0xff]  ;;  %v297_v20 = vld [vmem:[#allocation4 + $0x98] sm:$0xff]  ;;  %s214_s15 = scalar_lea.vmem %s990_s2, %s566_s18  ;;  %s220_s20 = scalar_lea.vmem %s991_s3, %s566_s18 }
  0x49   : > { %312 = vmatprep.subr.mxu0 %v307_v10  ;;  %577 = vmatprep.subr.mxu1 %v307_v10  ;;  %v296_v21 = vld [vmem:[#allocation4 + $0x90] sm:$0xff]  ;;  %v295_v22 = vld [vmem:[#allocation4 + $0x88] sm:$0xff]  ;;  %v294_v23 = vld [vmem:[#allocation4 + $0x80] sm:$0xff] }
  0x4a   : > { %236 = vadd.xlane.f32.xlu1 %v229_v6  ;;  %234 = vadd.xlane.f32.xlu0 %v228_v7  ;;  %v293_v24 = vld [vmem:[#allocation4 + $0x78] sm:$0xff]  ;;  %v292_v25 = vld [vmem:[#allocation4 + $0x70] sm:$0xff]  ;;  %v291_v26 = vld [vmem:[#allocation4 + $0x68] sm:$0xff] }
  0x4b   : > { %313 = vmatpush1.msra.mxu0 %v306_v11  ;;  %593 = vmatpush1.msra.mxu1 %v306_v11  ;;  %v290_v27 = vld [vmem:[#allocation4 + $0x60] sm:$0xff]  ;;  %v289_v28 = vld [vmem:[#allocation4 + $0x58] sm:$0xff]  ;;  %v288_v29 = vld [vmem:[#allocation4 + $0x50] sm:$0xff] }
  0x4c   : > { %314 = vmatprep.subr.mxu0 %v305_v12  ;;  %578 = vmatprep.subr.mxu1 %v305_v12  ;;  %v287_v30 = vld [vmem:[#allocation4 + $0x48] sm:$0xff]  ;;  %v286_v31 = vld [vmem:[#allocation4 + $0x40] sm:$0xff]  ;;  %v285_v32 = vld [vmem:[#allocation4 + $0x38] sm:$0xff] }
  0x4d   : > { %315 = vmatpush1.msra.mxu0 %v304_v13  ;;  %594 = vmatpush1.msra.mxu1 %v304_v13  ;;  %v284_v33 = vld [vmem:[#allocation4 + $0x30] sm:$0xff]  ;;  %v283_v34 = vld [vmem:[#allocation4 + $0x28] sm:$0xff]  ;;  %v282_v35 = vld [vmem:[#allocation4 + $0x20] sm:$0xff] }
  0x4e   : > { %316 = vmatprep.subr.mxu0 %v303_v14  ;;  %579 = vmatprep.subr.mxu1 %v303_v14  ;;  %v281_v36 = vld [vmem:[#allocation4 + $0x18] sm:$0xff]  ;;  %v280_v37 = vld [vmem:[#allocation4 + $0x10] sm:$0xff]  ;;  %v279_v38 = vld [vmem:[#allocation4 + $0x8] sm:$0xff] }
  0x4f   : > { %317 = vmatpush1.msra.mxu0 %v302_v15  ;;  %595 = vmatpush1.msra.mxu1 %v302_v15  ;;  %v278_v39 = vld [vmem:[#allocation4] sm:$0xff] }
  0x50   : > { %318 = vmatprep.subr.mxu0 %v301_v16  ;;  %580 = vmatprep.subr.mxu1 %v301_v16 }
  0x51   : > { %319 = vmatpush1.msra.mxu0 %v300_v17  ;;  %596 = vmatpush1.msra.mxu1 %v300_v17 }
  0x52   : > { %320 = vmatprep.subr.mxu0 %v299_v18  ;;  %581 = vmatprep.subr.mxu1 %v299_v18 }
  0x53   : > { %321 = vmatpush1.msra.mxu0 %v298_v19  ;;  %597 = vmatpush1.msra.mxu1 %v298_v19 }
  0x54   : > { %322 = vmatprep.subr.mxu0 %v297_v20  ;;  %582 = vmatprep.subr.mxu1 %v297_v20 }
  0x55   : > { %323 = vmatpush1.msra.mxu0 %v296_v21  ;;  %598 = vmatpush1.msra.mxu1 %v296_v21 }
  0x56   : > { %324 = vmatprep.subr.mxu0 %v295_v22  ;;  %583 = vmatprep.subr.mxu1 %v295_v22 }
  0x57   : > { %325 = vmatpush1.msra.mxu0 %v294_v23  ;;  %599 = vmatpush1.msra.mxu1 %v294_v23 }
  0x58   : > { %326 = vmatprep.subr.mxu0 %v293_v24  ;;  %584 = vmatprep.subr.mxu1 %v293_v24 }
  0x59   : > { %327 = vmatpush1.msra.mxu0 %v292_v25  ;;  %600 = vmatpush1.msra.mxu1 %v292_v25 }
  0x5a   : > { %328 = vmatprep.subr.mxu0 %v291_v26  ;;  %585 = vmatprep.subr.mxu1 %v291_v26 }
  0x5b   : > { %329 = vmatpush1.msra.mxu0 %v290_v27  ;;  %601 = vmatpush1.msra.mxu1 %v290_v27 }
  0x5c   : > { %330 = vmatprep.subr.mxu0 %v289_v28  ;;  %586 = vmatprep.subr.mxu1 %v289_v28 }
  0x5d   : > { %331 = vmatpush1.msra.mxu0 %v288_v29  ;;  %602 = vmatpush1.msra.mxu1 %v288_v29 }
  0x5e   : > { %332 = vmatprep.subr.mxu0 %v287_v30  ;;  %587 = vmatprep.subr.mxu1 %v287_v30 }
  0x5f   : > { %333 = vmatpush1.msra.mxu0 %v286_v31  ;;  %603 = vmatpush1.msra.mxu1 %v286_v31 }
  0x60   : > { %334 = vmatprep.subr.mxu0 %v285_v32  ;;  %588 = vmatprep.subr.mxu1 %v285_v32 }
  0x61   : > { %335 = vmatpush1.msra.mxu0 %v284_v33  ;;  %604 = vmatpush1.msra.mxu1 %v284_v33 }
  0x62   : > { %336 = vmatprep.subr.mxu0 %v283_v34  ;;  %589 = vmatprep.subr.mxu1 %v283_v34 }
  0x63   : > { %337 = vmatpush1.msra.mxu0 %v282_v35  ;;  %605 = vmatpush1.msra.mxu1 %v282_v35 }
  0x64   : > { %338 = vmatprep.subr.mxu0 %v281_v36  ;;  %590 = vmatprep.subr.mxu1 %v281_v36 }
  0x65   : > { %339 = vmatpush1.msra.mxu0 %v280_v37  ;;  %606 = vmatpush1.msra.mxu1 %v280_v37 }
  0x66   : > { %340 = vmatprep.subr.mxu0 %v279_v38  ;;  %591 = vmatprep.subr.mxu1 %v279_v38 }
  0x67   : > { %341 = vmatpush1.msra.mxu0 %v278_v39  ;;  %607 = vmatpush1.msra.mxu1 %v278_v39 }
  0xcf   : > { %v233_v41 = vpop.xlane.xlu1 %232  ;;  %v231_v42 = vpop.xlane.xlu0 %230 }
  0xd0   : > { %663 = vrsqrt.f32 %v233_v41  ;;  %vm247_vm0 = vcmp.eq.f32.partialorder %v233_v41, inf  ;;  %v250_v48 = vand.u32 2147483648, %v233_v41  ;;  %vm249_vm1 = vcmp.eq.f32.partialorder %v233_v41, 0.0 }
  0xd1   : > { %665 = vrsqrt.f32 %v231_v42  ;;  %vm240_vm2 = vcmp.eq.f32.partialorder %v231_v42, inf  ;;  %v243_v51 = vand.u32 2147483648, %v231_v42  ;;  %vm242_vm3 = vcmp.eq.f32.partialorder %v231_v42, 0.0 }
  0xd3   : > { %v237_v43 = vpop.xlane.xlu1 %236  ;;  %v235_v44 = vpop.xlane.xlu0 %234 }
  0xd4   : > { %667 = vrsqrt.f32 %v237_v43  ;;  %vm261_vm4 = vcmp.eq.f32.partialorder %v237_v43, inf  ;;  %v264_v60 = vand.u32 2147483648, %v237_v43  ;;  %vm263_vm5 = vcmp.eq.f32.partialorder %v237_v43, 0.0 }
  0xd5   : > { %669 = vrsqrt.f32 %v235_v44  ;;  %vm254_vm6 = vcmp.eq.f32.partialorder %v235_v44, inf  ;;  %v257_v63 = vand.u32 2147483648, %v235_v44  ;;  %vm256_vm7 = vcmp.eq.f32.partialorder %v235_v44, 0.0 }
  0xdd   : > { %v664_v45 = vpop.eup %663 }
  0xde   : > { %v666_v46 = vpop.eup %665  ;;  %v246_v47 = vmul.f32 %v664_v45, %v233_v41 }
  0xdf   : > { %v239_v49 = vmul.f32 %v666_v46, %v231_v42 }
  0xe0   : > { %v248_v50 = vsel %vm247_vm0, %v233_v41, %v246_v47 }
  0xe1   : > { %v668_v52 = vpop.eup %667  ;;  %v945_v53 = vsel %vm249_vm1, %v250_v48, %v248_v50  ;;  %v241_v54 = vsel %vm240_vm2, %v231_v42, %v239_v49 }
  0xe2   : > { %v670_v55 = vpop.eup %669  ;;  %v947_v56 = vsel %vm242_vm3, %v243_v51, %v241_v54  ;;  %v260_v57 = vmul.f32 %v668_v52, %v237_v43  ;;  %v267_v58 = vadd.f32 1e-09, %v945_v53 }
  0xe3   : > { %v266_v59 = vadd.f32 1e-09, %v947_v56  ;;  %v253_v61 = vmul.f32 %v670_v55, %v235_v44 }
  0xe4   : > { %v262_v62 = vsel %vm261_vm4, %v237_v43, %v260_v57 }
  0xe5   : > { %671 = vrcp.f32 %v266_v59  ;;  %v951_v3 = vsel %vm263_vm5, %v264_v60, %v262_v62  ;;  %v255_v4 = vsel %vm254_vm6, %v235_v44, %v253_v61 }
  0xe6   : > { %v953_v6 = vsel %vm256_vm7, %v257_v63, %v255_v4  ;;  %673 = vrcp.f32 %v267_v58  ;;  %v269_v7 = vadd.f32 1e-09, %v951_v3 }
  0xe7   : > { %v268_v8 = vadd.f32 1e-09, %v953_v6 }
  0xe9   : > { %675 = vrcp.f32 %v268_v8 }
  0xea   : > { %677 = vrcp.f32 %v269_v7 }
  0xf2   : > { %v672_v9 = vpop.eup %671 }
  0xf3   : > { %v271_v10 = vmul.f32 %v672_v9, %v929_v1  ;;  %v674_v11 = vpop.eup %673 }
  0xf4   : > { %v273_v13 = vmul.f32 %v674_v11, %v927_v0 }
  0xf5   : > { %375 = vmatmul.mubr.f32.vlgmr.msra.gmra.mxu0 %v271_v10 }
  0xf6   : > { %v676_v12 = vpop.eup %675  ;;  %380 = vmatprep.mubr.f32.mxu0 %v795_v40 }
  0xf7   : > { %v275_v14 = vmul.f32 %v676_v12, %v937_v5  ;;  %v678_v15 = vpop.eup %677 }
  0xf8   : > { %v277_v16 = vmul.f32 %v678_v15, %v931_v2 }
  0xf9   : > { %381 = vmatmul.mubr.f32.gmra.mxu0 %v273_v13  ;;  %387 = vmatmul.mubr.f32.vlgmr.msra.gmra.mxu1 %v275_v14 }
  0xfa   : > { %392 = vmatprep.mubr.f32.mxu1 %v795_v40 }
  0xfd   : > { %393 = vmatmul.mubr.f32.gmra.mxu1 %v277_v16 }
 0x1b5   : > { %v376_v17 = vpop.f32.mrf.mxu0 }
 0x1b6   : > { %v569_v1 = vmul.f32 -1.442695, %v376_v17 }
 0x1b7   : > { %v378_v18 = vpop.f32.mrf.mxu0 }
 0x1b8   : > { %679 = vpow2.f32 %v569_v1  ;;  %v423_v31 = vmax.f32 %v378_v18, 0.0 }
 0x1b9   : > { %v382_v19 = vpop.f32.mrf.mxu0  ;;  %v388_v20 = vpop.f32.mrf.mxu1 }
 0x1ba   : > { %v570_v21 = vmul.f32 -1.442695, %v382_v19  ;;  %v571_v22 = vmul.f32 -1.442695, %v388_v20 }
 0x1bb   : > { %v390_v0 = vpop.f32.mrf.mxu1  ;;  %v384_v33 = vpop.f32.mrf.mxu0 }
 0x1bc   : > { %681 = vpow2.f32 %v570_v21  ;;  %v424_v36 = vmax.f32 %v384_v33, 0.0  ;;  %v425_v38 = vmax.f32 %v390_v0, 0.0 }
 0x1bd   : > { %683 = vpow2.f32 %v571_v22  ;;  %v394_v5 = vpop.f32.mrf.mxu1 }
 0x1be   : > { %v572_v23 = vmul.f32 -1.442695, %v394_v5 }
 0x1bf   : > { %v396_v39 = vpop.f32.mrf.mxu1 }
 0x1c0   : > { %685 = vpow2.f32 %v572_v23  ;;  %v426_v44 = vmax.f32 %v396_v39, 0.0 }
 0x1c5   : > { %v680_v24 = vpop.eup %679 }
 0x1c6   : > { %v411_v25 = vadd.f32 1.0, %v680_v24 }
 0x1c8   : > { %687 = vrcp.f32 %v411_v25 }
 0x1c9   : > { %v682_v2 = vpop.eup %681 }
 0x1ca   : > { %v684_v26 = vpop.eup %683  ;;  %v412_v27 = vadd.f32 1.0, %v682_v2 }
 0x1cb   : > { %v413_v28 = vadd.f32 1.0, %v684_v26 }
 0x1cc   : > { %689 = vrcp.f32 %v412_v27 }
 0x1cd   : > { %v686_v29 = vpop.eup %685  ;;  %691 = vrcp.f32 %v413_v28 }
 0x1ce   : > { %v414_v30 = vadd.f32 1.0, %v686_v29 }
 0x1d0   : > { %693 = vrcp.f32 %v414_v30 }
 0x1d5   : > { %v688_v32 = vpop.eup %687 }
 0x1d6   : > { %v427_v34 = vmul.f32 %v688_v32, %v423_v31 }
 0x1d8   : > { %431 = vst [vmem:[%s214_s15] sm:$0xff] %v427_v34  ;;  %v435_v35 = vmul.f32 %v427_v34, %v947_v56 }
 0x1d9   : > { %v690_v37 = vpop.eup %689 }
 0x1da   : > { %v692_v40 = vpop.eup %691  ;;  %439 = vst [vmem:[%s220_s20] sm:$0xff] %v435_v35  ;;  %v428_v41 = vmul.f32 %v690_v37, %v424_v36 }
 0x1db   : > { %v429_v42 = vmul.f32 %v692_v40, %v425_v38 }
 0x1dc   : > { %432 = vst [vmem:[%s214_s15 + $0x8] sm:$0xff] %v428_v41  ;;  %v436_v43 = vmul.f32 %v428_v41, %v945_v53 }
 0x1dd   : > { %v694_v45 = vpop.eup %693  ;;  %433 = vst [vmem:[%s214_s15 + $0x10] sm:$0xff] %v429_v42  ;;  %v437_v46 = vmul.f32 %v429_v42, %v953_v6 }
 0x1de   : > { %440 = vst [vmem:[%s220_s20 + $0x8] sm:$0xff] %v436_v43  ;;  %v430_v47 = vmul.f32 %v694_v45, %v426_v44 }
 0x1df   : > { %441 = vst [vmem:[%s220_s20 + $0x10] sm:$0xff] %v437_v46 }
 0x1e0   : > { %434 = vst [vmem:[%s214_s15 + $0x18] sm:$0xff] %v430_v47  ;;  %v438_v48 = vmul.f32 %v430_v47, %v951_v3 }
 0x1e2   : > { %442 = vst [vmem:[%s220_s20 + $0x18] sm:$0xff] %v438_v48 }
 0x1e3 PF: > { %p15_p7 = scmp.ge.s32.totalorder %s863_s23, 4   ;;  %s1004_s12 = smov %s779_s13 }
 0x1e4   : > { %s1005_s13 = smov %s783_s14  ;;  %s1006_s14 = smov %s880_s4 }
 0x1e5   : > { %s1007_s15 = smov %s863_s23  ;;  %17 = sbr.rel (!%p15_p7) target bundleno = 4 (0x4), region = 84 }
 0x1ea   :  { %482 = vsyncpa [#allocation3], 1 }
 0x1eb   :  { %484 = vsyncpa [#allocation3 + $0x1], 1 }
 0x1ec   :  { %485 = vsyncpa [#allocation5], 1 }

// kernel: tasnet_forward.11
= control target key start
LH: loop header
LB: loop body
LE: loop exit
PB: predicated region body
PF: predicated region fallthrough
CT: control target
= control target key end

     0   :  { %s1093_s18 = smov 0   ;;  %s1095_s19 = smov 0   ;;  %s1404_s0 = inlined_call_operand.vmem [shape: f32[64,256], index: 0, kind: input, shape index: {}]   ;;  %s1405_s1 = inlined_call_operand.vmem [shape: f32[64,128], index: 1, kind: input, shape index: {}]   ;;  %s1406_s2 = inlined_call_operand.vmem [shape: f32[256,256], index: 2, kind: input, shape index: {}]   ;;  %s1407_s3 = inlined_call_operand.vmem [shape: f32[1,256], index: 3, kind: input, shape index: {}]   ;;  %s1408_s4 = inlined_call_operand.vmem [shape: f32[128,128], index: 4, kind: input, shape index: {}]   ;;  %s1409_s5 = inlined_call_operand.vmem [shape: f32[2,64,128], index: 5, kind: output, shape index: {}]  }
   0x1   :  { %s1097_s20 = smov 0  }
   0x2 LB: > { %s845_s21 = sadd.s32 4294967295, %s1061_s20   ;;  %s1110_s22 = sadd.s32 1, %s1061_s20   ;;  %s1061_s20 = sphi %s1097_s20, %s1412_s20   ;;  %s1057_s19 = sphi %s1095_s19, %s1411_s19   ;;  %s1053_s18 = sphi %s1093_s18, %s1410_s18  }
   0x3   : > { %s61_s23 = ssub.s32 %s1061_s20, %s1110_s22  ;;  %s64_s24 = sadd.s32 1, %s1057_s19 }
   0x4   : > { %p62_p0 = scmp.eq.s32.totalorder %s61_s23, 0  ;;  %p71_p1 = scmp.ne.s32.totalorder %s1057_s19, %s1053_s18 }
   0x5   : > { %p72_p2 = scmp.eq.s32.totalorder %s1061_s20, 0  ;;  %p848_p4 = scmp.ge.s32.totalorder %s1061_s20, 2 }
   0x6   : > { %s1119_s25 = scalar_select %p62_p0, %s1057_s19, %s64_s24  }
   0x7   : > { %p73_p3 = por %p72_p2, %p71_p1  ;;  %179 = sbr.rel (%p848_p4) target bundleno = 32 (0x20), region = 28 }
   0xc   : > { %182 = sbr.rel (!%p73_p3) target bundleno = 32 (0x20), region = 32  ;;  %s184_s26 = sand.u32 (%p73_p3), 1, %s1057_s19  }
   0xd   : > { %s850_s27 = sshll.u32 (%p73_p3), %s1061_s20, 3  ;;  %s849_s28 = sshll.u32 (%p73_p3), %s184_s26, 8 }
   0xe   : > { %s1127_s6 = scalar_lea.vmem (%p73_p3), %s1406_s2, %s850_s27  ;;  %s1132_s7 = scalar_lea.vmem (%p73_p3), [#allocation2], %s849_s28 }
   0xf   : > { %v279_v0 = vld [vmem:[%s1127_s6] sm:$0xff] (%p73_p3)  ;;  %v281_v1 = vld [vmem:[%s1127_s6 + $0x10] sm:$0xff] (%p73_p3) }
  0x10   : > { %v283_v2 = vld [vmem:[%s1127_s6 + $0x20] sm:$0xff] (%p73_p3)  ;;  %280 = vst [vmem:[%s1132_s7] sm:$0xff] (%p73_p3), %v279_v0  ;;  %282 = vst [vmem:[%s1132_s7 + $0x8] sm:$0xff] (%p73_p3), %v281_v1  ;;  %v285_v3 = vld [vmem:[%s1127_s6 + $0x30] sm:$0xff] (%p73_p3) }
  0x11   : > { %284 = vst [vmem:[%s1132_s7 + $0x10] sm:$0xff] %v283_v2  ;;  %v287_v4 = vld [vmem:[%s1127_s6 + $0x40] sm:$0xff]  ;;  %v289_v5 = vld [vmem:[%s1127_s6 + $0x50] sm:$0xff]  ;;  %286 = vst [vmem:[%s1132_s7 + $0x18] sm:$0xff] %v285_v3 }
  0x12   : > { %288 = vst [vmem:[%s1132_s7 + $0x20] sm:$0xff] %v287_v4  ;;  %290 = vst [vmem:[%s1132_s7 + $0x28] sm:$0xff] %v289_v5  ;;  %v291_v6 = vld [vmem:[%s1127_s6 + $0x60] sm:$0xff]  ;;  %v293_v7 = vld [vmem:[%s1127_s6 + $0x70] sm:$0xff] }
  0x13   : > { %v295_v8 = vld [vmem:[%s1127_s6 + $0x80] sm:$0xff]  ;;  %292 = vst [vmem:[%s1132_s7 + $0x30] sm:$0xff] %v291_v6  ;;  %294 = vst [vmem:[%s1132_s7 + $0x38] sm:$0xff] %v293_v7  ;;  %v297_v9 = vld [vmem:[%s1127_s6 + $0x90] sm:$0xff] }
  0x14   : > { %296 = vst [vmem:[%s1132_s7 + $0x40] sm:$0xff] %v295_v8  ;;  %v299_v10 = vld [vmem:[%s1127_s6 + $0xa0] sm:$0xff]  ;;  %v301_v11 = vld [vmem:[%s1127_s6 + $0xb0] sm:$0xff]  ;;  %298 = vst [vmem:[%s1132_s7 + $0x48] sm:$0xff] %v297_v9 }
  0x15   : > { %300 = vst [vmem:[%s1132_s7 + $0x50] sm:$0xff] %v299_v10  ;;  %302 = vst [vmem:[%s1132_s7 + $0x58] sm:$0xff] %v301_v11  ;;  %v303_v12 = vld [vmem:[%s1127_s6 + $0xc0] sm:$0xff]  ;;  %v305_v13 = vld [vmem:[%s1127_s6 + $0xd0] sm:$0xff] }
  0x16   : > { %v307_v14 = vld [vmem:[%s1127_s6 + $0xe0] sm:$0xff]  ;;  %304 = vst [vmem:[%s1132_s7 + $0x60] sm:$0xff] %v303_v12  ;;  %306 = vst [vmem:[%s1132_s7 + $0x68] sm:$0xff] %v305_v13  ;;  %v309_v15 = vld [vmem:[%s1127_s6 + $0xf0] sm:$0xff] }
  0x17   : > { %308 = vst [vmem:[%s1132_s7 + $0x70] sm:$0xff] %v307_v14  ;;  %v311_v16 = vld [vmem:[%s1127_s6 + $0x100] sm:$0xff]  ;;  %v313_v17 = vld [vmem:[%s1127_s6 + $0x110] sm:$0xff]  ;;  %310 = vst [vmem:[%s1132_s7 + $0x78] sm:$0xff] %v309_v15 }
  0x18   : > { %312 = vst [vmem:[%s1132_s7 + $0x80] sm:$0xff] %v311_v16  ;;  %314 = vst [vmem:[%s1132_s7 + $0x88] sm:$0xff] %v313_v17  ;;  %v315_v18 = vld [vmem:[%s1127_s6 + $0x120] sm:$0xff]  ;;  %v317_v19 = vld [vmem:[%s1127_s6 + $0x130] sm:$0xff] }
  0x19   : > { %v319_v20 = vld [vmem:[%s1127_s6 + $0x140] sm:$0xff]  ;;  %316 = vst [vmem:[%s1132_s7 + $0x90] sm:$0xff] %v315_v18  ;;  %318 = vst [vmem:[%s1132_s7 + $0x98] sm:$0xff] %v317_v19  ;;  %v321_v21 = vld [vmem:[%s1127_s6 + $0x150] sm:$0xff] }
  0x1a   : > { %320 = vst [vmem:[%s1132_s7 + $0xa0] sm:$0xff] %v319_v20  ;;  %v323_v22 = vld [vmem:[%s1127_s6 + $0x160] sm:$0xff]  ;;  %v325_v23 = vld [vmem:[%s1127_s6 + $0x170] sm:$0xff]  ;;  %322 = vst [vmem:[%s1132_s7 + $0xa8] sm:$0xff] %v321_v21 }
  0x1b   : > { %324 = vst [vmem:[%s1132_s7 + $0xb0] sm:$0xff] %v323_v22  ;;  %326 = vst [vmem:[%s1132_s7 + $0xb8] sm:$0xff] %v325_v23  ;;  %v327_v24 = vld [vmem:[%s1127_s6 + $0x180] sm:$0xff]  ;;  %v329_v25 = vld [vmem:[%s1127_s6 + $0x190] sm:$0xff] }
  0x1c   : > { %v331_v26 = vld [vmem:[%s1127_s6 + $0x1a0] sm:$0xff]  ;;  %328 = vst [vmem:[%s1132_s7 + $0xc0] sm:$0xff] %v327_v24  ;;  %330 = vst [vmem:[%s1132_s7 + $0xc8] sm:$0xff] %v329_v25  ;;  %v333_v27 = vld [vmem:[%s1127_s6 + $0x1b0] sm:$0xff] }
  0x1d   : > { %332 = vst [vmem:[%s1132_s7 + $0xd0] sm:$0xff] %v331_v26  ;;  %v335_v28 = vld [vmem:[%s1127_s6 + $0x1c0] sm:$0xff]  ;;  %v337_v29 = vld [vmem:[%s1127_s6 + $0x1d0] sm:$0xff]  ;;  %334 = vst [vmem:[%s1132_s7 + $0xd8] sm:$0xff] %v333_v27 }
  0x1e   : > { %336 = vst [vmem:[%s1132_s7 + $0xe0] sm:$0xff] %v335_v28  ;;  %338 = vst [vmem:[%s1132_s7 + $0xe8] sm:$0xff] %v337_v29  ;;  %v339_v30 = vld [vmem:[%s1127_s6 + $0x1e0] sm:$0xff]  ;;  %v341_v31 = vld [vmem:[%s1127_s6 + $0x1f0] sm:$0xff] }
  0x1f   : > { %340 = vst [vmem:[%s1132_s7 + $0xf0] sm:$0xff] %v339_v30  ;;  %342 = vst [vmem:[%s1132_s7 + $0xf8] sm:$0xff] %v341_v31 }
  0x20 PF: > { %p851_p5 = scmp.ge.s32.totalorder %s1061_s20, 1  ;;  %p353_p6 = scmp.lt.s32.totalorder %s1061_s20, 3 }
  0x22   : > { %p354_p7 = pnand %p851_p5, %p353_p6 }
  0x23   : > { %s360_s8 = sand.u32 (!%p354_p7), 1, %s1053_s18   ;;  %p390_p8 = scmp.lt.s32.totalorder (!%p354_p7), %s845_s21, 1 }
  0x24   : > { %357 = sbr.rel (%p354_p7) target bundleno = 809 (0x329), region = 74  ;;  %s852_s11 = sshll.u32 (!%p354_p7), %s360_s8, 8 }
  0x25   : > { %s1201_s12 = scalar_lea.vmem (!%p354_p7), [#allocation2], %s852_s11 }
  0x29   : > { %v399_v32 = vld [vmem:[%s1404_s0 + $0x8] sm:$0xff]  ;;  %v445_v33 = vld [vmem:[%s1201_s12 + $0xf8] sm:$0xff]  ;;  %v444_v35 = vld [vmem:[%s1201_s12 + $0xf0] sm:$0xff]  ;;  %s1414_s21 = smov (!%p390_p8, %s845_s21), 1 }
  0x2a   : > { %517 = vmatprep.mubr.f32.mxu0 %v399_v32  ;;  %v429_v34 = vld [vmem:[%s1201_s12 + $0x78] sm:$0xff]  ;;  %859 = vmatprep.subr.mxu0 %v445_v33  ;;  %v428_v36 = vld [vmem:[%s1201_s12 + $0x70] sm:$0xff]  ;;  %v443_v37 = vld [vmem:[%s1201_s12 + $0xe8] sm:$0xff]  ;;  %s392_s30 = scalar_lea.vmem %s1407_s3, %s1414_s21  ;;  %s858_s11 = sshll.u32 %s1414_s21, 6 }
  0x2b   : > { %860 = vmatpush3.msra.mxu0 %v429_v34  ;;  %v427_v38 = vld [vmem:[%s1201_s12 + $0x68] sm:$0xff]  ;;  %v442_v39 = vld [vmem:[%s1201_s12 + $0xe0] sm:$0xff]  ;;  %v441_v41 = vld [vmem:[%s1201_s12 + $0xd8] sm:$0xff]  ;;  %s397_s14 = scalar_lea.vmem %s1409_s5, %s858_s11 }
  0x2c   : > { %861 = vmatprep.subr.mxu0 %v444_v35  ;;  %v426_v40 = vld [vmem:[%s1201_s12 + $0x60] sm:$0xff]  ;;  %v425_v42 = vld [vmem:[%s1201_s12 + $0x58] sm:$0xff]  ;;  %v440_v43 = vld [vmem:[%s1201_s12 + $0xd0] sm:$0xff] }
  0x2d   : > { %862 = vmatpush3.msra.mxu0 %v428_v36  ;;  %v424_v44 = vld [vmem:[%s1201_s12 + $0x50] sm:$0xff]  ;;  %v439_v45 = vld [vmem:[%s1201_s12 + $0xc8] sm:$0xff]  ;;  %v438_v47 = vld [vmem:[%s1201_s12 + $0xc0] sm:$0xff] }
  0x2e   : > { %863 = vmatprep.subr.mxu0 %v443_v37  ;;  %v423_v46 = vld [vmem:[%s1201_s12 + $0x48] sm:$0xff]  ;;  %v422_v48 = vld [vmem:[%s1201_s12 + $0x40] sm:$0xff]  ;;  %v437_v49 = vld [vmem:[%s1201_s12 + $0xb8] sm:$0xff] }
  0x2f   : > { %864 = vmatpush3.msra.mxu0 %v427_v38  ;;  %v421_v50 = vld [vmem:[%s1201_s12 + $0x38] sm:$0xff]  ;;  %v436_v51 = vld [vmem:[%s1201_s12 + $0xb0] sm:$0xff]  ;;  %v435_v53 = vld [vmem:[%s1201_s12 + $0xa8] sm:$0xff] }
  0x30   : > { %865 = vmatprep.subr.mxu0 %v442_v39  ;;  %v420_v52 = vld [vmem:[%s1201_s12 + $0x30] sm:$0xff]  ;;  %v419_v54 = vld [vmem:[%s1201_s12 + $0x28] sm:$0xff]  ;;  %v434_v55 = vld [vmem:[%s1201_s12 + $0xa0] sm:$0xff] }
  0x31   : > { %866 = vmatpush3.msra.mxu0 %v426_v40  ;;  %v418_v56 = vld [vmem:[%s1201_s12 + $0x20] sm:$0xff]  ;;  %v433_v57 = vld [vmem:[%s1201_s12 + $0x98] sm:$0xff]  ;;  %v432_v59 = vld [vmem:[%s1201_s12 + $0x90] sm:$0xff] }
  0x32   : > { %867 = vmatprep.subr.mxu0 %v441_v41  ;;  %v417_v58 = vld [vmem:[%s1201_s12 + $0x18] sm:$0xff]  ;;  %v416_v60 = vld [vmem:[%s1201_s12 + $0x10] sm:$0xff]  ;;  %v431_v61 = vld [vmem:[%s1201_s12 + $0x88] sm:$0xff] }
  0x33   : > { %868 = vmatpush3.msra.mxu0 %v425_v42  ;;  %v415_v62 = vld [vmem:[%s1201_s12 + $0x8] sm:$0xff]  ;;  %v430_v63 = vld [vmem:[%s1201_s12 + $0x80] sm:$0xff]  ;;  %v401_v2 = vld [vmem:[%s1404_s0 + $0x18] sm:$0xff] }
  0x34   : > { %869 = vmatprep.subr.mxu0 %v440_v43  ;;  %v414_v0 = vld [vmem:[%s1201_s12] sm:$0xff]  ;;  %v400_v3 = vld [vmem:[%s1404_s0 + $0x10] sm:$0xff]  ;;  %v403_v4 = vld [vmem:[%s1404_s0 + $0x28] sm:$0xff] }
  0x35   : > { %870 = vmatpush3.msra.mxu0 %v424_v44  ;;  %v398_v1 = vld [vmem:[%s1404_s0] sm:$0xff]  ;;  %v405_v6 = vld [vmem:[%s1404_s0 + $0x38] sm:$0xff]  ;;  %v404_v7 = vld [vmem:[%s1404_s0 + $0x30] sm:$0xff] }
  0x36   : > { %871 = vmatprep.subr.mxu0 %v439_v45  ;;  %v402_v5 = vld [vmem:[%s1404_s0 + $0x20] sm:$0xff]  ;;  %v407_v8 = vld [vmem:[%s1404_s0 + $0x48] sm:$0xff]  ;;  %v409_v10 = vld [vmem:[%s1404_s0 + $0x58] sm:$0xff] }
  0x37   : > { %872 = vmatpush3.msra.mxu0 %v423_v46  ;;  %v406_v9 = vld [vmem:[%s1404_s0 + $0x40] sm:$0xff]  ;;  %v408_v11 = vld [vmem:[%s1404_s0 + $0x50] sm:$0xff]  ;;  %v411_v12 = vld [vmem:[%s1404_s0 + $0x68] sm:$0xff] }
  0x38   : > { %873 = vmatprep.subr.mxu0 %v438_v47  ;;  %v410_v13 = vld [vmem:[%s1404_s0 + $0x60] sm:$0xff]  ;;  %v413_v14 = vld [vmem:[%s1404_s0 + $0x78] sm:$0xff]  ;;  %v412_v15 = vld [vmem:[%s1404_s0 + $0x70] sm:$0xff] }
  0x39   : > { %874 = vmatpush3.msra.mxu0 %v422_v48  ;;  %v855_v18 = vld [vmem:[%s392_s30] ss:$0 sm:$0xff] }
  0x3a   : > { %875 = vmatprep.subr.mxu0 %v437_v49  ;;  %v661_v49 = vld [vmem:[%s1408_s4 + $0x78] sm:$0xff] }
  0x3b   : > { %876 = vmatpush3.msra.mxu0 %v421_v50  ;;  %v660_v50 = vld [vmem:[%s1408_s4 + $0x70] sm:$0xff]  ;;  %939 = vmatprep.subr.mxu1 %v661_v49 }
  0x3c   : > { %877 = vmatprep.subr.mxu0 %v436_v51  ;;  %940 = vmatpush3.msra.mxu1 %v661_v49  ;;  %v659_v51 = vld [vmem:[%s1408_s4 + $0x68] sm:$0xff] }
  0x3d   : > { %878 = vmatpush3.msra.mxu0 %v420_v52  ;;  %941 = vmatprep.subr.mxu1 %v660_v50  ;;  %v658_v52 = vld [vmem:[%s1408_s4 + $0x60] sm:$0xff] }
  0x3e   : > { %879 = vmatprep.subr.mxu0 %v435_v53  ;;  %942 = vmatpush3.msra.mxu1 %v660_v50  ;;  %v657_v53 = vld [vmem:[%s1408_s4 + $0x58] sm:$0xff] }
  0x3f   : > { %880 = vmatpush3.msra.mxu0 %v419_v54  ;;  %943 = vmatprep.subr.mxu1 %v659_v51 }
  0x40   : > { %881 = vmatprep.subr.mxu0 %v434_v55  ;;  %944 = vmatpush3.msra.mxu1 %v659_v51 }
  0x41   : > { %882 = vmatpush3.msra.mxu0 %v418_v56  ;;  %945 = vmatprep.subr.mxu1 %v658_v52 }
  0x42   : > { %883 = vmatprep.subr.mxu0 %v433_v57  ;;  %946 = vmatpush3.msra.mxu1 %v658_v52 }
  0x43   : > { %884 = vmatpush3.msra.mxu0 %v417_v58  ;;  %947 = vmatprep.subr.mxu1 %v657_v53 }
  0x44   : > { %885 = vmatprep.subr.mxu0 %v432_v59  ;;  %948 = vmatpush3.msra.mxu1 %v657_v53  ;;  %v633_v53 = vld [vmem:[%s1405_s1 + $0x18] sm:$0xff] }
  0x45   : > { %886 = vmatpush3.msra.mxu0 %v416_v60 }
  0x46   : > { %887 = vmatprep.subr.mxu0 %v431_v61 }
  0x47   : > { %888 = vmatpush3.msra.mxu0 %v415_v62 }
  0x48   : > { %889 = vmatprep.subr.mxu0 %v430_v63 }
  0x49   : > { %890 = vmatpush3.msra.mxu0 %v414_v0 }
  0x4a   : > { %518 = vmatmul.mubr.f32.vlgmr.msra.gmra.mxu0 %v398_v1 }
  0x4b   : > { %522 = vmatprep.mubr.f32.mxu0 %v401_v2 }
  0x4e   : > { %523 = vmatmul.mubr.f32.gmra.mxu0 %v400_v3 }
  0x4f   : > { %527 = vmatprep.mubr.f32.mxu0 %v403_v4 }
  0x52   : > { %528 = vmatmul.mubr.f32.gmra.mxu0 %v402_v5 }
  0x53   : > { %532 = vmatprep.mubr.f32.mxu0 %v405_v6 }
  0x56   : > { %533 = vmatmul.mubr.f32.gmra.mxu0 %v404_v7 }
  0x57   : > { %537 = vmatprep.mubr.f32.mxu0 %v407_v8 }
  0x5a   : > { %538 = vmatmul.mubr.f32.gmra.mxu0 %v406_v9 }
  0x5b   : > { %542 = vmatprep.mubr.f32.mxu0 %v409_v10 }
  0x5e   : > { %543 = vmatmul.mubr.f32.gmra.mxu0 %v408_v11 }
  0x5f   : > { %547 = vmatprep.mubr.f32.mxu0 %v411_v12 }
  0x62   : > { %548 = vmatmul.mubr.f32.gmra.mxu0 %v410_v13 }
  0x63   : > { %552 = vmatprep.mubr.f32.mxu0 %v413_v14 }
  0x66   : > { %553 = vmatmul.mubr.f32.gmra.mxu0 %v412_v15  ;;  %v656_v15 = vld [vmem:[%s1408_s4 + $0x50] sm:$0xff] }
  0x67   : > { %949 = vmatprep.subr.mxu1 %v656_v15 }
  0x68   : > { %950 = vmatpush3.msra.mxu1 %v656_v15 }
 0x10a   : > { %v891_v16 = vpop.f32.mrf.mxu0 }
 0x10c   : > { %v892_v17 = vpop.f32.mrf.mxu0 }
 0x10d   : > { %v893_v19 = vadd.f32 %v892_v17, %v891_v16  ;;  %v655_v17 = vld [vmem:[%s1408_s4 + $0x48] sm:$0xff] }
 0x10e   : > { %v894_v20 = vpop.f32.mrf.mxu0  ;;  %951 = vmatprep.subr.mxu1 %v655_v17 }
 0x10f   : > { %v520_v21 = vadd.f32 %v893_v19, %v855_v18  ;;  %952 = vmatpush3.msra.mxu1 %v655_v17 }
 0x110   : > { %v895_v22 = vpop.f32.mrf.mxu0 }
 0x111   : > { %v896_v23 = vadd.f32 %v895_v22, %v894_v20  ;;  %558 = vmax.xlane.f32.xlu0 %v520_v21  ;;  %v654_v20 = vld [vmem:[%s1408_s4 + $0x40] sm:$0xff] }
 0x112   : > { %v897_v24 = vpop.f32.mrf.mxu0  ;;  %953 = vmatprep.subr.mxu1 %v654_v20 }
 0x113   : > { %v525_v25 = vadd.f32 %v896_v23, %v855_v18  ;;  %954 = vmatpush3.msra.mxu1 %v654_v20  ;;  %v652_v23 = vld [vmem:[%s1408_s4 + $0x30] sm:$0xff] }
 0x114   : > { %v898_v26 = vpop.f32.mrf.mxu0 }
 0x115   : > { %v899_v27 = vadd.f32 %v898_v26, %v897_v24  ;;  %560 = vmax.xlane.f32.xlu0 %v525_v25  ;;  %v651_v24 = vld [vmem:[%s1408_s4 + $0x28] sm:$0xff]  ;;  %v650_v26 = vld [vmem:[%s1408_s4 + $0x20] sm:$0xff] }
 0x116   : > { %v900_v28 = vpop.f32.mrf.mxu0 }
 0x117   : > { %v530_v29 = vadd.f32 %v899_v27, %v855_v18  ;;  %v649_v27 = vld [vmem:[%s1408_s4 + $0x18] sm:$0xff] }
 0x118   : > { %v901_v30 = vpop.f32.mrf.mxu0 }
 0x119   : > { %v902_v31 = vadd.f32 %v901_v30, %v900_v28  ;;  %562 = vmax.xlane.f32.xlu1 %v530_v29  ;;  %v647_v30 = vld [vmem:[%s1408_s4 + $0x8] sm:$0xff] }
 0x11a   : > { %v903_v32 = vpop.f32.mrf.mxu0 }
 0x11b   : > { %v535_v33 = vadd.f32 %v902_v31, %v855_v18 }
 0x11c   : > { %v904_v34 = vpop.f32.mrf.mxu0 }
 0x11d   : > { %v905_v35 = vadd.f32 %v904_v34, %v903_v32  ;;  %564 = vmax.xlane.f32.xlu1 %v535_v33  ;;  %v646_v32 = vld [vmem:[%s1408_s4] sm:$0xff] }
 0x11e   : > { %v906_v36 = vpop.f32.mrf.mxu0 }
 0x11f   : > { %v540_v37 = vadd.f32 %v905_v35, %v855_v18 }
 0x120   : > { %v907_v38 = vpop.f32.mrf.mxu0 }
 0x121   : > { %v908_v39 = vadd.f32 %v907_v38, %v906_v36  ;;  %566 = vmax.xlane.f32.xlu0 %v540_v37  ;;  %v630_v38 = vld [vmem:[%s1405_s1] sm:$0xff] }
 0x122   : > { %v909_v40 = vpop.f32.mrf.mxu0 }
 0x123   : > { %v545_v41 = vadd.f32 %v908_v39, %v855_v18 }
 0x124   : > { %v910_v42 = vpop.f32.mrf.mxu0 }
 0x125   : > { %v911_v43 = vadd.f32 %v910_v42, %v909_v40  ;;  %568 = vmax.xlane.f32.xlu1 %v545_v41 }
 0x126   : > { %v912_v44 = vpop.f32.mrf.mxu0 }
 0x127   : > { %v550_v45 = vadd.f32 %v911_v43, %v855_v18  ;;  %v631_v43 = vld [vmem:[%s1405_s1 + $0x8] sm:$0xff] }
 0x128   : > { %v913_v46 = vpop.f32.mrf.mxu0 }
 0x129   : > { %v914_v47 = vadd.f32 %v913_v46, %v912_v44  ;;  %570 = vmax.xlane.f32.xlu0 %v550_v45 }
 0x12b   : > { %v555_v48 = vadd.f32 %v914_v47, %v855_v18 }
 0x12d   : > { %572 = vmax.xlane.f32.xlu1 %v555_v48 }
 0x19a   : > { %v559_v54 = vpop.xlane.xlu0 %558 }
 0x19b   : > { %v574_v55 = vsub.f32 %v520_v21, %v559_v54  ;;  %v653_v21 = vld [vmem:[%s1408_s4 + $0x38] sm:$0xff] }
 0x19c   : > { %955 = vmatprep.subr.mxu1 %v653_v21 }
 0x19d   : > { %v582_v56 = vmul.f32 1.442695, %v574_v55  ;;  %956 = vmatpush3.msra.mxu1 %v653_v21 }
 0x19e   : > { %v561_v57 = vpop.xlane.xlu0 %560  ;;  %957 = vmatprep.subr.mxu1 %v652_v23 }
 0x19f   : > { %1007 = vpow2.f32 %v582_v56  ;;  %v575_v58 = vsub.f32 %v525_v25, %v561_v57  ;;  %958 = vmatpush3.msra.mxu1 %v652_v23 }
 0x1a0   : > { %959 = vmatprep.subr.mxu1 %v651_v24 }
 0x1a1   : > { %v584_v59 = vmul.f32 1.442695, %v575_v58  ;;  %960 = vmatpush3.msra.mxu1 %v651_v24  ;;  %v634_v58 = vld [vmem:[%s1405_s1 + $0x20] sm:$0xff] }
 0x1a2   : > { %v563_v60 = vpop.xlane.xlu1 %562  ;;  %961 = vmatprep.subr.mxu1 %v650_v26 }
 0x1a3   : > { %1009 = vpow2.f32 %v584_v59  ;;  %v576_v61 = vsub.f32 %v530_v29, %v563_v60  ;;  %962 = vmatpush3.msra.mxu1 %v650_v26  ;;  %v648_v29 = vld [vmem:[%s1408_s4 + $0x10] sm:$0xff] }
 0x1a4   : > { %963 = vmatprep.subr.mxu1 %v649_v27 }
 0x1a5   : > { %v586_v62 = vmul.f32 1.442695, %v576_v61  ;;  %964 = vmatpush3.msra.mxu1 %v649_v27 }
 0x1a6   : > { %v565_v63 = vpop.xlane.xlu1 %564  ;;  %965 = vmatprep.subr.mxu1 %v648_v29 }
 0x1a7   : > { %1011 = vpow2.f32 %v586_v62  ;;  %v577_v0 = vsub.f32 %v535_v33, %v565_v63  ;;  %966 = vmatpush3.msra.mxu1 %v648_v29  ;;  %v635_v62 = vld [vmem:[%s1405_s1 + $0x28] sm:$0xff] }
 0x1a8   : > { %967 = vmatprep.subr.mxu1 %v647_v30 }
 0x1a9   : > { %v588_v1 = vmul.f32 1.442695, %v577_v0  ;;  %968 = vmatpush3.msra.mxu1 %v647_v30 }
 0x1aa   : > { %v567_v2 = vpop.xlane.xlu0 %566  ;;  %969 = vmatprep.subr.mxu1 %v646_v32 }
 0x1ab   : > { %1013 = vpow2.f32 %v588_v1  ;;  %v578_v3 = vsub.f32 %v540_v37, %v567_v2  ;;  %970 = vmatpush3.msra.mxu1 %v646_v32  ;;  %v636_v2 = vld [vmem:[%s1405_s1 + $0x30] sm:$0xff] }
 0x1ac   : > { %v1305_v4 = vpop.eup %1007 }
 0x1ad   : > { %v590_v5 = vmul.f32 1.442695, %v578_v3  ;;  %598 = vadd.xlane.f32.xlu0 %v1305_v4 }
 0x1ae   : > { %v569_v6 = vpop.xlane.xlu1 %568 }
 0x1af   : > { %1015 = vpow2.f32 %v590_v5  ;;  %v579_v7 = vsub.f32 %v545_v41, %v569_v6  ;;  %v637_v6 = vld [vmem:[%s1405_s1 + $0x38] sm:$0xff] }
 0x1b0   : > { %v1308_v8 = vpop.eup %1009 }
 0x1b1   : > { %v592_v9 = vmul.f32 1.442695, %v579_v7  ;;  %600 = vadd.xlane.f32.xlu1 %v1308_v8 }
 0x1b2   : > { %v571_v10 = vpop.xlane.xlu0 %570 }
 0x1b3   : > { %1017 = vpow2.f32 %v592_v9  ;;  %v580_v11 = vsub.f32 %v550_v45, %v571_v10 }
 0x1b4   : > { %v1311_v12 = vpop.eup %1011 }
 0x1b5   : > { %v594_v13 = vmul.f32 1.442695, %v580_v11  ;;  %602 = vadd.xlane.f32.xlu0 %v1311_v12 }
 0x1b6   : > { %v573_v14 = vpop.xlane.xlu1 %572 }
 0x1b7   : > { %1019 = vpow2.f32 %v594_v13  ;;  %v581_v16 = vsub.f32 %v555_v48, %v573_v14  ;;  %v632_v48 = vld [vmem:[%s1405_s1 + $0x10] sm:$0xff] }
 0x1b8   : > { %v1320_v18 = vpop.eup %1013 }
 0x1b9   : > { %v596_v19 = vmul.f32 1.442695, %v581_v16  ;;  %604 = vadd.xlane.f32.xlu1 %v1320_v18 }
 0x1bb   : > { %1021 = vpow2.f32 %v596_v19 }
 0x1bc   : > { %v1329_v22 = vpop.eup %1015 }
 0x1bd   : > { %606 = vadd.xlane.f32.xlu0 %v1329_v22 }
 0x1c0   : > { %v1338_v25 = vpop.eup %1017 }
 0x1c1   : > { %608 = vadd.xlane.f32.xlu1 %v1338_v25 }
 0x1c4   : > { %v1347_v28 = vpop.eup %1019 }
 0x1c5   : > { %610 = vadd.xlane.f32.xlu0 %v1347_v28 }
 0x1c8   : > { %v1022_v31 = vpop.eup %1021 }
 0x1c9   : > { %612 = vadd.xlane.f32.xlu1 %v1022_v31 }
 0x236   : > { %v599_v33 = vpop.xlane.xlu0 %598 }
 0x237   : > { %1023 = vrcp.f32 %v599_v33 }
 0x23a   : > { %v601_v34 = vpop.xlane.xlu1 %600 }
 0x23b   : > { %1025 = vrcp.f32 %v601_v34 }
 0x23e   : > { %v603_v35 = vpop.xlane.xlu0 %602 }
 0x23f   : > { %1027 = vrcp.f32 %v603_v35 }
 0x242   : > { %v605_v36 = vpop.xlane.xlu1 %604 }
 0x243   : > { %1029 = vrcp.f32 %v605_v36 }
 0x244   : > { %v1024_v37 = vpop.eup %1023 }
 0x245   : > { %v615_v39 = vmul.f32 %v1024_v37, %v1305_v4 }
 0x246   : > { %v607_v40 = vpop.xlane.xlu0 %606 }
 0x247   : > { %1031 = vrcp.f32 %v607_v40  ;;  %v638_v41 = vmul.f32 %v630_v38, %v615_v39 }
 0x248   : > { %v1026_v42 = vpop.eup %1025 }
 0x249   : > { %971 = vmatprep.mubr.f32.mxu1 %v638_v41  ;;  %v617_v44 = vmul.f32 %v1026_v42, %v1308_v8 }
 0x24a   : > { %v609_v45 = vpop.xlane.xlu1 %608 }
 0x24b   : > { %1033 = vrcp.f32 %v609_v45  ;;  %v639_v46 = vmul.f32 %v631_v43, %v617_v44 }
 0x24c   : > { %v1028_v47 = vpop.eup %1027 }
 0x24d   : > { %972 = vmatmul.mubr.f32.vlgmr.msra.gmra.mxu1 %v639_v46  ;;  %v619_v49 = vmul.f32 %v1028_v47, %v1311_v12 }
 0x24e   : > { %v611_v50 = vpop.xlane.xlu0 %610 }
 0x24f   : > { %1035 = vrcp.f32 %v611_v50  ;;  %v640_v51 = vmul.f32 %v632_v48, %v619_v49 }
 0x250   : > { %v1030_v52 = vpop.eup %1029 }
 0x251   : > { %974 = vmatprep.mubr.f32.mxu1 %v640_v51  ;;  %v621_v54 = vmul.f32 %v1030_v52, %v1320_v18 }
 0x252   : > { %v613_v55 = vpop.xlane.xlu1 %612 }
 0x253   : > { %1037 = vrcp.f32 %v613_v55  ;;  %v641_v56 = vmul.f32 %v633_v53, %v621_v54 }
 0x254   : > { %v1032_v57 = vpop.eup %1031 }
 0x255   : > { %975 = vmatmul.mubr.f32.gmra.mxu1 %v641_v56  ;;  %v623_v59 = vmul.f32 %v1032_v57, %v1329_v22 }
 0x257   : > { %v642_v60 = vmul.f32 %v634_v58, %v623_v59 }
 0x258   : > { %v1034_v61 = vpop.eup %1033 }
 0x259   : > { %977 = vmatprep.mubr.f32.mxu1 %v642_v60  ;;  %v625_v63 = vmul.f32 %v1034_v61, %v1338_v25 }
 0x25b   : > { %v643_v0 = vmul.f32 %v635_v62, %v625_v63 }
 0x25c   : > { %v1036_v1 = vpop.eup %1035 }
 0x25d   : > { %978 = vmatmul.mubr.f32.gmra.mxu1 %v643_v0  ;;  %v627_v3 = vmul.f32 %v1036_v1, %v1347_v28 }
 0x25f   : > { %v644_v4 = vmul.f32 %v636_v2, %v627_v3 }
 0x260   : > { %v1038_v5 = vpop.eup %1037 }
 0x261   : > { %980 = vmatprep.mubr.f32.mxu1 %v644_v4  ;;  %v629_v7 = vmul.f32 %v1038_v5, %v1022_v31 }
 0x263   : > { %v645_v8 = vmul.f32 %v637_v6, %v629_v7 }
 0x265   : > { %981 = vmatmul.mubr.f32.gmra.mxu1 %v645_v8 }
 0x30d   : > { %v973_v9 = vpop.f32.mrf.mxu1 }
 0x30e   : > { %768 = vst [vmem:[%s397_s14 + $0x8] sm:$0xff] %v973_v9 }
 0x30f   : > { %v728_v10 = vpop.f32.mrf.mxu1 }
 0x310   : > { %767 = vst [vmem:[%s397_s14] sm:$0xff] %v728_v10 }
 0x315   : > { %v976_v11 = vpop.f32.mrf.mxu1 }
 0x316   : > { %770 = vst [vmem:[%s397_s14 + $0x18] sm:$0xff] %v976_v11 }
 0x317   : > { %v738_v12 = vpop.f32.mrf.mxu1 }
 0x318   : > { %769 = vst [vmem:[%s397_s14 + $0x10] sm:$0xff] %v738_v12 }
 0x31d   : > { %v979_v13 = vpop.f32.mrf.mxu1 }
 0x31e   : > { %772 = vst [vmem:[%s397_s14 + $0x28] sm:$0xff] %v979_v13 }
 0x31f   : > { %v748_v14 = vpop.f32.mrf.mxu1 }
 0x320   : > { %771 = vst [vmem:[%s397_s14 + $0x20] sm:$0xff] %v748_v14 }
 0x325   : > { %v982_v15 = vpop.f32.mrf.mxu1 }
 0x326   : > { %774 = vst [vmem:[%s397_s14 + $0x38] sm:$0xff] %v982_v15 }
 0x327   : > { %v758_v16 = vpop.f32.mrf.mxu1 }
 0x328   : > { %773 = vst [vmem:[%s397_s14 + $0x30] sm:$0xff] %v758_v16 }
 0x329 PF: > { %p12_p9 = scmp.ge.s32.totalorder %s1110_s22, 4   ;;  %s1410_s18 = smov %s1057_s19 }
 0x32a   : > { %s1411_s19 = smov %s1119_s25  ;;  %s1412_s20 = smov %s1110_s22 }
 0x32b   :  { %14 = sbr.rel (!%p12_p9) target bundleno = 2 (0x2), region = 116 }

// kernel: tasnet_forward.7
= control target key start
LH: loop header
LB: loop body
LE: loop exit
PB: predicated region body
PF: predicated region fallthrough
CT: control target
= control target key end

     0   :  { %s4669_s0 = inlined_call_operand.vmem [shape: f32[64,128], index: 0, kind: input, shape index: {}]   ;;  %s4670_s1 = inlined_call_operand.hbm [shape: f32[2,128,512], index: 1, kind: input, shape index: {}]   ;;  %s4671_s2 = inlined_call_operand.hbm [shape: f32[2,128,512], index: 2, kind: input, shape index: {}]   ;;  %s4672_s3 = inlined_call_operand.hbm [shape: f32[2,1,512], index: 3, kind: input, shape index: {}]   ;;  %s4673_s4 = inlined_call_operand.vmem [shape: f32[64,256], index: 4, kind: output, shape index: {}]  }
   0x1   :  { %4739 = sst [smem:[#allocation34_spill]] %s4670_s1 }
   0x2   :  { %4740 = sst [smem:[#allocation35_spill]] %s4671_s2 }
   0x3   :  { %9 = vsyncpa [#allocation6], 0 }
   0x4   :  { %11 = vsyncpa [#allocation6 + $0x1], 0 }
   0x5   :  { %12 = vsyncpa [#allocation8], 0 }
   0x6   :  { %14 = vsyncpa [#allocation8 + $0x1], 0  ;;  %s3298_s15 = smov 0   ;;  %s3300_s16 = smov 0  }
   0x7   :  { %s3302_s17 = smov 0   ;;  %s3304_s18 = smov 0  }
   0x8 LB: > { %4741 = sst [smem:[#allocation13_spill]] %s3261_s17  ;;  %s3317_s19 = sadd.s32 4294967295, %s3265_s18   ;;  %s3265_s18 = sphi %s3304_s18, %s4874_s18   ;;  %s3261_s17 = sphi %s3302_s17, %s4871_s17   ;;  %s3257_s16 = sphi %s3300_s16, %s4873_s16   ;;  %s3253_s15 = sphi %s3298_s15, %s4872_s15  }
   0x9   : > { %s3320_s20 = sadd.s32 1, %s3265_s18   ;;  %s48_s22 = sadd.s32 1, %s3261_s17 }
   0xa   : > { %s45_s21 = ssub.s32 %s3265_s18, %s3320_s20  ;;  %p55_p1 = scmp.ne.s32.totalorder %s3261_s17, %s3257_s16 }
   0xb   : > { %p46_p0 = scmp.eq.s32.totalorder %s45_s21, 0  ;;  %p56_p2 = scmp.eq.s32.totalorder %s3265_s18, 0 }
   0xc   : > { %p61_p3 = scmp.ne.s32.totalorder %s3257_s16, %s3253_s15  ;;  %p62_p5 = scmp.eq.s32.totalorder %s3317_s19, 0 }
   0xd   : > { %s3330_s23 = scalar_select %p46_p0, %s3261_s17, %s48_s22  }
   0xe   : > { %p57_p4 = por %p56_p2, %p55_p1  ;;  %p137_p6 = scmp.eq.s32.totalorder %s3317_s19, 1 }
   0xf   : > { %4742 = sst [smem:[#allocation14_spill]] %s3330_s23  ;;  %p3334_p7 = por %p62_p5, %p61_p3 }
  0x10   : > { %p2979_p8 = scmp.lt.s32.totalorder %s3265_s18, 2  ;;  %p3339_p9 = por %p137_p6, %p55_p1 }
  0x11   : > { %s4743_s24 = scalar_select %p3334_p7, 1, 0 }
  0x12   : > { %s4744_s25 = scalar_select %p3339_p9, 1, 0 }
  0x13   : > { %s3344_s26 = sand.u32 1, %s3261_s17   ;;  %s2952_s28 = sshll.u32 %s3265_s18, 13 }
  0x14   : > { %s2884_s27 = sshll.u32 %s3344_s26, 9  ;;  %p3348_p10 = pnand %p2979_p8, %p57_p4 }
  0x15   : > { %s187_s30 = sand.u32 1, %s3265_s18   ;;  %s4746_s2 = sld [smem:[#allocation35_spill]] }
  0x16   : > { %s191_s8 = scalar_lea.vmem [#allocation7], %s2884_s27  ;;  %s3366_s10 = scalar_lea.sflag [#allocation8], %s187_s30 }
  0x17   : > { %s198_s9 = sshll.u32 %s191_s8, 4  ;;  %p3372_p0 = pneg %p3348_p10  ;;  %s3363_s9 = int_to_ptr.vmem [resolvable:$true] %s198_s9 }
  0x1b   : > { %s3358_s7 = scalar_lea.hbm %s4746_s2, %s2952_s28  ;;  %s3148_s15 = scalar_lea.hbm %s4746_s2, 16384 }
  0x1c   : > { %s3143_s11 = scalar_lea.hbm %s3358_s7, 8192  ;;  %p3149_p3 = scmp.lt.s32.totalorder %s3358_s7, %s4746_s2 }
  0x1d   : > { %p3144_p13 = scmp.ne.s32.totalorder %s3358_s7, %s3143_s11  ;;  %p3150_p4 = scmp.lt.s32.totalorder %s3148_s15, %s3143_s11 }
  0x1f   : > { %p3146_p1 = pnand %p3372_p0, %p3144_p13  ;;  %p3151_p5 = por %p3150_p4, %p3149_p3 }
  0x21   : > { %p3147_p2 = pneg %p3146_p1 }
  0x23   : > { %p3152_p6 = pnand %p3151_p5, %p3147_p2 }
  0x25   : > { %3155 = shalt.err (!%p3152_p6)
}
  0x26   : > { %s3156_s30 = scalar_lea.vmem %s3363_s9, 8192  ;;  %s3267_s5 = smov [#allocation7]  }
  0x27   : > { %p3157_p8 = scmp.ne.s32.totalorder %s3363_s9, %s3156_s30  ;;  %s3161_s6 = sshll.u32 %s3267_s5, 4  ;;  %s3162_s6 = int_to_ptr.vmem [resolvable:$false] %s3161_s6 }
  0x28   : > { %s3163_s8 = scalar_lea.vmem %s3162_s6, 16384  ;;  %p3164_p11 = scmp.lt.s32.totalorder %s3363_s9, %s3162_s6 }
  0x29   : > { %p3159_p13 = pnand %p3157_p8, %p3372_p0  ;;  %p3165_p12 = scmp.lt.s32.totalorder %s3163_s8, %s3156_s30 }
  0x2b   : > { %p3160_p1 = pneg %p3159_p13  ;;  %p3166_p9 = por %p3165_p12, %p3164_p11 }
  0x2d   : > { %p3167_p7 = pnand %p3166_p9, %p3160_p1 }
  0x2f   : > { %3170 = shalt.err (!%p3167_p7)
}
  0x30   : > { %s4675_s11 = smov 512   ;;  %s3269_s13 = smov 32  }
  0x31   : > { %2975 = dma.hbm_to_vmem [thread:$0]  (!%p3348_p10), %s3358_s7, 8192, %s3363_s9, %s3366_s10, %s4675_s11, %s4675_s11, %s3269_s13  }
  0x32   : > { %p4748_p9 = scmp.lt.s32.totalorder %s3265_s18, 3  ;;  %p4749_p7 = scmp.ge.s32.totalorder %s3265_s18, 1 }
  0x33   : > { %s4751_s1 = sld [smem:[#allocation34_spill]]  ;;  %s170_s30 = scalar_lea.vmem [#allocation5], %s2884_s27 }
  0x34   : > { %p3402_p11 = pnand %p4749_p7, %p4748_p9  ;;  %s177_s5 = sshll.u32 %s170_s30, 4  ;;  %s3416_s5 = int_to_ptr.vmem [resolvable:$true] %s177_s5 }
  0x35   : > { %s2890_s6 = sshll.u32 %s3344_s26, 2  ;;  %s167_s7 = scalar_lea.sflag [#allocation6], %s3344_s26 }
  0x36   : > { %s4750_s14 = scalar_select %p3402_p11, 1, 0 }
  0x39   : > { %s3411_s22 = scalar_lea.hbm %s4751_s1, %s2952_s28  ;;  %s3176_s28 = scalar_lea.hbm %s4751_s1, 16384 }
  0x3a   : > { %s3171_s9 = scalar_lea.hbm %s3411_s22, 8192  ;;  %p3177_p4 = scmp.lt.s32.totalorder %s3411_s22, %s4751_s1 }
  0x3b   : > { %p3172_p12 = scmp.ne.s32.totalorder %s3411_s22, %s3171_s9  ;;  %p3178_p5 = scmp.lt.s32.totalorder %s3176_s28, %s3171_s9 }
  0x3d   : > { %p3174_p2 = pnand %p3172_p12, %p3372_p0  ;;  %p3179_p6 = por %p3178_p5, %p3177_p4 }
  0x3f   : > { %p3175_p3 = pneg %p3174_p2 }
  0x41   : > { %p3180_p8 = pnand %p3179_p6, %p3175_p3 }
  0x43   : > { %3183 = shalt.err (!%p3180_p8)
}
  0x44   : > { %s3184_s27 = scalar_lea.vmem %s3416_s5, 8192  ;;  %s3270_s30 = smov [#allocation5]  }
  0x45   : > { %p3185_p13 = scmp.ne.s32.totalorder %s3416_s5, %s3184_s27  ;;  %s3189_s11 = sshll.u32 %s3270_s30, 4  ;;  %s3190_s11 = int_to_ptr.vmem [resolvable:$false] %s3189_s11 }
  0x46   : > { %s3191_s8 = scalar_lea.vmem %s3190_s11, 16384  ;;  %p3192_p7 = scmp.lt.s32.totalorder %s3416_s5, %s3190_s11 }
  0x47   : > { %p3187_p1 = pnand %p3185_p13, %p3372_p0  ;;  %p3193_p12 = scmp.lt.s32.totalorder %s3191_s8, %s3184_s27 }
  0x49   : > { %p3188_p9 = pneg %p3187_p1  ;;  %p3194_p2 = por %p3193_p12, %p3192_p7 }
  0x4b   : > { %p3195_p11 = pnand %p3194_p2, %p3188_p9 }
  0x4d   : > { %3198 = shalt.err (!%p3195_p11)
}
  0x4e   : > { %s4752_s9 = smov 512   ;;  %s2954_s28 = sshll.u32 %s3265_s18, 6 }
  0x4f   : > { %2972 = dma.hbm_to_vmem [thread:$0]  (!%p3348_p10), %s3411_s22, 8192, %s3416_s5, %s167_s7, %s4752_s9, %s4752_s9, %s3269_s13  }
  0x50   : > { %s212_s15 = scalar_lea.vmem [#allocation9], %s2890_s6  ;;  %s218_s11 = scalar_lea.hbm %s4672_s3, %s2954_s28 }
  0x51   : > { %s220_s21 = sshll.u32 %s212_s15, 4  ;;  %s3199_s8 = scalar_lea.hbm %s218_s11, 64  ;;  %s221_s21 = int_to_ptr.vmem [resolvable:$true] %s220_s21 }
  0x52   : > { %p3200_p11 = scmp.ne.s32.totalorder %s218_s11, %s3199_s8  ;;  %s3204_s23 = scalar_lea.hbm %s4672_s3, 128 }
  0x53   : > { %p3205_p5 = scmp.lt.s32.totalorder %s218_s11, %s4672_s3  ;;  %p3206_p6 = scmp.lt.s32.totalorder %s3204_s23, %s3199_s8 }
  0x54   : > { %p3202_p3 = pnand %p3200_p11, %p3372_p0 }
  0x55   : > { %p3207_p8 = por %p3206_p6, %p3205_p5 }
  0x56   : > { %p3203_p4 = pneg %p3202_p3 }
  0x58   : > { %p3208_p13 = pnand %p3207_p8, %p3203_p4 }
  0x5a   : > { %3211 = shalt.err (!%p3208_p13)
}
  0x5b   : > { %s3212_s18 = scalar_lea.vmem %s221_s21, 64  ;;  %s3271_s26 = smov [#allocation9]  }
  0x5c   : > { %p3213_p1 = scmp.ne.s32.totalorder %s221_s21, %s3212_s18  ;;  %s3217_s22 = sshll.u32 %s3271_s26, 4  ;;  %s3218_s22 = int_to_ptr.vmem [resolvable:$false] %s3217_s22 }
  0x5d   : > { %s3219_s5 = scalar_lea.vmem %s3218_s22, 128  ;;  %p3220_p12 = scmp.lt.s32.totalorder %s221_s21, %s3218_s22 }
  0x5e   : > { %p3215_p9 = pnand %p3213_p1, %p3372_p0  ;;  %p3221_p2 = scmp.lt.s32.totalorder %s3219_s5, %s3212_s18 }
  0x60   : > { %p3216_p7 = pneg %p3215_p9  ;;  %p3222_p11 = por %p3221_p2, %p3220_p12 }
  0x62   : > { %p3223_p3 = pnand %p3222_p11, %p3216_p7 }
  0x64   : > { %3226 = shalt.err (!%p3223_p3)
}
  0x65   : > { %2978 = dma.hbm_to_vmem [thread:$0]  (!%p3348_p10), %s218_s11, 64, %s221_s21, %s3366_s10  }
  0x66   : > { %p4753_p4 = scmp.ne.s32.totalorder %s4750_s14, 0 }
  0x68   : > { %229 = sbr.rel (%p4753_p4) target bundleno = 2203 (0x89b), region = 36 }
  0x6d   : > { %s3464_s1 = sand.u32 1, %s3257_s16   ;;  %p4754_p0 = scmp.ne.s32.totalorder %s4743_s24, 0 }
  0x6e   : > { %s2894_s2 = sshll.u32 %s3464_s1, 9  ;;  %s232_s17 = scalar_lea.sflag [#allocation6], %s3464_s1 }
  0x6f   : > { %s3468_s23 = scalar_lea.vmem [#allocation5], %s2894_s2 }
  0x70   : > { %3244 = dma.done.wait (%p4754_p0), %s232_s17, 8192  }
  0x71   : > { %3246 = vsyncadd (%p4754_p0), %s232_s17, 4294959104  ;;  %s240_s29 = sand.u32 1, %s3317_s19   ;;  %s3475_s12 = scalar_lea.vmem [#allocation7], %s2894_s2 }
  0x72   : > { %s241_s10 = scalar_lea.sflag [#allocation8], %s240_s29 }
  0x73   : > { %3248 = dma.done.wait (%p4754_p0), %s241_s10, 8256  }
  0x74   : > { %3250 = vsyncadd (%p4754_p0), %s241_s10, 4294959040  ;;  %v4679_v0 = vmov 0.0   ;;  %v356_v1 = vld [vmem:[%s3468_s23 + $0x1e8] sm:$0xff]  ;;  %v358_v2 = vld [vmem:[%s3468_s23 + $0x1f8] sm:$0xff]  ;;  %s2896_s5 = sshll.u32 %s3464_s1, 2  ;;  %s641_s17 = smul.u32 56, %s3317_s19 }
  0x75   : > { %445 = vmatprep.mubr.f32.mxu0 %v4679_v0  ;;  %558 = vmatprep.mubr.f32.mxu1 %v4679_v0  ;;  %v355_v3 = vld [vmem:[%s3468_s23 + $0x1e0] sm:$0xff]  ;;  %v357_v4 = vld [vmem:[%s3468_s23 + $0x1f0] sm:$0xff]  ;;  %v352_v5 = vld [vmem:[%s3468_s23 + $0x1c8] sm:$0xff]  ;;  %s253_s2 = scalar_lea.vmem [#allocation9], %s2896_s5  ;;  %s2897_s24 = sshll.u32 %s3464_s1, 6 }
  0x76   : > { %381 = vmatprep.subr.mxu0 %v356_v1  ;;  %494 = vmatprep.subr.mxu1 %v358_v2  ;;  %v354_v6 = vld [vmem:[%s3468_s23 + $0x1d8] sm:$0xff]  ;;  %v351_v7 = vld [vmem:[%s3468_s23 + $0x1c0] sm:$0xff]  ;;  %v353_v8 = vld [vmem:[%s3468_s23 + $0x1d0] sm:$0xff]  ;;  %s3961_s14 = scalar_lea.vmem [#allocation10], %s2897_s24  ;;  %s892_s1 = smul.u32 6, %s3317_s19 }
  0x77   : > { %382 = vmatpush1.msra.mxu0 %v355_v3  ;;  %495 = vmatpush1.msra.mxu1 %v357_v4  ;;  %v348_v9 = vld [vmem:[%s3468_s23 + $0x1a8] sm:$0xff]  ;;  %v350_v10 = vld [vmem:[%s3468_s23 + $0x1b8] sm:$0xff]  ;;  %v347_v11 = vld [vmem:[%s3468_s23 + $0x1a0] sm:$0xff]  ;;  %s889_s6 = scalar_lea.vmem %s3961_s14, %s641_s17 [#allocation10]  ;;  %s4032_s7 = ssub.s32 1, %s3317_s19 }
  0x78   : > { %383 = vmatprep.subr.mxu0 %v352_v5  ;;  %496 = vmatprep.subr.mxu1 %v354_v6  ;;  %v349_v12 = vld [vmem:[%s3468_s23 + $0x1b0] sm:$0xff]  ;;  %v344_v13 = vld [vmem:[%s3468_s23 + $0x188] sm:$0xff]  ;;  %v346_v14 = vld [vmem:[%s3468_s23 + $0x198] sm:$0xff]  ;;  %s4035_s9 = sadd.s32 %s892_s1, %s4032_s7  ;;  %s1145_s11 = smul.u32 5, %s3317_s19 }
  0x79   : > { %384 = vmatpush1.msra.mxu0 %v351_v7  ;;  %497 = vmatpush1.msra.mxu1 %v353_v8  ;;  %v343_v15 = vld [vmem:[%s3468_s23 + $0x180] sm:$0xff]  ;;  %v345_v16 = vld [vmem:[%s3468_s23 + $0x190] sm:$0xff]  ;;  %v340_v17 = vld [vmem:[%s3468_s23 + $0x168] sm:$0xff]  ;;  %s2903_s28 = sshll.u32 %s4035_s9, 3  ;;  %s2909_s8 = sshll.u32 %s4032_s7, 1 }
  0x7a   : > { %385 = vmatprep.subr.mxu0 %v348_v9  ;;  %498 = vmatprep.subr.mxu1 %v350_v10  ;;  %v342_v18 = vld [vmem:[%s3468_s23 + $0x178] sm:$0xff]  ;;  %v339_v19 = vld [vmem:[%s3468_s23 + $0x160] sm:$0xff]  ;;  %v341_v20 = vld [vmem:[%s3468_s23 + $0x170] sm:$0xff]  ;;  %s895_s15 = sshra.s32 %s2903_s28, 3  ;;  %s1142_s27 = scalar_lea.vmem %s3961_s14, %s2903_s28 [#allocation10] }
  0x7b   : > { %386 = vmatpush1.msra.mxu0 %v347_v11  ;;  %499 = vmatpush1.msra.mxu1 %v349_v12  ;;  %v336_v21 = vld [vmem:[%s3468_s23 + $0x148] sm:$0xff]  ;;  %v338_v22 = vld [vmem:[%s3468_s23 + $0x158] sm:$0xff]  ;;  %v335_v23 = vld [vmem:[%s3468_s23 + $0x140] sm:$0xff]  ;;  %s2956_s21 = sshll.u32 %s895_s15, 5  ;;  %s4309_s13 = sadd.s32 %s2909_s8, %s1145_s11 }
  0x7c   : > { %387 = vmatprep.subr.mxu0 %v344_v13  ;;  %500 = vmatprep.subr.mxu1 %v346_v14  ;;  %v337_v24 = vld [vmem:[%s3468_s23 + $0x150] sm:$0xff]  ;;  %v332_v25 = vld [vmem:[%s3468_s23 + $0x128] sm:$0xff]  ;;  %v334_v26 = vld [vmem:[%s3468_s23 + $0x138] sm:$0xff]  ;;  %s899_s30 = scalar_lea.vmem [#allocation2], %s2956_s21  ;;  %s2910_s18 = sshll.u32 %s4309_s13, 3 }
  0x7d   : > { %388 = vmatpush1.msra.mxu0 %v343_v15  ;;  %501 = vmatpush1.msra.mxu1 %v345_v16  ;;  %v331_v27 = vld [vmem:[%s3468_s23 + $0x120] sm:$0xff]  ;;  %v333_v28 = vld [vmem:[%s3468_s23 + $0x130] sm:$0xff]  ;;  %v328_v29 = vld [vmem:[%s3468_s23 + $0x108] sm:$0xff]  ;;  %s1148_s26 = sshra.s32 %s2910_s18, 3  ;;  %s1651_s28 = smul.u32 3, %s3317_s19 }
  0x7e   : > { %389 = vmatprep.subr.mxu0 %v340_v17  ;;  %502 = vmatprep.subr.mxu1 %v342_v18  ;;  %v330_v30 = vld [vmem:[%s3468_s23 + $0x118] sm:$0xff]  ;;  %v327_v31 = vld [vmem:[%s3468_s23 + $0x100] sm:$0xff]  ;;  %v329_v32 = vld [vmem:[%s3468_s23 + $0x110] sm:$0xff]  ;;  %s2957_s22 = sshll.u32 %s1148_s26, 5  ;;  %s2923_s15 = sshll.u32 %s4032_s7, 2 }
  0x7f   : > { %390 = vmatpush1.msra.mxu0 %v339_v19  ;;  %503 = vmatpush1.msra.mxu1 %v341_v20  ;;  %v324_v33 = vld [vmem:[%s3468_s23 + $0xe8] sm:$0xff]  ;;  %v326_v34 = vld [vmem:[%s3468_s23 + $0xf8] sm:$0xff]  ;;  %v323_v35 = vld [vmem:[%s3468_s23 + $0xe0] sm:$0xff]  ;;  %s1152_s5 = scalar_lea.vmem [#allocation2], %s2957_s22  ;;  %s4469_s21 = sadd.s32 %s2923_s15, %s1651_s28 }
  0x80   : > { %391 = vmatprep.subr.mxu0 %v336_v21  ;;  %504 = vmatprep.subr.mxu1 %v338_v22  ;;  %v325_v36 = vld [vmem:[%s3468_s23 + $0xf0] sm:$0xff]  ;;  %v320_v37 = vld [vmem:[%s3468_s23 + $0xc8] sm:$0xff]  ;;  %v322_v38 = vld [vmem:[%s3468_s23 + $0xd8] sm:$0xff]  ;;  %s2930_s26 = sshll.u32 %s3317_s19, 1  ;;  %s2408_s15 = smul.u32 56, %s4032_s7 }
  0x81   : > { %392 = vmatpush1.msra.mxu0 %v335_v23  ;;  %505 = vmatpush1.msra.mxu1 %v337_v24  ;;  %v319_v39 = vld [vmem:[%s3468_s23 + $0xc0] sm:$0xff]  ;;  %v321_v40 = vld [vmem:[%s3468_s23 + $0xd0] sm:$0xff]  ;;  %v316_v41 = vld [vmem:[%s3468_s23 + $0xa8] sm:$0xff]  ;;  %p4869_p10 = scmp.ne.s32.totalorder %s4744_s25, 0 }
  0x82   : > { %393 = vmatprep.subr.mxu0 %v332_v25  ;;  %506 = vmatprep.subr.mxu1 %v334_v26  ;;  %v318_v42 = vld [vmem:[%s3468_s23 + $0xb8] sm:$0xff]  ;;  %v315_v43 = vld [vmem:[%s3468_s23 + $0xa0] sm:$0xff]  ;;  %v317_v44 = vld [vmem:[%s3468_s23 + $0xb0] sm:$0xff] }
  0x83   : > { %394 = vmatpush1.msra.mxu0 %v331_v27  ;;  %507 = vmatpush1.msra.mxu1 %v333_v28  ;;  %v312_v45 = vld [vmem:[%s3468_s23 + $0x88] sm:$0xff]  ;;  %v314_v46 = vld [vmem:[%s3468_s23 + $0x98] sm:$0xff]  ;;  %v311_v47 = vld [vmem:[%s3468_s23 + $0x80] sm:$0xff] }
  0x84   : > { %395 = vmatprep.subr.mxu0 %v328_v29  ;;  %508 = vmatprep.subr.mxu1 %v330_v30  ;;  %v313_v48 = vld [vmem:[%s3468_s23 + $0x90] sm:$0xff]  ;;  %v308_v49 = vld [vmem:[%s3468_s23 + $0x68] sm:$0xff]  ;;  %v310_v50 = vld [vmem:[%s3468_s23 + $0x78] sm:$0xff] }
  0x85   : > { %396 = vmatpush1.msra.mxu0 %v327_v31  ;;  %509 = vmatpush1.msra.mxu1 %v329_v32  ;;  %v307_v51 = vld [vmem:[%s3468_s23 + $0x60] sm:$0xff]  ;;  %v309_v52 = vld [vmem:[%s3468_s23 + $0x70] sm:$0xff]  ;;  %v304_v53 = vld [vmem:[%s3468_s23 + $0x48] sm:$0xff] }
  0x86   : > { %397 = vmatprep.subr.mxu0 %v324_v33  ;;  %510 = vmatprep.subr.mxu1 %v326_v34  ;;  %v306_v54 = vld [vmem:[%s3468_s23 + $0x58] sm:$0xff]  ;;  %v303_v55 = vld [vmem:[%s3468_s23 + $0x40] sm:$0xff]  ;;  %v305_v56 = vld [vmem:[%s3468_s23 + $0x50] sm:$0xff] }
  0x87   : > { %398 = vmatpush1.msra.mxu0 %v323_v35  ;;  %511 = vmatpush1.msra.mxu1 %v325_v36  ;;  %v300_v57 = vld [vmem:[%s3468_s23 + $0x28] sm:$0xff]  ;;  %v302_v58 = vld [vmem:[%s3468_s23 + $0x38] sm:$0xff]  ;;  %v299_v59 = vld [vmem:[%s3468_s23 + $0x20] sm:$0xff] }
  0x88   : > { %399 = vmatprep.subr.mxu0 %v320_v37  ;;  %512 = vmatprep.subr.mxu1 %v322_v38  ;;  %v301_v60 = vld [vmem:[%s3468_s23 + $0x30] sm:$0xff]  ;;  %v296_v61 = vld [vmem:[%s3468_s23 + $0x8] sm:$0xff]  ;;  %v298_v62 = vld [vmem:[%s3468_s23 + $0x18] sm:$0xff] }
  0x89   : > { %400 = vmatpush1.msra.mxu0 %v319_v39  ;;  %513 = vmatpush1.msra.mxu1 %v321_v40  ;;  %v295_v63 = vld [vmem:[%s3468_s23] sm:$0xff]  ;;  %v297_v1 = vld [vmem:[%s3468_s23 + $0x10] sm:$0xff]  ;;  %v3551_v3 = vld [vmem:[%s3475_s12 + $0x1e8] sm:$0xff]  ;;  %s642_s23 = sshra.s32 %s641_s17, 3  ;;  %s1397_s17 = smul.u32 3, %s4032_s7 }
  0x8a   : > { %401 = vmatprep.subr.mxu0 %v316_v41  ;;  %514 = vmatprep.subr.mxu1 %v318_v42  ;;  %v287_v2 = vld [vmem:[%s4669_s0] sm:$0xff]  ;;  %v3554_v4 = vld [vmem:[%s3475_s12 + $0x1f8] sm:$0xff]  ;;  %v3560_v6 = vld [vmem:[%s3475_s12 + $0x1f0] sm:$0xff]  ;;  %s2955_s29 = sshll.u32 %s642_s23, 5  ;;  %s2916_s23 = sshll.u32 %s3317_s19, 2 }
  0x8b   : > { %402 = vmatpush1.msra.mxu0 %v315_v43  ;;  %515 = vmatpush1.msra.mxu1 %v317_v44  ;;  %v3557_v5 = vld [vmem:[%s3475_s12 + $0x1e0] sm:$0xff]  ;;  %v288_v7 = vld [vmem:[%s4669_s0 + $0x8] sm:$0xff]  ;;  %v3581_v11 = vld [vmem:[%s3475_s12 + $0x1d8] sm:$0xff]  ;;  %s646_s10 = scalar_lea.vmem [#allocation2], %s2955_s29  ;;  %s4389_s29 = sadd.s32 %s2916_s23, %s1397_s17 }
  0x8c   : > { %403 = vmatprep.subr.mxu0 %v312_v45  ;;  %516 = vmatprep.subr.mxu1 %v314_v46  ;;  %v3569_v8 = vld [vmem:[%s3475_s12 + $0x1c8] sm:$0xff]  ;;  %v3574_v9 = vld [vmem:[%s3475_s12 + $0x1c0] sm:$0xff]  ;;  %v289_v12 = vld [vmem:[%s4669_s0 + $0x10] sm:$0xff] }
  0x8d   : > { %404 = vmatpush1.msra.mxu0 %v311_v47  ;;  %517 = vmatpush1.msra.mxu1 %v313_v48  ;;  %v3578_v10 = vld [vmem:[%s3475_s12 + $0x1a8] sm:$0xff]  ;;  %v3591_v13 = vld [vmem:[%s3475_s12 + $0x1a0] sm:$0xff]  ;;  %v3594_v14 = vld [vmem:[%s3475_s12 + $0x1d0] sm:$0xff] }
  0x8e   : > { %405 = vmatprep.subr.mxu0 %v308_v49  ;;  %518 = vmatprep.subr.mxu1 %v310_v50  ;;  %v3599_v15 = vld [vmem:[%s3475_s12 + $0x188] sm:$0xff]  ;;  %v3602_v16 = vld [vmem:[%s3475_s12 + $0x1b8] sm:$0xff]  ;;  %v3607_v17 = vld [vmem:[%s3475_s12 + $0x180] sm:$0xff] }
  0x8f   : > { %406 = vmatpush1.msra.mxu0 %v307_v51  ;;  %519 = vmatpush1.msra.mxu1 %v309_v52  ;;  %v3610_v18 = vld [vmem:[%s3475_s12 + $0x1b0] sm:$0xff]  ;;  %v290_v19 = vld [vmem:[%s4669_s0 + $0x18] sm:$0xff]  ;;  %v3620_v20 = vld [vmem:[%s3475_s12 + $0x168] sm:$0xff] }
  0x90   : > { %407 = vmatprep.subr.mxu0 %v304_v53  ;;  %520 = vmatprep.subr.mxu1 %v306_v54  ;;  %v3623_v21 = vld [vmem:[%s3475_s12 + $0x198] sm:$0xff]  ;;  %v3628_v22 = vld [vmem:[%s3475_s12 + $0x160] sm:$0xff]  ;;  %v3631_v23 = vld [vmem:[%s3475_s12 + $0x190] sm:$0xff] }
  0x91   : > { %408 = vmatpush1.msra.mxu0 %v303_v55  ;;  %521 = vmatpush1.msra.mxu1 %v305_v56  ;;  %v3634_v24 = vld [vmem:[%s3475_s12 + $0x148] sm:$0xff]  ;;  %v3637_v25 = vld [vmem:[%s3475_s12 + $0x178] sm:$0xff]  ;;  %v3644_v26 = vld [vmem:[%s3475_s12 + $0x140] sm:$0xff] }
  0x92   : > { %409 = vmatprep.subr.mxu0 %v300_v57  ;;  %522 = vmatprep.subr.mxu1 %v302_v58  ;;  %v3647_v27 = vld [vmem:[%s3475_s12 + $0x170] sm:$0xff]  ;;  %v291_v28 = vld [vmem:[%s4669_s0 + $0x20] sm:$0xff]  ;;  %v3657_v29 = vld [vmem:[%s3475_s12 + $0x128] sm:$0xff] }
  0x93   : > { %410 = vmatpush1.msra.mxu0 %v299_v59  ;;  %523 = vmatpush1.msra.mxu1 %v301_v60  ;;  %v3660_v30 = vld [vmem:[%s3475_s12 + $0x158] sm:$0xff]  ;;  %v3665_v31 = vld [vmem:[%s3475_s12 + $0x120] sm:$0xff]  ;;  %v3668_v32 = vld [vmem:[%s3475_s12 + $0x150] sm:$0xff] }
  0x94   : > { %411 = vmatprep.subr.mxu0 %v296_v61  ;;  %524 = vmatprep.subr.mxu1 %v298_v62  ;;  %v3671_v33 = vld [vmem:[%s3475_s12 + $0x108] sm:$0xff]  ;;  %v3674_v34 = vld [vmem:[%s3475_s12 + $0x138] sm:$0xff]  ;;  %v3681_v35 = vld [vmem:[%s3475_s12 + $0x100] sm:$0xff] }
  0x95   : > { %412 = vmatpush1.msra.mxu0 %v295_v63  ;;  %525 = vmatpush1.msra.mxu1 %v297_v1  ;;  %v3684_v36 = vld [vmem:[%s3475_s12 + $0x130] sm:$0xff]  ;;  %v292_v37 = vld [vmem:[%s4669_s0 + $0x28] sm:$0xff]  ;;  %v3697_v39 = vld [vmem:[%s3475_s12 + $0x118] sm:$0xff] }
  0x96   : > { %446 = vmatmul.mubr.f32.vlgmr.msra.gmra.mxu0 %v287_v2  ;;  %559 = vmatmul.mubr.f32.vlgmr.msra.gmra.mxu1 %v287_v2  ;;  %v3694_v38 = vld [vmem:[%s3475_s12 + $0xe8] sm:$0xff]  ;;  %v3702_v40 = vld [vmem:[%s3475_s12 + $0xe0] sm:$0xff]  ;;  %v3705_v41 = vld [vmem:[%s3475_s12 + $0x110] sm:$0xff] }
  0x97   : > { %451 = vmatprep.mubr.f32.mxu0 %v4679_v0  ;;  %564 = vmatprep.mubr.f32.mxu1 %v4679_v0  ;;  %v3708_v42 = vld [vmem:[%s3475_s12 + $0xc8] sm:$0xff]  ;;  %v3711_v43 = vld [vmem:[%s3475_s12 + $0xf8] sm:$0xff]  ;;  %v3718_v44 = vld [vmem:[%s3475_s12 + $0xc0] sm:$0xff] }
  0x98   : > { %716 = vmatprep.subr.mxu0 %v3551_v3  ;;  %787 = vmatprep.subr.mxu1 %v3554_v4  ;;  %v3721_v45 = vld [vmem:[%s3475_s12 + $0xf0] sm:$0xff]  ;;  %v3731_v47 = vld [vmem:[%s3475_s12 + $0xa8] sm:$0xff]  ;;  %v3734_v48 = vld [vmem:[%s3475_s12 + $0xd8] sm:$0xff] }
  0x99   : > { %717 = vmatpush1.msra.mxu0 %v3557_v5  ;;  %788 = vmatpush1.msra.mxu1 %v3560_v6  ;;  %v293_v46 = vld [vmem:[%s4669_s0 + $0x30] sm:$0xff]  ;;  %v3739_v49 = vld [vmem:[%s3475_s12 + $0xa0] sm:$0xff]  ;;  %v3745_v51 = vld [vmem:[%s3475_s12 + $0x88] sm:$0xff] }
  0x9a   : > { %452 = vmatmul.mubr.f32.gmra.mxu0 %v288_v7  ;;  %565 = vmatmul.mubr.f32.gmra.mxu1 %v288_v7  ;;  %v3742_v50 = vld [vmem:[%s3475_s12 + $0xd0] sm:$0xff]  ;;  %v3748_v52 = vld [vmem:[%s3475_s12 + $0xb8] sm:$0xff]  ;;  %v3755_v53 = vld [vmem:[%s3475_s12 + $0x80] sm:$0xff] }
  0x9b   : > { %718 = vmatprep.subr.mxu0 %v3569_v8  ;;  %457 = vmatprep.mubr.f32.mxu0 %v4679_v0  ;;  %v3758_v54 = vld [vmem:[%s3475_s12 + $0xb0] sm:$0xff]  ;;  %v294_v55 = vld [vmem:[%s4669_s0 + $0x38] sm:$0xff]  ;;  %v3768_v56 = vld [vmem:[%s3475_s12 + $0x68] sm:$0xff] }
  0x9c   : > { %570 = vmatprep.mubr.f32.mxu1 %v4679_v0  ;;  %719 = vmatpush1.msra.mxu0 %v3574_v9  ;;  %4755 = vst [vmem:[#allocation15_spill] sm:$0xff] %v3768_v56  ;;  %v3771_v57 = vld [vmem:[%s3475_s12 + $0x98] sm:$0xff]  ;;  %v3776_v58 = vld [vmem:[%s3475_s12 + $0x60] sm:$0xff]  ;;  %v3779_v59 = vld [vmem:[%s3475_s12 + $0x90] sm:$0xff] }
  0x9d   : > { %720 = vmatprep.subr.mxu0 %v3578_v10  ;;  %789 = vmatprep.subr.mxu1 %v3581_v11  ;;  %4756 = vst [vmem:[#allocation16_spill] sm:$0xff] %v3776_v58  ;;  %4757 = vst [vmem:[#allocation17_spill] sm:$0xff] %v3779_v59  ;;  %v3782_v60 = vld [vmem:[%s3475_s12 + $0x48] sm:$0xff]  ;;  %v3785_v61 = vld [vmem:[%s3475_s12 + $0x78] sm:$0xff] }
  0x9e   : > { %458 = vmatmul.mubr.f32.gmra.mxu0 %v289_v12  ;;  %571 = vmatmul.mubr.f32.gmra.mxu1 %v289_v12  ;;  %4758 = vst [vmem:[#allocation18_spill] sm:$0xff] %v3782_v60  ;;  %4759 = vst [vmem:[#allocation19_spill] sm:$0xff] %v3785_v61  ;;  %v3790_v62 = vld [vmem:[%s3475_s12 + $0x40] sm:$0xff]  ;;  %v3793_v63 = vld [vmem:[%s3475_s12 + $0x70] sm:$0xff] }
  0x9f   : > { %721 = vmatpush1.msra.mxu0 %v3591_v13  ;;  %790 = vmatpush1.msra.mxu1 %v3594_v14  ;;  %4760 = vst [vmem:[#allocation20_spill] sm:$0xff] %v3790_v62  ;;  %4761 = vst [vmem:[#allocation21_spill] sm:$0xff] %v3793_v63  ;;  %v3798_v1 = vld [vmem:[%s3475_s12 + $0x28] sm:$0xff]  ;;  %v3801_v2 = vld [vmem:[%s3475_s12 + $0x58] sm:$0xff] }
  0xa0   : > { %722 = vmatprep.subr.mxu0 %v3599_v15  ;;  %791 = vmatprep.subr.mxu1 %v3602_v16  ;;  %4762 = vst [vmem:[#allocation22_spill] sm:$0xff] %v3798_v1  ;;  %4763 = vst [vmem:[#allocation23_spill] sm:$0xff] %v3801_v2  ;;  %v3806_v7 = vld [vmem:[%s3475_s12 + $0x20] sm:$0xff]  ;;  %v3809_v12 = vld [vmem:[%s3475_s12 + $0x50] sm:$0xff] }
  0xa1   : > { %463 = vmatprep.mubr.f32.mxu0 %v4679_v0  ;;  %576 = vmatprep.mubr.f32.mxu1 %v4679_v0  ;;  %4764 = vst [vmem:[#allocation24_spill] sm:$0xff] %v3806_v7  ;;  %4765 = vst [vmem:[#allocation25_spill] sm:$0xff] %v3809_v12 }
  0xa2   : > { %723 = vmatpush1.msra.mxu0 %v3607_v17  ;;  %792 = vmatpush1.msra.mxu1 %v3610_v18 }
  0xa3   : > { %464 = vmatmul.mubr.f32.gmra.mxu0 %v290_v19  ;;  %577 = vmatmul.mubr.f32.gmra.mxu1 %v290_v19  ;;  %v3814_v19 = vld [vmem:[%s3475_s12 + $0x8] sm:$0xff] }
  0xa4   : > { %724 = vmatprep.subr.mxu0 %v3620_v20  ;;  %793 = vmatprep.subr.mxu1 %v3623_v21  ;;  %4766 = vst [vmem:[#allocation26_spill] sm:$0xff] %v3814_v19 }
  0xa5   : > { %725 = vmatpush1.msra.mxu0 %v3628_v22  ;;  %794 = vmatpush1.msra.mxu1 %v3631_v23 }
  0xa6   : > { %726 = vmatprep.subr.mxu0 %v3634_v24  ;;  %795 = vmatprep.subr.mxu1 %v3637_v25 }
  0xa7   : > { %469 = vmatprep.mubr.f32.mxu0 %v4679_v0  ;;  %582 = vmatprep.mubr.f32.mxu1 %v4679_v0 }
  0xa8   : > { %727 = vmatpush1.msra.mxu0 %v3644_v26  ;;  %796 = vmatpush1.msra.mxu1 %v3647_v27 }
  0xa9   : > { %470 = vmatmul.mubr.f32.gmra.mxu0 %v291_v28  ;;  %583 = vmatmul.mubr.f32.gmra.mxu1 %v291_v28  ;;  %v3817_v28 = vld [vmem:[%s3475_s12 + $0x38] sm:$0xff] }
  0xaa   : > { %728 = vmatprep.subr.mxu0 %v3657_v29  ;;  %797 = vmatprep.subr.mxu1 %v3660_v30  ;;  %4767 = vst [vmem:[#allocation27_spill] sm:$0xff] %v3817_v28 }
  0xab   : > { %729 = vmatpush1.msra.mxu0 %v3665_v31  ;;  %798 = vmatpush1.msra.mxu1 %v3668_v32 }
  0xac   : > { %730 = vmatprep.subr.mxu0 %v3671_v33  ;;  %799 = vmatprep.subr.mxu1 %v3674_v34 }
  0xad   : > { %475 = vmatprep.mubr.f32.mxu0 %v4679_v0  ;;  %588 = vmatprep.mubr.f32.mxu1 %v4679_v0 }
  0xae   : > { %731 = vmatpush1.msra.mxu0 %v3681_v35  ;;  %800 = vmatpush1.msra.mxu1 %v3684_v36 }
  0xaf   : > { %476 = vmatmul.mubr.f32.gmra.mxu0 %v292_v37  ;;  %589 = vmatmul.mubr.f32.gmra.mxu1 %v292_v37  ;;  %v3822_v37 = vld [vmem:[%s3475_s12] sm:$0xff] }
  0xb0   : > { %732 = vmatprep.subr.mxu0 %v3694_v38  ;;  %801 = vmatprep.subr.mxu1 %v3697_v39  ;;  %4768 = vst [vmem:[#allocation28_spill] sm:$0xff] %v3822_v37 }
  0xb1   : > { %733 = vmatpush1.msra.mxu0 %v3702_v40  ;;  %802 = vmatpush1.msra.mxu1 %v3705_v41 }
  0xb2   : > { %734 = vmatprep.subr.mxu0 %v3708_v42  ;;  %803 = vmatprep.subr.mxu1 %v3711_v43 }
  0xb3   : > { %481 = vmatprep.mubr.f32.mxu0 %v4679_v0  ;;  %594 = vmatprep.mubr.f32.mxu1 %v4679_v0 }
  0xb4   : > { %735 = vmatpush1.msra.mxu0 %v3718_v44  ;;  %804 = vmatpush1.msra.mxu1 %v3721_v45 }
  0xb5   : > { %482 = vmatmul.mubr.f32.gmra.mxu0 %v293_v46  ;;  %595 = vmatmul.mubr.f32.gmra.mxu1 %v293_v46  ;;  %v3827_v46 = vld [vmem:[%s3475_s12 + $0x30] sm:$0xff] }
  0xb6   : > { %736 = vmatprep.subr.mxu0 %v3731_v47  ;;  %805 = vmatprep.subr.mxu1 %v3734_v48  ;;  %4769 = vst [vmem:[#allocation29_spill] sm:$0xff] %v3827_v46 }
  0xb7   : > { %737 = vmatpush1.msra.mxu0 %v3739_v49  ;;  %806 = vmatpush1.msra.mxu1 %v3742_v50 }
  0xb8   : > { %738 = vmatprep.subr.mxu0 %v3745_v51  ;;  %807 = vmatprep.subr.mxu1 %v3748_v52 }
  0xb9   : > { %487 = vmatprep.mubr.f32.mxu0 %v4679_v0  ;;  %600 = vmatprep.mubr.f32.mxu1 %v4679_v0 }
  0xba   : > { %739 = vmatpush1.msra.mxu0 %v3755_v53  ;;  %808 = vmatpush1.msra.mxu1 %v3758_v54 }
  0xbb   : > { %488 = vmatmul.mubr.f32.gmra.mxu0 %v294_v55  ;;  %601 = vmatmul.mubr.f32.gmra.mxu1 %v294_v55  ;;  %v3832_v55 = vld [vmem:[%s3475_s12 + $0x18] sm:$0xff] }
  0xbc   : > { %740 = vmatprep.subr.mxu0 %v3768_v56  ;;  %809 = vmatprep.subr.mxu1 %v3771_v57  ;;  %4770 = vst [vmem:[#allocation30_spill] sm:$0xff] %v3832_v55 }
  0xbd   : > { %741 = vmatpush1.msra.mxu0 %v3776_v58  ;;  %810 = vmatpush1.msra.mxu1 %v3779_v59 }
  0xbe   : > { %742 = vmatprep.subr.mxu0 %v3782_v60  ;;  %811 = vmatprep.subr.mxu1 %v3785_v61 }
  0xbf   : > { %743 = vmatpush1.msra.mxu0 %v3790_v62  ;;  %812 = vmatpush1.msra.mxu1 %v3793_v63 }
  0xc0   : > { %744 = vmatprep.subr.mxu0 %v3798_v1  ;;  %813 = vmatprep.subr.mxu1 %v3801_v2  ;;  %v3837_v1 = vld [vmem:[%s3475_s12 + $0x10] sm:$0xff] }
  0xc1   : > { %745 = vmatpush1.msra.mxu0 %v3806_v7  ;;  %814 = vmatpush1.msra.mxu1 %v3809_v12  ;;  %4771 = vst [vmem:[#allocation31_spill] sm:$0xff] %v3837_v1 }
  0xc2   : > { %746 = vmatprep.subr.mxu0 %v3814_v19  ;;  %815 = vmatprep.subr.mxu1 %v3817_v28 }
  0xc3   : > { %747 = vmatpush1.msra.mxu0 %v3822_v37  ;;  %780 = vmatprep.mubr.f32.mxu0 %v4679_v0 }
  0xc4   : > { %816 = vmatpush1.msra.mxu1 %v3827_v46  ;;  %781 = vmatmul.mubr.f32.vlgmr.msra.gmra.mxu0 %v4679_v0 }
  0xc5   : > { %817 = vmatprep.subr.mxu1 %v3832_v55  ;;  %851 = vmatprep.mubr.f32.mxu1 %v4679_v0 }
  0xc6   : > { %818 = vmatpush1.msra.mxu1 %v3837_v1  ;;  %969 = vmatprep.subr.mxu0 %v3551_v3 }
  0xc7   : > { %852 = vmatmul.mubr.f32.vlgmr.msra.gmra.mxu1 %v4679_v0  ;;  %1040 = vmatprep.subr.mxu1 %v3554_v4  ;;  %v4772_v0 = vld [vmem:[#allocation22_spill] sm:$0xff] }
  0xc8   : > { %970 = vmatpush1.msra.mxu0 %v3557_v5  ;;  %1041 = vmatpush1.msra.mxu1 %v3560_v6 }
  0xc9   : > { %971 = vmatprep.subr.mxu0 %v3569_v8  ;;  %1042 = vmatprep.subr.mxu1 %v3581_v11 }
  0xca   : > { %972 = vmatpush1.msra.mxu0 %v3574_v9  ;;  %1043 = vmatpush1.msra.mxu1 %v3594_v14 }
  0xcb   : > { %973 = vmatprep.subr.mxu0 %v3578_v10  ;;  %1044 = vmatprep.subr.mxu1 %v3602_v16 }
  0xcc   : > { %974 = vmatpush1.msra.mxu0 %v3591_v13  ;;  %1045 = vmatpush1.msra.mxu1 %v3610_v18 }
  0xcd   : > { %975 = vmatprep.subr.mxu0 %v3599_v15  ;;  %1046 = vmatprep.subr.mxu1 %v3623_v21 }
  0xce   : > { %976 = vmatpush1.msra.mxu0 %v3607_v17  ;;  %1047 = vmatpush1.msra.mxu1 %v3631_v23 }
  0xcf   : > { %977 = vmatprep.subr.mxu0 %v3620_v20  ;;  %1048 = vmatprep.subr.mxu1 %v3637_v25 }
  0xd0   : > { %978 = vmatpush1.msra.mxu0 %v3628_v22  ;;  %1049 = vmatpush1.msra.mxu1 %v3647_v27 }
  0xd1   : > { %979 = vmatprep.subr.mxu0 %v3634_v24  ;;  %1050 = vmatprep.subr.mxu1 %v3660_v30 }
  0xd2   : > { %980 = vmatpush1.msra.mxu0 %v3644_v26  ;;  %1051 = vmatpush1.msra.mxu1 %v3668_v32 }
  0xd3   : > { %981 = vmatprep.subr.mxu0 %v3657_v29  ;;  %1052 = vmatprep.subr.mxu1 %v3674_v34 }
  0xd4   : > { %982 = vmatpush1.msra.mxu0 %v3665_v31  ;;  %1053 = vmatpush1.msra.mxu1 %v3684_v36 }
  0xd5   : > { %983 = vmatprep.subr.mxu0 %v3671_v33  ;;  %1054 = vmatprep.subr.mxu1 %v3697_v39 }
  0xd6   : > { %984 = vmatpush1.msra.mxu0 %v3681_v35  ;;  %1055 = vmatpush1.msra.mxu1 %v3705_v41 }
  0xd7   : > { %985 = vmatprep.subr.mxu0 %v3694_v38  ;;  %1056 = vmatprep.subr.mxu1 %v3711_v43 }
  0xd8   : > { %986 = vmatpush1.msra.mxu0 %v3702_v40  ;;  %1057 = vmatpush1.msra.mxu1 %v3721_v45 }
  0xd9   : > { %987 = vmatprep.subr.mxu0 %v3708_v42  ;;  %1058 = vmatprep.subr.mxu1 %v3734_v48 }
  0xda   : > { %988 = vmatpush1.msra.mxu0 %v3718_v44  ;;  %1059 = vmatpush1.msra.mxu1 %v3742_v50 }
  0xdb   : > { %989 = vmatprep.subr.mxu0 %v3731_v47  ;;  %1060 = vmatprep.subr.mxu1 %v3748_v52 }
  0xdc   : > { %990 = vmatpush1.msra.mxu0 %v3739_v49  ;;  %1061 = vmatpush1.msra.mxu1 %v3758_v54 }
  0xdd   : > { %991 = vmatprep.subr.mxu0 %v3745_v51  ;;  %1062 = vmatprep.subr.mxu1 %v3771_v57 }
  0xde   : > { %992 = vmatpush1.msra.mxu0 %v3755_v53  ;;  %1063 = vmatpush1.msra.mxu1 %v3779_v59 }
  0xdf   : > { %993 = vmatprep.subr.mxu0 %v3768_v56  ;;  %1064 = vmatprep.subr.mxu1 %v3785_v61 }
  0xe0   : > { %994 = vmatpush1.msra.mxu0 %v3776_v58  ;;  %1065 = vmatpush1.msra.mxu1 %v3793_v63 }
  0xe1   : > { %995 = vmatprep.subr.mxu0 %v3782_v60  ;;  %1066 = vmatprep.subr.mxu1 %v3801_v2  ;;  %v4773_v2 = vmov 0.0  }
  0xe2   : > { %996 = vmatpush1.msra.mxu0 %v3790_v62  ;;  %1067 = vmatpush1.msra.mxu1 %v3809_v12 }
  0xe3   : > { %997 = vmatprep.subr.mxu0 %v4772_v0  ;;  %1068 = vmatprep.subr.mxu1 %v3817_v28  ;;  %v361_v28 = vlaneseq }
  0xe4   : > { %998 = vmatpush1.msra.mxu0 %v3806_v7  ;;  %1069 = vmatpush1.msra.mxu1 %v3827_v46 }
  0xe5   : > { %999 = vmatprep.subr.mxu0 %v3814_v19  ;;  %1070 = vmatprep.subr.mxu1 %v3832_v55  ;;  %v362_v7 = vshrl.u32 %v361_v28, 7  ;;  %v359_v19 = vld [vmem:[%s253_s2] sm:$0xf]  ;;  %s1395_s2 = scalar_lea.vmem %s3961_s14, %s2910_s18 [#allocation10]  ;;  %s1903_s18 = smul.u32 5, %s4032_s7 }
  0xe6   : > { %1000 = vmatpush1.msra.mxu0 %v3822_v37  ;;  %1033 = vmatprep.mubr.f32.mxu0 %v4773_v2 }
  0xe7   : > { %1071 = vmatpush1.msra.mxu1 %v3837_v1  ;;  %1104 = vmatprep.mubr.f32.mxu1 %v4773_v2  ;;  %v363_v46 = vsub.s32 0, %v362_v7  ;;  %v371_v0 = vsub.s32 2, %v362_v7  ;;  %v367_v55 = vsub.s32 1, %v362_v7  ;;  %v375_v12 = vsub.s32 3, %v362_v7  ;;  %s4547_s22 = sadd.s32 %s2930_s26, %s1903_s18 }
  0xe8   : > { %1222 = vmatprep.subr.mxu0 %v3551_v3  ;;  %1293 = vmatprep.subr.mxu1 %v3554_v4 }
  0xe9   : > { %v3914_v37 = vrot.slane %v359_v19, %v363_v46  ;;  %v3916_v62 = vrot.slane %v359_v19, %v371_v0  ;;  %v3918_v1 = vrot.slane %v359_v19, %v367_v55  ;;  %v3920_v2 = vrot.slane %v359_v19, %v375_v12 }
 0x156   : > { %v447_v3 = vpop.f32.mrf.mxu0  ;;  %v560_v60 = vpop.f32.mrf.mxu1 }
 0x157   : > { %v448_v4 = vadd.f32 %v447_v3, %v3914_v37  ;;  %v561_v28 = vadd.f32 %v560_v60, %v3916_v62 }
 0x158   : > { %v449_v63 = vpop.f32.mrf.mxu0  ;;  %v562_v58 = vpop.f32.mrf.mxu1 }
 0x159   : > { %607 = vst [vmem:[#allocation2] sm:$0xff] %v448_v4  ;;  %609 = vst [vmem:[#allocation2 + $0x10] sm:$0xff] %v561_v28  ;;  %v450_v7 = vadd.f32 %v449_v63, %v3918_v1  ;;  %v563_v46 = vadd.f32 %v562_v58, %v3920_v2 }
 0x15a   : > { %v453_v0 = vpop.f32.mrf.mxu0  ;;  %v566_v61 = vpop.f32.mrf.mxu1 }
 0x15b   : > { %608 = vst [vmem:[#allocation2 + $0x8] sm:$0xff] %v450_v7  ;;  %610 = vst [vmem:[#allocation2 + $0x18] sm:$0xff] %v563_v46  ;;  %v454_v12 = vadd.f32 %v453_v0, %v3914_v37  ;;  %v567_v19 = vadd.f32 %v566_v61, %v3916_v62 }
 0x15c   : > { %v455_v55 = vpop.f32.mrf.mxu0  ;;  %v568_v3 = vpop.f32.mrf.mxu1 }
 0x15d   : > { %611 = vst [vmem:[#allocation2 + $0x20] sm:$0xff] %v454_v12  ;;  %613 = vst [vmem:[#allocation2 + $0x30] sm:$0xff] %v567_v19  ;;  %v456_v60 = vadd.f32 %v455_v55, %v3918_v1  ;;  %v569_v4 = vadd.f32 %v568_v3, %v3920_v2 }
 0x15e   : > { %v459_v28 = vpop.f32.mrf.mxu0  ;;  %v572_v63 = vpop.f32.mrf.mxu1 }
 0x15f   : > { %612 = vst [vmem:[#allocation2 + $0x28] sm:$0xff] %v456_v60  ;;  %614 = vst [vmem:[#allocation2 + $0x38] sm:$0xff] %v569_v4  ;;  %v460_v58 = vadd.f32 %v459_v28, %v3914_v37  ;;  %v573_v7 = vadd.f32 %v572_v63, %v3916_v62 }
 0x160   : > { %v461_v46 = vpop.f32.mrf.mxu0  ;;  %v574_v0 = vpop.f32.mrf.mxu1 }
 0x161   : > { %615 = vst [vmem:[#allocation2 + $0x40] sm:$0xff] %v460_v58  ;;  %617 = vst [vmem:[#allocation2 + $0x50] sm:$0xff] %v573_v7  ;;  %v462_v61 = vadd.f32 %v461_v46, %v3918_v1  ;;  %v575_v12 = vadd.f32 %v574_v0, %v3920_v2 }
 0x163   : > { %616 = vst [vmem:[#allocation2 + $0x48] sm:$0xff] %v462_v61  ;;  %618 = vst [vmem:[#allocation2 + $0x58] sm:$0xff] %v575_v12  ;;  %v465_v19 = vpop.f32.mrf.mxu0  ;;  %v578_v55 = vpop.f32.mrf.mxu1 }
 0x164   : > { %v466_v3 = vadd.f32 %v465_v19, %v3914_v37  ;;  %v579_v60 = vadd.f32 %v578_v55, %v3916_v62 }
 0x165   : > { %v467_v4 = vpop.f32.mrf.mxu0  ;;  %v580_v28 = vpop.f32.mrf.mxu1 }
 0x166   : > { %619 = vst [vmem:[#allocation2 + $0x60] sm:$0xff] %v466_v3  ;;  %621 = vst [vmem:[#allocation2 + $0x70] sm:$0xff] %v579_v60  ;;  %v468_v63 = vadd.f32 %v467_v4, %v3918_v1  ;;  %v581_v58 = vadd.f32 %v580_v28, %v3920_v2 }
 0x168   : > { %620 = vst [vmem:[#allocation2 + $0x68] sm:$0xff] %v468_v63  ;;  %622 = vst [vmem:[#allocation2 + $0x78] sm:$0xff] %v581_v58 }
 0x169   : > { %v471_v7 = vpop.f32.mrf.mxu0  ;;  %v584_v46 = vpop.f32.mrf.mxu1 }
 0x16a   : > { %v472_v0 = vadd.f32 %v471_v7, %v3914_v37  ;;  %v585_v61 = vadd.f32 %v584_v46, %v3916_v62 }
 0x16b   : > { %v473_v12 = vpop.f32.mrf.mxu0  ;;  %v586_v19 = vpop.f32.mrf.mxu1 }
 0x16c   : > { %623 = vst [vmem:[#allocation2 + $0x80] sm:$0xff] %v472_v0  ;;  %625 = vst [vmem:[#allocation2 + $0x90] sm:$0xff] %v585_v61  ;;  %v474_v55 = vadd.f32 %v473_v12, %v3918_v1  ;;  %v587_v3 = vadd.f32 %v586_v19, %v3920_v2 }
 0x16e   : > { %624 = vst [vmem:[#allocation2 + $0x88] sm:$0xff] %v474_v55  ;;  %626 = vst [vmem:[#allocation2 + $0x98] sm:$0xff] %v587_v3 }
 0x16f   : > { %v477_v60 = vpop.f32.mrf.mxu0  ;;  %v590_v4 = vpop.f32.mrf.mxu1 }
 0x170   : > { %v478_v28 = vadd.f32 %v477_v60, %v3914_v37  ;;  %v591_v63 = vadd.f32 %v590_v4, %v3916_v62 }
 0x171   : > { %v479_v58 = vpop.f32.mrf.mxu0  ;;  %v592_v7 = vpop.f32.mrf.mxu1 }
 0x172   : > { %627 = vst [vmem:[#allocation2 + $0xa0] sm:$0xff] %v478_v28  ;;  %629 = vst [vmem:[#allocation2 + $0xb0] sm:$0xff] %v591_v63  ;;  %v480_v46 = vadd.f32 %v479_v58, %v3918_v1  ;;  %v593_v0 = vadd.f32 %v592_v7, %v3920_v2 }
 0x174   : > { %628 = vst [vmem:[#allocation2 + $0xa8] sm:$0xff] %v480_v46  ;;  %630 = vst [vmem:[#allocation2 + $0xb8] sm:$0xff] %v593_v0 }
 0x175   : > { %v483_v61 = vpop.f32.mrf.mxu0  ;;  %v596_v12 = vpop.f32.mrf.mxu1 }
 0x176   : > { %v484_v19 = vadd.f32 %v483_v61, %v3914_v37  ;;  %v597_v55 = vadd.f32 %v596_v12, %v3916_v62 }
 0x177   : > { %v485_v3 = vpop.f32.mrf.mxu0  ;;  %v598_v60 = vpop.f32.mrf.mxu1 }
 0x178   : > { %631 = vst [vmem:[#allocation2 + $0xc0] sm:$0xff] %v484_v19  ;;  %633 = vst [vmem:[#allocation2 + $0xd0] sm:$0xff] %v597_v55  ;;  %v486_v4 = vadd.f32 %v485_v3, %v3918_v1  ;;  %v599_v28 = vadd.f32 %v598_v60, %v3920_v2 }
 0x17a   : > { %632 = vst [vmem:[#allocation2 + $0xc8] sm:$0xff] %v486_v4  ;;  %634 = vst [vmem:[#allocation2 + $0xd8] sm:$0xff] %v599_v28 }
 0x17b   : > { %v489_v63 = vpop.f32.mrf.mxu0  ;;  %v602_v58 = vpop.f32.mrf.mxu1 }
 0x17c   : > { %v490_v7 = vadd.f32 %v489_v63, %v3914_v37  ;;  %v603_v46 = vadd.f32 %v602_v58, %v3916_v62 }
 0x17d   : > { %v491_v0 = vpop.f32.mrf.mxu0  ;;  %v604_v61 = vpop.f32.mrf.mxu1 }
 0x17e   : > { %635 = vst [vmem:[#allocation2 + $0xe0] sm:$0xff] %v490_v7  ;;  %637 = vst [vmem:[#allocation2 + $0xf0] sm:$0xff] %v603_v46  ;;  %v492_v12 = vadd.f32 %v491_v0, %v3918_v1  ;;  %v605_v19 = vadd.f32 %v604_v61, %v3920_v2 }
 0x180   : > { %636 = vst [vmem:[#allocation2 + $0xe8] sm:$0xff] %v492_v12  ;;  %638 = vst [vmem:[#allocation2 + $0xf8] sm:$0xff] %v605_v19 }
 0x184   : > { %v782_v55 = vpop.f32.mrf.mxu0 }
 0x186   : > { %v784_v37 = vpop.f32.mrf.mxu0 }
 0x187   : > { %v647_v3 = vld [vmem:[%s646_s10] sm:$0xff]  ;;  %v648_v60 = vld [vmem:[%s646_s10 + $0x8] sm:$0xff]  ;;  %v649_v58 = vld [vmem:[%s646_s10 + $0x10] sm:$0xff]  ;;  %v853_v1 = vpop.f32.mrf.mxu1 }
 0x188   : > { %v858_v4 = vadd.f32 %v782_v55, %v647_v3  ;;  %v859_v62 = vadd.f32 %v784_v37, %v648_v60  ;;  %v860_v7 = vadd.f32 %v853_v1, %v649_v58  ;;  %v650_v2 = vld [vmem:[%s646_s10 + $0x18] sm:$0xff]  ;;  %s2917_s10 = sshll.u32 %s4389_s29, 3 }
 0x189   : > { %v855_v46 = vpop.f32.mrf.mxu1  ;;  %s1401_s24 = sshra.s32 %s2917_s10, 3  ;;  %s1648_s9 = scalar_lea.vmem %s3961_s14, %s2917_s10 [#allocation10] }
 0x18a   : > { %v2900_v28 = vmul.f32 -1.442695, %v858_v4  ;;  %v2901_v63 = vmul.f32 -1.442695, %v859_v62  ;;  %v2902_v0 = vmul.f32 -1.442695, %v860_v7  ;;  %v861_v61 = vadd.f32 %v855_v46, %v650_v2 }
 0x18b   : > { %v4050_v46 = vld [vmem:[%s3475_s12 + $0x1e8] sm:$0xff]  ;;  %s2156_s10 = smul.u32 6, %s4032_s7 }
 0x18c   : > { %3015 = vpow2.f32 %v2900_v28 }
 0x18d   : > { %3017 = vpow2.f32 %v2901_v63 }
 0x18e   : > { %3019 = vpow2.f32 %v2902_v0  ;;  %v4053_v0 = vld [vmem:[%s3475_s12 + $0x1f8] sm:$0xff] }
 0x18f   : > { %3021 = vtanh.f32 %v861_v61  ;;  %v4058_v61 = vld [vmem:[%s3475_s12 + $0x1e0] sm:$0xff] }
 0x199   : > { %v3016_v12 = vpop.eup %3015 }
 0x19a   : > { %v3018_v19 = vpop.eup %3017  ;;  %v871_v56 = vadd.f32 1.0, %v3016_v12  ;;  %v4061_v12 = vld [vmem:[%s3475_s12 + $0x1f0] sm:$0xff] }
 0x19b   : > { %v872_v59 = vadd.f32 1.0, %v3018_v19  ;;  %v3020_v55 = vpop.eup %3019  ;;  %v4066_v19 = vld [vmem:[%s3475_s12 + $0x1c8] sm:$0xff] }
 0x19c   : > { %3023 = vrcp.f32 %v871_v56  ;;  %v3022_v3 = vpop.eup %3021  ;;  %v873_v4 = vadd.f32 1.0, %v3020_v55  ;;  %v4069_v55 = vld [vmem:[%s3475_s12 + $0x1d8] sm:$0xff] }
 0x19d   : > { %3025 = vrcp.f32 %v872_v59 }
 0x19e   : > { %3027 = vrcp.f32 %v873_v4  ;;  %v4085_v4 = vld [vmem:[%s3475_s12 + $0x1b8] sm:$0xff] }
 0x1a9   : > { %v3024_v60 = vpop.eup %3023 }
 0x1aa   : > { %v3026_v37 = vpop.eup %3025  ;;  %v883_v62 = vmul.f32 %v3024_v60, %v3022_v3  ;;  %v4074_v3 = vld [vmem:[%s3475_s12 + $0x1c0] sm:$0xff]  ;;  %v4077_v60 = vld [vmem:[%s3475_s12 + $0x1d0] sm:$0xff] }
 0x1ab   : > { %v882_v28 = vmul.f32 0.0, %v3026_v37  ;;  %v3028_v58 = vpop.eup %3027  ;;  %v4082_v37 = vld [vmem:[%s3475_s12 + $0x1a8] sm:$0xff] }
 0x1ad   : > { %v3957_v63 = vadd.f32 %v883_v62, %v882_v28  ;;  %v4090_v62 = vld [vmem:[%s3475_s12 + $0x1a0] sm:$0xff]  ;;  %v4093_v28 = vld [vmem:[%s3475_s12 + $0x1b0] sm:$0xff] }
 0x1af   : > { %3029 = vtanh.f32 %v3957_v63 }
 0x1bc   : > { %v3030_v1 = vpop.eup %3029 }
 0x1bd   : > { %v886_v56 = vmul.f32 %v3030_v1, %v3028_v58  ;;  %v4101_v58 = vld [vmem:[%s3475_s12 + $0x198] sm:$0xff]  ;;  %v4106_v1 = vld [vmem:[%s3475_s12 + $0x180] sm:$0xff] }
 0x1bf   : > { %890 = vst [vmem:[%s889_s6] sm:$0xff] %v886_v56  ;;  %1034 = vmatmul.mubr.f32.vlgmr.msra.gmra.mxu0 %v886_v56  ;;  %1105 = vmatmul.mubr.f32.vlgmr.msra.gmra.mxu1 %v886_v56  ;;  %v4109_v56 = vld [vmem:[%s3475_s12 + $0x190] sm:$0xff]  ;;  %s2958_s6 = sshll.u32 %s1401_s24, 5  ;;  %s4627_s24 = sadd.s32 %s3317_s19, %s2156_s10 }
 0x1c0   : > { %1223 = vmatpush1.msra.mxu0 %v3557_v5  ;;  %1294 = vmatpush1.msra.mxu1 %v3560_v6  ;;  %v4774_v5 = vld [vmem:[#allocation17_spill] sm:$0xff]  ;;  %v4775_v6 = vld [vmem:[#allocation15_spill] sm:$0xff]  ;;  %s1405_s1 = scalar_lea.vmem [#allocation2], %s2958_s6  ;;  %s2937_s6 = sshll.u32 %s4627_s24, 3 }
 0x1c1   : > { %1224 = vmatprep.subr.mxu0 %v3569_v8  ;;  %1295 = vmatprep.subr.mxu1 %v3581_v11  ;;  %v4776_v8 = vld [vmem:[#allocation19_spill] sm:$0xff]  ;;  %v4779_v11 = vld [vmem:[#allocation18_spill] sm:$0xff]  ;;  %4792 = vst [vmem:[#allocation17_spill] sm:$0xff] %v4050_v46  ;;  %4793 = vst [vmem:[#allocation15_spill] sm:$0xff] %v4053_v0 }
 0x1c2   : > { %1225 = vmatpush1.msra.mxu0 %v3574_v9  ;;  %1296 = vmatpush1.msra.mxu1 %v3594_v14  ;;  %v4777_v9 = vld [vmem:[#allocation16_spill] sm:$0xff] }
 0x1c3   : > { %1226 = vmatprep.subr.mxu0 %v3578_v10  ;;  %1297 = vmatprep.subr.mxu1 %v3602_v16  ;;  %v4778_v10 = vld [vmem:[#allocation21_spill] sm:$0xff]  ;;  %v4781_v14 = vld [vmem:[#allocation20_spill] sm:$0xff]  ;;  %v4783_v16 = vld [vmem:[#allocation22_spill] sm:$0xff] }
 0x1c4   : > { %1227 = vmatpush1.msra.mxu0 %v3591_v13  ;;  %1298 = vmatpush1.msra.mxu1 %v3610_v18  ;;  %v4780_v13 = vld [vmem:[#allocation23_spill] sm:$0xff]  ;;  %v4785_v18 = vld [vmem:[#allocation24_spill] sm:$0xff] }
 0x1c5   : > { %1228 = vmatprep.subr.mxu0 %v3599_v15  ;;  %1299 = vmatprep.subr.mxu1 %v3623_v21  ;;  %v4782_v15 = vld [vmem:[#allocation25_spill] sm:$0xff]  ;;  %v4787_v21 = vld [vmem:[#allocation26_spill] sm:$0xff] }
 0x1c6   : > { %1229 = vmatpush1.msra.mxu0 %v3607_v17  ;;  %1300 = vmatpush1.msra.mxu1 %v3631_v23  ;;  %v4784_v17 = vld [vmem:[#allocation27_spill] sm:$0xff]  ;;  %v4789_v23 = vld [vmem:[#allocation28_spill] sm:$0xff] }
 0x1c7   : > { %1230 = vmatprep.subr.mxu0 %v3620_v20  ;;  %1301 = vmatprep.subr.mxu1 %v3637_v25  ;;  %v4786_v20 = vld [vmem:[#allocation29_spill] sm:$0xff]  ;;  %v4791_v25 = vld [vmem:[#allocation31_spill] sm:$0xff] }
 0x1c8   : > { %1231 = vmatpush1.msra.mxu0 %v3628_v22  ;;  %1302 = vmatpush1.msra.mxu1 %v3647_v27  ;;  %v4788_v22 = vld [vmem:[#allocation30_spill] sm:$0xff] }
 0x1c9   : > { %1232 = vmatprep.subr.mxu0 %v3634_v24  ;;  %1303 = vmatprep.subr.mxu1 %v3660_v30  ;;  %v4790_v24 = vmov 0.0   ;;  %v901_v30 = vld [vmem:[%s899_s30 + $0x8] sm:$0xff] }
 0x1ca   : > { %1233 = vmatpush1.msra.mxu0 %v3644_v26  ;;  %1304 = vmatpush1.msra.mxu1 %v3668_v32  ;;  %v900_v26 = vld [vmem:[%s899_s30] sm:$0xff] }
 0x1cb   : > { %1234 = vmatprep.subr.mxu0 %v3657_v29  ;;  %1305 = vmatprep.subr.mxu1 %v3674_v34 }
 0x1cc   : > { %1235 = vmatpush1.msra.mxu0 %v3665_v31  ;;  %1306 = vmatpush1.msra.mxu1 %v3684_v36  ;;  %v902_v36 = vld [vmem:[%s899_s30 + $0x10] sm:$0xff] }
 0x1cd   : > { %1236 = vmatprep.subr.mxu0 %v3671_v33  ;;  %1307 = vmatprep.subr.mxu1 %v3697_v39 }
 0x1ce   : > { %1237 = vmatpush1.msra.mxu0 %v3681_v35  ;;  %1308 = vmatpush1.msra.mxu1 %v3705_v41  ;;  %v903_v41 = vld [vmem:[%s899_s30 + $0x18] sm:$0xff]  ;;  %s2924_s30 = sshll.u32 %s4469_s21, 3  ;;  %s2409_s21 = sshra.s32 %s2408_s15, 3 }
 0x1cf   : > { %1238 = vmatprep.subr.mxu0 %v3694_v38  ;;  %1309 = vmatprep.subr.mxu1 %v3711_v43  ;;  %s1901_s13 = scalar_lea.vmem %s3961_s14, %s2924_s30 [#allocation10] }
 0x1d0   : > { %1239 = vmatpush1.msra.mxu0 %v3702_v40  ;;  %1310 = vmatpush1.msra.mxu1 %v3721_v45 }
 0x1d1   : > { %1240 = vmatprep.subr.mxu0 %v3708_v42  ;;  %1311 = vmatprep.subr.mxu1 %v3734_v48 }
 0x1d2   : > { %1241 = vmatpush1.msra.mxu0 %v3718_v44  ;;  %1312 = vmatpush1.msra.mxu1 %v3742_v50 }
 0x1d3   : > { %1242 = vmatprep.subr.mxu0 %v3731_v47  ;;  %1313 = vmatprep.subr.mxu1 %v3748_v52 }
 0x1d4   : > { %1243 = vmatpush1.msra.mxu0 %v3739_v49  ;;  %1314 = vmatpush1.msra.mxu1 %v3758_v54 }
 0x1d5   : > { %1244 = vmatprep.subr.mxu0 %v3745_v51  ;;  %1315 = vmatprep.subr.mxu1 %v3771_v57 }
 0x1d6   : > { %1245 = vmatpush1.msra.mxu0 %v3755_v53  ;;  %1316 = vmatpush1.msra.mxu1 %v4774_v5  ;;  %v4114_v5 = vld [vmem:[%s3475_s12 + $0x168] sm:$0xff] }
 0x1d7   : > { %1246 = vmatprep.subr.mxu0 %v4775_v6  ;;  %1317 = vmatprep.subr.mxu1 %v4776_v8  ;;  %v4117_v6 = vld [vmem:[%s3475_s12 + $0x178] sm:$0xff]  ;;  %v4122_v8 = vld [vmem:[%s3475_s12 + $0x160] sm:$0xff] }
 0x1d8   : > { %1247 = vmatpush1.msra.mxu0 %v4777_v9  ;;  %1318 = vmatpush1.msra.mxu1 %v4778_v10  ;;  %v4125_v9 = vld [vmem:[%s3475_s12 + $0x170] sm:$0xff]  ;;  %v4130_v10 = vld [vmem:[%s3475_s12 + $0x148] sm:$0xff] }
 0x1d9   : > { %1248 = vmatprep.subr.mxu0 %v4779_v11  ;;  %1319 = vmatprep.subr.mxu1 %v4780_v13  ;;  %v4133_v11 = vld [vmem:[%s3475_s12 + $0x158] sm:$0xff]  ;;  %v4138_v13 = vld [vmem:[%s3475_s12 + $0x140] sm:$0xff] }
 0x1da   : > { %1249 = vmatpush1.msra.mxu0 %v4781_v14  ;;  %1320 = vmatpush1.msra.mxu1 %v4782_v15  ;;  %v4141_v14 = vld [vmem:[%s3475_s12 + $0x150] sm:$0xff]  ;;  %v4146_v15 = vld [vmem:[%s3475_s12 + $0x128] sm:$0xff] }
 0x1db   : > { %1250 = vmatprep.subr.mxu0 %v4783_v16  ;;  %1321 = vmatprep.subr.mxu1 %v4784_v17  ;;  %v4149_v16 = vld [vmem:[%s3475_s12 + $0x138] sm:$0xff]  ;;  %v4154_v17 = vld [vmem:[%s3475_s12 + $0x120] sm:$0xff] }
 0x1dc   : > { %1251 = vmatpush1.msra.mxu0 %v4785_v18  ;;  %1322 = vmatpush1.msra.mxu1 %v4786_v20  ;;  %v4157_v18 = vld [vmem:[%s3475_s12 + $0x130] sm:$0xff]  ;;  %v4160_v20 = vld [vmem:[%s3475_s12 + $0x108] sm:$0xff] }
 0x1dd   : > { %1252 = vmatprep.subr.mxu0 %v4787_v21  ;;  %1323 = vmatprep.subr.mxu1 %v4788_v22  ;;  %v4165_v21 = vld [vmem:[%s3475_s12 + $0x118] sm:$0xff]  ;;  %v4168_v22 = vld [vmem:[%s3475_s12 + $0x100] sm:$0xff] }
 0x1de   : > { %1253 = vmatpush1.msra.mxu0 %v4789_v23  ;;  %1286 = vmatprep.mubr.f32.mxu0 %v4790_v24  ;;  %v4171_v23 = vld [vmem:[%s3475_s12 + $0x110] sm:$0xff] }
 0x1df   : > { %1324 = vmatpush1.msra.mxu1 %v4791_v25  ;;  %1357 = vmatprep.mubr.f32.mxu1 %v4790_v24  ;;  %v4176_v25 = vld [vmem:[%s3475_s12 + $0xe8] sm:$0xff] }
 0x1e0   : > { %1475 = vmatprep.subr.mxu0 %v4050_v46  ;;  %1546 = vmatprep.subr.mxu1 %v4053_v0 }
 0x27f   : > { %v1035_v27 = vpop.f32.mrf.mxu0  ;;  %v1106_v35 = vpop.f32.mrf.mxu1 }
 0x280   : > { %v1111_v29 = vadd.f32 %v1035_v27, %v900_v26  ;;  %v1113_v38 = vadd.f32 %v1106_v35, %v902_v36  ;;  %v4179_v26 = vld [vmem:[%s3475_s12 + $0xf8] sm:$0xff]  ;;  %v4182_v27 = vld [vmem:[%s3475_s12 + $0xe0] sm:$0xff] }
 0x281   : > { %v1037_v31 = vpop.f32.mrf.mxu0  ;;  %v1108_v39 = vpop.f32.mrf.mxu1  ;;  %v4209_v35 = vld [vmem:[%s3475_s12 + $0xb8] sm:$0xff]  ;;  %v4214_v36 = vld [vmem:[%s3475_s12 + $0xa0] sm:$0xff] }
 0x282   : > { %v2906_v32 = vmul.f32 -1.442695, %v1111_v29  ;;  %v1112_v33 = vadd.f32 %v1037_v31, %v901_v30  ;;  %v2908_v40 = vmul.f32 -1.442695, %v1113_v38  ;;  %v1114_v43 = vadd.f32 %v1108_v39, %v903_v41  ;;  %v4187_v29 = vld [vmem:[%s3475_s12 + $0xf0] sm:$0xff]  ;;  %v4190_v30 = vld [vmem:[%s3475_s12 + $0xc8] sm:$0xff] }
 0x283   : > { %v4193_v31 = vld [vmem:[%s3475_s12 + $0xd8] sm:$0xff]  ;;  %v4217_v38 = vld [vmem:[%s3475_s12 + $0xb0] sm:$0xff]  ;;  %v4222_v39 = vld [vmem:[%s3475_s12 + $0x88] sm:$0xff] }
 0x284   : > { %3031 = vpow2.f32 %v2906_v32  ;;  %v2907_v34 = vmul.f32 -1.442695, %v1112_v33  ;;  %v4198_v32 = vld [vmem:[%s3475_s12 + $0xc0] sm:$0xff]  ;;  %v4201_v33 = vld [vmem:[%s3475_s12 + $0xd0] sm:$0xff] }
 0x285   : > { %v4230_v41 = vld [vmem:[%s3475_s12 + $0x80] sm:$0xff] }
 0x286   : > { %3033 = vpow2.f32 %v2907_v34  ;;  %v4206_v34 = vld [vmem:[%s3475_s12 + $0xa8] sm:$0xff] }
 0x287   : > { %3035 = vpow2.f32 %v2908_v40  ;;  %v4225_v40 = vld [vmem:[%s3475_s12 + $0x98] sm:$0xff] }
 0x291   : > { %v3032_v42 = vpop.eup %3031 }
 0x292   : > { %v1124_v44 = vadd.f32 1.0, %v3032_v42  ;;  %v4233_v42 = vld [vmem:[%s3475_s12 + $0x90] sm:$0xff] }
 0x293   : > { %v3034_v45 = vpop.eup %3033  ;;  %4794 = vst [vmem:[#allocation19_spill] sm:$0xff] %v4233_v42 }
 0x294   : > { %3037 = vrcp.f32 %v1124_v44  ;;  %v1125_v47 = vadd.f32 1.0, %v3034_v45  ;;  %v3036_v48 = vpop.eup %3035  ;;  %v4241_v44 = vld [vmem:[%s3475_s12 + $0x78] sm:$0xff]  ;;  %v4246_v45 = vld [vmem:[%s3475_s12 + $0x60] sm:$0xff] }
 0x295   : > { %3039 = vtanh.f32 %v1114_v43  ;;  %v1126_v52 = vadd.f32 1.0, %v3036_v48  ;;  %v4238_v43 = vld [vmem:[%s3475_s12 + $0x68] sm:$0xff]  ;;  %4796 = vst [vmem:[#allocation21_spill] sm:$0xff] %v4241_v44  ;;  %4797 = vst [vmem:[#allocation18_spill] sm:$0xff] %v4246_v45 }
 0x296   : > { %3041 = vrcp.f32 %v1125_v47  ;;  %4795 = vst [vmem:[#allocation16_spill] sm:$0xff] %v4238_v43  ;;  %v4249_v47 = vld [vmem:[%s3475_s12 + $0x70] sm:$0xff]  ;;  %v4254_v48 = vld [vmem:[%s3475_s12 + $0x48] sm:$0xff] }
 0x297   : > { %3043 = vrcp.f32 %v1126_v52  ;;  %4798 = vst [vmem:[#allocation23_spill] sm:$0xff] %v4249_v47  ;;  %4799 = vst [vmem:[#allocation20_spill] sm:$0xff] %v4254_v48  ;;  %v4270_v52 = vld [vmem:[%s3475_s12 + $0x28] sm:$0xff] }
 0x298   : > { %4803 = vst [vmem:[#allocation24_spill] sm:$0xff] %v4270_v52 }
 0x2a1   : > { %v3038_v49 = vpop.eup %3037 }
 0x2a2   : > { %v3040_v50 = vpop.eup %3039 }
 0x2a3   : > { %v3042_v51 = vpop.eup %3041  ;;  %v1136_v54 = vmul.f32 %v3040_v50, %v3038_v49  ;;  %v4257_v49 = vld [vmem:[%s3475_s12 + $0x58] sm:$0xff]  ;;  %v4262_v50 = vld [vmem:[%s3475_s12 + $0x40] sm:$0xff] }
 0x2a4   : > { %v1135_v53 = vmul.f32 %v3042_v51, %v3957_v63  ;;  %v3044_v59 = vpop.eup %3043  ;;  %v4098_v63 = vld [vmem:[%s3475_s12 + $0x188] sm:$0xff]  ;;  %4800 = vst [vmem:[#allocation25_spill] sm:$0xff] %v4257_v49  ;;  %4801 = vst [vmem:[#allocation22_spill] sm:$0xff] %v4262_v50  ;;  %v4265_v51 = vld [vmem:[%s3475_s12 + $0x50] sm:$0xff] }
 0x2a5   : > { %4802 = vst [vmem:[#allocation27_spill] sm:$0xff] %v4265_v51 }
 0x2a6   : > { %v4041_v57 = vadd.f32 %v1136_v54, %v1135_v53  ;;  %v4273_v53 = vld [vmem:[%s3475_s12 + $0x38] sm:$0xff]  ;;  %v4278_v54 = vld [vmem:[%s3475_s12 + $0x20] sm:$0xff] }
 0x2a7   : > { %4804 = vst [vmem:[#allocation29_spill] sm:$0xff] %v4273_v53  ;;  %4805 = vst [vmem:[#allocation26_spill] sm:$0xff] %v4278_v54 }
 0x2a8   : > { %3045 = vtanh.f32 %v4041_v57 }
 0x2b5   : > { %v3046_v7 = vpop.eup %3045 }
 0x2b6   : > { %v1139_v2 = vmul.f32 %v3046_v7, %v3044_v59  ;;  %v4281_v59 = vld [vmem:[%s3475_s12 + $0x30] sm:$0xff]  ;;  %v4286_v7 = vld [vmem:[%s3475_s12 + $0x8] sm:$0xff] }
 0x2b7   : > { %4806 = vst [vmem:[#allocation30_spill] sm:$0xff] %v4281_v59  ;;  %4807 = vst [vmem:[#allocation28_spill] sm:$0xff] %v4286_v7 }
 0x2b8   : > { %1143 = vst [vmem:[%s1142_s27] sm:$0xff] %v1139_v2  ;;  %1287 = vmatmul.mubr.f32.vlgmr.msra.gmra.mxu0 %v1139_v2  ;;  %1358 = vmatmul.mubr.f32.vlgmr.msra.gmra.mxu1 %v1139_v2  ;;  %v4289_v2 = vld [vmem:[%s3475_s12 + $0x18] sm:$0xff]  ;;  %s1654_s27 = sshra.s32 %s2924_s30, 3  ;;  %s2962_s30 = sshll.u32 %s2409_s21, 5 }
 0x2b9   : > { %1539 = vmatprep.mubr.f32.mxu0 %v4790_v24  ;;  %1610 = vmatprep.mubr.f32.mxu1 %v4790_v24  ;;  %4808 = vst [vmem:[#allocation31_spill] sm:$0xff] %v4289_v2  ;;  %v4294_v24 = vld [vmem:[%s3475_s12] sm:$0xff]  ;;  %s2959_s11 = sshll.u32 %s1654_s27, 5  ;;  %s2413_s27 = scalar_lea.vmem [#allocation2], %s2962_s30 }
 0x2ba   : > { %1476 = vmatpush1.msra.mxu0 %v4058_v61  ;;  %1547 = vmatpush1.msra.mxu1 %v4061_v12  ;;  %4809 = vst [vmem:[#allocation32_spill] sm:$0xff] %v4294_v24  ;;  %s1658_s8 = scalar_lea.vmem [#allocation2], %s2959_s11  ;;  %s2656_s11 = scalar_lea.vmem %s3961_s14, %s2408_s15 [#allocation10] }
 0x2bb   : > { %1477 = vmatprep.subr.mxu0 %v4066_v19  ;;  %1548 = vmatprep.subr.mxu1 %v4069_v55 }
 0x2bc   : > { %1478 = vmatpush1.msra.mxu0 %v4074_v3  ;;  %1549 = vmatpush1.msra.mxu1 %v4077_v60 }
 0x2bd   : > { %1479 = vmatprep.subr.mxu0 %v4082_v37  ;;  %1550 = vmatprep.subr.mxu1 %v4085_v4 }
 0x2be   : > { %1480 = vmatpush1.msra.mxu0 %v4090_v62  ;;  %1551 = vmatpush1.msra.mxu1 %v4093_v28 }
 0x2bf   : > { %1481 = vmatprep.subr.mxu0 %v4098_v63  ;;  %1552 = vmatprep.subr.mxu1 %v4101_v58 }
 0x2c0   : > { %1482 = vmatpush1.msra.mxu0 %v4106_v1  ;;  %1553 = vmatpush1.msra.mxu1 %v4109_v56 }
 0x2c1   : > { %1483 = vmatprep.subr.mxu0 %v4114_v5  ;;  %1554 = vmatprep.subr.mxu1 %v4117_v6 }
 0x2c2   : > { %1484 = vmatpush1.msra.mxu0 %v4122_v8  ;;  %1555 = vmatpush1.msra.mxu1 %v4125_v9 }
 0x2c3   : > { %1485 = vmatprep.subr.mxu0 %v4130_v10  ;;  %1556 = vmatprep.subr.mxu1 %v4133_v11 }
 0x2c4   : > { %1486 = vmatpush1.msra.mxu0 %v4138_v13  ;;  %1557 = vmatpush1.msra.mxu1 %v4141_v14 }
 0x2c5   : > { %1487 = vmatprep.subr.mxu0 %v4146_v15  ;;  %1558 = vmatprep.subr.mxu1 %v4149_v16 }
 0x2c6   : > { %1488 = vmatpush1.msra.mxu0 %v4154_v17  ;;  %1559 = vmatpush1.msra.mxu1 %v4157_v18 }
 0x2c7   : > { %1489 = vmatprep.subr.mxu0 %v4160_v20  ;;  %1560 = vmatprep.subr.mxu1 %v4165_v21 }
 0x2c8   : > { %1490 = vmatpush1.msra.mxu0 %v4168_v22  ;;  %1561 = vmatpush1.msra.mxu1 %v4171_v23 }
 0x2c9   : > { %1491 = vmatprep.subr.mxu0 %v4176_v25  ;;  %1562 = vmatprep.subr.mxu1 %v4179_v26 }
 0x2ca   : > { %1492 = vmatpush1.msra.mxu0 %v4182_v27  ;;  %1563 = vmatpush1.msra.mxu1 %v4187_v29 }
 0x2cb   : > { %1493 = vmatprep.subr.mxu0 %v4190_v30  ;;  %1564 = vmatprep.subr.mxu1 %v4193_v31 }
 0x2cc   : > { %1494 = vmatpush1.msra.mxu0 %v4198_v32  ;;  %1565 = vmatpush1.msra.mxu1 %v4201_v33 }
 0x2cd   : > { %1495 = vmatprep.subr.mxu0 %v4206_v34  ;;  %1566 = vmatprep.subr.mxu1 %v4209_v35 }
 0x2ce   : > { %1496 = vmatpush1.msra.mxu0 %v4214_v36  ;;  %1567 = vmatpush1.msra.mxu1 %v4217_v38 }
 0x2cf   : > { %1497 = vmatprep.subr.mxu0 %v4222_v39  ;;  %1568 = vmatprep.subr.mxu1 %v4225_v40 }
 0x2d0   : > { %1498 = vmatpush1.msra.mxu0 %v4230_v41  ;;  %1569 = vmatpush1.msra.mxu1 %v4233_v42 }
 0x2d1   : > { %1499 = vmatprep.subr.mxu0 %v4238_v43  ;;  %1570 = vmatprep.subr.mxu1 %v4241_v44 }
 0x2d2   : > { %1500 = vmatpush1.msra.mxu0 %v4246_v45  ;;  %1571 = vmatpush1.msra.mxu1 %v4249_v47  ;;  %v1156_v47 = vld [vmem:[%s1152_s5 + $0x18] sm:$0xff] }
 0x2d3   : > { %1501 = vmatprep.subr.mxu0 %v4254_v48  ;;  %1572 = vmatprep.subr.mxu1 %v4257_v49  ;;  %v4297_v49 = vld [vmem:[%s3475_s12 + $0x10] sm:$0xff] }
 0x2d4   : > { %1502 = vmatpush1.msra.mxu0 %v4262_v50  ;;  %1573 = vmatpush1.msra.mxu1 %v4265_v51  ;;  %4810 = vst [vmem:[#allocation33_spill] sm:$0xff] %v4297_v49 }
 0x2d5   : > { %1503 = vmatprep.subr.mxu0 %v4270_v52  ;;  %1574 = vmatprep.subr.mxu1 %v4273_v53  ;;  %v1155_v52 = vld [vmem:[%s1152_s5 + $0x10] sm:$0xff] }
 0x2d6   : > { %1504 = vmatpush1.msra.mxu0 %v4278_v54  ;;  %1575 = vmatpush1.msra.mxu1 %v4281_v59  ;;  %v1154_v59 = vld [vmem:[%s1152_s5 + $0x8] sm:$0xff] }
 0x2d7   : > { %1505 = vmatprep.subr.mxu0 %v4286_v7  ;;  %1576 = vmatprep.subr.mxu1 %v4289_v2  ;;  %v1153_v2 = vld [vmem:[%s1152_s5] sm:$0xff]  ;;  %s2931_s5 = sshll.u32 %s4547_s22, 3 }
 0x2d8   : > { %1506 = vmatpush1.msra.mxu0 %v4294_v24  ;;  %1577 = vmatpush1.msra.mxu1 %v4297_v49  ;;  %s2154_s29 = scalar_lea.vmem %s3961_s14, %s2931_s5 [#allocation10] }
 0x2d9   : > { %1728 = vmatprep.subr.mxu0 %v4050_v46  ;;  %1799 = vmatprep.subr.mxu1 %v4053_v0 }
 0x378   : > { %v1288_v7 = vpop.f32.mrf.mxu0  ;;  %v1359_v53 = vpop.f32.mrf.mxu1 }
 0x379   : > { %v1364_v24 = vadd.f32 %v1288_v7, %v1153_v2  ;;  %v1366_v51 = vadd.f32 %v1359_v53, %v1155_v52  ;;  %v4817_v2 = vld [vmem:[#allocation25_spill] sm:$0xff] }
 0x37a   : > { %v1290_v49 = vpop.f32.mrf.mxu0  ;;  %v1361_v50 = vpop.f32.mrf.mxu1 }
 0x37b   : > { %v2913_v54 = vmul.f32 -1.442695, %v1364_v24  ;;  %v1365_v46 = vadd.f32 %v1290_v49, %v1154_v59  ;;  %v2915_v48 = vmul.f32 -1.442695, %v1366_v51  ;;  %v1367_v44 = vadd.f32 %v1361_v50, %v1156_v47  ;;  %v4813_v47 = vld [vmem:[#allocation21_spill] sm:$0xff]  ;;  %v4815_v50 = vld [vmem:[#allocation23_spill] sm:$0xff] }
 0x37c   : > { %v4816_v59 = vld [vmem:[#allocation20_spill] sm:$0xff] }
 0x37d   : > { %3047 = vpow2.f32 %v2913_v54  ;;  %v2914_v0 = vmul.f32 -1.442695, %v1365_v46 }
 0x37f   : > { %3049 = vpow2.f32 %v2914_v0 }
 0x380   : > { %3051 = vpow2.f32 %v2915_v48  ;;  %v4814_v48 = vld [vmem:[#allocation18_spill] sm:$0xff] }
 0x38a   : > { %v3048_v45 = vpop.eup %3047 }
 0x38b   : > { %v1377_v43 = vadd.f32 1.0, %v3048_v45 }
 0x38c   : > { %v3050_v42 = vpop.eup %3049 }
 0x38d   : > { %3053 = vrcp.f32 %v1377_v43  ;;  %v1378_v7 = vadd.f32 1.0, %v3050_v42  ;;  %v3052_v24 = vpop.eup %3051 }
 0x38e   : > { %3055 = vtanh.f32 %v1367_v44  ;;  %v1379_v54 = vadd.f32 1.0, %v3052_v24  ;;  %v4812_v44 = vld [vmem:[#allocation16_spill] sm:$0xff]  ;;  %v4819_v24 = vld [vmem:[#allocation27_spill] sm:$0xff] }
 0x38f   : > { %3057 = vrcp.f32 %v1378_v7  ;;  %v4818_v7 = vld [vmem:[#allocation22_spill] sm:$0xff] }
 0x390   : > { %3059 = vrcp.f32 %v1379_v54  ;;  %v4823_v54 = vld [vmem:[#allocation30_spill] sm:$0xff] }
 0x39a   : > { %v3054_v46 = vpop.eup %3053 }
 0x39b   : > { %v3056_v0 = vpop.eup %3055 }
 0x39c   : > { %v3058_v49 = vpop.eup %3057  ;;  %v1389_v51 = vmul.f32 %v3056_v0, %v3054_v46  ;;  %v4820_v46 = vld [vmem:[#allocation24_spill] sm:$0xff]  ;;  %v4821_v0 = vld [vmem:[#allocation29_spill] sm:$0xff] }
 0x39d   : > { %v1388_v52 = vmul.f32 %v3058_v49, %v4041_v57  ;;  %v3060_v45 = vpop.eup %3059  ;;  %v4811_v57 = vld [vmem:[#allocation19_spill] sm:$0xff]  ;;  %v4822_v49 = vld [vmem:[#allocation26_spill] sm:$0xff] }
 0x39f   : > { %v4315_v53 = vadd.f32 %v1389_v51, %v1388_v52  ;;  %v4824_v52 = vld [vmem:[#allocation28_spill] sm:$0xff]  ;;  %v4825_v51 = vld [vmem:[#allocation31_spill] sm:$0xff] }
 0x3a1   : > { %3061 = vtanh.f32 %v4315_v53 }
 0x3ae   : > { %v3062_v43 = vpop.eup %3061 }
 0x3af   : > { %v1392_v42 = vmul.f32 %v3062_v43, %v3060_v45  ;;  %v4826_v45 = vld [vmem:[#allocation32_spill] sm:$0xff]  ;;  %v4827_v43 = vmov 0.0  }
 0x3b1   : > { %1396 = vst [vmem:[%s1395_s2] sm:$0xff] %v1392_v42  ;;  %1540 = vmatmul.mubr.f32.vlgmr.msra.gmra.mxu0 %v1392_v42  ;;  %1611 = vmatmul.mubr.f32.vlgmr.msra.gmra.mxu1 %v1392_v42  ;;  %v4828_v42 = vld [vmem:[#allocation33_spill] sm:$0xff]  ;;  %s1907_s2 = sshra.s32 %s2931_s5, 3 }
 0x3b2   : > { %1729 = vmatpush1.msra.mxu0 %v4058_v61  ;;  %1800 = vmatpush1.msra.mxu1 %v4061_v12  ;;  %s2960_s17 = sshll.u32 %s1907_s2, 5 }
 0x3b3   : > { %1730 = vmatprep.subr.mxu0 %v4066_v19  ;;  %1801 = vmatprep.subr.mxu1 %v4069_v55  ;;  %s1911_s23 = scalar_lea.vmem [#allocation2], %s2960_s17 }
 0x3b4   : > { %1731 = vmatpush1.msra.mxu0 %v4074_v3  ;;  %1802 = vmatpush1.msra.mxu1 %v4077_v60 }
 0x3b5   : > { %1732 = vmatprep.subr.mxu0 %v4082_v37  ;;  %1803 = vmatprep.subr.mxu1 %v4085_v4 }
 0x3b6   : > { %1733 = vmatpush1.msra.mxu0 %v4090_v62  ;;  %1804 = vmatpush1.msra.mxu1 %v4093_v28 }
 0x3b7   : > { %1734 = vmatprep.subr.mxu0 %v4098_v63  ;;  %1805 = vmatprep.subr.mxu1 %v4101_v58 }
 0x3b8   : > { %1735 = vmatpush1.msra.mxu0 %v4106_v1  ;;  %1806 = vmatpush1.msra.mxu1 %v4109_v56 }
 0x3b9   : > { %1736 = vmatprep.subr.mxu0 %v4114_v5  ;;  %1807 = vmatprep.subr.mxu1 %v4117_v6 }
 0x3ba   : > { %1737 = vmatpush1.msra.mxu0 %v4122_v8  ;;  %1808 = vmatpush1.msra.mxu1 %v4125_v9 }
 0x3bb   : > { %1738 = vmatprep.subr.mxu0 %v4130_v10  ;;  %1809 = vmatprep.subr.mxu1 %v4133_v11 }
 0x3bc   : > { %1739 = vmatpush1.msra.mxu0 %v4138_v13  ;;  %1810 = vmatpush1.msra.mxu1 %v4141_v14 }
 0x3bd   : > { %1740 = vmatprep.subr.mxu0 %v4146_v15  ;;  %1811 = vmatprep.subr.mxu1 %v4149_v16 }
 0x3be   : > { %1741 = vmatpush1.msra.mxu0 %v4154_v17  ;;  %1812 = vmatpush1.msra.mxu1 %v4157_v18 }
 0x3bf   : > { %1742 = vmatprep.subr.mxu0 %v4160_v20  ;;  %1813 = vmatprep.subr.mxu1 %v4165_v21 }
 0x3c0   : > { %1743 = vmatpush1.msra.mxu0 %v4168_v22  ;;  %1814 = vmatpush1.msra.mxu1 %v4171_v23 }
 0x3c1   : > { %1744 = vmatprep.subr.mxu0 %v4176_v25  ;;  %1815 = vmatprep.subr.mxu1 %v4179_v26 }
 0x3c2   : > { %1745 = vmatpush1.msra.mxu0 %v4182_v27  ;;  %1816 = vmatpush1.msra.mxu1 %v4187_v29 }
 0x3c3   : > { %1746 = vmatprep.subr.mxu0 %v4190_v30  ;;  %1817 = vmatprep.subr.mxu1 %v4193_v31 }
 0x3c4   : > { %1747 = vmatpush1.msra.mxu0 %v4198_v32  ;;  %1818 = vmatpush1.msra.mxu1 %v4201_v33 }
 0x3c5   : > { %1748 = vmatprep.subr.mxu0 %v4206_v34  ;;  %1819 = vmatprep.subr.mxu1 %v4209_v35 }
 0x3c6   : > { %1749 = vmatpush1.msra.mxu0 %v4214_v36  ;;  %1820 = vmatpush1.msra.mxu1 %v4217_v38 }
 0x3c7   : > { %1750 = vmatprep.subr.mxu0 %v4222_v39  ;;  %1821 = vmatprep.subr.mxu1 %v4225_v40 }
 0x3c8   : > { %1751 = vmatpush1.msra.mxu0 %v4230_v41  ;;  %1822 = vmatpush1.msra.mxu1 %v4811_v57 }
 0x3c9   : > { %1752 = vmatprep.subr.mxu0 %v4812_v44  ;;  %1823 = vmatprep.subr.mxu1 %v4813_v47 }
 0x3ca   : > { %1753 = vmatpush1.msra.mxu0 %v4814_v48  ;;  %1824 = vmatpush1.msra.mxu1 %v4815_v50  ;;  %v1409_v50 = vld [vmem:[%s1405_s1 + $0x18] sm:$0xff] }
 0x3cb   : > { %1754 = vmatprep.subr.mxu0 %v4816_v59  ;;  %1825 = vmatprep.subr.mxu1 %v4817_v2 }
 0x3cc   : > { %1755 = vmatpush1.msra.mxu0 %v4818_v7  ;;  %1826 = vmatpush1.msra.mxu1 %v4819_v24  ;;  %v4829_v24 = vld [vmem:[#allocation17_spill] sm:$0xff] }
 0x3cd   : > { %1756 = vmatprep.subr.mxu0 %v4820_v46  ;;  %1827 = vmatprep.subr.mxu1 %v4821_v0  ;;  %v4830_v46 = vld [vmem:[#allocation15_spill] sm:$0xff]  ;;  %v1408_v0 = vld [vmem:[%s1405_s1 + $0x10] sm:$0xff] }
 0x3ce   : > { %1757 = vmatpush1.msra.mxu0 %v4822_v49  ;;  %1828 = vmatpush1.msra.mxu1 %v4823_v54 }
 0x3cf   : > { %1758 = vmatprep.subr.mxu0 %v4824_v52  ;;  %1829 = vmatprep.subr.mxu1 %v4825_v51  ;;  %v1407_v52 = vld [vmem:[%s1405_s1 + $0x8] sm:$0xff] }
 0x3d0   : > { %1759 = vmatpush1.msra.mxu0 %v4826_v45  ;;  %1792 = vmatprep.mubr.f32.mxu0 %v4827_v43  ;;  %v1406_v45 = vld [vmem:[%s1405_s1] sm:$0xff]  ;;  %s2159_s1 = sshra.s32 %s2937_s6, 3 }
 0x3d1   : > { %1830 = vmatpush1.msra.mxu1 %v4828_v42  ;;  %1863 = vmatprep.mubr.f32.mxu1 %v4827_v43 }
 0x3d2   : > { %1981 = vmatprep.subr.mxu0 %v4829_v24  ;;  %2052 = vmatprep.subr.mxu1 %v4830_v46 }
 0x471   : > { %v1541_v51 = vpop.f32.mrf.mxu0  ;;  %v1612_v49 = vpop.f32.mrf.mxu1 }
 0x472   : > { %v1617_v42 = vadd.f32 %v1541_v51, %v1406_v45  ;;  %v1619_v7 = vadd.f32 %v1612_v49, %v1408_v0 }
 0x473   : > { %v1543_v43 = vpop.f32.mrf.mxu0  ;;  %v1614_v2 = vpop.f32.mrf.mxu1 }
 0x474   : > { %v2920_v54 = vmul.f32 -1.442695, %v1617_v42  ;;  %v1618_v24 = vadd.f32 %v1543_v43, %v1407_v52  ;;  %v2922_v59 = vmul.f32 -1.442695, %v1619_v7  ;;  %v1620_v47 = vadd.f32 %v1614_v2, %v1409_v50  ;;  %v4833_v50 = vld [vmem:[#allocation21_spill] sm:$0xff]  ;;  %v4835_v2 = vld [vmem:[#allocation23_spill] sm:$0xff] }
 0x475   : > { %v4836_v43 = vld [vmem:[#allocation20_spill] sm:$0xff]  ;;  %v4837_v42 = vld [vmem:[#allocation25_spill] sm:$0xff] }
 0x476   : > { %3063 = vpow2.f32 %v2920_v54  ;;  %v2921_v46 = vmul.f32 -1.442695, %v1618_v24 }
 0x478   : > { %3065 = vpow2.f32 %v2921_v46 }
 0x479   : > { %3067 = vpow2.f32 %v2922_v59  ;;  %v4834_v59 = vld [vmem:[#allocation18_spill] sm:$0xff] }
 0x483   : > { %v3064_v48 = vpop.eup %3063 }
 0x484   : > { %v1630_v44 = vadd.f32 1.0, %v3064_v48 }
 0x485   : > { %v3066_v57 = vpop.eup %3065 }
 0x486   : > { %3069 = vrcp.f32 %v1630_v44  ;;  %v1631_v51 = vadd.f32 1.0, %v3066_v57  ;;  %v3068_v54 = vpop.eup %3067 }
 0x487   : > { %3071 = vtanh.f32 %v1620_v47  ;;  %v1632_v45 = vadd.f32 1.0, %v3068_v54  ;;  %v4832_v47 = vld [vmem:[#allocation16_spill] sm:$0xff]  ;;  %v4839_v54 = vld [vmem:[#allocation27_spill] sm:$0xff] }
 0x488   : > { %3073 = vrcp.f32 %v1631_v51  ;;  %v4838_v51 = vld [vmem:[#allocation22_spill] sm:$0xff] }
 0x489   : > { %3075 = vrcp.f32 %v1632_v45  ;;  %v4843_v45 = vld [vmem:[#allocation30_spill] sm:$0xff] }
 0x493   : > { %v3070_v24 = vpop.eup %3069 }
 0x494   : > { %v3072_v46 = vpop.eup %3071 }
 0x495   : > { %v3074_v52 = vpop.eup %3073  ;;  %v1642_v7 = vmul.f32 %v3072_v46, %v3070_v24  ;;  %v4840_v24 = vld [vmem:[#allocation24_spill] sm:$0xff]  ;;  %v4841_v46 = vld [vmem:[#allocation29_spill] sm:$0xff] }
 0x496   : > { %v1641_v0 = vmul.f32 %v3074_v52, %v4315_v53  ;;  %v3076_v48 = vpop.eup %3075  ;;  %v4831_v53 = vld [vmem:[#allocation19_spill] sm:$0xff]  ;;  %v4842_v52 = vld [vmem:[#allocation26_spill] sm:$0xff] }
 0x498   : > { %v4395_v49 = vadd.f32 %v1642_v7, %v1641_v0  ;;  %v4844_v0 = vld [vmem:[#allocation28_spill] sm:$0xff]  ;;  %v4845_v7 = vld [vmem:[#allocation31_spill] sm:$0xff] }
 0x49a   : > { %3077 = vtanh.f32 %v4395_v49 }
 0x4a7   : > { %v3078_v44 = vpop.eup %3077 }
 0x4a8   : > { %v1645_v57 = vmul.f32 %v3078_v44, %v3076_v48  ;;  %v4846_v48 = vld [vmem:[#allocation32_spill] sm:$0xff]  ;;  %v4847_v44 = vmov 0.0  }
 0x4aa   : > { %1649 = vst [vmem:[%s1648_s9] sm:$0xff] %v1645_v57  ;;  %1793 = vmatmul.mubr.f32.vlgmr.msra.gmra.mxu0 %v1645_v57  ;;  %1864 = vmatmul.mubr.f32.vlgmr.msra.gmra.mxu1 %v1645_v57  ;;  %v4848_v57 = vld [vmem:[#allocation33_spill] sm:$0xff]  ;;  %s2961_s9 = sshll.u32 %s2159_s1, 5 }
 0x4ab   : > { %1982 = vmatpush1.msra.mxu0 %v4058_v61  ;;  %2053 = vmatpush1.msra.mxu1 %v4061_v12  ;;  %s2163_s28 = scalar_lea.vmem [#allocation2], %s2961_s9 }
 0x4ac   : > { %1983 = vmatprep.subr.mxu0 %v4066_v19  ;;  %2054 = vmatprep.subr.mxu1 %v4069_v55 }
 0x4ad   : > { %1984 = vmatpush1.msra.mxu0 %v4074_v3  ;;  %2055 = vmatpush1.msra.mxu1 %v4077_v60 }
 0x4ae   : > { %1985 = vmatprep.subr.mxu0 %v4082_v37  ;;  %2056 = vmatprep.subr.mxu1 %v4085_v4 }
 0x4af   : > { %1986 = vmatpush1.msra.mxu0 %v4090_v62  ;;  %2057 = vmatpush1.msra.mxu1 %v4093_v28 }
 0x4b0   : > { %1987 = vmatprep.subr.mxu0 %v4098_v63  ;;  %2058 = vmatprep.subr.mxu1 %v4101_v58 }
 0x4b1   : > { %1988 = vmatpush1.msra.mxu0 %v4106_v1  ;;  %2059 = vmatpush1.msra.mxu1 %v4109_v56 }
 0x4b2   : > { %1989 = vmatprep.subr.mxu0 %v4114_v5  ;;  %2060 = vmatprep.subr.mxu1 %v4117_v6 }
 0x4b3   : > { %1990 = vmatpush1.msra.mxu0 %v4122_v8  ;;  %2061 = vmatpush1.msra.mxu1 %v4125_v9 }
 0x4b4   : > { %1991 = vmatprep.subr.mxu0 %v4130_v10  ;;  %2062 = vmatprep.subr.mxu1 %v4133_v11 }
 0x4b5   : > { %1992 = vmatpush1.msra.mxu0 %v4138_v13  ;;  %2063 = vmatpush1.msra.mxu1 %v4141_v14 }
 0x4b6   : > { %1993 = vmatprep.subr.mxu0 %v4146_v15  ;;  %2064 = vmatprep.subr.mxu1 %v4149_v16 }
 0x4b7   : > { %1994 = vmatpush1.msra.mxu0 %v4154_v17  ;;  %2065 = vmatpush1.msra.mxu1 %v4157_v18 }
 0x4b8   : > { %1995 = vmatprep.subr.mxu0 %v4160_v20  ;;  %2066 = vmatprep.subr.mxu1 %v4165_v21 }
 0x4b9   : > { %1996 = vmatpush1.msra.mxu0 %v4168_v22  ;;  %2067 = vmatpush1.msra.mxu1 %v4171_v23 }
 0x4ba   : > { %1997 = vmatprep.subr.mxu0 %v4176_v25  ;;  %2068 = vmatprep.subr.mxu1 %v4179_v26 }
 0x4bb   : > { %1998 = vmatpush1.msra.mxu0 %v4182_v27  ;;  %2069 = vmatpush1.msra.mxu1 %v4187_v29 }
 0x4bc   : > { %1999 = vmatprep.subr.mxu0 %v4190_v30  ;;  %2070 = vmatprep.subr.mxu1 %v4193_v31 }
 0x4bd   : > { %2000 = vmatpush1.msra.mxu0 %v4198_v32  ;;  %2071 = vmatpush1.msra.mxu1 %v4201_v33 }
 0x4be   : > { %2001 = vmatprep.subr.mxu0 %v4206_v34  ;;  %2072 = vmatprep.subr.mxu1 %v4209_v35 }
 0x4bf   : > { %2002 = vmatpush1.msra.mxu0 %v4214_v36  ;;  %2073 = vmatpush1.msra.mxu1 %v4217_v38 }
 0x4c0   : > { %2003 = vmatprep.subr.mxu0 %v4222_v39  ;;  %2074 = vmatprep.subr.mxu1 %v4225_v40 }
 0x4c1   : > { %2004 = vmatpush1.msra.mxu0 %v4230_v41  ;;  %2075 = vmatpush1.msra.mxu1 %v4831_v53 }
 0x4c2   : > { %2005 = vmatprep.subr.mxu0 %v4832_v47  ;;  %2076 = vmatprep.subr.mxu1 %v4833_v50 }
 0x4c3   : > { %2006 = vmatpush1.msra.mxu0 %v4834_v59  ;;  %2077 = vmatpush1.msra.mxu1 %v4835_v2  ;;  %v1662_v2 = vld [vmem:[%s1658_s8 + $0x18] sm:$0xff] }
 0x4c4   : > { %2007 = vmatprep.subr.mxu0 %v4836_v43  ;;  %2078 = vmatprep.subr.mxu1 %v4837_v42 }
 0x4c5   : > { %2008 = vmatpush1.msra.mxu0 %v4838_v51  ;;  %2079 = vmatpush1.msra.mxu1 %v4839_v54  ;;  %v4849_v54 = vld [vmem:[#allocation17_spill] sm:$0xff] }
 0x4c6   : > { %2009 = vmatprep.subr.mxu0 %v4840_v24  ;;  %2080 = vmatprep.subr.mxu1 %v4841_v46  ;;  %v4850_v24 = vld [vmem:[#allocation15_spill] sm:$0xff]  ;;  %v1661_v46 = vld [vmem:[%s1658_s8 + $0x10] sm:$0xff] }
 0x4c7   : > { %2010 = vmatpush1.msra.mxu0 %v4842_v52  ;;  %2081 = vmatpush1.msra.mxu1 %v4843_v45 }
 0x4c8   : > { %2011 = vmatprep.subr.mxu0 %v4844_v0  ;;  %2082 = vmatprep.subr.mxu1 %v4845_v7  ;;  %v1660_v0 = vld [vmem:[%s1658_s8 + $0x8] sm:$0xff] }
 0x4c9   : > { %2012 = vmatpush1.msra.mxu0 %v4846_v48  ;;  %2045 = vmatprep.mubr.f32.mxu0 %v4847_v44  ;;  %v1659_v48 = vld [vmem:[%s1658_s8] sm:$0xff]  ;;  %s2949_s8 = sshll.u32 (%p4869_p10), %s3317_s19, 3 }
 0x4ca   : > { %2083 = vmatpush1.msra.mxu1 %v4848_v57  ;;  %2116 = vmatprep.mubr.f32.mxu1 %v4847_v44  ;;  %s2666_s18 = scalar_lea.vmem (%p4869_p10), %s4673_s4, %s2949_s8 }
 0x4cb   : > { %2233 = vmatprep.subr.mxu0 %v4849_v54  ;;  %2304 = vmatprep.subr.mxu1 %v4850_v24 }
 0x56a   : > { %v1794_v7 = vpop.f32.mrf.mxu0  ;;  %v1865_v52 = vpop.f32.mrf.mxu1 }
 0x56b   : > { %v1870_v57 = vadd.f32 %v1794_v7, %v1659_v48  ;;  %v1872_v51 = vadd.f32 %v1865_v52, %v1661_v46 }
 0x56c   : > { %v1796_v44 = vpop.f32.mrf.mxu0  ;;  %v1867_v42 = vpop.f32.mrf.mxu1 }
 0x56d   : > { %v2927_v45 = vmul.f32 -1.442695, %v1870_v57  ;;  %v1871_v54 = vadd.f32 %v1796_v44, %v1660_v0  ;;  %v2929_v43 = vmul.f32 -1.442695, %v1872_v51  ;;  %v1873_v50 = vadd.f32 %v1867_v42, %v1662_v2  ;;  %v2482_v42 = vld [vmem:[%s3475_s12 + $0x1f8] sm:$0xff] }
 0x56f   : > { %3079 = vpow2.f32 %v2927_v45  ;;  %v2928_v24 = vmul.f32 -1.442695, %v1871_v54  ;;  %v2479_v54 = vld [vmem:[%s3475_s12 + $0x1e0] sm:$0xff] }
 0x571   : > { %3081 = vpow2.f32 %v2928_v24  ;;  %v2481_v24 = vld [vmem:[%s3475_s12 + $0x1f0] sm:$0xff] }
 0x572   : > { %3083 = vpow2.f32 %v2929_v43  ;;  %v2480_v43 = vld [vmem:[%s3475_s12 + $0x1e8] sm:$0xff] }
 0x57c   : > { %v3080_v59 = vpop.eup %3079 }
 0x57d   : > { %v1883_v47 = vadd.f32 1.0, %v3080_v59 }
 0x57e   : > { %v3082_v53 = vpop.eup %3081 }
 0x57f   : > { %3085 = vrcp.f32 %v1883_v47  ;;  %v1884_v7 = vadd.f32 1.0, %v3082_v53  ;;  %v3084_v45 = vpop.eup %3083 }
 0x580   : > { %3087 = vtanh.f32 %v1873_v50  ;;  %v1885_v57 = vadd.f32 1.0, %v3084_v45  ;;  %v2478_v45 = vld [vmem:[%s3475_s12 + $0x1d8] sm:$0xff] }
 0x581   : > { %3089 = vrcp.f32 %v1884_v7  ;;  %v2476_v7 = vld [vmem:[%s3475_s12 + $0x1c8] sm:$0xff] }
 0x582   : > { %3091 = vrcp.f32 %v1885_v57  ;;  %v2474_v57 = vld [vmem:[%s3475_s12 + $0x1b8] sm:$0xff] }
 0x58c   : > { %v3086_v0 = vpop.eup %3085 }
 0x58d   : > { %v3088_v48 = vpop.eup %3087 }
 0x58e   : > { %v3090_v44 = vpop.eup %3089  ;;  %v1895_v51 = vmul.f32 %v3088_v48, %v3086_v0  ;;  %v2475_v0 = vld [vmem:[%s3475_s12 + $0x1c0] sm:$0xff]  ;;  %v2477_v48 = vld [vmem:[%s3475_s12 + $0x1d0] sm:$0xff] }
 0x58f   : > { %v1894_v46 = vmul.f32 %v3090_v44, %v4395_v49  ;;  %v3092_v59 = vpop.eup %3091  ;;  %v2472_v44 = vld [vmem:[%s3475_s12 + $0x1a8] sm:$0xff] }
 0x591   : > { %v4475_v52 = vadd.f32 %v1895_v51, %v1894_v46  ;;  %v2471_v46 = vld [vmem:[%s3475_s12 + $0x1a0] sm:$0xff]  ;;  %v2473_v51 = vld [vmem:[%s3475_s12 + $0x1b0] sm:$0xff] }
 0x593   : > { %3093 = vtanh.f32 %v4475_v52 }
 0x5a0   : > { %v3094_v47 = vpop.eup %3093 }
 0x5a1   : > { %v1898_v53 = vmul.f32 %v3094_v47, %v3092_v59  ;;  %v2470_v59 = vld [vmem:[%s3475_s12 + $0x198] sm:$0xff]  ;;  %v2467_v47 = vld [vmem:[%s3475_s12 + $0x180] sm:$0xff] }
 0x5a3   : > { %1902 = vst [vmem:[%s1901_s13] sm:$0xff] %v1898_v53  ;;  %2046 = vmatmul.mubr.f32.vlgmr.msra.gmra.mxu0 %v1898_v53  ;;  %2117 = vmatmul.mubr.f32.vlgmr.msra.gmra.mxu1 %v1898_v53  ;;  %v2469_v53 = vld [vmem:[%s3475_s12 + $0x190] sm:$0xff] }
 0x5a4   : > { %2234 = vmatpush1.msra.mxu0 %v4058_v61  ;;  %2305 = vmatpush1.msra.mxu1 %v4061_v12  ;;  %v4851_v61 = vld [vmem:[#allocation19_spill] sm:$0xff]  ;;  %v4852_v12 = vld [vmem:[#allocation16_spill] sm:$0xff] }
 0x5a5   : > { %2235 = vmatprep.subr.mxu0 %v4066_v19  ;;  %2306 = vmatprep.subr.mxu1 %v4069_v55  ;;  %v4853_v19 = vld [vmem:[#allocation21_spill] sm:$0xff]  ;;  %v4854_v55 = vld [vmem:[#allocation18_spill] sm:$0xff] }
 0x5a6   : > { %2236 = vmatpush1.msra.mxu0 %v4074_v3  ;;  %2307 = vmatpush1.msra.mxu1 %v4077_v60  ;;  %v4855_v3 = vld [vmem:[#allocation23_spill] sm:$0xff]  ;;  %v4856_v60 = vld [vmem:[#allocation20_spill] sm:$0xff] }
 0x5a7   : > { %2237 = vmatprep.subr.mxu0 %v4082_v37  ;;  %2308 = vmatprep.subr.mxu1 %v4085_v4  ;;  %v4857_v37 = vld [vmem:[#allocation25_spill] sm:$0xff]  ;;  %v4858_v4 = vld [vmem:[#allocation22_spill] sm:$0xff] }
 0x5a8   : > { %2238 = vmatpush1.msra.mxu0 %v4090_v62  ;;  %2309 = vmatpush1.msra.mxu1 %v4093_v28  ;;  %v4859_v62 = vld [vmem:[#allocation27_spill] sm:$0xff]  ;;  %v4860_v28 = vld [vmem:[#allocation24_spill] sm:$0xff] }
 0x5a9   : > { %2239 = vmatprep.subr.mxu0 %v4098_v63  ;;  %2310 = vmatprep.subr.mxu1 %v4101_v58  ;;  %v4861_v63 = vld [vmem:[#allocation29_spill] sm:$0xff]  ;;  %v4862_v58 = vld [vmem:[#allocation26_spill] sm:$0xff] }
 0x5aa   : > { %2240 = vmatpush1.msra.mxu0 %v4106_v1  ;;  %2311 = vmatpush1.msra.mxu1 %v4109_v56  ;;  %v4863_v1 = vld [vmem:[#allocation30_spill] sm:$0xff]  ;;  %v4864_v56 = vld [vmem:[#allocation28_spill] sm:$0xff] }
 0x5ab   : > { %2241 = vmatprep.subr.mxu0 %v4114_v5  ;;  %2312 = vmatprep.subr.mxu1 %v4117_v6  ;;  %v4865_v5 = vld [vmem:[#allocation31_spill] sm:$0xff]  ;;  %v4866_v6 = vld [vmem:[#allocation32_spill] sm:$0xff] }
 0x5ac   : > { %2242 = vmatpush1.msra.mxu0 %v4122_v8  ;;  %2313 = vmatpush1.msra.mxu1 %v4125_v9  ;;  %v4867_v8 = vmov 0.0   ;;  %v4868_v9 = vld [vmem:[#allocation33_spill] sm:$0xff] }
 0x5ad   : > { %2243 = vmatprep.subr.mxu0 %v4130_v10  ;;  %2314 = vmatprep.subr.mxu1 %v4133_v11  ;;  %v1912_v10 = vld [vmem:[%s1911_s23] sm:$0xff] }
 0x5ae   : > { %2244 = vmatpush1.msra.mxu0 %v4138_v13  ;;  %2315 = vmatpush1.msra.mxu1 %v4141_v14  ;;  %v1913_v14 = vld [vmem:[%s1911_s23 + $0x8] sm:$0xff] }
 0x5af   : > { %2245 = vmatprep.subr.mxu0 %v4146_v15  ;;  %2316 = vmatprep.subr.mxu1 %v4149_v16 }
 0x5b0   : > { %2246 = vmatpush1.msra.mxu0 %v4154_v17  ;;  %2317 = vmatpush1.msra.mxu1 %v4157_v18 }
 0x5b1   : > { %2247 = vmatprep.subr.mxu0 %v4160_v20  ;;  %2318 = vmatprep.subr.mxu1 %v4165_v21  ;;  %v1914_v21 = vld [vmem:[%s1911_s23 + $0x10] sm:$0xff] }
 0x5b2   : > { %2248 = vmatpush1.msra.mxu0 %v4168_v22  ;;  %2319 = vmatpush1.msra.mxu1 %v4171_v23 }
 0x5b3   : > { %2249 = vmatprep.subr.mxu0 %v4176_v25  ;;  %2320 = vmatprep.subr.mxu1 %v4179_v26  ;;  %v1915_v26 = vld [vmem:[%s1911_s23 + $0x18] sm:$0xff] }
 0x5b4   : > { %2250 = vmatpush1.msra.mxu0 %v4182_v27  ;;  %2321 = vmatpush1.msra.mxu1 %v4187_v29 }
 0x5b5   : > { %2251 = vmatprep.subr.mxu0 %v4190_v30  ;;  %2322 = vmatprep.subr.mxu1 %v4193_v31 }
 0x5b6   : > { %2252 = vmatpush1.msra.mxu0 %v4198_v32  ;;  %2323 = vmatpush1.msra.mxu1 %v4201_v33 }
 0x5b7   : > { %2253 = vmatprep.subr.mxu0 %v4206_v34  ;;  %2324 = vmatprep.subr.mxu1 %v4209_v35 }
 0x5b8   : > { %2254 = vmatpush1.msra.mxu0 %v4214_v36  ;;  %2325 = vmatpush1.msra.mxu1 %v4217_v38 }
 0x5b9   : > { %2255 = vmatprep.subr.mxu0 %v4222_v39  ;;  %2326 = vmatprep.subr.mxu1 %v4225_v40 }
 0x5ba   : > { %2256 = vmatpush1.msra.mxu0 %v4230_v41  ;;  %2327 = vmatpush1.msra.mxu1 %v4851_v61  ;;  %v2464_v61 = vld [vmem:[%s3475_s12 + $0x168] sm:$0xff] }
 0x5bb   : > { %2257 = vmatprep.subr.mxu0 %v4852_v12  ;;  %2328 = vmatprep.subr.mxu1 %v4853_v19  ;;  %v2466_v12 = vld [vmem:[%s3475_s12 + $0x178] sm:$0xff]  ;;  %v2463_v19 = vld [vmem:[%s3475_s12 + $0x160] sm:$0xff] }
 0x5bc   : > { %2258 = vmatpush1.msra.mxu0 %v4854_v55  ;;  %2329 = vmatpush1.msra.mxu1 %v4855_v3  ;;  %v2465_v55 = vld [vmem:[%s3475_s12 + $0x170] sm:$0xff]  ;;  %v2460_v3 = vld [vmem:[%s3475_s12 + $0x148] sm:$0xff] }
 0x5bd   : > { %2259 = vmatprep.subr.mxu0 %v4856_v60  ;;  %2330 = vmatprep.subr.mxu1 %v4857_v37  ;;  %v2462_v60 = vld [vmem:[%s3475_s12 + $0x158] sm:$0xff]  ;;  %v2459_v37 = vld [vmem:[%s3475_s12 + $0x140] sm:$0xff] }
 0x5be   : > { %2260 = vmatpush1.msra.mxu0 %v4858_v4  ;;  %2331 = vmatpush1.msra.mxu1 %v4859_v62  ;;  %v2461_v4 = vld [vmem:[%s3475_s12 + $0x150] sm:$0xff]  ;;  %v2456_v62 = vld [vmem:[%s3475_s12 + $0x128] sm:$0xff] }
 0x5bf   : > { %2261 = vmatprep.subr.mxu0 %v4860_v28  ;;  %2332 = vmatprep.subr.mxu1 %v4861_v63  ;;  %v2458_v28 = vld [vmem:[%s3475_s12 + $0x138] sm:$0xff]  ;;  %v2455_v63 = vld [vmem:[%s3475_s12 + $0x120] sm:$0xff] }
 0x5c0   : > { %2262 = vmatpush1.msra.mxu0 %v4862_v58  ;;  %2333 = vmatpush1.msra.mxu1 %v4863_v1  ;;  %v2457_v58 = vld [vmem:[%s3475_s12 + $0x130] sm:$0xff]  ;;  %v2452_v1 = vld [vmem:[%s3475_s12 + $0x108] sm:$0xff] }
 0x5c1   : > { %2263 = vmatprep.subr.mxu0 %v4864_v56  ;;  %2334 = vmatprep.subr.mxu1 %v4865_v5  ;;  %v2454_v56 = vld [vmem:[%s3475_s12 + $0x118] sm:$0xff]  ;;  %v2451_v5 = vld [vmem:[%s3475_s12 + $0x100] sm:$0xff] }
 0x5c2   : > { %2264 = vmatpush1.msra.mxu0 %v4866_v6  ;;  %2297 = vmatprep.mubr.f32.mxu0 %v4867_v8  ;;  %v2453_v6 = vld [vmem:[%s3475_s12 + $0x110] sm:$0xff] }
 0x5c3   : > { %2335 = vmatpush1.msra.mxu1 %v4868_v9  ;;  %2368 = vmatprep.mubr.f32.mxu1 %v4867_v8  ;;  %v2450_v9 = vld [vmem:[%s3475_s12 + $0xf8] sm:$0xff] }
 0x5c4   : > { %2483 = vmatprep.subr.mxu0 %v2480_v43  ;;  %2554 = vmatprep.subr.mxu1 %v2482_v42  ;;  %v2421_v43 = vld [vmem:[%s3475_s12 + $0x10] sm:$0xff]  ;;  %v2164_v42 = vld [vmem:[%s2163_s28] sm:$0xff] }
 0x663   : > { %v2047_v11 = vpop.f32.mrf.mxu0  ;;  %v2118_v20 = vpop.f32.mrf.mxu1 }
 0x664   : > { %v2123_v13 = vadd.f32 %v2047_v11, %v1912_v10  ;;  %v2125_v22 = vadd.f32 %v2118_v20, %v1914_v21  ;;  %v2447_v10 = vld [vmem:[%s3475_s12 + $0xe0] sm:$0xff]  ;;  %v2449_v11 = vld [vmem:[%s3475_s12 + $0xf0] sm:$0xff] }
 0x665   : > { %v2049_v15 = vpop.f32.mrf.mxu0  ;;  %v2120_v23 = vpop.f32.mrf.mxu1  ;;  %v2439_v20 = vld [vmem:[%s3475_s12 + $0xa0] sm:$0xff]  ;;  %v2441_v21 = vld [vmem:[%s3475_s12 + $0xb0] sm:$0xff] }
 0x666   : > { %v2934_v16 = vmul.f32 -1.442695, %v2123_v13  ;;  %v2124_v17 = vadd.f32 %v2049_v15, %v1913_v14  ;;  %v2936_v25 = vmul.f32 -1.442695, %v2125_v22  ;;  %v2126_v29 = vadd.f32 %v2120_v23, %v1915_v26  ;;  %v2444_v13 = vld [vmem:[%s3475_s12 + $0xc8] sm:$0xff]  ;;  %v2446_v14 = vld [vmem:[%s3475_s12 + $0xd8] sm:$0xff] }
 0x667   : > { %v2443_v15 = vld [vmem:[%s3475_s12 + $0xc0] sm:$0xff]  ;;  %v2436_v22 = vld [vmem:[%s3475_s12 + $0x88] sm:$0xff]  ;;  %v2438_v23 = vld [vmem:[%s3475_s12 + $0x98] sm:$0xff] }
 0x668   : > { %3095 = vpow2.f32 %v2934_v16  ;;  %v2935_v18 = vmul.f32 -1.442695, %v2124_v17  ;;  %v2445_v16 = vld [vmem:[%s3475_s12 + $0xd0] sm:$0xff]  ;;  %v2440_v17 = vld [vmem:[%s3475_s12 + $0xa8] sm:$0xff] }
 0x669   : > { %v2437_v26 = vld [vmem:[%s3475_s12 + $0x90] sm:$0xff] }
 0x66a   : > { %3097 = vpow2.f32 %v2935_v18  ;;  %v2442_v18 = vld [vmem:[%s3475_s12 + $0xb8] sm:$0xff] }
 0x66b   : > { %3099 = vpow2.f32 %v2936_v25  ;;  %v2435_v25 = vld [vmem:[%s3475_s12 + $0x80] sm:$0xff] }
 0x675   : > { %v3096_v27 = vpop.eup %3095 }
 0x676   : > { %v2136_v30 = vadd.f32 1.0, %v3096_v27  ;;  %v2432_v27 = vld [vmem:[%s3475_s12 + $0x68] sm:$0xff] }
 0x677   : > { %v3098_v31 = vpop.eup %3097 }
 0x678   : > { %3101 = vrcp.f32 %v2136_v30  ;;  %v2137_v32 = vadd.f32 1.0, %v3098_v31  ;;  %v3100_v33 = vpop.eup %3099  ;;  %v2431_v30 = vld [vmem:[%s3475_s12 + $0x60] sm:$0xff]  ;;  %v2433_v31 = vld [vmem:[%s3475_s12 + $0x70] sm:$0xff] }
 0x679   : > { %3103 = vtanh.f32 %v2126_v29  ;;  %v2138_v38 = vadd.f32 1.0, %v3100_v33  ;;  %v2434_v29 = vld [vmem:[%s3475_s12 + $0x78] sm:$0xff] }
 0x67a   : > { %3105 = vrcp.f32 %v2137_v32  ;;  %v2428_v32 = vld [vmem:[%s3475_s12 + $0x48] sm:$0xff]  ;;  %v2430_v33 = vld [vmem:[%s3475_s12 + $0x58] sm:$0xff] }
 0x67b   : > { %3107 = vrcp.f32 %v2138_v38  ;;  %v2426_v38 = vld [vmem:[%s3475_s12 + $0x38] sm:$0xff] }
 0x685   : > { %v3102_v34 = vpop.eup %3101 }
 0x686   : > { %v3104_v35 = vpop.eup %3103 }
 0x687   : > { %v3106_v36 = vpop.eup %3105  ;;  %v2148_v40 = vmul.f32 %v3104_v35, %v3102_v34  ;;  %v2427_v34 = vld [vmem:[%s3475_s12 + $0x40] sm:$0xff]  ;;  %v2429_v35 = vld [vmem:[%s3475_s12 + $0x50] sm:$0xff] }
 0x688   : > { %v2147_v39 = vmul.f32 %v3106_v36, %v4475_v52  ;;  %v3108_v49 = vpop.eup %3107  ;;  %v2468_v52 = vld [vmem:[%s3475_s12 + $0x188] sm:$0xff] }
 0x689   : > { %v2424_v36 = vld [vmem:[%s3475_s12 + $0x28] sm:$0xff] }
 0x68a   : > { %v4553_v41 = vadd.f32 %v2148_v40, %v2147_v39  ;;  %v2423_v39 = vld [vmem:[%s3475_s12 + $0x20] sm:$0xff]  ;;  %v2425_v40 = vld [vmem:[%s3475_s12 + $0x30] sm:$0xff] }
 0x68c   : > { %3109 = vtanh.f32 %v4553_v41 }
 0x699   : > { %v3110_v50 = vpop.eup %3109 }
 0x69a   : > { %v2151_v2 = vmul.f32 %v3110_v50, %v3108_v49  ;;  %v2420_v49 = vld [vmem:[%s3475_s12 + $0x8] sm:$0xff]  ;;  %v2422_v50 = vld [vmem:[%s3475_s12 + $0x18] sm:$0xff] }
 0x69c   : > { %2155 = vst [vmem:[%s2154_s29] sm:$0xff] %v2151_v2  ;;  %2298 = vmatmul.mubr.f32.vlgmr.msra.gmra.mxu0 %v2151_v2  ;;  %2369 = vmatmul.mubr.f32.vlgmr.msra.gmra.mxu1 %v2151_v2  ;;  %v2419_v2 = vld [vmem:[%s3475_s12] sm:$0xff] }
 0x69d   : > { %2547 = vmatprep.mubr.f32.mxu0 %v4867_v8  ;;  %2618 = vmatprep.mubr.f32.mxu1 %v4867_v8  ;;  %v2448_v8 = vld [vmem:[%s3475_s12 + $0xe8] sm:$0xff]  ;;  %s2406_s12 = scalar_lea.vmem %s3961_s14, %s2937_s6 [#allocation10] }
 0x69e   : > { %2484 = vmatpush1.msra.mxu0 %v2479_v54  ;;  %2555 = vmatpush1.msra.mxu1 %v2481_v24 }
 0x69f   : > { %2485 = vmatprep.subr.mxu0 %v2476_v7  ;;  %2556 = vmatprep.subr.mxu1 %v2478_v45  ;;  %v2165_v7 = vld [vmem:[%s2163_s28 + $0x8] sm:$0xff] }
 0x6a0   : > { %2486 = vmatpush1.msra.mxu0 %v2475_v0  ;;  %2557 = vmatpush1.msra.mxu1 %v2477_v48 }
 0x6a1   : > { %2487 = vmatprep.subr.mxu0 %v2472_v44  ;;  %2558 = vmatprep.subr.mxu1 %v2474_v57 }
 0x6a2   : > { %2488 = vmatpush1.msra.mxu0 %v2471_v46  ;;  %2559 = vmatpush1.msra.mxu1 %v2473_v51  ;;  %v2166_v46 = vld [vmem:[%s2163_s28 + $0x10] sm:$0xff] }
 0x6a3   : > { %2489 = vmatprep.subr.mxu0 %v2468_v52  ;;  %2560 = vmatprep.subr.mxu1 %v2470_v59 }
 0x6a4   : > { %2490 = vmatpush1.msra.mxu0 %v2467_v47  ;;  %2561 = vmatpush1.msra.mxu1 %v2469_v53  ;;  %v2167_v47 = vld [vmem:[%s2163_s28 + $0x18] sm:$0xff] }
 0x6a5   : > { %2491 = vmatprep.subr.mxu0 %v2464_v61  ;;  %2562 = vmatprep.subr.mxu1 %v2466_v12 }
 0x6a6   : > { %2492 = vmatpush1.msra.mxu0 %v2463_v19  ;;  %2563 = vmatpush1.msra.mxu1 %v2465_v55 }
 0x6a7   : > { %2493 = vmatprep.subr.mxu0 %v2460_v3  ;;  %2564 = vmatprep.subr.mxu1 %v2462_v60 }
 0x6a8   : > { %2494 = vmatpush1.msra.mxu0 %v2459_v37  ;;  %2565 = vmatpush1.msra.mxu1 %v2461_v4 }
 0x6a9   : > { %2495 = vmatprep.subr.mxu0 %v2456_v62  ;;  %2566 = vmatprep.subr.mxu1 %v2458_v28 }
 0x6aa   : > { %2496 = vmatpush1.msra.mxu0 %v2455_v63  ;;  %2567 = vmatpush1.msra.mxu1 %v2457_v58 }
 0x6ab   : > { %2497 = vmatprep.subr.mxu0 %v2452_v1  ;;  %2568 = vmatprep.subr.mxu1 %v2454_v56 }
 0x6ac   : > { %2498 = vmatpush1.msra.mxu0 %v2451_v5  ;;  %2569 = vmatpush1.msra.mxu1 %v2453_v6  ;;  %v2414_v6 = vld [vmem:[%s2413_s27] sm:$0xff] }
 0x6ad   : > { %2499 = vmatprep.subr.mxu0 %v2448_v8  ;;  %2570 = vmatprep.subr.mxu1 %v2450_v9  ;;  %v2415_v9 = vld [vmem:[%s2413_s27 + $0x8] sm:$0xff] }
 0x6ae   : > { %2500 = vmatpush1.msra.mxu0 %v2447_v10  ;;  %2571 = vmatpush1.msra.mxu1 %v2449_v11 }
 0x6af   : > { %2501 = vmatprep.subr.mxu0 %v2444_v13  ;;  %2572 = vmatprep.subr.mxu1 %v2446_v14 }
 0x6b0   : > { %2502 = vmatpush1.msra.mxu0 %v2443_v15  ;;  %2573 = vmatpush1.msra.mxu1 %v2445_v16  ;;  %v2416_v16 = vld [vmem:[%s2413_s27 + $0x10] sm:$0xff] }
 0x6b1   : > { %2503 = vmatprep.subr.mxu0 %v2440_v17  ;;  %2574 = vmatprep.subr.mxu1 %v2442_v18 }
 0x6b2   : > { %2504 = vmatpush1.msra.mxu0 %v2439_v20  ;;  %2575 = vmatpush1.msra.mxu1 %v2441_v21  ;;  %v2417_v21 = vld [vmem:[%s2413_s27 + $0x18] sm:$0xff] }
 0x6b3   : > { %2505 = vmatprep.subr.mxu0 %v2436_v22  ;;  %2576 = vmatprep.subr.mxu1 %v2438_v23 }
 0x6b4   : > { %2506 = vmatpush1.msra.mxu0 %v2435_v25  ;;  %2577 = vmatpush1.msra.mxu1 %v2437_v26 }
 0x6b5   : > { %2507 = vmatprep.subr.mxu0 %v2432_v27  ;;  %2578 = vmatprep.subr.mxu1 %v2434_v29 }
 0x6b6   : > { %2508 = vmatpush1.msra.mxu0 %v2431_v30  ;;  %2579 = vmatpush1.msra.mxu1 %v2433_v31 }
 0x6b7   : > { %2509 = vmatprep.subr.mxu0 %v2428_v32  ;;  %2580 = vmatprep.subr.mxu1 %v2430_v33 }
 0x6b8   : > { %2510 = vmatpush1.msra.mxu0 %v2427_v34  ;;  %2581 = vmatpush1.msra.mxu1 %v2429_v35 }
 0x6b9   : > { %2511 = vmatprep.subr.mxu0 %v2424_v36  ;;  %2582 = vmatprep.subr.mxu1 %v2426_v38 }
 0x6ba   : > { %2512 = vmatpush1.msra.mxu0 %v2423_v39  ;;  %2583 = vmatpush1.msra.mxu1 %v2425_v40 }
 0x6bb   : > { %2513 = vmatprep.subr.mxu0 %v2420_v49  ;;  %2584 = vmatprep.subr.mxu1 %v2422_v50 }
 0x6bc   : > { %2514 = vmatpush1.msra.mxu0 %v2419_v2  ;;  %2585 = vmatpush1.msra.mxu1 %v2421_v43 }
 0x75c   : > { %v2299_v54 = vpop.f32.mrf.mxu0  ;;  %v2370_v57 = vpop.f32.mrf.mxu1 }
 0x75d   : > { %v2375_v24 = vadd.f32 %v2299_v54, %v2164_v42  ;;  %v2377_v51 = vadd.f32 %v2370_v57, %v2166_v46 }
 0x75e   : > { %v2301_v45 = vpop.f32.mrf.mxu0  ;;  %v2372_v52 = vpop.f32.mrf.mxu1 }
 0x75f   : > { %v2940_v0 = vmul.f32 -1.442695, %v2375_v24  ;;  %v2376_v48 = vadd.f32 %v2301_v45, %v2165_v7  ;;  %v2942_v59 = vmul.f32 -1.442695, %v2377_v51  ;;  %v2378_v61 = vadd.f32 %v2372_v52, %v2167_v47 }
 0x761   : > { %3111 = vpow2.f32 %v2940_v0  ;;  %v2941_v44 = vmul.f32 -1.442695, %v2376_v48 }
 0x763   : > { %3113 = vpow2.f32 %v2941_v44 }
 0x764   : > { %3115 = vpow2.f32 %v2942_v59 }
 0x76e   : > { %v3112_v53 = vpop.eup %3111 }
 0x76f   : > { %v2388_v12 = vadd.f32 1.0, %v3112_v53 }
 0x770   : > { %v3114_v19 = vpop.eup %3113 }
 0x771   : > { %3117 = vrcp.f32 %v2388_v12  ;;  %v2389_v55 = vadd.f32 1.0, %v3114_v19  ;;  %v3116_v3 = vpop.eup %3115 }
 0x772   : > { %3119 = vtanh.f32 %v2378_v61  ;;  %v2390_v62 = vadd.f32 1.0, %v3116_v3 }
 0x773   : > { %3121 = vrcp.f32 %v2389_v55 }
 0x774   : > { %3123 = vrcp.f32 %v2390_v62 }
 0x77e   : > { %v3118_v60 = vpop.eup %3117 }
 0x77f   : > { %v3120_v37 = vpop.eup %3119 }
 0x780   : > { %v3122_v4 = vpop.eup %3121  ;;  %v2400_v63 = vmul.f32 %v3120_v37, %v3118_v60 }
 0x781   : > { %v2399_v28 = vmul.f32 %v3122_v4, %v4553_v41  ;;  %v3124_v1 = vpop.eup %3123 }
 0x783   : > { %v2401_v58 = vadd.f32 %v2400_v63, %v2399_v28 }
 0x785   : > { %3125 = vtanh.f32 %v2401_v58 }
 0x792   : > { %v3126_v56 = vpop.eup %3125 }
 0x793   : > { %v2403_v5 = vmul.f32 %v3126_v56, %v3124_v1 }
 0x795   : > { %2407 = vst [vmem:[%s2406_s12] sm:$0xff] %v2403_v5  ;;  %2548 = vmatmul.mubr.f32.vlgmr.msra.gmra.mxu0 %v2403_v5  ;;  %2619 = vmatmul.mubr.f32.vlgmr.msra.gmra.mxu1 %v2403_v5 }
 0x855   : > { %v2549_v8 = vpop.f32.mrf.mxu0  ;;  %v2620_v15 = vpop.f32.mrf.mxu1 }
 0x856   : > { %v2625_v41 = vadd.f32 %v2549_v8, %v2414_v6  ;;  %v2627_v17 = vadd.f32 %v2620_v15, %v2416_v16 }
 0x857   : > { %v2551_v10 = vpop.f32.mrf.mxu0  ;;  %v2622_v18 = vpop.f32.mrf.mxu1 }
 0x858   : > { %v2945_v11 = vmul.f32 -1.442695, %v2625_v41  ;;  %v2626_v13 = vadd.f32 %v2551_v10, %v2415_v9  ;;  %v2947_v20 = vmul.f32 -1.442695, %v2627_v17  ;;  %v2628_v23 = vadd.f32 %v2622_v18, %v2417_v21 }
 0x85a   : > { %3127 = vpow2.f32 %v2945_v11  ;;  %v2946_v14 = vmul.f32 -1.442695, %v2626_v13 }
 0x85c   : > { %3129 = vpow2.f32 %v2946_v14 }
 0x85d   : > { %3131 = vpow2.f32 %v2947_v20 }
 0x867   : > { %v3128_v22 = vpop.eup %3127 }
 0x868   : > { %v2638_v25 = vadd.f32 1.0, %v3128_v22 }
 0x869   : > { %v3130_v26 = vpop.eup %3129 }
 0x86a   : > { %3133 = vrcp.f32 %v2638_v25  ;;  %v2639_v27 = vadd.f32 1.0, %v3130_v26  ;;  %v3132_v29 = vpop.eup %3131 }
 0x86b   : > { %3135 = vtanh.f32 %v2628_v23  ;;  %v2640_v33 = vadd.f32 1.0, %v3132_v29 }
 0x86c   : > { %3137 = vrcp.f32 %v2639_v27 }
 0x86d   : > { %3139 = vrcp.f32 %v2640_v33 }
 0x877   : > { %v3134_v30 = vpop.eup %3133 }
 0x878   : > { %v3136_v31 = vpop.eup %3135 }
 0x879   : > { %v3138_v32 = vpop.eup %3137  ;;  %v2650_v35 = vmul.f32 %v3136_v31, %v3134_v30 }
 0x87a   : > { %v2649_v34 = vmul.f32 %v3138_v32, %v2401_v58  ;;  %v3140_v38 = vpop.eup %3139 }
 0x87c   : > { %v2651_v36 = vadd.f32 %v2650_v35, %v2649_v34 }
 0x87e   : > { %3141 = vtanh.f32 %v2651_v36 }
 0x88a   : > { %2664 = sbr.rel (!%p4869_p10) target bundleno = 2203 (0x89b), region = 52 }
 0x88b   : > { %v3142_v39 = vpop.eup %3141 }
 0x88c   : > { %v2653_v40 = vmul.f32 %v3142_v39, %v3140_v38 }
 0x88e   : > { %2657 = vst [vmem:[%s2656_s11] sm:$0xff] %v2653_v40 }
 0x895   : > { %v2709_v49 = vld [vmem:[%s3961_s14] sm:$0xff]  ;;  %v2711_v50 = vld [vmem:[%s3961_s14 + $0x8] sm:$0xff]  ;;  %v2713_v2 = vld [vmem:[%s3961_s14 + $0x10] sm:$0xff] }
 0x896   : > { %v2715_v43 = vld [vmem:[%s3961_s14 + $0x18] sm:$0xff]  ;;  %v2717_v42 = vld [vmem:[%s3961_s14 + $0x20] sm:$0xff]  ;;  %v2719_v54 = vld [vmem:[%s3961_s14 + $0x28] sm:$0xff]  ;;  %2710 = vst [vmem:[%s2666_s18] sm:$0xff] %v2709_v49 }
 0x897   : > { %2712 = vst [vmem:[%s2666_s18 + $0x10] sm:$0xff] %v2711_v50  ;;  %2714 = vst [vmem:[%s2666_s18 + $0x20] sm:$0xff] %v2713_v2  ;;  %v2721_v24 = vld [vmem:[%s3961_s14 + $0x30] sm:$0xff]  ;;  %v2723_v7 = vld [vmem:[%s3961_s14 + $0x38] sm:$0xff] }
 0x898   : > { %2716 = vst [vmem:[%s2666_s18 + $0x30] sm:$0xff] %v2715_v43  ;;  %2718 = vst [vmem:[%s2666_s18 + $0x40] sm:$0xff] %v2717_v42 }
 0x899   : > { %2720 = vst [vmem:[%s2666_s18 + $0x50] sm:$0xff] %v2719_v54  ;;  %2722 = vst [vmem:[%s2666_s18 + $0x60] sm:$0xff] %v2721_v24 }
 0x89a   : > { %2724 = vst [vmem:[%s2666_s18 + $0x70] sm:$0xff] %v2723_v7 }
 0x89b PF: > { %s4870_s19 = sld [smem:[#allocation13_spill]]  ;;  %p17_p5 = scmp.ge.s32.totalorder %s3320_s20, 4  }
 0x89c   : > { %s4871_s17 = sld [smem:[#allocation14_spill]]  ;;  %s4872_s15 = smov %s3257_s16 }
 0x89d   : > { %s4874_s18 = smov %s3320_s20  ;;  %19 = sbr.rel (!%p17_p5) target bundleno = 8 (0x8), region = 154 }
 0x8a1   : > { %s4873_s16 = smov %s4870_s19 }
 0x8a2   :  { %2740 = vsyncpa [#allocation6], 1 }
 0x8a3   :  { %2742 = vsyncpa [#allocation6 + $0x1], 1 }
 0x8a4   :  { %2743 = vsyncpa [#allocation8], 1 }
 0x8a5   :  { %2745 = vsyncpa [#allocation8 + $0x1], 1 }

// kernel: tasnet_forward.8
= control target key start
LH: loop header
LB: loop body
LE: loop exit
PB: predicated region body
PF: predicated region fallthrough
CT: control target
= control target key end

     0   :  { %9 = vsyncpa [#allocation6], 0  ;;  %s4608_s0 = inlined_call_operand.vmem [shape: f32[64,256], index: 0, kind: input, shape index: {}]   ;;  %s4609_s1 = inlined_call_operand.vmem [shape: f32[2,256,512], index: 1, kind: input, shape index: {}]   ;;  %s4610_s2 = inlined_call_operand.hbm [shape: f32[2,128,512], index: 2, kind: input, shape index: {}]   ;;  %s4611_s3 = inlined_call_operand.vmem [shape: f32[2,1,512], index: 3, kind: input, shape index: {}]   ;;  %s4612_s4 = inlined_call_operand.vmem [shape: f32[64,256], index: 4, kind: output, shape index: {}]  }
   0x1   :  { %11 = vsyncpa [#allocation6 + $0x1], 0  ;;  %s3235_s15 = smov 0   ;;  %s3237_s16 = smov 0  }
   0x2   :  { %s3239_s17 = smov 0   ;;  %s3241_s18 = smov 0  }
   0x3 LB: > { %s3254_s19 = sadd.s32 4294967295, %s3204_s18   ;;  %s3257_s20 = sadd.s32 1, %s3204_s18   ;;  %s3204_s18 = sphi %s3241_s18, %s4800_s18   ;;  %s3200_s17 = sphi %s3239_s17, %s4799_s17   ;;  %s3196_s16 = sphi %s3237_s16, %s4798_s16   ;;  %s3192_s15 = sphi %s3235_s15, %s4797_s15  }
   0x4   : > { %s68_s21 = ssub.s32 %s3204_s18, %s3257_s20  ;;  %s71_s22 = sadd.s32 1, %s3200_s17 }
   0x5   : > { %p69_p0 = scmp.eq.s32.totalorder %s68_s21, 0  ;;  %p78_p1 = scmp.ne.s32.totalorder %s3200_s17, %s3196_s16 }
   0x6   : > { %p79_p2 = scmp.eq.s32.totalorder %s3204_s18, 0  ;;  %p84_p3 = scmp.ne.s32.totalorder %s3196_s16, %s3192_s15 }
   0x7   : > { %s3267_s23 = scalar_select %p69_p0, %s3200_s17, %s71_s22  }
   0x8   : > { %p3269_p4 = por %p79_p2, %p78_p1  ;;  %p85_p5 = scmp.eq.s32.totalorder %s3254_s19, 0 }
   0x9   : > { %p134_p6 = scmp.eq.s32.totalorder %s3254_s19, 1  ;;  %p2978_p8 = scmp.lt.s32.totalorder %s3204_s18, 2 }
   0xa   : > { %p3275_p7 = por %p85_p5, %p84_p3  ;;  %s171_s27 = sand.u32 1, %s3200_s17  }
   0xb   : > { %p3280_p9 = por %p134_p6, %p78_p1  ;;  %s2899_s28 = sshll.u32 %s171_s27, 9 }
   0xc   : > { %s4677_s25 = scalar_select %p3275_p7, 1, 0 }
   0xd   : > { %s4678_s26 = scalar_select %p3280_p9, 1, 0 }
   0xe   : > { %s2962_s29 = sshll.u32 %s3204_s18, 13  ;;  %s175_s7 = scalar_lea.vmem [#allocation5], %s2899_s28 }
   0xf   : > { %s3289_s6 = scalar_lea.hbm %s4610_s2, %s2962_s29  ;;  %s182_s8 = sshll.u32 %s175_s7, 4  ;;  %s3291_s8 = int_to_ptr.vmem [resolvable:$true] %s182_s8 }
  0x10   : > { %p3295_p10 = pnand %p2978_p8, %p3269_p4  ;;  %s3300_s10 = scalar_lea.sflag [#allocation6], %s171_s27 }
  0x11   : > { %s3142_s11 = scalar_lea.hbm %s3289_s6, 8192  ;;  %s3147_s14 = scalar_lea.hbm %s4610_s2, 16384 }
  0x12   : > { %p3143_p12 = scmp.ne.s32.totalorder %s3289_s6, %s3142_s11  ;;  %p3144_p13 = pneg %p3295_p10 }
  0x13   : > { %p3148_p2 = scmp.lt.s32.totalorder %s3289_s6, %s4610_s2  ;;  %p3149_p3 = scmp.lt.s32.totalorder %s3147_s14, %s3142_s11 }
  0x14   : > { %p3145_p0 = pnand %p3144_p13, %p3143_p12 }
  0x15   : > { %p3150_p4 = por %p3149_p3, %p3148_p2 }
  0x16   : > { %p3146_p1 = pneg %p3145_p0 }
  0x18   : > { %p3151_p5 = pnand %p3150_p4, %p3146_p1 }
  0x1a   : > { %3154 = shalt.err (!%p3151_p5)
}
  0x1b   : > { %s3155_s22 = scalar_lea.vmem %s3291_s8, 8192  ;;  %s3206_s24 = smov [#allocation5]  }
  0x1c   : > { %p3156_p6 = scmp.ne.s32.totalorder %s3291_s8, %s3155_s22  ;;  %s3160_s27 = sshll.u32 %s3206_s24, 4  ;;  %s3161_s27 = int_to_ptr.vmem [resolvable:$false] %s3160_s27 }
  0x1d   : > { %s3162_s28 = scalar_lea.vmem %s3161_s27, 16384  ;;  %p3163_p0 = scmp.lt.s32.totalorder %s3291_s8, %s3161_s27 }
  0x1e   : > { %p3158_p8 = pnand %p3156_p6, %p3144_p13  ;;  %p3164_p11 = scmp.lt.s32.totalorder %s3162_s28, %s3155_s22 }
  0x20   : > { %p3159_p12 = pneg %p3158_p8  ;;  %p3165_p9 = por %p3164_p11, %p3163_p0 }
  0x22   : > { %p3166_p7 = pnand %p3165_p9, %p3159_p12 }
  0x24   : > { %3169 = shalt.err (!%p3166_p7)
}
  0x25   : > { %s3207_s29 = smov 512   ;;  %s3208_s30 = smov 32  }
  0x26   : > { %2977 = dma.hbm_to_vmem [thread:$0]  (!%p3295_p10), %s3289_s6, 8192, %s3291_s8, %s3300_s10, %s3207_s29, %s3207_s29, %s3208_s30  }
  0x27   : > { %p197_p13 = scmp.lt.s32.totalorder %s3204_s18, 3  ;;  %p4680_p1 = scmp.ge.s32.totalorder %s3204_s18, 1 }
  0x29   : > { %p198_p2 = pnand %p4680_p1, %p197_p13 }
  0x2b   : > { %201 = sbr.rel (%p198_p2) target bundleno = 2177 (0x881), region = 36 }
  0x30   : > { %s3325_s5 = sand.u32 1, %s3196_s16   ;;  %p4681_p7 = scmp.ne.s32.totalorder %s4677_s25, 0 }
  0x31   : > { %s2903_s7 = sshll.u32 %s3325_s5, 9  ;;  %s204_s11 = scalar_lea.sflag [#allocation6], %s3325_s5 }
  0x32   : > { %s3329_s12 = scalar_lea.vmem [#allocation5], %s2903_s7 }
  0x33   : > { %3187 = dma.done.wait (%p4681_p7), %s204_s11, 8192  }
  0x34   : > { %3189 = vsyncadd (%p4681_p7), %s204_s11, 4294959104  ;;  %p240_p9 = scmp.lt.s32.totalorder %s3254_s19, 1  ;;  %s2904_s22 = sshll.u32 %s3325_s5, 6 }
  0x35   : > { %s3900_s24 = scalar_lea.vmem [#allocation7], %s2904_s22  ;;  %s926_s5 = smul.u32 6, %s3254_s19 }
  0x36   : > { %s3337_s18 = scalar_select %p240_p9, %s3254_s19, 1 }
  0x37   : > { %s3971_s28 = ssub.s32 1, %s3254_s19  ;;  %p4796_p10 = scmp.ne.s32.totalorder %s4678_s26, 0 }
  0x38   : > { %s2963_s6 = sshll.u32 %s3337_s18, 10  ;;  %s2907_s9 = sshll.u32 %s3337_s18, 2 }
  0x39   : > { %s3343_s10 = scalar_lea.vmem %s4609_s1, %s2963_s6  ;;  %s248_s13 = scalar_lea.vmem %s4611_s3, %s2907_s9 }
  0x3a   : > { %v326_v0 = vld [vmem:[%s3343_s10 + $0x1e8] sm:$0xff]  ;;  %v328_v1 = vld [vmem:[%s3343_s10 + $0x1f8] sm:$0xff]  ;;  %v325_v2 = vld [vmem:[%s3343_s10 + $0x1e0] sm:$0xff]  ;;  %s675_s18 = smul.u32 56, %s3254_s19  ;;  %s3974_s29 = sadd.s32 %s926_s5, %s3971_s28 }
  0x3b   : > { %415 = vmatprep.subr.mxu0 %v326_v0  ;;  %528 = vmatprep.subr.mxu1 %v328_v1  ;;  %v327_v3 = vld [vmem:[%s3343_s10 + $0x1f0] sm:$0xff]  ;;  %v322_v4 = vld [vmem:[%s3343_s10 + $0x1c8] sm:$0xff]  ;;  %v324_v5 = vld [vmem:[%s3343_s10 + $0x1d8] sm:$0xff]  ;;  %s2913_s30 = sshll.u32 %s3974_s29, 3  ;;  %s1179_s9 = smul.u32 5, %s3254_s19 }
  0x3c   : > { %416 = vmatpush1.msra.mxu0 %v325_v2  ;;  %529 = vmatpush1.msra.mxu1 %v327_v3  ;;  %v321_v6 = vld [vmem:[%s3343_s10 + $0x1c0] sm:$0xff]  ;;  %v323_v7 = vld [vmem:[%s3343_s10 + $0x1d0] sm:$0xff]  ;;  %v318_v8 = vld [vmem:[%s3343_s10 + $0x1a8] sm:$0xff]  ;;  %s676_s14 = sshra.s32 %s675_s18, 3  ;;  %s923_s27 = scalar_lea.vmem %s3900_s24, %s675_s18 [#allocation7] }
  0x3d   : > { %417 = vmatprep.subr.mxu0 %v322_v4  ;;  %530 = vmatprep.subr.mxu1 %v324_v5  ;;  %v320_v9 = vld [vmem:[%s3343_s10 + $0x1b8] sm:$0xff]  ;;  %v317_v10 = vld [vmem:[%s3343_s10 + $0x1a0] sm:$0xff]  ;;  %v319_v11 = vld [vmem:[%s3343_s10 + $0x1b0] sm:$0xff]  ;;  %s2964_s15 = sshll.u32 %s676_s14, 5  ;;  %s929_s7 = sshra.s32 %s2913_s30, 3 }
  0x3e   : > { %418 = vmatpush1.msra.mxu0 %v321_v6  ;;  %531 = vmatpush1.msra.mxu1 %v323_v7  ;;  %v314_v12 = vld [vmem:[%s3343_s10 + $0x188] sm:$0xff]  ;;  %v316_v13 = vld [vmem:[%s3343_s10 + $0x198] sm:$0xff]  ;;  %v313_v14 = vld [vmem:[%s3343_s10 + $0x180] sm:$0xff]  ;;  %s680_s21 = scalar_lea.vmem [#allocation2], %s2964_s15  ;;  %s2965_s11 = sshll.u32 %s929_s7, 5 }
  0x3f   : > { %419 = vmatprep.subr.mxu0 %v318_v8  ;;  %532 = vmatprep.subr.mxu1 %v320_v9  ;;  %v315_v15 = vld [vmem:[%s3343_s10 + $0x190] sm:$0xff]  ;;  %v310_v16 = vld [vmem:[%s3343_s10 + $0x168] sm:$0xff]  ;;  %v312_v17 = vld [vmem:[%s3343_s10 + $0x178] sm:$0xff]  ;;  %s933_s6 = scalar_lea.vmem [#allocation2], %s2965_s11  ;;  %s1176_s8 = scalar_lea.vmem %s3900_s24, %s2913_s30 [#allocation7] }
  0x40   : > { %420 = vmatpush1.msra.mxu0 %v317_v10  ;;  %533 = vmatpush1.msra.mxu1 %v319_v11  ;;  %v309_v18 = vld [vmem:[%s3343_s10 + $0x160] sm:$0xff]  ;;  %v311_v19 = vld [vmem:[%s3343_s10 + $0x170] sm:$0xff]  ;;  %v306_v20 = vld [vmem:[%s3343_s10 + $0x148] sm:$0xff]  ;;  %s1431_s22 = smul.u32 3, %s3971_s28 }
  0x41   : > { %421 = vmatprep.subr.mxu0 %v314_v12  ;;  %534 = vmatprep.subr.mxu1 %v316_v13  ;;  %v308_v21 = vld [vmem:[%s3343_s10 + $0x158] sm:$0xff]  ;;  %v305_v22 = vld [vmem:[%s3343_s10 + $0x140] sm:$0xff]  ;;  %v307_v23 = vld [vmem:[%s3343_s10 + $0x150] sm:$0xff] }
  0x42   : > { %422 = vmatpush1.msra.mxu0 %v313_v14  ;;  %535 = vmatpush1.msra.mxu1 %v315_v15  ;;  %v302_v24 = vld [vmem:[%s3343_s10 + $0x128] sm:$0xff]  ;;  %v304_v25 = vld [vmem:[%s3343_s10 + $0x138] sm:$0xff]  ;;  %v301_v26 = vld [vmem:[%s3343_s10 + $0x120] sm:$0xff] }
  0x43   : > { %423 = vmatprep.subr.mxu0 %v310_v16  ;;  %536 = vmatprep.subr.mxu1 %v312_v17  ;;  %v303_v27 = vld [vmem:[%s3343_s10 + $0x130] sm:$0xff]  ;;  %v298_v28 = vld [vmem:[%s3343_s10 + $0x108] sm:$0xff]  ;;  %v300_v29 = vld [vmem:[%s3343_s10 + $0x118] sm:$0xff] }
  0x44   : > { %424 = vmatpush1.msra.mxu0 %v309_v18  ;;  %537 = vmatpush1.msra.mxu1 %v311_v19  ;;  %v297_v30 = vld [vmem:[%s3343_s10 + $0x100] sm:$0xff]  ;;  %v299_v31 = vld [vmem:[%s3343_s10 + $0x110] sm:$0xff]  ;;  %v294_v32 = vld [vmem:[%s3343_s10 + $0xe8] sm:$0xff] }
  0x45   : > { %425 = vmatprep.subr.mxu0 %v306_v20  ;;  %538 = vmatprep.subr.mxu1 %v308_v21  ;;  %v296_v33 = vld [vmem:[%s3343_s10 + $0xf8] sm:$0xff]  ;;  %v293_v34 = vld [vmem:[%s3343_s10 + $0xe0] sm:$0xff]  ;;  %v295_v35 = vld [vmem:[%s3343_s10 + $0xf0] sm:$0xff] }
  0x46   : > { %426 = vmatpush1.msra.mxu0 %v305_v22  ;;  %539 = vmatpush1.msra.mxu1 %v307_v23  ;;  %v290_v36 = vld [vmem:[%s3343_s10 + $0xc8] sm:$0xff]  ;;  %v292_v37 = vld [vmem:[%s3343_s10 + $0xd8] sm:$0xff]  ;;  %v289_v38 = vld [vmem:[%s3343_s10 + $0xc0] sm:$0xff] }
  0x47   : > { %427 = vmatprep.subr.mxu0 %v302_v24  ;;  %540 = vmatprep.subr.mxu1 %v304_v25  ;;  %v291_v39 = vld [vmem:[%s3343_s10 + $0xd0] sm:$0xff]  ;;  %v286_v40 = vld [vmem:[%s3343_s10 + $0xa8] sm:$0xff]  ;;  %v288_v41 = vld [vmem:[%s3343_s10 + $0xb8] sm:$0xff] }
  0x48   : > { %428 = vmatpush1.msra.mxu0 %v301_v26  ;;  %541 = vmatpush1.msra.mxu1 %v303_v27  ;;  %v285_v42 = vld [vmem:[%s3343_s10 + $0xa0] sm:$0xff]  ;;  %v287_v43 = vld [vmem:[%s3343_s10 + $0xb0] sm:$0xff]  ;;  %v282_v44 = vld [vmem:[%s3343_s10 + $0x88] sm:$0xff] }
  0x49   : > { %429 = vmatprep.subr.mxu0 %v298_v28  ;;  %542 = vmatprep.subr.mxu1 %v300_v29  ;;  %v284_v45 = vld [vmem:[%s3343_s10 + $0x98] sm:$0xff]  ;;  %v281_v46 = vld [vmem:[%s3343_s10 + $0x80] sm:$0xff]  ;;  %v283_v47 = vld [vmem:[%s3343_s10 + $0x90] sm:$0xff] }
  0x4a   : > { %430 = vmatpush1.msra.mxu0 %v297_v30  ;;  %543 = vmatpush1.msra.mxu1 %v299_v31  ;;  %v278_v48 = vld [vmem:[%s3343_s10 + $0x68] sm:$0xff]  ;;  %v280_v49 = vld [vmem:[%s3343_s10 + $0x78] sm:$0xff]  ;;  %v277_v50 = vld [vmem:[%s3343_s10 + $0x60] sm:$0xff] }
  0x4b   : > { %431 = vmatprep.subr.mxu0 %v294_v32  ;;  %544 = vmatprep.subr.mxu1 %v296_v33  ;;  %v279_v51 = vld [vmem:[%s3343_s10 + $0x70] sm:$0xff]  ;;  %v274_v52 = vld [vmem:[%s3343_s10 + $0x48] sm:$0xff]  ;;  %v276_v53 = vld [vmem:[%s3343_s10 + $0x58] sm:$0xff] }
  0x4c   : > { %432 = vmatpush1.msra.mxu0 %v293_v34  ;;  %545 = vmatpush1.msra.mxu1 %v295_v35  ;;  %v273_v54 = vld [vmem:[%s3343_s10 + $0x40] sm:$0xff]  ;;  %v275_v55 = vld [vmem:[%s3343_s10 + $0x50] sm:$0xff]  ;;  %v270_v56 = vld [vmem:[%s3343_s10 + $0x28] sm:$0xff] }
  0x4d   : > { %433 = vmatprep.subr.mxu0 %v290_v36  ;;  %546 = vmatprep.subr.mxu1 %v292_v37  ;;  %v272_v57 = vld [vmem:[%s3343_s10 + $0x38] sm:$0xff]  ;;  %v269_v58 = vld [vmem:[%s3343_s10 + $0x20] sm:$0xff]  ;;  %v271_v59 = vld [vmem:[%s3343_s10 + $0x30] sm:$0xff] }
  0x4e   : > { %434 = vmatpush1.msra.mxu0 %v289_v38  ;;  %547 = vmatpush1.msra.mxu1 %v291_v39  ;;  %v266_v60 = vld [vmem:[%s3343_s10 + $0x8] sm:$0xff]  ;;  %v268_v61 = vld [vmem:[%s3343_s10 + $0x18] sm:$0xff]  ;;  %v265_v62 = vld [vmem:[%s3343_s10] sm:$0xff] }
  0x4f   : > { %435 = vmatprep.subr.mxu0 %v286_v40  ;;  %548 = vmatprep.subr.mxu1 %v288_v41  ;;  %v267_v63 = vld [vmem:[%s3343_s10 + $0x10] sm:$0xff]  ;;  %v390_v0 = vld [vmem:[%s3343_s10 + $0x3e8] sm:$0xff]  ;;  %v392_v1 = vld [vmem:[%s3343_s10 + $0x3f8] sm:$0xff] }
  0x50   : > { %436 = vmatpush1.msra.mxu0 %v285_v42  ;;  %549 = vmatpush1.msra.mxu1 %v287_v43  ;;  %v389_v2 = vld [vmem:[%s3343_s10 + $0x3e0] sm:$0xff]  ;;  %v391_v3 = vld [vmem:[%s3343_s10 + $0x3f0] sm:$0xff]  ;;  %v386_v4 = vld [vmem:[%s3343_s10 + $0x3c8] sm:$0xff] }
  0x51   : > { %437 = vmatprep.subr.mxu0 %v282_v44  ;;  %550 = vmatprep.subr.mxu1 %v284_v45  ;;  %v388_v5 = vld [vmem:[%s3343_s10 + $0x3d8] sm:$0xff]  ;;  %v385_v6 = vld [vmem:[%s3343_s10 + $0x3c0] sm:$0xff]  ;;  %v387_v7 = vld [vmem:[%s3343_s10 + $0x3d0] sm:$0xff] }
  0x52   : > { %438 = vmatpush1.msra.mxu0 %v281_v46  ;;  %551 = vmatpush1.msra.mxu1 %v283_v47  ;;  %v382_v8 = vld [vmem:[%s3343_s10 + $0x3a8] sm:$0xff]  ;;  %v384_v9 = vld [vmem:[%s3343_s10 + $0x3b8] sm:$0xff]  ;;  %v381_v10 = vld [vmem:[%s3343_s10 + $0x3a0] sm:$0xff] }
  0x53   : > { %439 = vmatprep.subr.mxu0 %v278_v48  ;;  %552 = vmatprep.subr.mxu1 %v280_v49  ;;  %v383_v11 = vld [vmem:[%s3343_s10 + $0x3b0] sm:$0xff]  ;;  %v378_v12 = vld [vmem:[%s3343_s10 + $0x388] sm:$0xff]  ;;  %v380_v13 = vld [vmem:[%s3343_s10 + $0x398] sm:$0xff] }
  0x54   : > { %440 = vmatpush1.msra.mxu0 %v277_v50  ;;  %553 = vmatpush1.msra.mxu1 %v279_v51  ;;  %v377_v14 = vld [vmem:[%s3343_s10 + $0x380] sm:$0xff]  ;;  %v379_v15 = vld [vmem:[%s3343_s10 + $0x390] sm:$0xff]  ;;  %v374_v16 = vld [vmem:[%s3343_s10 + $0x368] sm:$0xff] }
  0x55   : > { %441 = vmatprep.subr.mxu0 %v274_v52  ;;  %554 = vmatprep.subr.mxu1 %v276_v53  ;;  %v376_v17 = vld [vmem:[%s3343_s10 + $0x378] sm:$0xff]  ;;  %v373_v18 = vld [vmem:[%s3343_s10 + $0x360] sm:$0xff]  ;;  %v375_v19 = vld [vmem:[%s3343_s10 + $0x370] sm:$0xff] }
  0x56   : > { %442 = vmatpush1.msra.mxu0 %v273_v54  ;;  %555 = vmatpush1.msra.mxu1 %v275_v55  ;;  %v370_v20 = vld [vmem:[%s3343_s10 + $0x348] sm:$0xff]  ;;  %v372_v21 = vld [vmem:[%s3343_s10 + $0x358] sm:$0xff]  ;;  %v369_v22 = vld [vmem:[%s3343_s10 + $0x340] sm:$0xff] }
  0x57   : > { %443 = vmatprep.subr.mxu0 %v270_v56  ;;  %556 = vmatprep.subr.mxu1 %v272_v57  ;;  %v371_v23 = vld [vmem:[%s3343_s10 + $0x350] sm:$0xff]  ;;  %v366_v24 = vld [vmem:[%s3343_s10 + $0x328] sm:$0xff]  ;;  %v368_v25 = vld [vmem:[%s3343_s10 + $0x338] sm:$0xff] }
  0x58   : > { %444 = vmatpush1.msra.mxu0 %v269_v58  ;;  %557 = vmatpush1.msra.mxu1 %v271_v59  ;;  %v365_v26 = vld [vmem:[%s3343_s10 + $0x320] sm:$0xff]  ;;  %v367_v27 = vld [vmem:[%s3343_s10 + $0x330] sm:$0xff]  ;;  %v362_v28 = vld [vmem:[%s3343_s10 + $0x308] sm:$0xff] }
  0x59   : > { %445 = vmatprep.subr.mxu0 %v266_v60  ;;  %558 = vmatprep.subr.mxu1 %v268_v61  ;;  %v364_v29 = vld [vmem:[%s3343_s10 + $0x318] sm:$0xff]  ;;  %v361_v30 = vld [vmem:[%s3343_s10 + $0x300] sm:$0xff]  ;;  %v363_v31 = vld [vmem:[%s3343_s10 + $0x310] sm:$0xff] }
  0x5a   : > { %446 = vmatpush1.msra.mxu0 %v265_v62  ;;  %559 = vmatpush1.msra.mxu1 %v267_v63  ;;  %v358_v32 = vld [vmem:[%s3343_s10 + $0x2e8] sm:$0xff]  ;;  %v360_v33 = vld [vmem:[%s3343_s10 + $0x2f8] sm:$0xff]  ;;  %v357_v34 = vld [vmem:[%s3343_s10 + $0x2e0] sm:$0xff] }
  0x5b   : > { %447 = vmatprep.subr.mxu0 %v390_v0  ;;  %560 = vmatprep.subr.mxu1 %v392_v1  ;;  %v359_v35 = vld [vmem:[%s3343_s10 + $0x2f0] sm:$0xff]  ;;  %v354_v36 = vld [vmem:[%s3343_s10 + $0x2c8] sm:$0xff]  ;;  %v356_v37 = vld [vmem:[%s3343_s10 + $0x2d8] sm:$0xff] }
  0x5c   : > { %448 = vmatpush2.msra.mxu0 %v389_v2  ;;  %561 = vmatpush2.msra.mxu1 %v391_v3  ;;  %v353_v38 = vld [vmem:[%s3343_s10 + $0x2c0] sm:$0xff]  ;;  %v355_v39 = vld [vmem:[%s3343_s10 + $0x2d0] sm:$0xff]  ;;  %v350_v40 = vld [vmem:[%s3343_s10 + $0x2a8] sm:$0xff] }
  0x5d   : > { %449 = vmatprep.subr.mxu0 %v386_v4  ;;  %562 = vmatprep.subr.mxu1 %v388_v5  ;;  %v352_v41 = vld [vmem:[%s3343_s10 + $0x2b8] sm:$0xff]  ;;  %v349_v42 = vld [vmem:[%s3343_s10 + $0x2a0] sm:$0xff]  ;;  %v351_v43 = vld [vmem:[%s3343_s10 + $0x2b0] sm:$0xff] }
  0x5e   : > { %450 = vmatpush2.msra.mxu0 %v385_v6  ;;  %563 = vmatpush2.msra.mxu1 %v387_v7  ;;  %v346_v44 = vld [vmem:[%s3343_s10 + $0x288] sm:$0xff]  ;;  %v348_v45 = vld [vmem:[%s3343_s10 + $0x298] sm:$0xff]  ;;  %v345_v46 = vld [vmem:[%s3343_s10 + $0x280] sm:$0xff] }
  0x5f   : > { %451 = vmatprep.subr.mxu0 %v382_v8  ;;  %564 = vmatprep.subr.mxu1 %v384_v9  ;;  %v347_v47 = vld [vmem:[%s3343_s10 + $0x290] sm:$0xff]  ;;  %v342_v48 = vld [vmem:[%s3343_s10 + $0x268] sm:$0xff]  ;;  %v344_v49 = vld [vmem:[%s3343_s10 + $0x278] sm:$0xff] }
  0x60   : > { %452 = vmatpush2.msra.mxu0 %v381_v10  ;;  %565 = vmatpush2.msra.mxu1 %v383_v11  ;;  %v341_v50 = vld [vmem:[%s3343_s10 + $0x260] sm:$0xff]  ;;  %v343_v51 = vld [vmem:[%s3343_s10 + $0x270] sm:$0xff]  ;;  %v338_v52 = vld [vmem:[%s3343_s10 + $0x248] sm:$0xff] }
  0x61   : > { %453 = vmatprep.subr.mxu0 %v378_v12  ;;  %566 = vmatprep.subr.mxu1 %v380_v13  ;;  %v340_v53 = vld [vmem:[%s3343_s10 + $0x258] sm:$0xff]  ;;  %v337_v54 = vld [vmem:[%s3343_s10 + $0x240] sm:$0xff]  ;;  %v339_v55 = vld [vmem:[%s3343_s10 + $0x250] sm:$0xff] }
  0x62   : > { %454 = vmatpush2.msra.mxu0 %v377_v14  ;;  %567 = vmatpush2.msra.mxu1 %v379_v15  ;;  %v334_v56 = vld [vmem:[%s3343_s10 + $0x228] sm:$0xff]  ;;  %v336_v57 = vld [vmem:[%s3343_s10 + $0x238] sm:$0xff]  ;;  %v333_v58 = vld [vmem:[%s3343_s10 + $0x220] sm:$0xff] }
  0x63   : > { %455 = vmatprep.subr.mxu0 %v374_v16  ;;  %568 = vmatprep.subr.mxu1 %v376_v17  ;;  %v335_v59 = vld [vmem:[%s3343_s10 + $0x230] sm:$0xff]  ;;  %v330_v60 = vld [vmem:[%s3343_s10 + $0x208] sm:$0xff]  ;;  %v332_v61 = vld [vmem:[%s3343_s10 + $0x218] sm:$0xff] }
  0x64   : > { %456 = vmatpush2.msra.mxu0 %v373_v18  ;;  %569 = vmatpush2.msra.mxu1 %v375_v19  ;;  %v329_v62 = vld [vmem:[%s3343_s10 + $0x200] sm:$0xff]  ;;  %v250_v63 = vld [vmem:[%s4608_s0 + $0x8] sm:$0xff]  ;;  %v331_v0 = vld [vmem:[%s3343_s10 + $0x210] sm:$0xff]  ;;  %s2919_s10 = sshll.u32 %s3971_s28, 1 }
  0x65   : > { %457 = vmatprep.subr.mxu0 %v370_v20  ;;  %570 = vmatprep.subr.mxu1 %v372_v21  ;;  %v249_v1 = vld [vmem:[%s4608_s0] sm:$0xff]  ;;  %v252_v2 = vld [vmem:[%s4608_s0 + $0x18] sm:$0xff]  ;;  %v3483_v3 = vld [vmem:[%s3329_s12 + $0x1e8] sm:$0xff]  ;;  %s4248_s25 = sadd.s32 %s2919_s10, %s1179_s9  ;;  %s2933_s9 = sshll.u32 %s3971_s28, 2 }
  0x66   : > { %458 = vmatpush2.msra.mxu0 %v369_v22  ;;  %571 = vmatpush2.msra.mxu1 %v371_v23  ;;  %v3486_v4 = vld [vmem:[%s3329_s12 + $0x1f8] sm:$0xff]  ;;  %v3489_v5 = vld [vmem:[%s3329_s12 + $0x1e0] sm:$0xff]  ;;  %v3492_v6 = vld [vmem:[%s3329_s12 + $0x1f0] sm:$0xff] }
  0x67   : > { %459 = vmatprep.subr.mxu0 %v366_v24  ;;  %572 = vmatprep.subr.mxu1 %v368_v25  ;;  %v251_v7 = vld [vmem:[%s4608_s0 + $0x10] sm:$0xff]  ;;  %v3499_v8 = vld [vmem:[%s3329_s12 + $0x1c8] sm:$0xff]  ;;  %v3507_v10 = vld [vmem:[%s3329_s12 + $0x1c0] sm:$0xff] }
  0x68   : > { %460 = vmatpush2.msra.mxu0 %v365_v26  ;;  %573 = vmatpush2.msra.mxu1 %v367_v27  ;;  %v254_v9 = vld [vmem:[%s4608_s0 + $0x28] sm:$0xff]  ;;  %v3514_v12 = vld [vmem:[%s3329_s12 + $0x1d8] sm:$0xff]  ;;  %v253_v13 = vld [vmem:[%s4608_s0 + $0x20] sm:$0xff] }
  0x69   : > { %461 = vmatprep.subr.mxu0 %v362_v28  ;;  %574 = vmatprep.subr.mxu1 %v364_v29  ;;  %v3511_v11 = vld [vmem:[%s3329_s12 + $0x1a8] sm:$0xff]  ;;  %v3522_v14 = vld [vmem:[%s3329_s12 + $0x1a0] sm:$0xff]  ;;  %v3525_v15 = vld [vmem:[%s3329_s12 + $0x1d0] sm:$0xff] }
  0x6a   : > { %462 = vmatpush2.msra.mxu0 %v361_v30  ;;  %575 = vmatpush2.msra.mxu1 %v363_v31  ;;  %v3530_v16 = vld [vmem:[%s3329_s12 + $0x188] sm:$0xff]  ;;  %v3533_v17 = vld [vmem:[%s3329_s12 + $0x1b8] sm:$0xff]  ;;  %v3541_v19 = vld [vmem:[%s3329_s12 + $0x180] sm:$0xff] }
  0x6b   : > { %463 = vmatprep.subr.mxu0 %v358_v32  ;;  %576 = vmatprep.subr.mxu1 %v360_v33  ;;  %v256_v18 = vld [vmem:[%s4608_s0 + $0x38] sm:$0xff]  ;;  %v3544_v20 = vld [vmem:[%s3329_s12 + $0x1b0] sm:$0xff]  ;;  %v3552_v22 = vld [vmem:[%s3329_s12 + $0x168] sm:$0xff] }
  0x6c   : > { %464 = vmatpush2.msra.mxu0 %v357_v34  ;;  %577 = vmatpush2.msra.mxu1 %v359_v35  ;;  %v255_v21 = vld [vmem:[%s4608_s0 + $0x30] sm:$0xff]  ;;  %v3555_v23 = vld [vmem:[%s3329_s12 + $0x198] sm:$0xff]  ;;  %v3560_v24 = vld [vmem:[%s3329_s12 + $0x160] sm:$0xff] }
  0x6d   : > { %465 = vmatprep.subr.mxu0 %v354_v36  ;;  %578 = vmatprep.subr.mxu1 %v356_v37  ;;  %v3563_v25 = vld [vmem:[%s3329_s12 + $0x190] sm:$0xff]  ;;  %v3566_v26 = vld [vmem:[%s3329_s12 + $0x148] sm:$0xff]  ;;  %v3569_v27 = vld [vmem:[%s3329_s12 + $0x178] sm:$0xff] }
  0x6e   : > { %466 = vmatpush2.msra.mxu0 %v353_v38  ;;  %579 = vmatpush2.msra.mxu1 %v355_v39  ;;  %v258_v28 = vld [vmem:[%s4608_s0 + $0x48] sm:$0xff]  ;;  %v3579_v29 = vld [vmem:[%s3329_s12 + $0x140] sm:$0xff]  ;;  %v3582_v30 = vld [vmem:[%s3329_s12 + $0x170] sm:$0xff] }
  0x6f   : > { %467 = vmatprep.subr.mxu0 %v350_v40  ;;  %580 = vmatprep.subr.mxu1 %v352_v41  ;;  %v257_v31 = vld [vmem:[%s4608_s0 + $0x40] sm:$0xff]  ;;  %v3590_v32 = vld [vmem:[%s3329_s12 + $0x128] sm:$0xff]  ;;  %v3593_v33 = vld [vmem:[%s3329_s12 + $0x158] sm:$0xff] }
  0x70   : > { %468 = vmatpush2.msra.mxu0 %v349_v42  ;;  %581 = vmatpush2.msra.mxu1 %v351_v43  ;;  %v3598_v34 = vld [vmem:[%s3329_s12 + $0x120] sm:$0xff]  ;;  %v3601_v35 = vld [vmem:[%s3329_s12 + $0x150] sm:$0xff]  ;;  %v3604_v36 = vld [vmem:[%s3329_s12 + $0x108] sm:$0xff] }
  0x71   : > { %469 = vmatprep.subr.mxu0 %v346_v44  ;;  %582 = vmatprep.subr.mxu1 %v348_v45  ;;  %v3607_v37 = vld [vmem:[%s3329_s12 + $0x138] sm:$0xff]  ;;  %v3617_v39 = vld [vmem:[%s3329_s12 + $0x100] sm:$0xff]  ;;  %v3620_v40 = vld [vmem:[%s3329_s12 + $0x130] sm:$0xff] }
  0x72   : > { %470 = vmatpush2.msra.mxu0 %v345_v46  ;;  %583 = vmatpush2.msra.mxu1 %v347_v47  ;;  %v260_v38 = vld [vmem:[%s4608_s0 + $0x58] sm:$0xff]  ;;  %v259_v41 = vld [vmem:[%s4608_s0 + $0x50] sm:$0xff]  ;;  %v3628_v42 = vld [vmem:[%s3329_s12 + $0xe8] sm:$0xff] }
  0x73   : > { %471 = vmatprep.subr.mxu0 %v342_v48  ;;  %584 = vmatprep.subr.mxu1 %v344_v49  ;;  %v3631_v43 = vld [vmem:[%s3329_s12 + $0x118] sm:$0xff]  ;;  %v3636_v44 = vld [vmem:[%s3329_s12 + $0xe0] sm:$0xff]  ;;  %v3639_v45 = vld [vmem:[%s3329_s12 + $0x110] sm:$0xff] }
  0x74   : > { %472 = vmatpush2.msra.mxu0 %v341_v50  ;;  %585 = vmatpush2.msra.mxu1 %v343_v51  ;;  %v3642_v46 = vld [vmem:[%s3329_s12 + $0xc8] sm:$0xff]  ;;  %v3645_v47 = vld [vmem:[%s3329_s12 + $0xf8] sm:$0xff]  ;;  %v3655_v49 = vld [vmem:[%s3329_s12 + $0xc0] sm:$0xff] }
  0x75   : > { %473 = vmatprep.subr.mxu0 %v338_v52  ;;  %586 = vmatprep.subr.mxu1 %v340_v53  ;;  %v262_v48 = vld [vmem:[%s4608_s0 + $0x68] sm:$0xff]  ;;  %v3658_v50 = vld [vmem:[%s3329_s12 + $0xf0] sm:$0xff]  ;;  %v261_v51 = vld [vmem:[%s4608_s0 + $0x60] sm:$0xff] }
  0x76   : > { %474 = vmatpush2.msra.mxu0 %v337_v54  ;;  %587 = vmatpush2.msra.mxu1 %v339_v55  ;;  %v3666_v52 = vld [vmem:[%s3329_s12 + $0xa8] sm:$0xff]  ;;  %v3669_v53 = vld [vmem:[%s3329_s12 + $0xd8] sm:$0xff]  ;;  %v3674_v54 = vld [vmem:[%s3329_s12 + $0xa0] sm:$0xff] }
  0x77   : > { %475 = vmatprep.subr.mxu0 %v334_v56  ;;  %588 = vmatprep.subr.mxu1 %v336_v57  ;;  %v3677_v55 = vld [vmem:[%s3329_s12 + $0xd0] sm:$0xff]  ;;  %v3680_v56 = vld [vmem:[%s3329_s12 + $0x88] sm:$0xff]  ;;  %v3683_v57 = vld [vmem:[%s3329_s12 + $0xb8] sm:$0xff] }
  0x78   : > { %476 = vmatpush2.msra.mxu0 %v333_v58  ;;  %589 = vmatpush2.msra.mxu1 %v335_v59  ;;  %v264_v58 = vld [vmem:[%s4608_s0 + $0x78] sm:$0xff]  ;;  %v3693_v59 = vld [vmem:[%s3329_s12 + $0x80] sm:$0xff] }
  0x79   : > { %477 = vmatprep.subr.mxu0 %v330_v60  ;;  %590 = vmatprep.subr.mxu1 %v332_v61  ;;  %v3696_v60 = vld [vmem:[%s3329_s12 + $0xb0] sm:$0xff] }
  0x7a   : > { %478 = vmatpush2.msra.mxu0 %v329_v62  ;;  %479 = vmatprep.mubr.f32.mxu0 %v250_v63  ;;  %v263_v61 = vld [vmem:[%s4608_s0 + $0x70] sm:$0xff]  ;;  %v3704_v62 = vld [vmem:[%s3329_s12 + $0x68] sm:$0xff] }
  0x7b   : > { %591 = vmatpush2.msra.mxu1 %v331_v0  ;;  %592 = vmatprep.mubr.f32.mxu1 %v250_v63  ;;  %4682 = vst [vmem:[#allocation9_spill] sm:$0xff] %v3704_v62  ;;  %v3707_v63 = vld [vmem:[%s3329_s12 + $0x98] sm:$0xff]  ;;  %v3712_v0 = vld [vmem:[%s3329_s12 + $0x60] sm:$0xff] }
  0x7c   : > { %480 = vmatmul.mubr.f32.vlgmr.msra.gmra.mxu0 %v249_v1  ;;  %593 = vmatmul.mubr.f32.vlgmr.msra.gmra.mxu1 %v249_v1  ;;  %4683 = vst [vmem:[#allocation10_spill] sm:$0xff] %v3712_v0  ;;  %v3715_v1 = vld [vmem:[%s3329_s12 + $0x90] sm:$0xff] }
  0x7d   : > { %485 = vmatprep.mubr.f32.mxu0 %v252_v2  ;;  %598 = vmatprep.mubr.f32.mxu1 %v252_v2  ;;  %4684 = vst [vmem:[#allocation11_spill] sm:$0xff] %v3715_v1  ;;  %v3718_v2 = vld [vmem:[%s3329_s12 + $0x48] sm:$0xff] }
  0x7e   : > { %750 = vmatprep.subr.mxu0 %v3483_v3  ;;  %821 = vmatprep.subr.mxu1 %v3486_v4  ;;  %4685 = vst [vmem:[#allocation12_spill] sm:$0xff] %v3718_v2 }
  0x7f   : > { %751 = vmatpush1.msra.mxu0 %v3489_v5  ;;  %822 = vmatpush1.msra.mxu1 %v3492_v6 }
  0x80   : > { %486 = vmatmul.mubr.f32.gmra.mxu0 %v251_v7  ;;  %599 = vmatmul.mubr.f32.gmra.mxu1 %v251_v7  ;;  %v3721_v7 = vld [vmem:[%s3329_s12 + $0x78] sm:$0xff] }
  0x81   : > { %752 = vmatprep.subr.mxu0 %v3499_v8  ;;  %491 = vmatprep.mubr.f32.mxu0 %v254_v9  ;;  %4686 = vst [vmem:[#allocation13_spill] sm:$0xff] %v3721_v7 }
  0x82   : > { %604 = vmatprep.mubr.f32.mxu1 %v254_v9  ;;  %753 = vmatpush1.msra.mxu0 %v3507_v10  ;;  %v3726_v9 = vld [vmem:[%s3329_s12 + $0x40] sm:$0xff] }
  0x83   : > { %754 = vmatprep.subr.mxu0 %v3511_v11  ;;  %823 = vmatprep.subr.mxu1 %v3514_v12  ;;  %4687 = vst [vmem:[#allocation14_spill] sm:$0xff] %v3726_v9 }
  0x84   : > { %492 = vmatmul.mubr.f32.gmra.mxu0 %v253_v13  ;;  %605 = vmatmul.mubr.f32.gmra.mxu1 %v253_v13  ;;  %v3729_v13 = vld [vmem:[%s3329_s12 + $0x70] sm:$0xff] }
  0x85   : > { %755 = vmatpush1.msra.mxu0 %v3522_v14  ;;  %824 = vmatpush1.msra.mxu1 %v3525_v15  ;;  %4688 = vst [vmem:[#allocation15_spill] sm:$0xff] %v3729_v13 }
  0x86   : > { %756 = vmatprep.subr.mxu0 %v3530_v16  ;;  %825 = vmatprep.subr.mxu1 %v3533_v17 }
  0x87   : > { %497 = vmatprep.mubr.f32.mxu0 %v256_v18  ;;  %610 = vmatprep.mubr.f32.mxu1 %v256_v18  ;;  %v3734_v18 = vld [vmem:[%s3329_s12 + $0x28] sm:$0xff] }
  0x88   : > { %757 = vmatpush1.msra.mxu0 %v3541_v19  ;;  %826 = vmatpush1.msra.mxu1 %v3544_v20  ;;  %4689 = vst [vmem:[#allocation16_spill] sm:$0xff] %v3734_v18 }
  0x89   : > { %498 = vmatmul.mubr.f32.gmra.mxu0 %v255_v21  ;;  %611 = vmatmul.mubr.f32.gmra.mxu1 %v255_v21  ;;  %v3737_v21 = vld [vmem:[%s3329_s12 + $0x58] sm:$0xff] }
  0x8a   : > { %758 = vmatprep.subr.mxu0 %v3552_v22  ;;  %827 = vmatprep.subr.mxu1 %v3555_v23  ;;  %4690 = vst [vmem:[#allocation17_spill] sm:$0xff] %v3737_v21 }
  0x8b   : > { %759 = vmatpush1.msra.mxu0 %v3560_v24  ;;  %828 = vmatpush1.msra.mxu1 %v3563_v25 }
  0x8c   : > { %760 = vmatprep.subr.mxu0 %v3566_v26  ;;  %829 = vmatprep.subr.mxu1 %v3569_v27 }
  0x8d   : > { %503 = vmatprep.mubr.f32.mxu0 %v258_v28  ;;  %616 = vmatprep.mubr.f32.mxu1 %v258_v28  ;;  %v3742_v28 = vld [vmem:[%s3329_s12 + $0x20] sm:$0xff] }
  0x8e   : > { %761 = vmatpush1.msra.mxu0 %v3579_v29  ;;  %830 = vmatpush1.msra.mxu1 %v3582_v30  ;;  %4691 = vst [vmem:[#allocation18_spill] sm:$0xff] %v3742_v28 }
  0x8f   : > { %504 = vmatmul.mubr.f32.gmra.mxu0 %v257_v31  ;;  %617 = vmatmul.mubr.f32.gmra.mxu1 %v257_v31  ;;  %v3745_v31 = vld [vmem:[%s3329_s12 + $0x50] sm:$0xff] }
  0x90   : > { %762 = vmatprep.subr.mxu0 %v3590_v32  ;;  %831 = vmatprep.subr.mxu1 %v3593_v33  ;;  %4692 = vst [vmem:[#allocation19_spill] sm:$0xff] %v3745_v31 }
  0x91   : > { %763 = vmatpush1.msra.mxu0 %v3598_v34  ;;  %832 = vmatpush1.msra.mxu1 %v3601_v35 }
  0x92   : > { %764 = vmatprep.subr.mxu0 %v3604_v36  ;;  %833 = vmatprep.subr.mxu1 %v3607_v37 }
  0x93   : > { %509 = vmatprep.mubr.f32.mxu0 %v260_v38  ;;  %622 = vmatprep.mubr.f32.mxu1 %v260_v38  ;;  %v3750_v38 = vld [vmem:[%s3329_s12 + $0x8] sm:$0xff] }
  0x94   : > { %765 = vmatpush1.msra.mxu0 %v3617_v39  ;;  %834 = vmatpush1.msra.mxu1 %v3620_v40  ;;  %4693 = vst [vmem:[#allocation20_spill] sm:$0xff] %v3750_v38 }
  0x95   : > { %510 = vmatmul.mubr.f32.gmra.mxu0 %v259_v41  ;;  %623 = vmatmul.mubr.f32.gmra.mxu1 %v259_v41  ;;  %v3753_v41 = vld [vmem:[%s3329_s12 + $0x38] sm:$0xff] }
  0x96   : > { %766 = vmatprep.subr.mxu0 %v3628_v42  ;;  %835 = vmatprep.subr.mxu1 %v3631_v43  ;;  %4694 = vst [vmem:[#allocation21_spill] sm:$0xff] %v3753_v41 }
  0x97   : > { %767 = vmatpush1.msra.mxu0 %v3636_v44  ;;  %836 = vmatpush1.msra.mxu1 %v3639_v45 }
  0x98   : > { %768 = vmatprep.subr.mxu0 %v3642_v46  ;;  %837 = vmatprep.subr.mxu1 %v3645_v47 }
  0x99   : > { %515 = vmatprep.mubr.f32.mxu0 %v262_v48  ;;  %628 = vmatprep.mubr.f32.mxu1 %v262_v48  ;;  %v3758_v48 = vld [vmem:[%s3329_s12] sm:$0xff] }
  0x9a   : > { %769 = vmatpush1.msra.mxu0 %v3655_v49  ;;  %838 = vmatpush1.msra.mxu1 %v3658_v50  ;;  %4695 = vst [vmem:[#allocation22_spill] sm:$0xff] %v3758_v48 }
  0x9b   : > { %516 = vmatmul.mubr.f32.gmra.mxu0 %v261_v51  ;;  %629 = vmatmul.mubr.f32.gmra.mxu1 %v261_v51  ;;  %v3763_v51 = vld [vmem:[%s3329_s12 + $0x30] sm:$0xff] }
  0x9c   : > { %770 = vmatprep.subr.mxu0 %v3666_v52  ;;  %839 = vmatprep.subr.mxu1 %v3669_v53  ;;  %4696 = vst [vmem:[#allocation23_spill] sm:$0xff] %v3763_v51 }
  0x9d   : > { %771 = vmatpush1.msra.mxu0 %v3674_v54  ;;  %840 = vmatpush1.msra.mxu1 %v3677_v55 }
  0x9e   : > { %772 = vmatprep.subr.mxu0 %v3680_v56  ;;  %841 = vmatprep.subr.mxu1 %v3683_v57 }
  0x9f   : > { %521 = vmatprep.mubr.f32.mxu0 %v264_v58  ;;  %634 = vmatprep.mubr.f32.mxu1 %v264_v58  ;;  %v3768_v58 = vld [vmem:[%s3329_s12 + $0x18] sm:$0xff] }
  0xa0   : > { %773 = vmatpush1.msra.mxu0 %v3693_v59  ;;  %842 = vmatpush1.msra.mxu1 %v3696_v60  ;;  %4697 = vst [vmem:[#allocation24_spill] sm:$0xff] %v3768_v58 }
  0xa1   : > { %522 = vmatmul.mubr.f32.gmra.mxu0 %v263_v61  ;;  %635 = vmatmul.mubr.f32.gmra.mxu1 %v263_v61  ;;  %v4616_v61 = vmov 0.0  }
  0xa2   : > { %774 = vmatprep.subr.mxu0 %v3704_v62  ;;  %843 = vmatprep.subr.mxu1 %v3707_v63 }
  0xa3   : > { %775 = vmatpush1.msra.mxu0 %v3712_v0  ;;  %844 = vmatpush1.msra.mxu1 %v3715_v1 }
  0xa4   : > { %776 = vmatprep.subr.mxu0 %v3718_v2  ;;  %845 = vmatprep.subr.mxu1 %v3721_v7 }
  0xa5   : > { %777 = vmatpush1.msra.mxu0 %v3726_v9  ;;  %846 = vmatpush1.msra.mxu1 %v3729_v13 }
  0xa6   : > { %778 = vmatprep.subr.mxu0 %v3734_v18  ;;  %847 = vmatprep.subr.mxu1 %v3737_v21  ;;  %v3773_v18 = vld [vmem:[%s3329_s12 + $0x10] sm:$0xff] }
  0xa7   : > { %779 = vmatpush1.msra.mxu0 %v3742_v28  ;;  %848 = vmatpush1.msra.mxu1 %v3745_v31  ;;  %4698 = vst [vmem:[#allocation25_spill] sm:$0xff] %v3773_v18 }
  0xa8   : > { %780 = vmatprep.subr.mxu0 %v3750_v38  ;;  %849 = vmatprep.subr.mxu1 %v3753_v41 }
  0xa9   : > { %781 = vmatpush1.msra.mxu0 %v3758_v48  ;;  %814 = vmatprep.mubr.f32.mxu0 %v4616_v61 }
  0xaa   : > { %850 = vmatpush1.msra.mxu1 %v3763_v51  ;;  %815 = vmatmul.mubr.f32.vlgmr.msra.gmra.mxu0 %v4616_v61 }
  0xab   : > { %851 = vmatprep.subr.mxu1 %v3768_v58  ;;  %885 = vmatprep.mubr.f32.mxu1 %v4616_v61 }
  0xac   : > { %852 = vmatpush1.msra.mxu1 %v3773_v18  ;;  %1003 = vmatprep.subr.mxu0 %v3483_v3 }
  0xad   : > { %886 = vmatmul.mubr.f32.vlgmr.msra.gmra.mxu1 %v4616_v61  ;;  %1074 = vmatprep.subr.mxu1 %v3486_v4  ;;  %v4699_v61 = vld [vmem:[#allocation16_spill] sm:$0xff] }
  0xae   : > { %1004 = vmatpush1.msra.mxu0 %v3489_v5  ;;  %1075 = vmatpush1.msra.mxu1 %v3492_v6 }
  0xaf   : > { %1005 = vmatprep.subr.mxu0 %v3499_v8  ;;  %1076 = vmatprep.subr.mxu1 %v3514_v12 }
  0xb0   : > { %1006 = vmatpush1.msra.mxu0 %v3507_v10  ;;  %1077 = vmatpush1.msra.mxu1 %v3525_v15 }
  0xb1   : > { %1007 = vmatprep.subr.mxu0 %v3511_v11  ;;  %1078 = vmatprep.subr.mxu1 %v3533_v17 }
  0xb2   : > { %1008 = vmatpush1.msra.mxu0 %v3522_v14  ;;  %1079 = vmatpush1.msra.mxu1 %v3544_v20 }
  0xb3   : > { %1009 = vmatprep.subr.mxu0 %v3530_v16  ;;  %1080 = vmatprep.subr.mxu1 %v3555_v23 }
  0xb4   : > { %1010 = vmatpush1.msra.mxu0 %v3541_v19  ;;  %1081 = vmatpush1.msra.mxu1 %v3563_v25 }
  0xb5   : > { %1011 = vmatprep.subr.mxu0 %v3552_v22  ;;  %1082 = vmatprep.subr.mxu1 %v3569_v27 }
  0xb6   : > { %1012 = vmatpush1.msra.mxu0 %v3560_v24  ;;  %1083 = vmatpush1.msra.mxu1 %v3582_v30 }
  0xb7   : > { %1013 = vmatprep.subr.mxu0 %v3566_v26  ;;  %1084 = vmatprep.subr.mxu1 %v3593_v33 }
  0xb8   : > { %1014 = vmatpush1.msra.mxu0 %v3579_v29  ;;  %1085 = vmatpush1.msra.mxu1 %v3601_v35 }
  0xb9   : > { %1015 = vmatprep.subr.mxu0 %v3590_v32  ;;  %1086 = vmatprep.subr.mxu1 %v3607_v37 }
  0xba   : > { %1016 = vmatpush1.msra.mxu0 %v3598_v34  ;;  %1087 = vmatpush1.msra.mxu1 %v3620_v40 }
  0xbb   : > { %1017 = vmatprep.subr.mxu0 %v3604_v36  ;;  %1088 = vmatprep.subr.mxu1 %v3631_v43 }
  0xbc   : > { %1018 = vmatpush1.msra.mxu0 %v3617_v39  ;;  %1089 = vmatpush1.msra.mxu1 %v3639_v45 }
  0xbd   : > { %1019 = vmatprep.subr.mxu0 %v3628_v42  ;;  %1090 = vmatprep.subr.mxu1 %v3645_v47 }
  0xbe   : > { %1020 = vmatpush1.msra.mxu0 %v3636_v44  ;;  %1091 = vmatpush1.msra.mxu1 %v3658_v50 }
  0xbf   : > { %1021 = vmatprep.subr.mxu0 %v3642_v46  ;;  %1092 = vmatprep.subr.mxu1 %v3669_v53 }
  0xc0   : > { %1022 = vmatpush1.msra.mxu0 %v3655_v49  ;;  %1093 = vmatpush1.msra.mxu1 %v3677_v55 }
  0xc1   : > { %1023 = vmatprep.subr.mxu0 %v3666_v52  ;;  %1094 = vmatprep.subr.mxu1 %v3683_v57 }
  0xc2   : > { %1024 = vmatpush1.msra.mxu0 %v3674_v54  ;;  %1095 = vmatpush1.msra.mxu1 %v3696_v60 }
  0xc3   : > { %1025 = vmatprep.subr.mxu0 %v3680_v56  ;;  %1096 = vmatprep.subr.mxu1 %v3707_v63 }
  0xc4   : > { %1026 = vmatpush1.msra.mxu0 %v3693_v59  ;;  %1097 = vmatpush1.msra.mxu1 %v3715_v1 }
  0xc5   : > { %1027 = vmatprep.subr.mxu0 %v3704_v62  ;;  %1098 = vmatprep.subr.mxu1 %v3721_v7 }
  0xc6   : > { %1028 = vmatpush1.msra.mxu0 %v3712_v0  ;;  %1099 = vmatpush1.msra.mxu1 %v3729_v13 }
  0xc7   : > { %1029 = vmatprep.subr.mxu0 %v3718_v2  ;;  %1100 = vmatprep.subr.mxu1 %v3737_v21  ;;  %v4700_v21 = vmov 0.0  }
  0xc8   : > { %1030 = vmatpush1.msra.mxu0 %v3726_v9  ;;  %1101 = vmatpush1.msra.mxu1 %v3745_v31 }
  0xc9   : > { %1031 = vmatprep.subr.mxu0 %v4699_v61  ;;  %1102 = vmatprep.subr.mxu1 %v3753_v41  ;;  %v395_v41 = vlaneseq }
  0xca   : > { %1032 = vmatpush1.msra.mxu0 %v3742_v28  ;;  %1103 = vmatpush1.msra.mxu1 %v3763_v51 }
  0xcb   : > { %1033 = vmatprep.subr.mxu0 %v3750_v38  ;;  %1104 = vmatprep.subr.mxu1 %v3768_v58  ;;  %v396_v28 = vshrl.u32 %v395_v41, 7 }
  0xcc   : > { %1034 = vmatpush1.msra.mxu0 %v3758_v48  ;;  %1067 = vmatprep.mubr.f32.mxu0 %v4700_v21  ;;  %v393_v48 = vld [vmem:[%s248_s13] sm:$0xf]  ;;  %s2920_s13 = sshll.u32 %s4248_s25, 3 }
  0xcd   : > { %1105 = vmatpush1.msra.mxu1 %v3773_v18  ;;  %1138 = vmatprep.mubr.f32.mxu1 %v4700_v21  ;;  %v397_v58 = vsub.s32 0, %v396_v28  ;;  %v405_v38 = vsub.s32 2, %v396_v28  ;;  %v401_v51 = vsub.s32 1, %v396_v28  ;;  %v409_v61 = vsub.s32 3, %v396_v28  ;;  %s1182_s18 = sshra.s32 %s2920_s13, 3 }
  0xce   : > { %1256 = vmatprep.subr.mxu0 %v3483_v3  ;;  %1327 = vmatprep.subr.mxu1 %v3486_v4  ;;  %s2966_s14 = sshll.u32 %s1182_s18, 5 }
  0xcf   : > { %v3853_v31 = vrot.slane %v393_v48, %v397_v58  ;;  %v3855_v18 = vrot.slane %v393_v48, %v405_v38  ;;  %v3857_v21 = vrot.slane %v393_v48, %v401_v51  ;;  %v3859_v3 = vrot.slane %v393_v48, %v409_v61  ;;  %s1186_s15 = scalar_lea.vmem [#allocation2], %s2966_s14 }
 0x13c   : > { %v481_v4 = vpop.f32.mrf.mxu0  ;;  %v594_v9 = vpop.f32.mrf.mxu1 }
 0x13d   : > { %v482_v41 = vadd.f32 %v481_v4, %v3853_v31  ;;  %v595_v2 = vadd.f32 %v594_v9, %v3855_v18 }
 0x13e   : > { %v483_v13 = vpop.f32.mrf.mxu0  ;;  %v596_v0 = vpop.f32.mrf.mxu1 }
 0x13f   : > { %641 = vst [vmem:[#allocation2] sm:$0xff] %v482_v41  ;;  %643 = vst [vmem:[#allocation2 + $0x10] sm:$0xff] %v595_v2  ;;  %v484_v28 = vadd.f32 %v483_v13, %v3857_v21  ;;  %v597_v58 = vadd.f32 %v596_v0, %v3859_v3 }
 0x140   : > { %v487_v38 = vpop.f32.mrf.mxu0  ;;  %v600_v7 = vpop.f32.mrf.mxu1 }
 0x141   : > { %642 = vst [vmem:[#allocation2 + $0x8] sm:$0xff] %v484_v28  ;;  %644 = vst [vmem:[#allocation2 + $0x18] sm:$0xff] %v597_v58  ;;  %v488_v48 = vadd.f32 %v487_v38, %v3853_v31  ;;  %v601_v51 = vadd.f32 %v600_v7, %v3855_v18 }
 0x142   : > { %v489_v61 = vpop.f32.mrf.mxu0  ;;  %v602_v4 = vpop.f32.mrf.mxu1 }
 0x143   : > { %645 = vst [vmem:[#allocation2 + $0x20] sm:$0xff] %v488_v48  ;;  %647 = vst [vmem:[#allocation2 + $0x30] sm:$0xff] %v601_v51  ;;  %v490_v9 = vadd.f32 %v489_v61, %v3857_v21  ;;  %v603_v2 = vadd.f32 %v602_v4, %v3859_v3 }
 0x144   : > { %v493_v41 = vpop.f32.mrf.mxu0  ;;  %v606_v13 = vpop.f32.mrf.mxu1 }
 0x145   : > { %646 = vst [vmem:[#allocation2 + $0x28] sm:$0xff] %v490_v9  ;;  %648 = vst [vmem:[#allocation2 + $0x38] sm:$0xff] %v603_v2  ;;  %v494_v0 = vadd.f32 %v493_v41, %v3853_v31  ;;  %v607_v28 = vadd.f32 %v606_v13, %v3855_v18 }
 0x146   : > { %v495_v58 = vpop.f32.mrf.mxu0  ;;  %v608_v38 = vpop.f32.mrf.mxu1 }
 0x147   : > { %649 = vst [vmem:[#allocation2 + $0x40] sm:$0xff] %v494_v0  ;;  %651 = vst [vmem:[#allocation2 + $0x50] sm:$0xff] %v607_v28  ;;  %v496_v7 = vadd.f32 %v495_v58, %v3857_v21  ;;  %v609_v48 = vadd.f32 %v608_v38, %v3859_v3 }
 0x149   : > { %650 = vst [vmem:[#allocation2 + $0x48] sm:$0xff] %v496_v7  ;;  %652 = vst [vmem:[#allocation2 + $0x58] sm:$0xff] %v609_v48  ;;  %v499_v51 = vpop.f32.mrf.mxu0  ;;  %v612_v61 = vpop.f32.mrf.mxu1 }
 0x14a   : > { %v500_v4 = vadd.f32 %v499_v51, %v3853_v31  ;;  %v613_v9 = vadd.f32 %v612_v61, %v3855_v18 }
 0x14b   : > { %v501_v2 = vpop.f32.mrf.mxu0  ;;  %v614_v41 = vpop.f32.mrf.mxu1 }
 0x14c   : > { %653 = vst [vmem:[#allocation2 + $0x60] sm:$0xff] %v500_v4  ;;  %655 = vst [vmem:[#allocation2 + $0x70] sm:$0xff] %v613_v9  ;;  %v502_v13 = vadd.f32 %v501_v2, %v3857_v21  ;;  %v615_v0 = vadd.f32 %v614_v41, %v3859_v3 }
 0x14e   : > { %654 = vst [vmem:[#allocation2 + $0x68] sm:$0xff] %v502_v13  ;;  %656 = vst [vmem:[#allocation2 + $0x78] sm:$0xff] %v615_v0 }
 0x14f   : > { %v505_v28 = vpop.f32.mrf.mxu0  ;;  %v618_v58 = vpop.f32.mrf.mxu1 }
 0x150   : > { %v506_v38 = vadd.f32 %v505_v28, %v3853_v31  ;;  %v619_v7 = vadd.f32 %v618_v58, %v3855_v18 }
 0x151   : > { %v507_v48 = vpop.f32.mrf.mxu0  ;;  %v620_v51 = vpop.f32.mrf.mxu1 }
 0x152   : > { %657 = vst [vmem:[#allocation2 + $0x80] sm:$0xff] %v506_v38  ;;  %659 = vst [vmem:[#allocation2 + $0x90] sm:$0xff] %v619_v7  ;;  %v508_v61 = vadd.f32 %v507_v48, %v3857_v21  ;;  %v621_v4 = vadd.f32 %v620_v51, %v3859_v3 }
 0x154   : > { %658 = vst [vmem:[#allocation2 + $0x88] sm:$0xff] %v508_v61  ;;  %660 = vst [vmem:[#allocation2 + $0x98] sm:$0xff] %v621_v4 }
 0x155   : > { %v511_v9 = vpop.f32.mrf.mxu0  ;;  %v624_v2 = vpop.f32.mrf.mxu1 }
 0x156   : > { %v512_v41 = vadd.f32 %v511_v9, %v3853_v31  ;;  %v625_v13 = vadd.f32 %v624_v2, %v3855_v18 }
 0x157   : > { %v513_v0 = vpop.f32.mrf.mxu0  ;;  %v626_v28 = vpop.f32.mrf.mxu1 }
 0x158   : > { %661 = vst [vmem:[#allocation2 + $0xa0] sm:$0xff] %v512_v41  ;;  %663 = vst [vmem:[#allocation2 + $0xb0] sm:$0xff] %v625_v13  ;;  %v514_v58 = vadd.f32 %v513_v0, %v3857_v21  ;;  %v627_v38 = vadd.f32 %v626_v28, %v3859_v3 }
 0x15a   : > { %662 = vst [vmem:[#allocation2 + $0xa8] sm:$0xff] %v514_v58  ;;  %664 = vst [vmem:[#allocation2 + $0xb8] sm:$0xff] %v627_v38 }
 0x15b   : > { %v517_v7 = vpop.f32.mrf.mxu0  ;;  %v630_v48 = vpop.f32.mrf.mxu1 }
 0x15c   : > { %v518_v51 = vadd.f32 %v517_v7, %v3853_v31  ;;  %v631_v61 = vadd.f32 %v630_v48, %v3855_v18 }
 0x15d   : > { %v519_v4 = vpop.f32.mrf.mxu0  ;;  %v632_v9 = vpop.f32.mrf.mxu1 }
 0x15e   : > { %665 = vst [vmem:[#allocation2 + $0xc0] sm:$0xff] %v518_v51  ;;  %667 = vst [vmem:[#allocation2 + $0xd0] sm:$0xff] %v631_v61  ;;  %v520_v2 = vadd.f32 %v519_v4, %v3857_v21  ;;  %v633_v41 = vadd.f32 %v632_v9, %v3859_v3 }
 0x160   : > { %666 = vst [vmem:[#allocation2 + $0xc8] sm:$0xff] %v520_v2  ;;  %668 = vst [vmem:[#allocation2 + $0xd8] sm:$0xff] %v633_v41 }
 0x161   : > { %v523_v13 = vpop.f32.mrf.mxu0  ;;  %v636_v0 = vpop.f32.mrf.mxu1 }
 0x162   : > { %v524_v28 = vadd.f32 %v523_v13, %v3853_v31  ;;  %v637_v58 = vadd.f32 %v636_v0, %v3855_v18 }
 0x163   : > { %v525_v38 = vpop.f32.mrf.mxu0  ;;  %v638_v7 = vpop.f32.mrf.mxu1 }
 0x164   : > { %669 = vst [vmem:[#allocation2 + $0xe0] sm:$0xff] %v524_v28  ;;  %671 = vst [vmem:[#allocation2 + $0xf0] sm:$0xff] %v637_v58  ;;  %v526_v48 = vadd.f32 %v525_v38, %v3857_v21  ;;  %v639_v51 = vadd.f32 %v638_v7, %v3859_v3 }
 0x166   : > { %670 = vst [vmem:[#allocation2 + $0xe8] sm:$0xff] %v526_v48  ;;  %672 = vst [vmem:[#allocation2 + $0xf8] sm:$0xff] %v639_v51 }
 0x16a   : > { %v816_v61 = vpop.f32.mrf.mxu0 }
 0x16c   : > { %v818_v31 = vpop.f32.mrf.mxu0 }
 0x16d   : > { %v681_v4 = vld [vmem:[%s680_s21] sm:$0xff]  ;;  %v682_v9 = vld [vmem:[%s680_s21 + $0x8] sm:$0xff]  ;;  %v683_v0 = vld [vmem:[%s680_s21 + $0x10] sm:$0xff]  ;;  %v887_v21 = vpop.f32.mrf.mxu1 }
 0x16e   : > { %v892_v2 = vadd.f32 %v816_v61, %v681_v4  ;;  %v893_v18 = vadd.f32 %v818_v31, %v682_v9  ;;  %v894_v28 = vadd.f32 %v887_v21, %v683_v0  ;;  %v684_v3 = vld [vmem:[%s680_s21 + $0x18] sm:$0xff]  ;;  %s1429_s21 = scalar_lea.vmem %s3900_s24, %s2920_s13 [#allocation7] }
 0x16f   : > { %v889_v58 = vpop.f32.mrf.mxu1 }
 0x170   : > { %v2910_v41 = vmul.f32 -1.442695, %v892_v2  ;;  %v2911_v13 = vmul.f32 -1.442695, %v893_v18  ;;  %v2912_v38 = vmul.f32 -1.442695, %v894_v28  ;;  %v895_v7 = vadd.f32 %v889_v58, %v684_v3 }
 0x171   : > { %v3989_v58 = vld [vmem:[%s3329_s12 + $0x1e8] sm:$0xff] }
 0x172   : > { %3014 = vpow2.f32 %v2910_v41 }
 0x173   : > { %3016 = vpow2.f32 %v2911_v13 }
 0x174   : > { %3018 = vpow2.f32 %v2912_v38  ;;  %v3992_v38 = vld [vmem:[%s3329_s12 + $0x1f8] sm:$0xff] }
 0x175   : > { %3020 = vtanh.f32 %v895_v7  ;;  %v3997_v7 = vld [vmem:[%s3329_s12 + $0x1e0] sm:$0xff] }
 0x17f   : > { %v3015_v48 = vpop.eup %3014 }
 0x180   : > { %v3017_v51 = vpop.eup %3016  ;;  %v905_v62 = vadd.f32 1.0, %v3015_v48  ;;  %v4000_v48 = vld [vmem:[%s3329_s12 + $0x1f0] sm:$0xff] }
 0x181   : > { %v906_v1 = vadd.f32 1.0, %v3017_v51  ;;  %v3019_v61 = vpop.eup %3018  ;;  %v4005_v51 = vld [vmem:[%s3329_s12 + $0x1c8] sm:$0xff] }
 0x182   : > { %3022 = vrcp.f32 %v905_v62  ;;  %v3021_v4 = vpop.eup %3020  ;;  %v907_v2 = vadd.f32 1.0, %v3019_v61  ;;  %v4008_v61 = vld [vmem:[%s3329_s12 + $0x1d8] sm:$0xff] }
 0x183   : > { %3024 = vrcp.f32 %v906_v1 }
 0x184   : > { %3026 = vrcp.f32 %v907_v2  ;;  %v4024_v2 = vld [vmem:[%s3329_s12 + $0x1b8] sm:$0xff] }
 0x18f   : > { %v3023_v9 = vpop.eup %3022 }
 0x190   : > { %v3025_v31 = vpop.eup %3024  ;;  %v917_v18 = vmul.f32 %v3023_v9, %v3021_v4  ;;  %v4013_v4 = vld [vmem:[%s3329_s12 + $0x1c0] sm:$0xff]  ;;  %v4016_v9 = vld [vmem:[%s3329_s12 + $0x1d0] sm:$0xff] }
 0x191   : > { %v916_v41 = vmul.f32 0.0, %v3025_v31  ;;  %v3027_v0 = vpop.eup %3026  ;;  %v4021_v31 = vld [vmem:[%s3329_s12 + $0x1a8] sm:$0xff] }
 0x193   : > { %v3896_v13 = vadd.f32 %v917_v18, %v916_v41  ;;  %v4029_v18 = vld [vmem:[%s3329_s12 + $0x1a0] sm:$0xff]  ;;  %v4032_v41 = vld [vmem:[%s3329_s12 + $0x1b0] sm:$0xff] }
 0x195   : > { %3028 = vtanh.f32 %v3896_v13 }
 0x1a2   : > { %v3029_v21 = vpop.eup %3028 }
 0x1a3   : > { %v920_v62 = vmul.f32 %v3029_v21, %v3027_v0  ;;  %v4040_v0 = vld [vmem:[%s3329_s12 + $0x198] sm:$0xff]  ;;  %v4045_v21 = vld [vmem:[%s3329_s12 + $0x180] sm:$0xff] }
 0x1a5   : > { %924 = vst [vmem:[%s923_s27] sm:$0xff] %v920_v62  ;;  %1068 = vmatmul.mubr.f32.vlgmr.msra.gmra.mxu0 %v920_v62  ;;  %1139 = vmatmul.mubr.f32.vlgmr.msra.gmra.mxu1 %v920_v62  ;;  %v4048_v62 = vld [vmem:[%s3329_s12 + $0x190] sm:$0xff]  ;;  %s2926_s27 = sshll.u32 %s3254_s19, 2 }
 0x1a6   : > { %1257 = vmatpush1.msra.mxu0 %v3489_v5  ;;  %1328 = vmatpush1.msra.mxu1 %v3492_v6  ;;  %v4701_v5 = vld [vmem:[#allocation11_spill] sm:$0xff]  ;;  %v4702_v6 = vld [vmem:[#allocation9_spill] sm:$0xff]  ;;  %s4328_s5 = sadd.s32 %s2926_s27, %s1431_s22  ;;  %s2940_s22 = sshll.u32 %s3254_s19, 1 }
 0x1a7   : > { %1258 = vmatprep.subr.mxu0 %v3499_v8  ;;  %1329 = vmatprep.subr.mxu1 %v3514_v12  ;;  %v4703_v8 = vld [vmem:[#allocation13_spill] sm:$0xff]  ;;  %v4706_v12 = vld [vmem:[#allocation12_spill] sm:$0xff]  ;;  %4719 = vst [vmem:[#allocation11_spill] sm:$0xff] %v3989_v58  ;;  %4720 = vst [vmem:[#allocation9_spill] sm:$0xff] %v3992_v38  ;;  %s2927_s29 = sshll.u32 %s4328_s5, 3 }
 0x1a8   : > { %1259 = vmatpush1.msra.mxu0 %v3507_v10  ;;  %1330 = vmatpush1.msra.mxu1 %v3525_v15  ;;  %v4704_v10 = vld [vmem:[#allocation10_spill] sm:$0xff]  ;;  %s1435_s30 = sshra.s32 %s2927_s29, 3 }
 0x1a9   : > { %1260 = vmatprep.subr.mxu0 %v3511_v11  ;;  %1331 = vmatprep.subr.mxu1 %v3533_v17  ;;  %v4705_v11 = vld [vmem:[#allocation15_spill] sm:$0xff]  ;;  %v4708_v15 = vld [vmem:[#allocation14_spill] sm:$0xff]  ;;  %v4710_v17 = vld [vmem:[#allocation16_spill] sm:$0xff]  ;;  %s2967_s7 = sshll.u32 %s1435_s30, 5 }
 0x1aa   : > { %1261 = vmatpush1.msra.mxu0 %v3522_v14  ;;  %1332 = vmatpush1.msra.mxu1 %v3544_v20  ;;  %v4707_v14 = vld [vmem:[#allocation17_spill] sm:$0xff]  ;;  %v4712_v20 = vld [vmem:[#allocation18_spill] sm:$0xff]  ;;  %s1439_s11 = scalar_lea.vmem [#allocation2], %s2967_s7 }
 0x1ab   : > { %1262 = vmatprep.subr.mxu0 %v3530_v16  ;;  %1333 = vmatprep.subr.mxu1 %v3555_v23  ;;  %v4709_v16 = vld [vmem:[#allocation19_spill] sm:$0xff]  ;;  %v4714_v23 = vld [vmem:[#allocation20_spill] sm:$0xff] }
 0x1ac   : > { %1263 = vmatpush1.msra.mxu0 %v3541_v19  ;;  %1334 = vmatpush1.msra.mxu1 %v3563_v25  ;;  %v4711_v19 = vld [vmem:[#allocation21_spill] sm:$0xff]  ;;  %v4716_v25 = vld [vmem:[#allocation22_spill] sm:$0xff] }
 0x1ad   : > { %1264 = vmatprep.subr.mxu0 %v3552_v22  ;;  %1335 = vmatprep.subr.mxu1 %v3569_v27  ;;  %v4713_v22 = vld [vmem:[#allocation23_spill] sm:$0xff]  ;;  %v4718_v27 = vld [vmem:[#allocation25_spill] sm:$0xff] }
 0x1ae   : > { %1265 = vmatpush1.msra.mxu0 %v3560_v24  ;;  %1336 = vmatpush1.msra.mxu1 %v3582_v30  ;;  %v4715_v24 = vld [vmem:[#allocation24_spill] sm:$0xff] }
 0x1af   : > { %1266 = vmatprep.subr.mxu0 %v3566_v26  ;;  %1337 = vmatprep.subr.mxu1 %v3593_v33  ;;  %v4717_v26 = vmov 0.0   ;;  %v935_v33 = vld [vmem:[%s933_s6 + $0x8] sm:$0xff] }
 0x1b0   : > { %1267 = vmatpush1.msra.mxu0 %v3579_v29  ;;  %1338 = vmatpush1.msra.mxu1 %v3601_v35  ;;  %v934_v29 = vld [vmem:[%s933_s6] sm:$0xff] }
 0x1b1   : > { %1268 = vmatprep.subr.mxu0 %v3590_v32  ;;  %1339 = vmatprep.subr.mxu1 %v3607_v37 }
 0x1b2   : > { %1269 = vmatpush1.msra.mxu0 %v3598_v34  ;;  %1340 = vmatpush1.msra.mxu1 %v3620_v40  ;;  %v936_v40 = vld [vmem:[%s933_s6 + $0x10] sm:$0xff] }
 0x1b3   : > { %1270 = vmatprep.subr.mxu0 %v3604_v36  ;;  %1341 = vmatprep.subr.mxu1 %v3631_v43 }
 0x1b4   : > { %1271 = vmatpush1.msra.mxu0 %v3617_v39  ;;  %1342 = vmatpush1.msra.mxu1 %v3639_v45  ;;  %v937_v45 = vld [vmem:[%s933_s6 + $0x18] sm:$0xff]  ;;  %s1682_s6 = scalar_lea.vmem %s3900_s24, %s2927_s29 [#allocation7] }
 0x1b5   : > { %1272 = vmatprep.subr.mxu0 %v3628_v42  ;;  %1343 = vmatprep.subr.mxu1 %v3645_v47 }
 0x1b6   : > { %1273 = vmatpush1.msra.mxu0 %v3636_v44  ;;  %1344 = vmatpush1.msra.mxu1 %v3658_v50 }
 0x1b7   : > { %1274 = vmatprep.subr.mxu0 %v3642_v46  ;;  %1345 = vmatprep.subr.mxu1 %v3669_v53 }
 0x1b8   : > { %1275 = vmatpush1.msra.mxu0 %v3655_v49  ;;  %1346 = vmatpush1.msra.mxu1 %v3677_v55 }
 0x1b9   : > { %1276 = vmatprep.subr.mxu0 %v3666_v52  ;;  %1347 = vmatprep.subr.mxu1 %v3683_v57 }
 0x1ba   : > { %1277 = vmatpush1.msra.mxu0 %v3674_v54  ;;  %1348 = vmatpush1.msra.mxu1 %v3696_v60 }
 0x1bb   : > { %1278 = vmatprep.subr.mxu0 %v3680_v56  ;;  %1349 = vmatprep.subr.mxu1 %v3707_v63 }
 0x1bc   : > { %1279 = vmatpush1.msra.mxu0 %v3693_v59  ;;  %1350 = vmatpush1.msra.mxu1 %v4701_v5  ;;  %v4053_v5 = vld [vmem:[%s3329_s12 + $0x168] sm:$0xff] }
 0x1bd   : > { %1280 = vmatprep.subr.mxu0 %v4702_v6  ;;  %1351 = vmatprep.subr.mxu1 %v4703_v8  ;;  %v4056_v6 = vld [vmem:[%s3329_s12 + $0x178] sm:$0xff]  ;;  %v4061_v8 = vld [vmem:[%s3329_s12 + $0x160] sm:$0xff] }
 0x1be   : > { %1281 = vmatpush1.msra.mxu0 %v4704_v10  ;;  %1352 = vmatpush1.msra.mxu1 %v4705_v11  ;;  %v4064_v10 = vld [vmem:[%s3329_s12 + $0x170] sm:$0xff]  ;;  %v4069_v11 = vld [vmem:[%s3329_s12 + $0x148] sm:$0xff] }
 0x1bf   : > { %1282 = vmatprep.subr.mxu0 %v4706_v12  ;;  %1353 = vmatprep.subr.mxu1 %v4707_v14  ;;  %v4072_v12 = vld [vmem:[%s3329_s12 + $0x158] sm:$0xff]  ;;  %v4077_v14 = vld [vmem:[%s3329_s12 + $0x140] sm:$0xff] }
 0x1c0   : > { %1283 = vmatpush1.msra.mxu0 %v4708_v15  ;;  %1354 = vmatpush1.msra.mxu1 %v4709_v16  ;;  %v4080_v15 = vld [vmem:[%s3329_s12 + $0x150] sm:$0xff]  ;;  %v4085_v16 = vld [vmem:[%s3329_s12 + $0x128] sm:$0xff] }
 0x1c1   : > { %1284 = vmatprep.subr.mxu0 %v4710_v17  ;;  %1355 = vmatprep.subr.mxu1 %v4711_v19  ;;  %v4088_v17 = vld [vmem:[%s3329_s12 + $0x138] sm:$0xff]  ;;  %v4093_v19 = vld [vmem:[%s3329_s12 + $0x120] sm:$0xff] }
 0x1c2   : > { %1285 = vmatpush1.msra.mxu0 %v4712_v20  ;;  %1356 = vmatpush1.msra.mxu1 %v4713_v22  ;;  %v4096_v20 = vld [vmem:[%s3329_s12 + $0x130] sm:$0xff]  ;;  %v4099_v22 = vld [vmem:[%s3329_s12 + $0x108] sm:$0xff] }
 0x1c3   : > { %1286 = vmatprep.subr.mxu0 %v4714_v23  ;;  %1357 = vmatprep.subr.mxu1 %v4715_v24  ;;  %v4104_v23 = vld [vmem:[%s3329_s12 + $0x118] sm:$0xff]  ;;  %v4107_v24 = vld [vmem:[%s3329_s12 + $0x100] sm:$0xff] }
 0x1c4   : > { %1287 = vmatpush1.msra.mxu0 %v4716_v25  ;;  %1320 = vmatprep.mubr.f32.mxu0 %v4717_v26  ;;  %v4110_v25 = vld [vmem:[%s3329_s12 + $0x110] sm:$0xff] }
 0x1c5   : > { %1358 = vmatpush1.msra.mxu1 %v4718_v27  ;;  %1391 = vmatprep.mubr.f32.mxu1 %v4717_v26  ;;  %v4115_v27 = vld [vmem:[%s3329_s12 + $0xe8] sm:$0xff] }
 0x1c6   : > { %1509 = vmatprep.subr.mxu0 %v3989_v58  ;;  %1580 = vmatprep.subr.mxu1 %v3992_v38 }
 0x265   : > { %v1069_v30 = vpop.f32.mrf.mxu0  ;;  %v1140_v39 = vpop.f32.mrf.mxu1 }
 0x266   : > { %v1145_v32 = vadd.f32 %v1069_v30, %v934_v29  ;;  %v1147_v42 = vadd.f32 %v1140_v39, %v936_v40  ;;  %v4118_v29 = vld [vmem:[%s3329_s12 + $0xf8] sm:$0xff]  ;;  %v4121_v30 = vld [vmem:[%s3329_s12 + $0xe0] sm:$0xff] }
 0x267   : > { %v1071_v34 = vpop.f32.mrf.mxu0  ;;  %v1142_v43 = vpop.f32.mrf.mxu1  ;;  %v4148_v39 = vld [vmem:[%s3329_s12 + $0xb8] sm:$0xff]  ;;  %v4153_v40 = vld [vmem:[%s3329_s12 + $0xa0] sm:$0xff] }
 0x268   : > { %v2916_v35 = vmul.f32 -1.442695, %v1145_v32  ;;  %v1146_v36 = vadd.f32 %v1071_v34, %v935_v33  ;;  %v2918_v44 = vmul.f32 -1.442695, %v1147_v42  ;;  %v1148_v47 = vadd.f32 %v1142_v43, %v937_v45  ;;  %v4126_v32 = vld [vmem:[%s3329_s12 + $0xf0] sm:$0xff]  ;;  %v4129_v33 = vld [vmem:[%s3329_s12 + $0xc8] sm:$0xff] }
 0x269   : > { %v4132_v34 = vld [vmem:[%s3329_s12 + $0xd8] sm:$0xff]  ;;  %v4156_v42 = vld [vmem:[%s3329_s12 + $0xb0] sm:$0xff]  ;;  %v4161_v43 = vld [vmem:[%s3329_s12 + $0x88] sm:$0xff] }
 0x26a   : > { %3030 = vpow2.f32 %v2916_v35  ;;  %v2917_v37 = vmul.f32 -1.442695, %v1146_v36  ;;  %v4137_v35 = vld [vmem:[%s3329_s12 + $0xc0] sm:$0xff]  ;;  %v4140_v36 = vld [vmem:[%s3329_s12 + $0xd0] sm:$0xff] }
 0x26b   : > { %v4169_v45 = vld [vmem:[%s3329_s12 + $0x80] sm:$0xff] }
 0x26c   : > { %3032 = vpow2.f32 %v2917_v37  ;;  %v4145_v37 = vld [vmem:[%s3329_s12 + $0xa8] sm:$0xff] }
 0x26d   : > { %3034 = vpow2.f32 %v2918_v44  ;;  %v4164_v44 = vld [vmem:[%s3329_s12 + $0x98] sm:$0xff] }
 0x277   : > { %v3031_v46 = vpop.eup %3030 }
 0x278   : > { %v1158_v49 = vadd.f32 1.0, %v3031_v46  ;;  %v4172_v46 = vld [vmem:[%s3329_s12 + $0x90] sm:$0xff] }
 0x279   : > { %v3033_v50 = vpop.eup %3032  ;;  %4721 = vst [vmem:[#allocation13_spill] sm:$0xff] %v4172_v46 }
 0x27a   : > { %3036 = vrcp.f32 %v1158_v49  ;;  %v1159_v52 = vadd.f32 1.0, %v3033_v50  ;;  %v3035_v53 = vpop.eup %3034  ;;  %v4180_v49 = vld [vmem:[%s3329_s12 + $0x78] sm:$0xff]  ;;  %v4185_v50 = vld [vmem:[%s3329_s12 + $0x60] sm:$0xff] }
 0x27b   : > { %3038 = vtanh.f32 %v1148_v47  ;;  %v1160_v57 = vadd.f32 1.0, %v3035_v53  ;;  %v4177_v47 = vld [vmem:[%s3329_s12 + $0x68] sm:$0xff]  ;;  %4723 = vst [vmem:[#allocation15_spill] sm:$0xff] %v4180_v49  ;;  %4724 = vst [vmem:[#allocation12_spill] sm:$0xff] %v4185_v50 }
 0x27c   : > { %3040 = vrcp.f32 %v1159_v52  ;;  %4722 = vst [vmem:[#allocation10_spill] sm:$0xff] %v4177_v47  ;;  %v4188_v52 = vld [vmem:[%s3329_s12 + $0x70] sm:$0xff]  ;;  %v4193_v53 = vld [vmem:[%s3329_s12 + $0x48] sm:$0xff] }
 0x27d   : > { %3042 = vrcp.f32 %v1160_v57  ;;  %4725 = vst [vmem:[#allocation17_spill] sm:$0xff] %v4188_v52  ;;  %4726 = vst [vmem:[#allocation14_spill] sm:$0xff] %v4193_v53  ;;  %v4209_v57 = vld [vmem:[%s3329_s12 + $0x28] sm:$0xff] }
 0x27e   : > { %4730 = vst [vmem:[#allocation18_spill] sm:$0xff] %v4209_v57 }
 0x287   : > { %v3037_v54 = vpop.eup %3036 }
 0x288   : > { %v3039_v55 = vpop.eup %3038 }
 0x289   : > { %v3041_v56 = vpop.eup %3040  ;;  %v1170_v60 = vmul.f32 %v3039_v55, %v3037_v54  ;;  %v4196_v54 = vld [vmem:[%s3329_s12 + $0x58] sm:$0xff]  ;;  %v4201_v55 = vld [vmem:[%s3329_s12 + $0x40] sm:$0xff] }
 0x28a   : > { %v1169_v59 = vmul.f32 %v3041_v56, %v3896_v13  ;;  %v3043_v1 = vpop.eup %3042  ;;  %v4037_v13 = vld [vmem:[%s3329_s12 + $0x188] sm:$0xff]  ;;  %4727 = vst [vmem:[#allocation19_spill] sm:$0xff] %v4196_v54  ;;  %4728 = vst [vmem:[#allocation16_spill] sm:$0xff] %v4201_v55  ;;  %v4204_v56 = vld [vmem:[%s3329_s12 + $0x50] sm:$0xff] }
 0x28b   : > { %4729 = vst [vmem:[#allocation21_spill] sm:$0xff] %v4204_v56 }
 0x28c   : > { %v3980_v63 = vadd.f32 %v1170_v60, %v1169_v59  ;;  %v4212_v59 = vld [vmem:[%s3329_s12 + $0x38] sm:$0xff]  ;;  %v4217_v60 = vld [vmem:[%s3329_s12 + $0x20] sm:$0xff] }
 0x28d   : > { %4731 = vst [vmem:[#allocation23_spill] sm:$0xff] %v4212_v59  ;;  %4732 = vst [vmem:[#allocation20_spill] sm:$0xff] %v4217_v60 }
 0x28e   : > { %3044 = vtanh.f32 %v3980_v63 }
 0x29b   : > { %v3045_v28 = vpop.eup %3044 }
 0x29c   : > { %v1173_v3 = vmul.f32 %v3045_v28, %v3043_v1  ;;  %v4220_v1 = vld [vmem:[%s3329_s12 + $0x30] sm:$0xff]  ;;  %v4225_v28 = vld [vmem:[%s3329_s12 + $0x8] sm:$0xff] }
 0x29d   : > { %4733 = vst [vmem:[#allocation24_spill] sm:$0xff] %v4220_v1  ;;  %4734 = vst [vmem:[#allocation22_spill] sm:$0xff] %v4225_v28 }
 0x29e   : > { %1177 = vst [vmem:[%s1176_s8] sm:$0xff] %v1173_v3  ;;  %1321 = vmatmul.mubr.f32.vlgmr.msra.gmra.mxu0 %v1173_v3  ;;  %1392 = vmatmul.mubr.f32.vlgmr.msra.gmra.mxu1 %v1173_v3  ;;  %v4228_v3 = vld [vmem:[%s3329_s12 + $0x18] sm:$0xff]  ;;  %s1685_s8 = smul.u32 3, %s3254_s19 }
 0x29f   : > { %1573 = vmatprep.mubr.f32.mxu0 %v4717_v26  ;;  %1644 = vmatprep.mubr.f32.mxu1 %v4717_v26  ;;  %4735 = vst [vmem:[#allocation25_spill] sm:$0xff] %v4228_v3  ;;  %v4233_v26 = vld [vmem:[%s3329_s12] sm:$0xff] }
 0x2a0   : > { %1510 = vmatpush1.msra.mxu0 %v3997_v7  ;;  %1581 = vmatpush1.msra.mxu1 %v4000_v48  ;;  %4736 = vst [vmem:[#allocation26_spill] sm:$0xff] %v4233_v26  ;;  %s4408_s10 = sadd.s32 %s2933_s9, %s1685_s8 }
 0x2a1   : > { %1511 = vmatprep.subr.mxu0 %v4005_v51  ;;  %1582 = vmatprep.subr.mxu1 %v4008_v61  ;;  %s2934_s25 = sshll.u32 %s4408_s10, 3 }
 0x2a2   : > { %1512 = vmatpush1.msra.mxu0 %v4013_v4  ;;  %1583 = vmatpush1.msra.mxu1 %v4016_v9  ;;  %s1688_s13 = sshra.s32 %s2934_s25, 3 }
 0x2a3   : > { %1513 = vmatprep.subr.mxu0 %v4021_v31  ;;  %1584 = vmatprep.subr.mxu1 %v4024_v2  ;;  %s2968_s18 = sshll.u32 %s1688_s13, 5 }
 0x2a4   : > { %1514 = vmatpush1.msra.mxu0 %v4029_v18  ;;  %1585 = vmatpush1.msra.mxu1 %v4032_v41  ;;  %s1692_s14 = scalar_lea.vmem [#allocation2], %s2968_s18  ;;  %s2442_s18 = smul.u32 56, %s3971_s28 }
 0x2a5   : > { %1515 = vmatprep.subr.mxu0 %v4037_v13  ;;  %1586 = vmatprep.subr.mxu1 %v4040_v0 }
 0x2a6   : > { %1516 = vmatpush1.msra.mxu0 %v4045_v21  ;;  %1587 = vmatpush1.msra.mxu1 %v4048_v62 }
 0x2a7   : > { %1517 = vmatprep.subr.mxu0 %v4053_v5  ;;  %1588 = vmatprep.subr.mxu1 %v4056_v6 }
 0x2a8   : > { %1518 = vmatpush1.msra.mxu0 %v4061_v8  ;;  %1589 = vmatpush1.msra.mxu1 %v4064_v10 }
 0x2a9   : > { %1519 = vmatprep.subr.mxu0 %v4069_v11  ;;  %1590 = vmatprep.subr.mxu1 %v4072_v12 }
 0x2aa   : > { %1520 = vmatpush1.msra.mxu0 %v4077_v14  ;;  %1591 = vmatpush1.msra.mxu1 %v4080_v15 }
 0x2ab   : > { %1521 = vmatprep.subr.mxu0 %v4085_v16  ;;  %1592 = vmatprep.subr.mxu1 %v4088_v17 }
 0x2ac   : > { %1522 = vmatpush1.msra.mxu0 %v4093_v19  ;;  %1593 = vmatpush1.msra.mxu1 %v4096_v20 }
 0x2ad   : > { %1523 = vmatprep.subr.mxu0 %v4099_v22  ;;  %1594 = vmatprep.subr.mxu1 %v4104_v23 }
 0x2ae   : > { %1524 = vmatpush1.msra.mxu0 %v4107_v24  ;;  %1595 = vmatpush1.msra.mxu1 %v4110_v25 }
 0x2af   : > { %1525 = vmatprep.subr.mxu0 %v4115_v27  ;;  %1596 = vmatprep.subr.mxu1 %v4118_v29 }
 0x2b0   : > { %1526 = vmatpush1.msra.mxu0 %v4121_v30  ;;  %1597 = vmatpush1.msra.mxu1 %v4126_v32 }
 0x2b1   : > { %1527 = vmatprep.subr.mxu0 %v4129_v33  ;;  %1598 = vmatprep.subr.mxu1 %v4132_v34 }
 0x2b2   : > { %1528 = vmatpush1.msra.mxu0 %v4137_v35  ;;  %1599 = vmatpush1.msra.mxu1 %v4140_v36 }
 0x2b3   : > { %1529 = vmatprep.subr.mxu0 %v4145_v37  ;;  %1600 = vmatprep.subr.mxu1 %v4148_v39 }
 0x2b4   : > { %1530 = vmatpush1.msra.mxu0 %v4153_v40  ;;  %1601 = vmatpush1.msra.mxu1 %v4156_v42 }
 0x2b5   : > { %1531 = vmatprep.subr.mxu0 %v4161_v43  ;;  %1602 = vmatprep.subr.mxu1 %v4164_v44 }
 0x2b6   : > { %1532 = vmatpush1.msra.mxu0 %v4169_v45  ;;  %1603 = vmatpush1.msra.mxu1 %v4172_v46 }
 0x2b7   : > { %1533 = vmatprep.subr.mxu0 %v4177_v47  ;;  %1604 = vmatprep.subr.mxu1 %v4180_v49 }
 0x2b8   : > { %1534 = vmatpush1.msra.mxu0 %v4185_v50  ;;  %1605 = vmatpush1.msra.mxu1 %v4188_v52  ;;  %v1190_v52 = vld [vmem:[%s1186_s15 + $0x18] sm:$0xff] }
 0x2b9   : > { %1535 = vmatprep.subr.mxu0 %v4193_v53  ;;  %1606 = vmatprep.subr.mxu1 %v4196_v54  ;;  %v4236_v54 = vld [vmem:[%s3329_s12 + $0x10] sm:$0xff] }
 0x2ba   : > { %1536 = vmatpush1.msra.mxu0 %v4201_v55  ;;  %1607 = vmatpush1.msra.mxu1 %v4204_v56  ;;  %4737 = vst [vmem:[#allocation27_spill] sm:$0xff] %v4236_v54 }
 0x2bb   : > { %1537 = vmatprep.subr.mxu0 %v4209_v57  ;;  %1608 = vmatprep.subr.mxu1 %v4212_v59  ;;  %v1189_v57 = vld [vmem:[%s1186_s15 + $0x10] sm:$0xff] }
 0x2bc   : > { %1538 = vmatpush1.msra.mxu0 %v4217_v60  ;;  %1609 = vmatpush1.msra.mxu1 %v4220_v1  ;;  %v1188_v1 = vld [vmem:[%s1186_s15 + $0x8] sm:$0xff] }
 0x2bd   : > { %1539 = vmatprep.subr.mxu0 %v4225_v28  ;;  %1610 = vmatprep.subr.mxu1 %v4228_v3  ;;  %v1187_v3 = vld [vmem:[%s1186_s15] sm:$0xff]  ;;  %s1935_s15 = scalar_lea.vmem %s3900_s24, %s2934_s25 [#allocation7] }
 0x2be   : > { %1540 = vmatpush1.msra.mxu0 %v4233_v26  ;;  %1611 = vmatpush1.msra.mxu1 %v4236_v54 }
 0x2bf   : > { %1762 = vmatprep.subr.mxu0 %v3989_v58  ;;  %1833 = vmatprep.subr.mxu1 %v3992_v38 }
 0x35e   : > { %v1322_v28 = vpop.f32.mrf.mxu0  ;;  %v1393_v59 = vpop.f32.mrf.mxu1 }
 0x35f   : > { %v1398_v26 = vadd.f32 %v1322_v28, %v1187_v3  ;;  %v1400_v56 = vadd.f32 %v1393_v59, %v1189_v57  ;;  %v4744_v3 = vld [vmem:[#allocation19_spill] sm:$0xff] }
 0x360   : > { %v1324_v54 = vpop.f32.mrf.mxu0  ;;  %v1395_v55 = vpop.f32.mrf.mxu1 }
 0x361   : > { %v2923_v60 = vmul.f32 -1.442695, %v1398_v26  ;;  %v1399_v58 = vadd.f32 %v1324_v54, %v1188_v1  ;;  %v2925_v53 = vmul.f32 -1.442695, %v1400_v56  ;;  %v1401_v49 = vadd.f32 %v1395_v55, %v1190_v52  ;;  %v4740_v52 = vld [vmem:[#allocation15_spill] sm:$0xff]  ;;  %v4742_v55 = vld [vmem:[#allocation17_spill] sm:$0xff] }
 0x362   : > { %v4743_v1 = vld [vmem:[#allocation14_spill] sm:$0xff] }
 0x363   : > { %3046 = vpow2.f32 %v2923_v60  ;;  %v2924_v38 = vmul.f32 -1.442695, %v1399_v58 }
 0x365   : > { %3048 = vpow2.f32 %v2924_v38 }
 0x366   : > { %3050 = vpow2.f32 %v2925_v53  ;;  %v4741_v53 = vld [vmem:[#allocation12_spill] sm:$0xff] }
 0x370   : > { %v3047_v50 = vpop.eup %3046 }
 0x371   : > { %v1411_v47 = vadd.f32 1.0, %v3047_v50 }
 0x372   : > { %v3049_v46 = vpop.eup %3048 }
 0x373   : > { %3052 = vrcp.f32 %v1411_v47  ;;  %v1412_v28 = vadd.f32 1.0, %v3049_v46  ;;  %v3051_v26 = vpop.eup %3050 }
 0x374   : > { %3054 = vtanh.f32 %v1401_v49  ;;  %v1413_v60 = vadd.f32 1.0, %v3051_v26  ;;  %v4739_v49 = vld [vmem:[#allocation10_spill] sm:$0xff]  ;;  %v4746_v26 = vld [vmem:[#allocation21_spill] sm:$0xff] }
 0x375   : > { %3056 = vrcp.f32 %v1412_v28  ;;  %v4745_v28 = vld [vmem:[#allocation16_spill] sm:$0xff] }
 0x376   : > { %3058 = vrcp.f32 %v1413_v60  ;;  %v4750_v60 = vld [vmem:[#allocation24_spill] sm:$0xff] }
 0x380   : > { %v3053_v58 = vpop.eup %3052 }
 0x381   : > { %v3055_v38 = vpop.eup %3054 }
 0x382   : > { %v3057_v54 = vpop.eup %3056  ;;  %v1423_v56 = vmul.f32 %v3055_v38, %v3053_v58  ;;  %v4747_v58 = vld [vmem:[#allocation18_spill] sm:$0xff]  ;;  %v4748_v38 = vld [vmem:[#allocation23_spill] sm:$0xff] }
 0x383   : > { %v1422_v57 = vmul.f32 %v3057_v54, %v3980_v63  ;;  %v3059_v50 = vpop.eup %3058  ;;  %v4738_v63 = vld [vmem:[#allocation13_spill] sm:$0xff]  ;;  %v4749_v54 = vld [vmem:[#allocation20_spill] sm:$0xff] }
 0x385   : > { %v4254_v59 = vadd.f32 %v1423_v56, %v1422_v57  ;;  %v4751_v57 = vld [vmem:[#allocation22_spill] sm:$0xff]  ;;  %v4752_v56 = vld [vmem:[#allocation25_spill] sm:$0xff] }
 0x387   : > { %3060 = vtanh.f32 %v4254_v59 }
 0x394   : > { %v3061_v47 = vpop.eup %3060 }
 0x395   : > { %v1426_v46 = vmul.f32 %v3061_v47, %v3059_v50  ;;  %v4753_v50 = vld [vmem:[#allocation26_spill] sm:$0xff]  ;;  %v4754_v47 = vmov 0.0  }
 0x397   : > { %1430 = vst [vmem:[%s1429_s21] sm:$0xff] %v1426_v46  ;;  %1574 = vmatmul.mubr.f32.vlgmr.msra.gmra.mxu0 %v1426_v46  ;;  %1645 = vmatmul.mubr.f32.vlgmr.msra.gmra.mxu1 %v1426_v46  ;;  %v4755_v46 = vld [vmem:[#allocation27_spill] sm:$0xff]  ;;  %s1937_s21 = smul.u32 5, %s3971_s28 }
 0x398   : > { %1763 = vmatpush1.msra.mxu0 %v3997_v7  ;;  %1834 = vmatpush1.msra.mxu1 %v4000_v48 }
 0x399   : > { %1764 = vmatprep.subr.mxu0 %v4005_v51  ;;  %1835 = vmatprep.subr.mxu1 %v4008_v61  ;;  %s4486_s27 = sadd.s32 %s2940_s22, %s1937_s21  ;;  %s2690_s22 = scalar_lea.vmem %s3900_s24, %s2442_s18 [#allocation7] }
 0x39a   : > { %1765 = vmatpush1.msra.mxu0 %v4013_v4  ;;  %1836 = vmatpush1.msra.mxu1 %v4016_v9  ;;  %s2941_s5 = sshll.u32 %s4486_s27, 3  ;;  %s2959_s27 = sshll.u32 (%p4796_p10), %s3254_s19, 3 }
 0x39b   : > { %1766 = vmatprep.subr.mxu0 %v4021_v31  ;;  %1837 = vmatprep.subr.mxu1 %v4024_v2  ;;  %s1941_s29 = sshra.s32 %s2941_s5, 3 }
 0x39c   : > { %1767 = vmatpush1.msra.mxu0 %v4029_v18  ;;  %1838 = vmatpush1.msra.mxu1 %v4032_v41  ;;  %s2969_s30 = sshll.u32 %s1941_s29, 5  ;;  %s2700_s29 = scalar_lea.vmem (%p4796_p10), %s4612_s4, %s2959_s27 }
 0x39d   : > { %1768 = vmatprep.subr.mxu0 %v4037_v13  ;;  %1839 = vmatprep.subr.mxu1 %v4040_v0  ;;  %s1945_s7 = scalar_lea.vmem [#allocation2], %s2969_s30 }
 0x39e   : > { %1769 = vmatpush1.msra.mxu0 %v4045_v21  ;;  %1840 = vmatpush1.msra.mxu1 %v4048_v62 }
 0x39f   : > { %1770 = vmatprep.subr.mxu0 %v4053_v5  ;;  %1841 = vmatprep.subr.mxu1 %v4056_v6 }
 0x3a0   : > { %1771 = vmatpush1.msra.mxu0 %v4061_v8  ;;  %1842 = vmatpush1.msra.mxu1 %v4064_v10 }
 0x3a1   : > { %1772 = vmatprep.subr.mxu0 %v4069_v11  ;;  %1843 = vmatprep.subr.mxu1 %v4072_v12 }
 0x3a2   : > { %1773 = vmatpush1.msra.mxu0 %v4077_v14  ;;  %1844 = vmatpush1.msra.mxu1 %v4080_v15 }
 0x3a3   : > { %1774 = vmatprep.subr.mxu0 %v4085_v16  ;;  %1845 = vmatprep.subr.mxu1 %v4088_v17 }
 0x3a4   : > { %1775 = vmatpush1.msra.mxu0 %v4093_v19  ;;  %1846 = vmatpush1.msra.mxu1 %v4096_v20 }
 0x3a5   : > { %1776 = vmatprep.subr.mxu0 %v4099_v22  ;;  %1847 = vmatprep.subr.mxu1 %v4104_v23 }
 0x3a6   : > { %1777 = vmatpush1.msra.mxu0 %v4107_v24  ;;  %1848 = vmatpush1.msra.mxu1 %v4110_v25 }
 0x3a7   : > { %1778 = vmatprep.subr.mxu0 %v4115_v27  ;;  %1849 = vmatprep.subr.mxu1 %v4118_v29 }
 0x3a8   : > { %1779 = vmatpush1.msra.mxu0 %v4121_v30  ;;  %1850 = vmatpush1.msra.mxu1 %v4126_v32 }
 0x3a9   : > { %1780 = vmatprep.subr.mxu0 %v4129_v33  ;;  %1851 = vmatprep.subr.mxu1 %v4132_v34 }
 0x3aa   : > { %1781 = vmatpush1.msra.mxu0 %v4137_v35  ;;  %1852 = vmatpush1.msra.mxu1 %v4140_v36 }
 0x3ab   : > { %1782 = vmatprep.subr.mxu0 %v4145_v37  ;;  %1853 = vmatprep.subr.mxu1 %v4148_v39 }
 0x3ac   : > { %1783 = vmatpush1.msra.mxu0 %v4153_v40  ;;  %1854 = vmatpush1.msra.mxu1 %v4156_v42 }
 0x3ad   : > { %1784 = vmatprep.subr.mxu0 %v4161_v43  ;;  %1855 = vmatprep.subr.mxu1 %v4164_v44 }
 0x3ae   : > { %1785 = vmatpush1.msra.mxu0 %v4169_v45  ;;  %1856 = vmatpush1.msra.mxu1 %v4738_v63 }
 0x3af   : > { %1786 = vmatprep.subr.mxu0 %v4739_v49  ;;  %1857 = vmatprep.subr.mxu1 %v4740_v52 }
 0x3b0   : > { %1787 = vmatpush1.msra.mxu0 %v4741_v53  ;;  %1858 = vmatpush1.msra.mxu1 %v4742_v55  ;;  %v1443_v55 = vld [vmem:[%s1439_s11 + $0x18] sm:$0xff] }
 0x3b1   : > { %1788 = vmatprep.subr.mxu0 %v4743_v1  ;;  %1859 = vmatprep.subr.mxu1 %v4744_v3 }
 0x3b2   : > { %1789 = vmatpush1.msra.mxu0 %v4745_v28  ;;  %1860 = vmatpush1.msra.mxu1 %v4746_v26  ;;  %v4756_v26 = vld [vmem:[#allocation11_spill] sm:$0xff] }
 0x3b3   : > { %1790 = vmatprep.subr.mxu0 %v4747_v58  ;;  %1861 = vmatprep.subr.mxu1 %v4748_v38  ;;  %v4757_v58 = vld [vmem:[#allocation9_spill] sm:$0xff]  ;;  %v1442_v38 = vld [vmem:[%s1439_s11 + $0x10] sm:$0xff] }
 0x3b4   : > { %1791 = vmatpush1.msra.mxu0 %v4749_v54  ;;  %1862 = vmatpush1.msra.mxu1 %v4750_v60 }
 0x3b5   : > { %1792 = vmatprep.subr.mxu0 %v4751_v57  ;;  %1863 = vmatprep.subr.mxu1 %v4752_v56  ;;  %v1441_v57 = vld [vmem:[%s1439_s11 + $0x8] sm:$0xff] }
 0x3b6   : > { %1793 = vmatpush1.msra.mxu0 %v4753_v50  ;;  %1826 = vmatprep.mubr.f32.mxu0 %v4754_v47  ;;  %v1440_v50 = vld [vmem:[%s1439_s11] sm:$0xff]  ;;  %s2188_s11 = scalar_lea.vmem %s3900_s24, %s2941_s5 [#allocation7] }
 0x3b7   : > { %1864 = vmatpush1.msra.mxu1 %v4755_v46  ;;  %1897 = vmatprep.mubr.f32.mxu1 %v4754_v47 }
 0x3b8   : > { %2015 = vmatprep.subr.mxu0 %v4756_v26  ;;  %2086 = vmatprep.subr.mxu1 %v4757_v58 }
 0x457   : > { %v1575_v56 = vpop.f32.mrf.mxu0  ;;  %v1646_v54 = vpop.f32.mrf.mxu1 }
 0x458   : > { %v1651_v46 = vadd.f32 %v1575_v56, %v1440_v50  ;;  %v1653_v28 = vadd.f32 %v1646_v54, %v1442_v38 }
 0x459   : > { %v1577_v47 = vpop.f32.mrf.mxu0  ;;  %v1648_v3 = vpop.f32.mrf.mxu1 }
 0x45a   : > { %v2930_v60 = vmul.f32 -1.442695, %v1651_v46  ;;  %v1652_v26 = vadd.f32 %v1577_v47, %v1441_v57  ;;  %v2932_v1 = vmul.f32 -1.442695, %v1653_v28  ;;  %v1654_v52 = vadd.f32 %v1648_v3, %v1443_v55  ;;  %v4760_v55 = vld [vmem:[#allocation15_spill] sm:$0xff]  ;;  %v4762_v3 = vld [vmem:[#allocation17_spill] sm:$0xff] }
 0x45b   : > { %v4763_v47 = vld [vmem:[#allocation14_spill] sm:$0xff]  ;;  %v4764_v46 = vld [vmem:[#allocation19_spill] sm:$0xff] }
 0x45c   : > { %3062 = vpow2.f32 %v2930_v60  ;;  %v2931_v58 = vmul.f32 -1.442695, %v1652_v26 }
 0x45e   : > { %3064 = vpow2.f32 %v2931_v58 }
 0x45f   : > { %3066 = vpow2.f32 %v2932_v1  ;;  %v4761_v1 = vld [vmem:[#allocation12_spill] sm:$0xff] }
 0x469   : > { %v3063_v53 = vpop.eup %3062 }
 0x46a   : > { %v1664_v49 = vadd.f32 1.0, %v3063_v53 }
 0x46b   : > { %v3065_v63 = vpop.eup %3064 }
 0x46c   : > { %3068 = vrcp.f32 %v1664_v49  ;;  %v1665_v56 = vadd.f32 1.0, %v3065_v63  ;;  %v3067_v60 = vpop.eup %3066 }
 0x46d   : > { %3070 = vtanh.f32 %v1654_v52  ;;  %v1666_v50 = vadd.f32 1.0, %v3067_v60  ;;  %v4759_v52 = vld [vmem:[#allocation10_spill] sm:$0xff]  ;;  %v4766_v60 = vld [vmem:[#allocation21_spill] sm:$0xff] }
 0x46e   : > { %3072 = vrcp.f32 %v1665_v56  ;;  %v4765_v56 = vld [vmem:[#allocation16_spill] sm:$0xff] }
 0x46f   : > { %3074 = vrcp.f32 %v1666_v50  ;;  %v4770_v50 = vld [vmem:[#allocation24_spill] sm:$0xff] }
 0x479   : > { %v3069_v26 = vpop.eup %3068 }
 0x47a   : > { %v3071_v58 = vpop.eup %3070 }
 0x47b   : > { %v3073_v57 = vpop.eup %3072  ;;  %v1676_v28 = vmul.f32 %v3071_v58, %v3069_v26  ;;  %v4767_v26 = vld [vmem:[#allocation18_spill] sm:$0xff]  ;;  %v4768_v58 = vld [vmem:[#allocation23_spill] sm:$0xff] }
 0x47c   : > { %v1675_v38 = vmul.f32 %v3073_v57, %v4254_v59  ;;  %v3075_v53 = vpop.eup %3074  ;;  %v4758_v59 = vld [vmem:[#allocation13_spill] sm:$0xff]  ;;  %v4769_v57 = vld [vmem:[#allocation20_spill] sm:$0xff] }
 0x47e   : > { %v4334_v54 = vadd.f32 %v1676_v28, %v1675_v38  ;;  %v4771_v38 = vld [vmem:[#allocation22_spill] sm:$0xff]  ;;  %v4772_v28 = vld [vmem:[#allocation25_spill] sm:$0xff] }
 0x480   : > { %3076 = vtanh.f32 %v4334_v54 }
 0x48d   : > { %v3077_v49 = vpop.eup %3076 }
 0x48e   : > { %v1679_v63 = vmul.f32 %v3077_v49, %v3075_v53  ;;  %v4773_v53 = vld [vmem:[#allocation26_spill] sm:$0xff]  ;;  %v4774_v49 = vmov 0.0  }
 0x490   : > { %1683 = vst [vmem:[%s1682_s6] sm:$0xff] %v1679_v63  ;;  %1827 = vmatmul.mubr.f32.vlgmr.msra.gmra.mxu0 %v1679_v63  ;;  %1898 = vmatmul.mubr.f32.vlgmr.msra.gmra.mxu1 %v1679_v63  ;;  %v4775_v63 = vld [vmem:[#allocation27_spill] sm:$0xff]  ;;  %s2190_s6 = smul.u32 6, %s3971_s28 }
 0x491   : > { %2016 = vmatpush1.msra.mxu0 %v3997_v7  ;;  %2087 = vmatpush1.msra.mxu1 %v4000_v48 }
 0x492   : > { %2017 = vmatprep.subr.mxu0 %v4005_v51  ;;  %2088 = vmatprep.subr.mxu1 %v4008_v61  ;;  %s4566_s8 = sadd.s32 %s3254_s19, %s2190_s6 }
 0x493   : > { %2018 = vmatpush1.msra.mxu0 %v4013_v4  ;;  %2089 = vmatpush1.msra.mxu1 %v4016_v9  ;;  %s2947_s9 = sshll.u32 %s4566_s8, 3 }
 0x494   : > { %2019 = vmatprep.subr.mxu0 %v4021_v31  ;;  %2090 = vmatprep.subr.mxu1 %v4024_v2  ;;  %s2193_s10 = sshra.s32 %s2947_s9, 3 }
 0x495   : > { %2020 = vmatpush1.msra.mxu0 %v4029_v18  ;;  %2091 = vmatpush1.msra.mxu1 %v4032_v41  ;;  %s2970_s25 = sshll.u32 %s2193_s10, 5 }
 0x496   : > { %2021 = vmatprep.subr.mxu0 %v4037_v13  ;;  %2092 = vmatprep.subr.mxu1 %v4040_v0  ;;  %s2197_s13 = scalar_lea.vmem [#allocation2], %s2970_s25 }
 0x497   : > { %2022 = vmatpush1.msra.mxu0 %v4045_v21  ;;  %2093 = vmatpush1.msra.mxu1 %v4048_v62 }
 0x498   : > { %2023 = vmatprep.subr.mxu0 %v4053_v5  ;;  %2094 = vmatprep.subr.mxu1 %v4056_v6 }
 0x499   : > { %2024 = vmatpush1.msra.mxu0 %v4061_v8  ;;  %2095 = vmatpush1.msra.mxu1 %v4064_v10 }
 0x49a   : > { %2025 = vmatprep.subr.mxu0 %v4069_v11  ;;  %2096 = vmatprep.subr.mxu1 %v4072_v12 }
 0x49b   : > { %2026 = vmatpush1.msra.mxu0 %v4077_v14  ;;  %2097 = vmatpush1.msra.mxu1 %v4080_v15 }
 0x49c   : > { %2027 = vmatprep.subr.mxu0 %v4085_v16  ;;  %2098 = vmatprep.subr.mxu1 %v4088_v17 }
 0x49d   : > { %2028 = vmatpush1.msra.mxu0 %v4093_v19  ;;  %2099 = vmatpush1.msra.mxu1 %v4096_v20 }
 0x49e   : > { %2029 = vmatprep.subr.mxu0 %v4099_v22  ;;  %2100 = vmatprep.subr.mxu1 %v4104_v23 }
 0x49f   : > { %2030 = vmatpush1.msra.mxu0 %v4107_v24  ;;  %2101 = vmatpush1.msra.mxu1 %v4110_v25 }
 0x4a0   : > { %2031 = vmatprep.subr.mxu0 %v4115_v27  ;;  %2102 = vmatprep.subr.mxu1 %v4118_v29 }
 0x4a1   : > { %2032 = vmatpush1.msra.mxu0 %v4121_v30  ;;  %2103 = vmatpush1.msra.mxu1 %v4126_v32 }
 0x4a2   : > { %2033 = vmatprep.subr.mxu0 %v4129_v33  ;;  %2104 = vmatprep.subr.mxu1 %v4132_v34 }
 0x4a3   : > { %2034 = vmatpush1.msra.mxu0 %v4137_v35  ;;  %2105 = vmatpush1.msra.mxu1 %v4140_v36 }
 0x4a4   : > { %2035 = vmatprep.subr.mxu0 %v4145_v37  ;;  %2106 = vmatprep.subr.mxu1 %v4148_v39 }
 0x4a5   : > { %2036 = vmatpush1.msra.mxu0 %v4153_v40  ;;  %2107 = vmatpush1.msra.mxu1 %v4156_v42 }
 0x4a6   : > { %2037 = vmatprep.subr.mxu0 %v4161_v43  ;;  %2108 = vmatprep.subr.mxu1 %v4164_v44 }
 0x4a7   : > { %2038 = vmatpush1.msra.mxu0 %v4169_v45  ;;  %2109 = vmatpush1.msra.mxu1 %v4758_v59 }
 0x4a8   : > { %2039 = vmatprep.subr.mxu0 %v4759_v52  ;;  %2110 = vmatprep.subr.mxu1 %v4760_v55 }
 0x4a9   : > { %2040 = vmatpush1.msra.mxu0 %v4761_v1  ;;  %2111 = vmatpush1.msra.mxu1 %v4762_v3  ;;  %v1696_v3 = vld [vmem:[%s1692_s14 + $0x18] sm:$0xff] }
 0x4aa   : > { %2041 = vmatprep.subr.mxu0 %v4763_v47  ;;  %2112 = vmatprep.subr.mxu1 %v4764_v46 }
 0x4ab   : > { %2042 = vmatpush1.msra.mxu0 %v4765_v56  ;;  %2113 = vmatpush1.msra.mxu1 %v4766_v60  ;;  %v4776_v60 = vld [vmem:[#allocation11_spill] sm:$0xff] }
 0x4ac   : > { %2043 = vmatprep.subr.mxu0 %v4767_v26  ;;  %2114 = vmatprep.subr.mxu1 %v4768_v58  ;;  %v4777_v26 = vld [vmem:[#allocation9_spill] sm:$0xff]  ;;  %v1695_v58 = vld [vmem:[%s1692_s14 + $0x10] sm:$0xff] }
 0x4ad   : > { %2044 = vmatpush1.msra.mxu0 %v4769_v57  ;;  %2115 = vmatpush1.msra.mxu1 %v4770_v50 }
 0x4ae   : > { %2045 = vmatprep.subr.mxu0 %v4771_v38  ;;  %2116 = vmatprep.subr.mxu1 %v4772_v28  ;;  %v1694_v38 = vld [vmem:[%s1692_s14 + $0x8] sm:$0xff] }
 0x4af   : > { %2046 = vmatpush1.msra.mxu0 %v4773_v53  ;;  %2079 = vmatprep.mubr.f32.mxu0 %v4774_v49  ;;  %v1693_v53 = vld [vmem:[%s1692_s14] sm:$0xff]  ;;  %s2443_s14 = sshra.s32 %s2442_s18, 3 }
 0x4b0   : > { %2117 = vmatpush1.msra.mxu1 %v4775_v63  ;;  %2150 = vmatprep.mubr.f32.mxu1 %v4774_v49 }
 0x4b1   : > { %2267 = vmatprep.subr.mxu0 %v4776_v60  ;;  %2338 = vmatprep.subr.mxu1 %v4777_v26 }
 0x550   : > { %v1828_v28 = vpop.f32.mrf.mxu0  ;;  %v1899_v57 = vpop.f32.mrf.mxu1 }
 0x551   : > { %v1904_v63 = vadd.f32 %v1828_v28, %v1693_v53  ;;  %v1906_v56 = vadd.f32 %v1899_v57, %v1695_v58 }
 0x552   : > { %v1830_v49 = vpop.f32.mrf.mxu0  ;;  %v1901_v46 = vpop.f32.mrf.mxu1 }
 0x553   : > { %v2937_v50 = vmul.f32 -1.442695, %v1904_v63  ;;  %v1905_v60 = vadd.f32 %v1830_v49, %v1694_v38  ;;  %v2939_v47 = vmul.f32 -1.442695, %v1906_v56  ;;  %v1907_v55 = vadd.f32 %v1901_v46, %v1696_v3  ;;  %v2516_v46 = vld [vmem:[%s3329_s12 + $0x1f8] sm:$0xff] }
 0x555   : > { %3078 = vpow2.f32 %v2937_v50  ;;  %v2938_v26 = vmul.f32 -1.442695, %v1905_v60  ;;  %v2513_v60 = vld [vmem:[%s3329_s12 + $0x1e0] sm:$0xff] }
 0x557   : > { %3080 = vpow2.f32 %v2938_v26  ;;  %v2515_v26 = vld [vmem:[%s3329_s12 + $0x1f0] sm:$0xff] }
 0x558   : > { %3082 = vpow2.f32 %v2939_v47  ;;  %v2514_v47 = vld [vmem:[%s3329_s12 + $0x1e8] sm:$0xff] }
 0x562   : > { %v3079_v1 = vpop.eup %3078 }
 0x563   : > { %v1917_v52 = vadd.f32 1.0, %v3079_v1 }
 0x564   : > { %v3081_v59 = vpop.eup %3080 }
 0x565   : > { %3084 = vrcp.f32 %v1917_v52  ;;  %v1918_v28 = vadd.f32 1.0, %v3081_v59  ;;  %v3083_v50 = vpop.eup %3082 }
 0x566   : > { %3086 = vtanh.f32 %v1907_v55  ;;  %v1919_v63 = vadd.f32 1.0, %v3083_v50  ;;  %v2512_v50 = vld [vmem:[%s3329_s12 + $0x1d8] sm:$0xff] }
 0x567   : > { %3088 = vrcp.f32 %v1918_v28  ;;  %v2510_v28 = vld [vmem:[%s3329_s12 + $0x1c8] sm:$0xff] }
 0x568   : > { %3090 = vrcp.f32 %v1919_v63  ;;  %v2508_v63 = vld [vmem:[%s3329_s12 + $0x1b8] sm:$0xff] }
 0x572   : > { %v3085_v38 = vpop.eup %3084 }
 0x573   : > { %v3087_v53 = vpop.eup %3086 }
 0x574   : > { %v3089_v49 = vpop.eup %3088  ;;  %v1929_v56 = vmul.f32 %v3087_v53, %v3085_v38  ;;  %v2509_v38 = vld [vmem:[%s3329_s12 + $0x1c0] sm:$0xff]  ;;  %v2511_v53 = vld [vmem:[%s3329_s12 + $0x1d0] sm:$0xff] }
 0x575   : > { %v1928_v58 = vmul.f32 %v3089_v49, %v4334_v54  ;;  %v3091_v1 = vpop.eup %3090  ;;  %v2506_v49 = vld [vmem:[%s3329_s12 + $0x1a8] sm:$0xff] }
 0x577   : > { %v4414_v57 = vadd.f32 %v1929_v56, %v1928_v58  ;;  %v2505_v58 = vld [vmem:[%s3329_s12 + $0x1a0] sm:$0xff]  ;;  %v2507_v56 = vld [vmem:[%s3329_s12 + $0x1b0] sm:$0xff] }
 0x579   : > { %3092 = vtanh.f32 %v4414_v57 }
 0x586   : > { %v3093_v52 = vpop.eup %3092 }
 0x587   : > { %v1932_v59 = vmul.f32 %v3093_v52, %v3091_v1  ;;  %v2504_v1 = vld [vmem:[%s3329_s12 + $0x198] sm:$0xff]  ;;  %v2501_v52 = vld [vmem:[%s3329_s12 + $0x180] sm:$0xff] }
 0x589   : > { %1936 = vst [vmem:[%s1935_s15] sm:$0xff] %v1932_v59  ;;  %2080 = vmatmul.mubr.f32.vlgmr.msra.gmra.mxu0 %v1932_v59  ;;  %2151 = vmatmul.mubr.f32.vlgmr.msra.gmra.mxu1 %v1932_v59  ;;  %v2503_v59 = vld [vmem:[%s3329_s12 + $0x190] sm:$0xff]  ;;  %s2971_s15 = sshll.u32 %s2443_s14, 5 }
 0x58a   : > { %2268 = vmatpush1.msra.mxu0 %v3997_v7  ;;  %2339 = vmatpush1.msra.mxu1 %v4000_v48  ;;  %v4778_v7 = vld [vmem:[#allocation13_spill] sm:$0xff]  ;;  %v4779_v48 = vld [vmem:[#allocation10_spill] sm:$0xff]  ;;  %s2447_s21 = scalar_lea.vmem [#allocation2], %s2971_s15 }
 0x58b   : > { %2269 = vmatprep.subr.mxu0 %v4005_v51  ;;  %2340 = vmatprep.subr.mxu1 %v4008_v61  ;;  %v4780_v51 = vld [vmem:[#allocation15_spill] sm:$0xff]  ;;  %v4781_v61 = vld [vmem:[#allocation12_spill] sm:$0xff] }
 0x58c   : > { %2270 = vmatpush1.msra.mxu0 %v4013_v4  ;;  %2341 = vmatpush1.msra.mxu1 %v4016_v9  ;;  %v4782_v4 = vld [vmem:[#allocation17_spill] sm:$0xff]  ;;  %v4783_v9 = vld [vmem:[#allocation14_spill] sm:$0xff] }
 0x58d   : > { %2271 = vmatprep.subr.mxu0 %v4021_v31  ;;  %2342 = vmatprep.subr.mxu1 %v4024_v2  ;;  %v4784_v31 = vld [vmem:[#allocation19_spill] sm:$0xff]  ;;  %v4785_v2 = vld [vmem:[#allocation16_spill] sm:$0xff] }
 0x58e   : > { %2272 = vmatpush1.msra.mxu0 %v4029_v18  ;;  %2343 = vmatpush1.msra.mxu1 %v4032_v41  ;;  %v4786_v18 = vld [vmem:[#allocation21_spill] sm:$0xff]  ;;  %v4787_v41 = vld [vmem:[#allocation18_spill] sm:$0xff] }
 0x58f   : > { %2273 = vmatprep.subr.mxu0 %v4037_v13  ;;  %2344 = vmatprep.subr.mxu1 %v4040_v0  ;;  %v4788_v13 = vld [vmem:[#allocation23_spill] sm:$0xff]  ;;  %v4789_v0 = vld [vmem:[#allocation20_spill] sm:$0xff] }
 0x590   : > { %2274 = vmatpush1.msra.mxu0 %v4045_v21  ;;  %2345 = vmatpush1.msra.mxu1 %v4048_v62  ;;  %v4790_v21 = vld [vmem:[#allocation24_spill] sm:$0xff]  ;;  %v4791_v62 = vld [vmem:[#allocation22_spill] sm:$0xff] }
 0x591   : > { %2275 = vmatprep.subr.mxu0 %v4053_v5  ;;  %2346 = vmatprep.subr.mxu1 %v4056_v6  ;;  %v4792_v5 = vld [vmem:[#allocation25_spill] sm:$0xff]  ;;  %v4793_v6 = vld [vmem:[#allocation26_spill] sm:$0xff] }
 0x592   : > { %2276 = vmatpush1.msra.mxu0 %v4061_v8  ;;  %2347 = vmatpush1.msra.mxu1 %v4064_v10  ;;  %v4794_v8 = vmov 0.0   ;;  %v4795_v10 = vld [vmem:[#allocation27_spill] sm:$0xff] }
 0x593   : > { %2277 = vmatprep.subr.mxu0 %v4069_v11  ;;  %2348 = vmatprep.subr.mxu1 %v4072_v12  ;;  %v1946_v11 = vld [vmem:[%s1945_s7] sm:$0xff] }
 0x594   : > { %2278 = vmatpush1.msra.mxu0 %v4077_v14  ;;  %2349 = vmatpush1.msra.mxu1 %v4080_v15  ;;  %v1947_v15 = vld [vmem:[%s1945_s7 + $0x8] sm:$0xff] }
 0x595   : > { %2279 = vmatprep.subr.mxu0 %v4085_v16  ;;  %2350 = vmatprep.subr.mxu1 %v4088_v17 }
 0x596   : > { %2280 = vmatpush1.msra.mxu0 %v4093_v19  ;;  %2351 = vmatpush1.msra.mxu1 %v4096_v20 }
 0x597   : > { %2281 = vmatprep.subr.mxu0 %v4099_v22  ;;  %2352 = vmatprep.subr.mxu1 %v4104_v23  ;;  %v1948_v23 = vld [vmem:[%s1945_s7 + $0x10] sm:$0xff] }
 0x598   : > { %2282 = vmatpush1.msra.mxu0 %v4107_v24  ;;  %2353 = vmatpush1.msra.mxu1 %v4110_v25 }
 0x599   : > { %2283 = vmatprep.subr.mxu0 %v4115_v27  ;;  %2354 = vmatprep.subr.mxu1 %v4118_v29  ;;  %v1949_v29 = vld [vmem:[%s1945_s7 + $0x18] sm:$0xff] }
 0x59a   : > { %2284 = vmatpush1.msra.mxu0 %v4121_v30  ;;  %2355 = vmatpush1.msra.mxu1 %v4126_v32 }
 0x59b   : > { %2285 = vmatprep.subr.mxu0 %v4129_v33  ;;  %2356 = vmatprep.subr.mxu1 %v4132_v34 }
 0x59c   : > { %2286 = vmatpush1.msra.mxu0 %v4137_v35  ;;  %2357 = vmatpush1.msra.mxu1 %v4140_v36 }
 0x59d   : > { %2287 = vmatprep.subr.mxu0 %v4145_v37  ;;  %2358 = vmatprep.subr.mxu1 %v4148_v39 }
 0x59e   : > { %2288 = vmatpush1.msra.mxu0 %v4153_v40  ;;  %2359 = vmatpush1.msra.mxu1 %v4156_v42 }
 0x59f   : > { %2289 = vmatprep.subr.mxu0 %v4161_v43  ;;  %2360 = vmatprep.subr.mxu1 %v4164_v44 }
 0x5a0   : > { %2290 = vmatpush1.msra.mxu0 %v4169_v45  ;;  %2361 = vmatpush1.msra.mxu1 %v4778_v7  ;;  %v2498_v7 = vld [vmem:[%s3329_s12 + $0x168] sm:$0xff] }
 0x5a1   : > { %2291 = vmatprep.subr.mxu0 %v4779_v48  ;;  %2362 = vmatprep.subr.mxu1 %v4780_v51  ;;  %v2500_v48 = vld [vmem:[%s3329_s12 + $0x178] sm:$0xff]  ;;  %v2497_v51 = vld [vmem:[%s3329_s12 + $0x160] sm:$0xff] }
 0x5a2   : > { %2292 = vmatpush1.msra.mxu0 %v4781_v61  ;;  %2363 = vmatpush1.msra.mxu1 %v4782_v4  ;;  %v2499_v61 = vld [vmem:[%s3329_s12 + $0x170] sm:$0xff]  ;;  %v2494_v4 = vld [vmem:[%s3329_s12 + $0x148] sm:$0xff] }
 0x5a3   : > { %2293 = vmatprep.subr.mxu0 %v4783_v9  ;;  %2364 = vmatprep.subr.mxu1 %v4784_v31  ;;  %v2496_v9 = vld [vmem:[%s3329_s12 + $0x158] sm:$0xff]  ;;  %v2493_v31 = vld [vmem:[%s3329_s12 + $0x140] sm:$0xff] }
 0x5a4   : > { %2294 = vmatpush1.msra.mxu0 %v4785_v2  ;;  %2365 = vmatpush1.msra.mxu1 %v4786_v18  ;;  %v2495_v2 = vld [vmem:[%s3329_s12 + $0x150] sm:$0xff]  ;;  %v2490_v18 = vld [vmem:[%s3329_s12 + $0x128] sm:$0xff] }
 0x5a5   : > { %2295 = vmatprep.subr.mxu0 %v4787_v41  ;;  %2366 = vmatprep.subr.mxu1 %v4788_v13  ;;  %v2492_v41 = vld [vmem:[%s3329_s12 + $0x138] sm:$0xff]  ;;  %v2489_v13 = vld [vmem:[%s3329_s12 + $0x120] sm:$0xff] }
 0x5a6   : > { %2296 = vmatpush1.msra.mxu0 %v4789_v0  ;;  %2367 = vmatpush1.msra.mxu1 %v4790_v21  ;;  %v2491_v0 = vld [vmem:[%s3329_s12 + $0x130] sm:$0xff]  ;;  %v2486_v21 = vld [vmem:[%s3329_s12 + $0x108] sm:$0xff] }
 0x5a7   : > { %2297 = vmatprep.subr.mxu0 %v4791_v62  ;;  %2368 = vmatprep.subr.mxu1 %v4792_v5  ;;  %v2488_v62 = vld [vmem:[%s3329_s12 + $0x118] sm:$0xff]  ;;  %v2485_v5 = vld [vmem:[%s3329_s12 + $0x100] sm:$0xff] }
 0x5a8   : > { %2298 = vmatpush1.msra.mxu0 %v4793_v6  ;;  %2331 = vmatprep.mubr.f32.mxu0 %v4794_v8  ;;  %v2487_v6 = vld [vmem:[%s3329_s12 + $0x110] sm:$0xff] }
 0x5a9   : > { %2369 = vmatpush1.msra.mxu1 %v4795_v10  ;;  %2402 = vmatprep.mubr.f32.mxu1 %v4794_v8  ;;  %v2484_v10 = vld [vmem:[%s3329_s12 + $0xf8] sm:$0xff] }
 0x5aa   : > { %2517 = vmatprep.subr.mxu0 %v2514_v47  ;;  %2588 = vmatprep.subr.mxu1 %v2516_v46  ;;  %v2455_v47 = vld [vmem:[%s3329_s12 + $0x10] sm:$0xff]  ;;  %v2198_v46 = vld [vmem:[%s2197_s13] sm:$0xff] }
 0x649   : > { %v2081_v12 = vpop.f32.mrf.mxu0  ;;  %v2152_v22 = vpop.f32.mrf.mxu1 }
 0x64a   : > { %v2157_v14 = vadd.f32 %v2081_v12, %v1946_v11  ;;  %v2159_v24 = vadd.f32 %v2152_v22, %v1948_v23  ;;  %v2481_v11 = vld [vmem:[%s3329_s12 + $0xe0] sm:$0xff]  ;;  %v2483_v12 = vld [vmem:[%s3329_s12 + $0xf0] sm:$0xff] }
 0x64b   : > { %v2083_v16 = vpop.f32.mrf.mxu0  ;;  %v2154_v25 = vpop.f32.mrf.mxu1  ;;  %v2473_v22 = vld [vmem:[%s3329_s12 + $0xa0] sm:$0xff]  ;;  %v2475_v23 = vld [vmem:[%s3329_s12 + $0xb0] sm:$0xff] }
 0x64c   : > { %v2944_v17 = vmul.f32 -1.442695, %v2157_v14  ;;  %v2158_v19 = vadd.f32 %v2083_v16, %v1947_v15  ;;  %v2946_v27 = vmul.f32 -1.442695, %v2159_v24  ;;  %v2160_v32 = vadd.f32 %v2154_v25, %v1949_v29  ;;  %v2478_v14 = vld [vmem:[%s3329_s12 + $0xc8] sm:$0xff]  ;;  %v2480_v15 = vld [vmem:[%s3329_s12 + $0xd8] sm:$0xff] }
 0x64d   : > { %v2477_v16 = vld [vmem:[%s3329_s12 + $0xc0] sm:$0xff]  ;;  %v2470_v24 = vld [vmem:[%s3329_s12 + $0x88] sm:$0xff]  ;;  %v2472_v25 = vld [vmem:[%s3329_s12 + $0x98] sm:$0xff] }
 0x64e   : > { %3094 = vpow2.f32 %v2944_v17  ;;  %v2945_v20 = vmul.f32 -1.442695, %v2158_v19  ;;  %v2479_v17 = vld [vmem:[%s3329_s12 + $0xd0] sm:$0xff]  ;;  %v2474_v19 = vld [vmem:[%s3329_s12 + $0xa8] sm:$0xff] }
 0x64f   : > { %v2471_v29 = vld [vmem:[%s3329_s12 + $0x90] sm:$0xff] }
 0x650   : > { %3096 = vpow2.f32 %v2945_v20  ;;  %v2476_v20 = vld [vmem:[%s3329_s12 + $0xb8] sm:$0xff] }
 0x651   : > { %3098 = vpow2.f32 %v2946_v27  ;;  %v2469_v27 = vld [vmem:[%s3329_s12 + $0x80] sm:$0xff] }
 0x65b   : > { %v3095_v30 = vpop.eup %3094 }
 0x65c   : > { %v2170_v33 = vadd.f32 1.0, %v3095_v30  ;;  %v2466_v30 = vld [vmem:[%s3329_s12 + $0x68] sm:$0xff] }
 0x65d   : > { %v3097_v34 = vpop.eup %3096 }
 0x65e   : > { %3100 = vrcp.f32 %v2170_v33  ;;  %v2171_v35 = vadd.f32 1.0, %v3097_v34  ;;  %v3099_v36 = vpop.eup %3098  ;;  %v2465_v33 = vld [vmem:[%s3329_s12 + $0x60] sm:$0xff]  ;;  %v2467_v34 = vld [vmem:[%s3329_s12 + $0x70] sm:$0xff] }
 0x65f   : > { %3102 = vtanh.f32 %v2160_v32  ;;  %v2172_v42 = vadd.f32 1.0, %v3099_v36  ;;  %v2468_v32 = vld [vmem:[%s3329_s12 + $0x78] sm:$0xff] }
 0x660   : > { %3104 = vrcp.f32 %v2171_v35  ;;  %v2462_v35 = vld [vmem:[%s3329_s12 + $0x48] sm:$0xff]  ;;  %v2464_v36 = vld [vmem:[%s3329_s12 + $0x58] sm:$0xff] }
 0x661   : > { %3106 = vrcp.f32 %v2172_v42  ;;  %v2460_v42 = vld [vmem:[%s3329_s12 + $0x38] sm:$0xff] }
 0x66b   : > { %v3101_v37 = vpop.eup %3100 }
 0x66c   : > { %v3103_v39 = vpop.eup %3102 }
 0x66d   : > { %v3105_v40 = vpop.eup %3104  ;;  %v2182_v44 = vmul.f32 %v3103_v39, %v3101_v37  ;;  %v2461_v37 = vld [vmem:[%s3329_s12 + $0x40] sm:$0xff]  ;;  %v2463_v39 = vld [vmem:[%s3329_s12 + $0x50] sm:$0xff] }
 0x66e   : > { %v2181_v43 = vmul.f32 %v3105_v40, %v4414_v57  ;;  %v3107_v54 = vpop.eup %3106  ;;  %v2502_v57 = vld [vmem:[%s3329_s12 + $0x188] sm:$0xff] }
 0x66f   : > { %v2458_v40 = vld [vmem:[%s3329_s12 + $0x28] sm:$0xff] }
 0x670   : > { %v4492_v45 = vadd.f32 %v2182_v44, %v2181_v43  ;;  %v2457_v43 = vld [vmem:[%s3329_s12 + $0x20] sm:$0xff]  ;;  %v2459_v44 = vld [vmem:[%s3329_s12 + $0x30] sm:$0xff] }
 0x672   : > { %3108 = vtanh.f32 %v4492_v45 }
 0x67f   : > { %v3109_v55 = vpop.eup %3108 }
 0x680   : > { %v2185_v3 = vmul.f32 %v3109_v55, %v3107_v54  ;;  %v2454_v54 = vld [vmem:[%s3329_s12 + $0x8] sm:$0xff]  ;;  %v2456_v55 = vld [vmem:[%s3329_s12 + $0x18] sm:$0xff] }
 0x682   : > { %2189 = vst [vmem:[%s2188_s11] sm:$0xff] %v2185_v3  ;;  %2332 = vmatmul.mubr.f32.vlgmr.msra.gmra.mxu0 %v2185_v3  ;;  %2403 = vmatmul.mubr.f32.vlgmr.msra.gmra.mxu1 %v2185_v3  ;;  %v2453_v3 = vld [vmem:[%s3329_s12] sm:$0xff] }
 0x683   : > { %2581 = vmatprep.mubr.f32.mxu0 %v4794_v8  ;;  %2652 = vmatprep.mubr.f32.mxu1 %v4794_v8  ;;  %v2482_v8 = vld [vmem:[%s3329_s12 + $0xe8] sm:$0xff]  ;;  %s2440_s12 = scalar_lea.vmem %s3900_s24, %s2947_s9 [#allocation7] }
 0x684   : > { %2518 = vmatpush1.msra.mxu0 %v2513_v60  ;;  %2589 = vmatpush1.msra.mxu1 %v2515_v26 }
 0x685   : > { %2519 = vmatprep.subr.mxu0 %v2510_v28  ;;  %2590 = vmatprep.subr.mxu1 %v2512_v50  ;;  %v2199_v28 = vld [vmem:[%s2197_s13 + $0x8] sm:$0xff] }
 0x686   : > { %2520 = vmatpush1.msra.mxu0 %v2509_v38  ;;  %2591 = vmatpush1.msra.mxu1 %v2511_v53 }
 0x687   : > { %2521 = vmatprep.subr.mxu0 %v2506_v49  ;;  %2592 = vmatprep.subr.mxu1 %v2508_v63 }
 0x688   : > { %2522 = vmatpush1.msra.mxu0 %v2505_v58  ;;  %2593 = vmatpush1.msra.mxu1 %v2507_v56  ;;  %v2200_v58 = vld [vmem:[%s2197_s13 + $0x10] sm:$0xff] }
 0x689   : > { %2523 = vmatprep.subr.mxu0 %v2502_v57  ;;  %2594 = vmatprep.subr.mxu1 %v2504_v1 }
 0x68a   : > { %2524 = vmatpush1.msra.mxu0 %v2501_v52  ;;  %2595 = vmatpush1.msra.mxu1 %v2503_v59  ;;  %v2201_v52 = vld [vmem:[%s2197_s13 + $0x18] sm:$0xff] }
 0x68b   : > { %2525 = vmatprep.subr.mxu0 %v2498_v7  ;;  %2596 = vmatprep.subr.mxu1 %v2500_v48 }
 0x68c   : > { %2526 = vmatpush1.msra.mxu0 %v2497_v51  ;;  %2597 = vmatpush1.msra.mxu1 %v2499_v61 }
 0x68d   : > { %2527 = vmatprep.subr.mxu0 %v2494_v4  ;;  %2598 = vmatprep.subr.mxu1 %v2496_v9 }
 0x68e   : > { %2528 = vmatpush1.msra.mxu0 %v2493_v31  ;;  %2599 = vmatpush1.msra.mxu1 %v2495_v2 }
 0x68f   : > { %2529 = vmatprep.subr.mxu0 %v2490_v18  ;;  %2600 = vmatprep.subr.mxu1 %v2492_v41 }
 0x690   : > { %2530 = vmatpush1.msra.mxu0 %v2489_v13  ;;  %2601 = vmatpush1.msra.mxu1 %v2491_v0 }
 0x691   : > { %2531 = vmatprep.subr.mxu0 %v2486_v21  ;;  %2602 = vmatprep.subr.mxu1 %v2488_v62 }
 0x692   : > { %2532 = vmatpush1.msra.mxu0 %v2485_v5  ;;  %2603 = vmatpush1.msra.mxu1 %v2487_v6  ;;  %v2448_v6 = vld [vmem:[%s2447_s21] sm:$0xff] }
 0x693   : > { %2533 = vmatprep.subr.mxu0 %v2482_v8  ;;  %2604 = vmatprep.subr.mxu1 %v2484_v10  ;;  %v2449_v10 = vld [vmem:[%s2447_s21 + $0x8] sm:$0xff] }
 0x694   : > { %2534 = vmatpush1.msra.mxu0 %v2481_v11  ;;  %2605 = vmatpush1.msra.mxu1 %v2483_v12 }
 0x695   : > { %2535 = vmatprep.subr.mxu0 %v2478_v14  ;;  %2606 = vmatprep.subr.mxu1 %v2480_v15 }
 0x696   : > { %2536 = vmatpush1.msra.mxu0 %v2477_v16  ;;  %2607 = vmatpush1.msra.mxu1 %v2479_v17  ;;  %v2450_v17 = vld [vmem:[%s2447_s21 + $0x10] sm:$0xff] }
 0x697   : > { %2537 = vmatprep.subr.mxu0 %v2474_v19  ;;  %2608 = vmatprep.subr.mxu1 %v2476_v20 }
 0x698   : > { %2538 = vmatpush1.msra.mxu0 %v2473_v22  ;;  %2609 = vmatpush1.msra.mxu1 %v2475_v23  ;;  %v2451_v23 = vld [vmem:[%s2447_s21 + $0x18] sm:$0xff] }
 0x699   : > { %2539 = vmatprep.subr.mxu0 %v2470_v24  ;;  %2610 = vmatprep.subr.mxu1 %v2472_v25 }
 0x69a   : > { %2540 = vmatpush1.msra.mxu0 %v2469_v27  ;;  %2611 = vmatpush1.msra.mxu1 %v2471_v29 }
 0x69b   : > { %2541 = vmatprep.subr.mxu0 %v2466_v30  ;;  %2612 = vmatprep.subr.mxu1 %v2468_v32 }
 0x69c   : > { %2542 = vmatpush1.msra.mxu0 %v2465_v33  ;;  %2613 = vmatpush1.msra.mxu1 %v2467_v34 }
 0x69d   : > { %2543 = vmatprep.subr.mxu0 %v2462_v35  ;;  %2614 = vmatprep.subr.mxu1 %v2464_v36 }
 0x69e   : > { %2544 = vmatpush1.msra.mxu0 %v2461_v37  ;;  %2615 = vmatpush1.msra.mxu1 %v2463_v39 }
 0x69f   : > { %2545 = vmatprep.subr.mxu0 %v2458_v40  ;;  %2616 = vmatprep.subr.mxu1 %v2460_v42 }
 0x6a0   : > { %2546 = vmatpush1.msra.mxu0 %v2457_v43  ;;  %2617 = vmatpush1.msra.mxu1 %v2459_v44 }
 0x6a1   : > { %2547 = vmatprep.subr.mxu0 %v2454_v54  ;;  %2618 = vmatprep.subr.mxu1 %v2456_v55 }
 0x6a2   : > { %2548 = vmatpush1.msra.mxu0 %v2453_v3  ;;  %2619 = vmatpush1.msra.mxu1 %v2455_v47 }
 0x742   : > { %v2333_v60 = vpop.f32.mrf.mxu0  ;;  %v2404_v63 = vpop.f32.mrf.mxu1 }
 0x743   : > { %v2409_v26 = vadd.f32 %v2333_v60, %v2198_v46  ;;  %v2411_v56 = vadd.f32 %v2404_v63, %v2200_v58 }
 0x744   : > { %v2335_v50 = vpop.f32.mrf.mxu0  ;;  %v2406_v57 = vpop.f32.mrf.mxu1 }
 0x745   : > { %v2950_v38 = vmul.f32 -1.442695, %v2409_v26  ;;  %v2410_v53 = vadd.f32 %v2335_v50, %v2199_v28  ;;  %v2952_v1 = vmul.f32 -1.442695, %v2411_v56  ;;  %v2412_v7 = vadd.f32 %v2406_v57, %v2201_v52 }
 0x747   : > { %3110 = vpow2.f32 %v2950_v38  ;;  %v2951_v49 = vmul.f32 -1.442695, %v2410_v53 }
 0x749   : > { %3112 = vpow2.f32 %v2951_v49 }
 0x74a   : > { %3114 = vpow2.f32 %v2952_v1 }
 0x754   : > { %v3111_v59 = vpop.eup %3110 }
 0x755   : > { %v2422_v48 = vadd.f32 1.0, %v3111_v59 }
 0x756   : > { %v3113_v51 = vpop.eup %3112 }
 0x757   : > { %3116 = vrcp.f32 %v2422_v48  ;;  %v2423_v61 = vadd.f32 1.0, %v3113_v51  ;;  %v3115_v4 = vpop.eup %3114 }
 0x758   : > { %3118 = vtanh.f32 %v2412_v7  ;;  %v2424_v18 = vadd.f32 1.0, %v3115_v4 }
 0x759   : > { %3120 = vrcp.f32 %v2423_v61 }
 0x75a   : > { %3122 = vrcp.f32 %v2424_v18 }
 0x764   : > { %v3117_v9 = vpop.eup %3116 }
 0x765   : > { %v3119_v31 = vpop.eup %3118 }
 0x766   : > { %v3121_v2 = vpop.eup %3120  ;;  %v2434_v13 = vmul.f32 %v3119_v31, %v3117_v9 }
 0x767   : > { %v2433_v41 = vmul.f32 %v3121_v2, %v4492_v45  ;;  %v3123_v21 = vpop.eup %3122 }
 0x769   : > { %v2435_v0 = vadd.f32 %v2434_v13, %v2433_v41 }
 0x76b   : > { %3124 = vtanh.f32 %v2435_v0 }
 0x778   : > { %v3125_v62 = vpop.eup %3124 }
 0x779   : > { %v2437_v5 = vmul.f32 %v3125_v62, %v3123_v21 }
 0x77b   : > { %2441 = vst [vmem:[%s2440_s12] sm:$0xff] %v2437_v5  ;;  %2582 = vmatmul.mubr.f32.vlgmr.msra.gmra.mxu0 %v2437_v5  ;;  %2653 = vmatmul.mubr.f32.vlgmr.msra.gmra.mxu1 %v2437_v5 }
 0x83b   : > { %v2583_v8 = vpop.f32.mrf.mxu0  ;;  %v2654_v16 = vpop.f32.mrf.mxu1 }
 0x83c   : > { %v2659_v45 = vadd.f32 %v2583_v8, %v2448_v6  ;;  %v2661_v19 = vadd.f32 %v2654_v16, %v2450_v17 }
 0x83d   : > { %v2585_v11 = vpop.f32.mrf.mxu0  ;;  %v2656_v20 = vpop.f32.mrf.mxu1 }
 0x83e   : > { %v2955_v12 = vmul.f32 -1.442695, %v2659_v45  ;;  %v2660_v14 = vadd.f32 %v2585_v11, %v2449_v10  ;;  %v2957_v22 = vmul.f32 -1.442695, %v2661_v19  ;;  %v2662_v25 = vadd.f32 %v2656_v20, %v2451_v23 }
 0x840   : > { %3126 = vpow2.f32 %v2955_v12  ;;  %v2956_v15 = vmul.f32 -1.442695, %v2660_v14 }
 0x842   : > { %3128 = vpow2.f32 %v2956_v15 }
 0x843   : > { %3130 = vpow2.f32 %v2957_v22 }
 0x84d   : > { %v3127_v24 = vpop.eup %3126 }
 0x84e   : > { %v2672_v27 = vadd.f32 1.0, %v3127_v24 }
 0x84f   : > { %v3129_v29 = vpop.eup %3128 }
 0x850   : > { %3132 = vrcp.f32 %v2672_v27  ;;  %v2673_v30 = vadd.f32 1.0, %v3129_v29  ;;  %v3131_v32 = vpop.eup %3130 }
 0x851   : > { %3134 = vtanh.f32 %v2662_v25  ;;  %v2674_v36 = vadd.f32 1.0, %v3131_v32 }
 0x852   : > { %3136 = vrcp.f32 %v2673_v30 }
 0x853   : > { %3138 = vrcp.f32 %v2674_v36 }
 0x85d   : > { %v3133_v33 = vpop.eup %3132 }
 0x85e   : > { %v3135_v34 = vpop.eup %3134 }
 0x85f   : > { %v3137_v35 = vpop.eup %3136  ;;  %v2684_v39 = vmul.f32 %v3135_v34, %v3133_v33 }
 0x860   : > { %v2683_v37 = vmul.f32 %v3137_v35, %v2435_v0  ;;  %v3139_v42 = vpop.eup %3138 }
 0x862   : > { %v2685_v40 = vadd.f32 %v2684_v39, %v2683_v37 }
 0x864   : > { %3140 = vtanh.f32 %v2685_v40 }
 0x870   : > { %2698 = sbr.rel (!%p4796_p10) target bundleno = 2177 (0x881), region = 44 }
 0x871   : > { %v3141_v43 = vpop.eup %3140 }
 0x872   : > { %v2687_v44 = vmul.f32 %v3141_v43, %v3139_v42 }
 0x874   : > { %2691 = vst [vmem:[%s2690_s22] sm:$0xff] %v2687_v44 }
 0x87b   : > { %v2743_v54 = vld [vmem:[%s3900_s24] sm:$0xff]  ;;  %v2745_v55 = vld [vmem:[%s3900_s24 + $0x8] sm:$0xff]  ;;  %v2747_v3 = vld [vmem:[%s3900_s24 + $0x10] sm:$0xff] }
 0x87c   : > { %v2749_v47 = vld [vmem:[%s3900_s24 + $0x18] sm:$0xff]  ;;  %v2751_v46 = vld [vmem:[%s3900_s24 + $0x20] sm:$0xff]  ;;  %v2753_v60 = vld [vmem:[%s3900_s24 + $0x28] sm:$0xff]  ;;  %2744 = vst [vmem:[%s2700_s29] sm:$0xff] %v2743_v54 }
 0x87d   : > { %2746 = vst [vmem:[%s2700_s29 + $0x10] sm:$0xff] %v2745_v55  ;;  %2748 = vst [vmem:[%s2700_s29 + $0x20] sm:$0xff] %v2747_v3  ;;  %v2755_v26 = vld [vmem:[%s3900_s24 + $0x30] sm:$0xff]  ;;  %v2757_v28 = vld [vmem:[%s3900_s24 + $0x38] sm:$0xff] }
 0x87e   : > { %2750 = vst [vmem:[%s2700_s29 + $0x30] sm:$0xff] %v2749_v47  ;;  %2752 = vst [vmem:[%s2700_s29 + $0x40] sm:$0xff] %v2751_v46 }
 0x87f   : > { %2754 = vst [vmem:[%s2700_s29 + $0x50] sm:$0xff] %v2753_v60  ;;  %2756 = vst [vmem:[%s2700_s29 + $0x60] sm:$0xff] %v2755_v26 }
 0x880   : > { %2758 = vst [vmem:[%s2700_s29 + $0x70] sm:$0xff] %v2757_v28 }
 0x881 PF: > { %p14_p11 = scmp.ge.s32.totalorder %s3257_s20, 4   ;;  %s4797_s15 = smov %s3196_s16 }
 0x882   : > { %s4798_s16 = smov %s3200_s17  ;;  %s4799_s17 = smov %s3267_s23 }
 0x883   : > { %s4800_s18 = smov %s3257_s20  ;;  %16 = sbr.rel (!%p14_p11) target bundleno = 3 (0x3), region = 136 }
 0x888   :  { %2774 = vsyncpa [#allocation6], 1 }
 0x889   :  { %2776 = vsyncpa [#allocation6 + $0x1], 1 }

// kernel: tasnet_forward.9
= control target key start
LH: loop header
LB: loop body
LE: loop exit
PB: predicated region body
PF: predicated region fallthrough
CT: control target
= control target key end

     0   :  { %s3142_s15 = smov 0   ;;  %s3144_s16 = smov 0   ;;  %s4447_s0 = inlined_call_operand.vmem [shape: f32[64,256], index: 0, kind: input, shape index: {}]   ;;  %s4448_s1 = inlined_call_operand.vmem [shape: f32[2,256,512], index: 1, kind: input, shape index: {}]   ;;  %s4449_s2 = inlined_call_operand.vmem [shape: f32[2,128,512], index: 2, kind: input, shape index: {}]   ;;  %s4450_s3 = inlined_call_operand.vmem [shape: f32[2,1,512], index: 3, kind: input, shape index: {}]   ;;  %s4451_s4 = inlined_call_operand.vmem [shape: f32[64,256], index: 4, kind: output, shape index: {}]  }
   0x1   :  { %s3146_s17 = smov 0  }
   0x2 LB: > { %s3155_s18 = sadd.s32 4294967295, %s3114_s17   ;;  %s3157_s19 = sadd.s32 1, %s3114_s17   ;;  %s3114_s17 = sphi %s3146_s17, %s4631_s17   ;;  %s3110_s16 = sphi %s3144_s16, %s4630_s16   ;;  %s3106_s15 = sphi %s3142_s15, %s4629_s15  }
   0x3   : > { %s117_s20 = ssub.s32 %s3114_s17, %s3157_s19  ;;  %s120_s21 = sadd.s32 1, %s3110_s16 }
   0x4   : > { %p118_p0 = scmp.eq.s32.totalorder %s117_s20, 0  ;;  %p130_p1 = scmp.ne.s32.totalorder %s3110_s16, %s3106_s15 }
   0x5   : > { %p131_p2 = scmp.eq.s32.totalorder %s3155_s18, 1  ;;  %p2868_p3 = scmp.ge.s32.totalorder %s3114_s17, 1 }
   0x6   : > { %s3165_s22 = scalar_select %p118_p0, %s3110_s16, %s120_s21  }
   0x7   : > { %p3167_p4 = por %p131_p2, %p130_p1  ;;  %p181_p5 = scmp.lt.s32.totalorder %s3114_s17, 3 }
   0x9   : > { %p182_p6 = pnand %p2868_p3, %p181_p5 }
   0xb   : > { %185 = sbr.rel (%p182_p6) target bundleno = 2140 (0x85c), region = 36 }
  0x10   : > { %p215_p7 = scmp.lt.s32.totalorder %s3155_s18, 1  ;;  %v230_v0 = vld [vmem:[%s4447_s0 + $0x8] sm:$0xff]  ;;  %s212_s10 = sand.u32 1, %s3106_s15  }
  0x11   : > { %459 = vmatprep.mubr.f32.mxu0 %v230_v0  ;;  %572 = vmatprep.mubr.f32.mxu1 %v230_v0  ;;  %s2869_s11 = sshll.u32 %s212_s10, 6  ;;  %s906_s15 = smul.u32 6, %s3155_s18 }
  0x12   : > { %s3176_s26 = scalar_select %p215_p7, %s3155_s18, 1 }
  0x13   : > { %s3742_s12 = scalar_lea.vmem [#allocation5], %s2869_s11  ;;  %s3813_s14 = ssub.s32 1, %s3155_s18 }
  0x14   : > { %s2929_s27 = sshll.u32 %s3176_s26, 10  ;;  %s2930_s5 = sshll.u32 %s3176_s26, 9 }
  0x15   : > { %s3182_s30 = scalar_lea.vmem %s4448_s1, %s2929_s27  ;;  %s3314_s8 = scalar_lea.vmem %s4449_s2, %s2930_s5 }
  0x16   : > { %v306_v1 = vld [vmem:[%s3182_s30 + $0x1e8] sm:$0xff]  ;;  %v308_v2 = vld [vmem:[%s3182_s30 + $0x1f8] sm:$0xff]  ;;  %v305_v3 = vld [vmem:[%s3182_s30 + $0x1e0] sm:$0xff]  ;;  %s2874_s28 = sshll.u32 %s3176_s26, 2  ;;  %s655_s26 = smul.u32 56, %s3155_s18 }
  0x17   : > { %395 = vmatprep.subr.mxu0 %v306_v1  ;;  %508 = vmatprep.subr.mxu1 %v308_v2  ;;  %v307_v4 = vld [vmem:[%s3182_s30 + $0x1f0] sm:$0xff]  ;;  %v302_v5 = vld [vmem:[%s3182_s30 + $0x1c8] sm:$0xff]  ;;  %v304_v6 = vld [vmem:[%s3182_s30 + $0x1d8] sm:$0xff]  ;;  %s228_s5 = scalar_lea.vmem %s4450_s3, %s2874_s28  ;;  %s3816_s17 = sadd.s32 %s906_s15, %s3813_s14 }
  0x18   : > { %396 = vmatpush1.msra.mxu0 %v305_v3  ;;  %509 = vmatpush1.msra.mxu1 %v307_v4  ;;  %v301_v7 = vld [vmem:[%s3182_s30 + $0x1c0] sm:$0xff]  ;;  %v303_v8 = vld [vmem:[%s3182_s30 + $0x1d0] sm:$0xff]  ;;  %v298_v9 = vld [vmem:[%s3182_s30 + $0x1a8] sm:$0xff]  ;;  %s656_s6 = sshra.s32 %s655_s26, 3  ;;  %s903_s13 = scalar_lea.vmem %s3742_s12, %s655_s26 [#allocation5] }
  0x19   : > { %397 = vmatprep.subr.mxu0 %v302_v5  ;;  %510 = vmatprep.subr.mxu1 %v304_v6  ;;  %v300_v10 = vld [vmem:[%s3182_s30 + $0x1b8] sm:$0xff]  ;;  %v297_v11 = vld [vmem:[%s3182_s30 + $0x1a0] sm:$0xff]  ;;  %v299_v12 = vld [vmem:[%s3182_s30 + $0x1b0] sm:$0xff]  ;;  %s2931_s7 = sshll.u32 %s656_s6, 5  ;;  %s2880_s20 = sshll.u32 %s3816_s17, 3 }
  0x1a   : > { %398 = vmatpush1.msra.mxu0 %v301_v7  ;;  %511 = vmatpush1.msra.mxu1 %v303_v8  ;;  %v294_v13 = vld [vmem:[%s3182_s30 + $0x188] sm:$0xff]  ;;  %v296_v14 = vld [vmem:[%s3182_s30 + $0x198] sm:$0xff]  ;;  %v293_v15 = vld [vmem:[%s3182_s30 + $0x180] sm:$0xff]  ;;  %s660_s9 = scalar_lea.vmem [#allocation2], %s2931_s7  ;;  %s909_s21 = sshra.s32 %s2880_s20, 3 }
  0x1b   : > { %399 = vmatprep.subr.mxu0 %v298_v9  ;;  %512 = vmatprep.subr.mxu1 %v300_v10  ;;  %v295_v16 = vld [vmem:[%s3182_s30 + $0x190] sm:$0xff]  ;;  %v290_v17 = vld [vmem:[%s3182_s30 + $0x168] sm:$0xff]  ;;  %v292_v18 = vld [vmem:[%s3182_s30 + $0x178] sm:$0xff]  ;;  %s2932_s24 = sshll.u32 %s909_s21, 5  ;;  %s1156_s27 = scalar_lea.vmem %s3742_s12, %s2880_s20 [#allocation5] }
  0x1c   : > { %400 = vmatpush1.msra.mxu0 %v297_v11  ;;  %513 = vmatpush1.msra.mxu1 %v299_v12  ;;  %v289_v19 = vld [vmem:[%s3182_s30 + $0x160] sm:$0xff]  ;;  %v291_v20 = vld [vmem:[%s3182_s30 + $0x170] sm:$0xff]  ;;  %v286_v21 = vld [vmem:[%s3182_s30 + $0x148] sm:$0xff]  ;;  %s913_s25 = scalar_lea.vmem [#allocation2], %s2932_s24  ;;  %s1159_s28 = smul.u32 5, %s3155_s18 }
  0x1d   : > { %401 = vmatprep.subr.mxu0 %v294_v13  ;;  %514 = vmatprep.subr.mxu1 %v296_v14  ;;  %v288_v22 = vld [vmem:[%s3182_s30 + $0x158] sm:$0xff]  ;;  %v285_v23 = vld [vmem:[%s3182_s30 + $0x140] sm:$0xff]  ;;  %v287_v24 = vld [vmem:[%s3182_s30 + $0x150] sm:$0xff]  ;;  %s2886_s29 = sshll.u32 %s3813_s14, 1  ;;  %s1411_s10 = smul.u32 3, %s3813_s14 }
  0x1e   : > { %402 = vmatpush1.msra.mxu0 %v293_v15  ;;  %515 = vmatpush1.msra.mxu1 %v295_v16  ;;  %v282_v25 = vld [vmem:[%s3182_s30 + $0x128] sm:$0xff]  ;;  %v284_v26 = vld [vmem:[%s3182_s30 + $0x138] sm:$0xff]  ;;  %v281_v27 = vld [vmem:[%s3182_s30 + $0x120] sm:$0xff]  ;;  %s2893_s11 = sshll.u32 %s3155_s18, 2 }
  0x1f   : > { %403 = vmatprep.subr.mxu0 %v290_v17  ;;  %516 = vmatprep.subr.mxu1 %v292_v18  ;;  %v283_v28 = vld [vmem:[%s3182_s30 + $0x130] sm:$0xff]  ;;  %v278_v29 = vld [vmem:[%s3182_s30 + $0x108] sm:$0xff]  ;;  %v280_v30 = vld [vmem:[%s3182_s30 + $0x118] sm:$0xff] }
  0x20   : > { %404 = vmatpush1.msra.mxu0 %v289_v19  ;;  %517 = vmatpush1.msra.mxu1 %v291_v20  ;;  %v277_v31 = vld [vmem:[%s3182_s30 + $0x100] sm:$0xff]  ;;  %v279_v32 = vld [vmem:[%s3182_s30 + $0x110] sm:$0xff]  ;;  %v274_v33 = vld [vmem:[%s3182_s30 + $0xe8] sm:$0xff] }
  0x21   : > { %405 = vmatprep.subr.mxu0 %v286_v21  ;;  %518 = vmatprep.subr.mxu1 %v288_v22  ;;  %v276_v34 = vld [vmem:[%s3182_s30 + $0xf8] sm:$0xff]  ;;  %v273_v35 = vld [vmem:[%s3182_s30 + $0xe0] sm:$0xff]  ;;  %v275_v36 = vld [vmem:[%s3182_s30 + $0xf0] sm:$0xff] }
  0x22   : > { %406 = vmatpush1.msra.mxu0 %v285_v23  ;;  %519 = vmatpush1.msra.mxu1 %v287_v24  ;;  %v270_v37 = vld [vmem:[%s3182_s30 + $0xc8] sm:$0xff]  ;;  %v272_v38 = vld [vmem:[%s3182_s30 + $0xd8] sm:$0xff]  ;;  %v269_v39 = vld [vmem:[%s3182_s30 + $0xc0] sm:$0xff] }
  0x23   : > { %407 = vmatprep.subr.mxu0 %v282_v25  ;;  %520 = vmatprep.subr.mxu1 %v284_v26  ;;  %v271_v40 = vld [vmem:[%s3182_s30 + $0xd0] sm:$0xff]  ;;  %v266_v41 = vld [vmem:[%s3182_s30 + $0xa8] sm:$0xff]  ;;  %v268_v42 = vld [vmem:[%s3182_s30 + $0xb8] sm:$0xff] }
  0x24   : > { %408 = vmatpush1.msra.mxu0 %v281_v27  ;;  %521 = vmatpush1.msra.mxu1 %v283_v28  ;;  %v265_v43 = vld [vmem:[%s3182_s30 + $0xa0] sm:$0xff]  ;;  %v267_v44 = vld [vmem:[%s3182_s30 + $0xb0] sm:$0xff]  ;;  %v262_v45 = vld [vmem:[%s3182_s30 + $0x88] sm:$0xff] }
  0x25   : > { %409 = vmatprep.subr.mxu0 %v278_v29  ;;  %522 = vmatprep.subr.mxu1 %v280_v30  ;;  %v264_v46 = vld [vmem:[%s3182_s30 + $0x98] sm:$0xff]  ;;  %v261_v47 = vld [vmem:[%s3182_s30 + $0x80] sm:$0xff]  ;;  %v263_v48 = vld [vmem:[%s3182_s30 + $0x90] sm:$0xff] }
  0x26   : > { %410 = vmatpush1.msra.mxu0 %v277_v31  ;;  %523 = vmatpush1.msra.mxu1 %v279_v32  ;;  %v258_v49 = vld [vmem:[%s3182_s30 + $0x68] sm:$0xff]  ;;  %v260_v50 = vld [vmem:[%s3182_s30 + $0x78] sm:$0xff]  ;;  %v257_v51 = vld [vmem:[%s3182_s30 + $0x60] sm:$0xff] }
  0x27   : > { %411 = vmatprep.subr.mxu0 %v274_v33  ;;  %524 = vmatprep.subr.mxu1 %v276_v34  ;;  %v259_v52 = vld [vmem:[%s3182_s30 + $0x70] sm:$0xff]  ;;  %v254_v53 = vld [vmem:[%s3182_s30 + $0x48] sm:$0xff]  ;;  %v256_v54 = vld [vmem:[%s3182_s30 + $0x58] sm:$0xff] }
  0x28   : > { %412 = vmatpush1.msra.mxu0 %v273_v35  ;;  %525 = vmatpush1.msra.mxu1 %v275_v36  ;;  %v253_v55 = vld [vmem:[%s3182_s30 + $0x40] sm:$0xff]  ;;  %v255_v56 = vld [vmem:[%s3182_s30 + $0x50] sm:$0xff]  ;;  %v250_v57 = vld [vmem:[%s3182_s30 + $0x28] sm:$0xff] }
  0x29   : > { %413 = vmatprep.subr.mxu0 %v270_v37  ;;  %526 = vmatprep.subr.mxu1 %v272_v38  ;;  %v252_v58 = vld [vmem:[%s3182_s30 + $0x38] sm:$0xff]  ;;  %v249_v59 = vld [vmem:[%s3182_s30 + $0x20] sm:$0xff]  ;;  %v251_v60 = vld [vmem:[%s3182_s30 + $0x30] sm:$0xff] }
  0x2a   : > { %414 = vmatpush1.msra.mxu0 %v269_v39  ;;  %527 = vmatpush1.msra.mxu1 %v271_v40  ;;  %v246_v61 = vld [vmem:[%s3182_s30 + $0x8] sm:$0xff]  ;;  %v248_v62 = vld [vmem:[%s3182_s30 + $0x18] sm:$0xff]  ;;  %v245_v63 = vld [vmem:[%s3182_s30] sm:$0xff] }
  0x2b   : > { %415 = vmatprep.subr.mxu0 %v266_v41  ;;  %528 = vmatprep.subr.mxu1 %v268_v42  ;;  %v247_v0 = vld [vmem:[%s3182_s30 + $0x10] sm:$0xff]  ;;  %v370_v1 = vld [vmem:[%s3182_s30 + $0x3e8] sm:$0xff]  ;;  %v372_v2 = vld [vmem:[%s3182_s30 + $0x3f8] sm:$0xff] }
  0x2c   : > { %416 = vmatpush1.msra.mxu0 %v265_v43  ;;  %529 = vmatpush1.msra.mxu1 %v267_v44  ;;  %v369_v3 = vld [vmem:[%s3182_s30 + $0x3e0] sm:$0xff]  ;;  %v371_v4 = vld [vmem:[%s3182_s30 + $0x3f0] sm:$0xff]  ;;  %v366_v5 = vld [vmem:[%s3182_s30 + $0x3c8] sm:$0xff] }
  0x2d   : > { %417 = vmatprep.subr.mxu0 %v262_v45  ;;  %530 = vmatprep.subr.mxu1 %v264_v46  ;;  %v368_v6 = vld [vmem:[%s3182_s30 + $0x3d8] sm:$0xff]  ;;  %v365_v7 = vld [vmem:[%s3182_s30 + $0x3c0] sm:$0xff]  ;;  %v367_v8 = vld [vmem:[%s3182_s30 + $0x3d0] sm:$0xff] }
  0x2e   : > { %418 = vmatpush1.msra.mxu0 %v261_v47  ;;  %531 = vmatpush1.msra.mxu1 %v263_v48  ;;  %v362_v9 = vld [vmem:[%s3182_s30 + $0x3a8] sm:$0xff]  ;;  %v364_v10 = vld [vmem:[%s3182_s30 + $0x3b8] sm:$0xff]  ;;  %v361_v11 = vld [vmem:[%s3182_s30 + $0x3a0] sm:$0xff] }
  0x2f   : > { %419 = vmatprep.subr.mxu0 %v258_v49  ;;  %532 = vmatprep.subr.mxu1 %v260_v50  ;;  %v363_v12 = vld [vmem:[%s3182_s30 + $0x3b0] sm:$0xff]  ;;  %v358_v13 = vld [vmem:[%s3182_s30 + $0x388] sm:$0xff]  ;;  %v360_v14 = vld [vmem:[%s3182_s30 + $0x398] sm:$0xff] }
  0x30   : > { %420 = vmatpush1.msra.mxu0 %v257_v51  ;;  %533 = vmatpush1.msra.mxu1 %v259_v52  ;;  %v357_v15 = vld [vmem:[%s3182_s30 + $0x380] sm:$0xff]  ;;  %v359_v16 = vld [vmem:[%s3182_s30 + $0x390] sm:$0xff]  ;;  %v354_v17 = vld [vmem:[%s3182_s30 + $0x368] sm:$0xff] }
  0x31   : > { %421 = vmatprep.subr.mxu0 %v254_v53  ;;  %534 = vmatprep.subr.mxu1 %v256_v54  ;;  %v356_v18 = vld [vmem:[%s3182_s30 + $0x378] sm:$0xff]  ;;  %v353_v19 = vld [vmem:[%s3182_s30 + $0x360] sm:$0xff]  ;;  %v355_v20 = vld [vmem:[%s3182_s30 + $0x370] sm:$0xff] }
  0x32   : > { %422 = vmatpush1.msra.mxu0 %v253_v55  ;;  %535 = vmatpush1.msra.mxu1 %v255_v56  ;;  %v350_v21 = vld [vmem:[%s3182_s30 + $0x348] sm:$0xff]  ;;  %v352_v22 = vld [vmem:[%s3182_s30 + $0x358] sm:$0xff]  ;;  %v349_v23 = vld [vmem:[%s3182_s30 + $0x340] sm:$0xff] }
  0x33   : > { %423 = vmatprep.subr.mxu0 %v250_v57  ;;  %536 = vmatprep.subr.mxu1 %v252_v58  ;;  %v351_v24 = vld [vmem:[%s3182_s30 + $0x350] sm:$0xff]  ;;  %v346_v25 = vld [vmem:[%s3182_s30 + $0x328] sm:$0xff]  ;;  %v348_v26 = vld [vmem:[%s3182_s30 + $0x338] sm:$0xff] }
  0x34   : > { %424 = vmatpush1.msra.mxu0 %v249_v59  ;;  %537 = vmatpush1.msra.mxu1 %v251_v60  ;;  %v345_v27 = vld [vmem:[%s3182_s30 + $0x320] sm:$0xff]  ;;  %v347_v28 = vld [vmem:[%s3182_s30 + $0x330] sm:$0xff]  ;;  %v342_v29 = vld [vmem:[%s3182_s30 + $0x308] sm:$0xff] }
  0x35   : > { %425 = vmatprep.subr.mxu0 %v246_v61  ;;  %538 = vmatprep.subr.mxu1 %v248_v62  ;;  %v344_v30 = vld [vmem:[%s3182_s30 + $0x318] sm:$0xff]  ;;  %v341_v31 = vld [vmem:[%s3182_s30 + $0x300] sm:$0xff]  ;;  %v343_v32 = vld [vmem:[%s3182_s30 + $0x310] sm:$0xff] }
  0x36   : > { %426 = vmatpush1.msra.mxu0 %v245_v63  ;;  %539 = vmatpush1.msra.mxu1 %v247_v0  ;;  %v338_v33 = vld [vmem:[%s3182_s30 + $0x2e8] sm:$0xff]  ;;  %v340_v34 = vld [vmem:[%s3182_s30 + $0x2f8] sm:$0xff]  ;;  %v337_v35 = vld [vmem:[%s3182_s30 + $0x2e0] sm:$0xff] }
  0x37   : > { %427 = vmatprep.subr.mxu0 %v370_v1  ;;  %540 = vmatprep.subr.mxu1 %v372_v2  ;;  %v339_v36 = vld [vmem:[%s3182_s30 + $0x2f0] sm:$0xff]  ;;  %v334_v37 = vld [vmem:[%s3182_s30 + $0x2c8] sm:$0xff]  ;;  %v336_v38 = vld [vmem:[%s3182_s30 + $0x2d8] sm:$0xff] }
  0x38   : > { %428 = vmatpush2.msra.mxu0 %v369_v3  ;;  %541 = vmatpush2.msra.mxu1 %v371_v4  ;;  %v333_v39 = vld [vmem:[%s3182_s30 + $0x2c0] sm:$0xff]  ;;  %v335_v40 = vld [vmem:[%s3182_s30 + $0x2d0] sm:$0xff]  ;;  %v330_v41 = vld [vmem:[%s3182_s30 + $0x2a8] sm:$0xff] }
  0x39   : > { %429 = vmatprep.subr.mxu0 %v366_v5  ;;  %542 = vmatprep.subr.mxu1 %v368_v6  ;;  %v332_v42 = vld [vmem:[%s3182_s30 + $0x2b8] sm:$0xff]  ;;  %v329_v43 = vld [vmem:[%s3182_s30 + $0x2a0] sm:$0xff]  ;;  %v331_v44 = vld [vmem:[%s3182_s30 + $0x2b0] sm:$0xff] }
  0x3a   : > { %430 = vmatpush2.msra.mxu0 %v365_v7  ;;  %543 = vmatpush2.msra.mxu1 %v367_v8  ;;  %v326_v45 = vld [vmem:[%s3182_s30 + $0x288] sm:$0xff]  ;;  %v328_v46 = vld [vmem:[%s3182_s30 + $0x298] sm:$0xff]  ;;  %v325_v47 = vld [vmem:[%s3182_s30 + $0x280] sm:$0xff] }
  0x3b   : > { %431 = vmatprep.subr.mxu0 %v362_v9  ;;  %544 = vmatprep.subr.mxu1 %v364_v10  ;;  %v327_v48 = vld [vmem:[%s3182_s30 + $0x290] sm:$0xff]  ;;  %v322_v49 = vld [vmem:[%s3182_s30 + $0x268] sm:$0xff]  ;;  %v324_v50 = vld [vmem:[%s3182_s30 + $0x278] sm:$0xff] }
  0x3c   : > { %432 = vmatpush2.msra.mxu0 %v361_v11  ;;  %545 = vmatpush2.msra.mxu1 %v363_v12  ;;  %v321_v51 = vld [vmem:[%s3182_s30 + $0x260] sm:$0xff]  ;;  %v323_v52 = vld [vmem:[%s3182_s30 + $0x270] sm:$0xff]  ;;  %v318_v53 = vld [vmem:[%s3182_s30 + $0x248] sm:$0xff] }
  0x3d   : > { %433 = vmatprep.subr.mxu0 %v358_v13  ;;  %546 = vmatprep.subr.mxu1 %v360_v14  ;;  %v320_v54 = vld [vmem:[%s3182_s30 + $0x258] sm:$0xff]  ;;  %v317_v55 = vld [vmem:[%s3182_s30 + $0x240] sm:$0xff]  ;;  %v319_v56 = vld [vmem:[%s3182_s30 + $0x250] sm:$0xff] }
  0x3e   : > { %434 = vmatpush2.msra.mxu0 %v357_v15  ;;  %547 = vmatpush2.msra.mxu1 %v359_v16  ;;  %v314_v57 = vld [vmem:[%s3182_s30 + $0x228] sm:$0xff]  ;;  %v316_v58 = vld [vmem:[%s3182_s30 + $0x238] sm:$0xff]  ;;  %v313_v59 = vld [vmem:[%s3182_s30 + $0x220] sm:$0xff] }
  0x3f   : > { %435 = vmatprep.subr.mxu0 %v354_v17  ;;  %548 = vmatprep.subr.mxu1 %v356_v18  ;;  %v315_v60 = vld [vmem:[%s3182_s30 + $0x230] sm:$0xff]  ;;  %v310_v61 = vld [vmem:[%s3182_s30 + $0x208] sm:$0xff]  ;;  %v312_v62 = vld [vmem:[%s3182_s30 + $0x218] sm:$0xff] }
  0x40   : > { %436 = vmatpush2.msra.mxu0 %v353_v19  ;;  %549 = vmatpush2.msra.mxu1 %v355_v20  ;;  %v309_v63 = vld [vmem:[%s3182_s30 + $0x200] sm:$0xff]  ;;  %v311_v0 = vld [vmem:[%s3182_s30 + $0x210] sm:$0xff]  ;;  %v232_v2 = vld [vmem:[%s4447_s0 + $0x18] sm:$0xff]  ;;  %s4090_s30 = sadd.s32 %s2886_s29, %s1159_s28 }
  0x41   : > { %437 = vmatprep.subr.mxu0 %v350_v21  ;;  %550 = vmatprep.subr.mxu1 %v352_v22  ;;  %v229_v1 = vld [vmem:[%s4447_s0] sm:$0xff]  ;;  %v3325_v3 = vld [vmem:[%s3314_s8 + $0x1e8] sm:$0xff]  ;;  %v3328_v4 = vld [vmem:[%s3314_s8 + $0x1f8] sm:$0xff] }
  0x42   : > { %438 = vmatpush2.msra.mxu0 %v349_v23  ;;  %551 = vmatpush2.msra.mxu1 %v351_v24  ;;  %v3331_v5 = vld [vmem:[%s3314_s8 + $0x1e0] sm:$0xff]  ;;  %v3334_v6 = vld [vmem:[%s3314_s8 + $0x1f0] sm:$0xff]  ;;  %v3341_v8 = vld [vmem:[%s3314_s8 + $0x1c8] sm:$0xff] }
  0x43   : > { %439 = vmatprep.subr.mxu0 %v346_v25  ;;  %552 = vmatprep.subr.mxu1 %v348_v26  ;;  %v231_v7 = vld [vmem:[%s4447_s0 + $0x10] sm:$0xff]  ;;  %v234_v9 = vld [vmem:[%s4447_s0 + $0x28] sm:$0xff]  ;;  %v3349_v10 = vld [vmem:[%s3314_s8 + $0x1c0] sm:$0xff] }
  0x44   : > { %440 = vmatpush2.msra.mxu0 %v345_v27  ;;  %553 = vmatpush2.msra.mxu1 %v347_v28  ;;  %v3353_v11 = vld [vmem:[%s3314_s8 + $0x1a8] sm:$0xff]  ;;  %v3356_v12 = vld [vmem:[%s3314_s8 + $0x1d8] sm:$0xff]  ;;  %v233_v13 = vld [vmem:[%s4447_s0 + $0x20] sm:$0xff] }
  0x45   : > { %441 = vmatprep.subr.mxu0 %v342_v29  ;;  %554 = vmatprep.subr.mxu1 %v344_v30  ;;  %v3364_v14 = vld [vmem:[%s3314_s8 + $0x1a0] sm:$0xff]  ;;  %v3367_v15 = vld [vmem:[%s3314_s8 + $0x1d0] sm:$0xff]  ;;  %v3372_v16 = vld [vmem:[%s3314_s8 + $0x188] sm:$0xff] }
  0x46   : > { %442 = vmatpush2.msra.mxu0 %v341_v31  ;;  %555 = vmatpush2.msra.mxu1 %v343_v32  ;;  %v3375_v17 = vld [vmem:[%s3314_s8 + $0x1b8] sm:$0xff]  ;;  %v3383_v19 = vld [vmem:[%s3314_s8 + $0x180] sm:$0xff]  ;;  %v3386_v20 = vld [vmem:[%s3314_s8 + $0x1b0] sm:$0xff] }
  0x47   : > { %443 = vmatprep.subr.mxu0 %v338_v33  ;;  %556 = vmatprep.subr.mxu1 %v340_v34  ;;  %v236_v18 = vld [vmem:[%s4447_s0 + $0x38] sm:$0xff]  ;;  %v235_v21 = vld [vmem:[%s4447_s0 + $0x30] sm:$0xff]  ;;  %v3394_v22 = vld [vmem:[%s3314_s8 + $0x168] sm:$0xff] }
  0x48   : > { %444 = vmatpush2.msra.mxu0 %v337_v35  ;;  %557 = vmatpush2.msra.mxu1 %v339_v36  ;;  %v3397_v23 = vld [vmem:[%s3314_s8 + $0x198] sm:$0xff]  ;;  %v3402_v24 = vld [vmem:[%s3314_s8 + $0x160] sm:$0xff]  ;;  %v3405_v25 = vld [vmem:[%s3314_s8 + $0x190] sm:$0xff] }
  0x49   : > { %445 = vmatprep.subr.mxu0 %v334_v37  ;;  %558 = vmatprep.subr.mxu1 %v336_v38  ;;  %v3408_v26 = vld [vmem:[%s3314_s8 + $0x148] sm:$0xff]  ;;  %v3411_v27 = vld [vmem:[%s3314_s8 + $0x178] sm:$0xff]  ;;  %v3421_v29 = vld [vmem:[%s3314_s8 + $0x140] sm:$0xff] }
  0x4a   : > { %446 = vmatpush2.msra.mxu0 %v333_v39  ;;  %559 = vmatpush2.msra.mxu1 %v335_v40  ;;  %v238_v28 = vld [vmem:[%s4447_s0 + $0x48] sm:$0xff]  ;;  %v3424_v30 = vld [vmem:[%s3314_s8 + $0x170] sm:$0xff]  ;;  %v237_v31 = vld [vmem:[%s4447_s0 + $0x40] sm:$0xff] }
  0x4b   : > { %447 = vmatprep.subr.mxu0 %v330_v41  ;;  %560 = vmatprep.subr.mxu1 %v332_v42  ;;  %v3432_v32 = vld [vmem:[%s3314_s8 + $0x128] sm:$0xff]  ;;  %v3435_v33 = vld [vmem:[%s3314_s8 + $0x158] sm:$0xff]  ;;  %v3440_v34 = vld [vmem:[%s3314_s8 + $0x120] sm:$0xff] }
  0x4c   : > { %448 = vmatpush2.msra.mxu0 %v329_v43  ;;  %561 = vmatpush2.msra.mxu1 %v331_v44  ;;  %v3443_v35 = vld [vmem:[%s3314_s8 + $0x150] sm:$0xff]  ;;  %v3446_v36 = vld [vmem:[%s3314_s8 + $0x108] sm:$0xff]  ;;  %v3449_v37 = vld [vmem:[%s3314_s8 + $0x138] sm:$0xff] }
  0x4d   : > { %449 = vmatprep.subr.mxu0 %v326_v45  ;;  %562 = vmatprep.subr.mxu1 %v328_v46  ;;  %v240_v38 = vld [vmem:[%s4447_s0 + $0x58] sm:$0xff]  ;;  %v3459_v39 = vld [vmem:[%s3314_s8 + $0x100] sm:$0xff]  ;;  %v3462_v40 = vld [vmem:[%s3314_s8 + $0x130] sm:$0xff] }
  0x4e   : > { %450 = vmatpush2.msra.mxu0 %v325_v47  ;;  %563 = vmatpush2.msra.mxu1 %v327_v48  ;;  %v239_v41 = vld [vmem:[%s4447_s0 + $0x50] sm:$0xff]  ;;  %v3470_v42 = vld [vmem:[%s3314_s8 + $0xe8] sm:$0xff]  ;;  %v3473_v43 = vld [vmem:[%s3314_s8 + $0x118] sm:$0xff] }
  0x4f   : > { %451 = vmatprep.subr.mxu0 %v322_v49  ;;  %564 = vmatprep.subr.mxu1 %v324_v50  ;;  %v3478_v44 = vld [vmem:[%s3314_s8 + $0xe0] sm:$0xff]  ;;  %v3481_v45 = vld [vmem:[%s3314_s8 + $0x110] sm:$0xff]  ;;  %v3484_v46 = vld [vmem:[%s3314_s8 + $0xc8] sm:$0xff] }
  0x50   : > { %452 = vmatpush2.msra.mxu0 %v321_v51  ;;  %565 = vmatpush2.msra.mxu1 %v323_v52  ;;  %v3487_v47 = vld [vmem:[%s3314_s8 + $0xf8] sm:$0xff]  ;;  %v242_v48 = vld [vmem:[%s4447_s0 + $0x68] sm:$0xff]  ;;  %v3497_v49 = vld [vmem:[%s3314_s8 + $0xc0] sm:$0xff] }
  0x51   : > { %453 = vmatprep.subr.mxu0 %v318_v53  ;;  %566 = vmatprep.subr.mxu1 %v320_v54  ;;  %v3500_v50 = vld [vmem:[%s3314_s8 + $0xf0] sm:$0xff]  ;;  %v241_v51 = vld [vmem:[%s4447_s0 + $0x60] sm:$0xff]  ;;  %v3508_v52 = vld [vmem:[%s3314_s8 + $0xa8] sm:$0xff] }
  0x52   : > { %454 = vmatpush2.msra.mxu0 %v317_v55  ;;  %567 = vmatpush2.msra.mxu1 %v319_v56  ;;  %v3511_v53 = vld [vmem:[%s3314_s8 + $0xd8] sm:$0xff]  ;;  %v3516_v54 = vld [vmem:[%s3314_s8 + $0xa0] sm:$0xff]  ;;  %v3519_v55 = vld [vmem:[%s3314_s8 + $0xd0] sm:$0xff] }
  0x53   : > { %455 = vmatprep.subr.mxu0 %v314_v57  ;;  %568 = vmatprep.subr.mxu1 %v316_v58  ;;  %v3522_v56 = vld [vmem:[%s3314_s8 + $0x88] sm:$0xff]  ;;  %v3525_v57 = vld [vmem:[%s3314_s8 + $0xb8] sm:$0xff] }
  0x54   : > { %456 = vmatpush2.msra.mxu0 %v313_v59  ;;  %569 = vmatpush2.msra.mxu1 %v315_v60  ;;  %v244_v58 = vld [vmem:[%s4447_s0 + $0x78] sm:$0xff]  ;;  %v3535_v59 = vld [vmem:[%s3314_s8 + $0x80] sm:$0xff]  ;;  %v3538_v60 = vld [vmem:[%s3314_s8 + $0xb0] sm:$0xff] }
  0x55   : > { %457 = vmatprep.subr.mxu0 %v310_v61  ;;  %570 = vmatprep.subr.mxu1 %v312_v62  ;;  %v243_v61 = vld [vmem:[%s4447_s0 + $0x70] sm:$0xff]  ;;  %v3546_v62 = vld [vmem:[%s3314_s8 + $0x68] sm:$0xff] }
  0x56   : > { %458 = vmatpush2.msra.mxu0 %v309_v63  ;;  %571 = vmatpush2.msra.mxu1 %v311_v0  ;;  %4515 = vst [vmem:[#allocation6_spill] sm:$0xff] %v3546_v62  ;;  %v3549_v63 = vld [vmem:[%s3314_s8 + $0x98] sm:$0xff]  ;;  %v3554_v0 = vld [vmem:[%s3314_s8 + $0x60] sm:$0xff] }
  0x57   : > { %460 = vmatmul.mubr.f32.vlgmr.msra.gmra.mxu0 %v229_v1  ;;  %573 = vmatmul.mubr.f32.vlgmr.msra.gmra.mxu1 %v229_v1  ;;  %4516 = vst [vmem:[#allocation7_spill] sm:$0xff] %v3554_v0  ;;  %v3557_v1 = vld [vmem:[%s3314_s8 + $0x90] sm:$0xff] }
  0x58   : > { %465 = vmatprep.mubr.f32.mxu0 %v232_v2  ;;  %578 = vmatprep.mubr.f32.mxu1 %v232_v2  ;;  %4517 = vst [vmem:[#allocation8_spill] sm:$0xff] %v3557_v1  ;;  %v3560_v2 = vld [vmem:[%s3314_s8 + $0x48] sm:$0xff] }
  0x59   : > { %730 = vmatprep.subr.mxu0 %v3325_v3  ;;  %801 = vmatprep.subr.mxu1 %v3328_v4  ;;  %4518 = vst [vmem:[#allocation9_spill] sm:$0xff] %v3560_v2 }
  0x5a   : > { %731 = vmatpush1.msra.mxu0 %v3331_v5  ;;  %802 = vmatpush1.msra.mxu1 %v3334_v6 }
  0x5b   : > { %466 = vmatmul.mubr.f32.gmra.mxu0 %v231_v7  ;;  %579 = vmatmul.mubr.f32.gmra.mxu1 %v231_v7  ;;  %v3563_v7 = vld [vmem:[%s3314_s8 + $0x78] sm:$0xff] }
  0x5c   : > { %732 = vmatprep.subr.mxu0 %v3341_v8  ;;  %471 = vmatprep.mubr.f32.mxu0 %v234_v9  ;;  %4519 = vst [vmem:[#allocation10_spill] sm:$0xff] %v3563_v7 }
  0x5d   : > { %584 = vmatprep.mubr.f32.mxu1 %v234_v9  ;;  %733 = vmatpush1.msra.mxu0 %v3349_v10  ;;  %v3568_v9 = vld [vmem:[%s3314_s8 + $0x40] sm:$0xff] }
  0x5e   : > { %734 = vmatprep.subr.mxu0 %v3353_v11  ;;  %803 = vmatprep.subr.mxu1 %v3356_v12  ;;  %4520 = vst [vmem:[#allocation11_spill] sm:$0xff] %v3568_v9 }
  0x5f   : > { %472 = vmatmul.mubr.f32.gmra.mxu0 %v233_v13  ;;  %585 = vmatmul.mubr.f32.gmra.mxu1 %v233_v13  ;;  %v3571_v13 = vld [vmem:[%s3314_s8 + $0x70] sm:$0xff] }
  0x60   : > { %735 = vmatpush1.msra.mxu0 %v3364_v14  ;;  %804 = vmatpush1.msra.mxu1 %v3367_v15  ;;  %4521 = vst [vmem:[#allocation12_spill] sm:$0xff] %v3571_v13 }
  0x61   : > { %736 = vmatprep.subr.mxu0 %v3372_v16  ;;  %805 = vmatprep.subr.mxu1 %v3375_v17 }
  0x62   : > { %477 = vmatprep.mubr.f32.mxu0 %v236_v18  ;;  %590 = vmatprep.mubr.f32.mxu1 %v236_v18  ;;  %v3576_v18 = vld [vmem:[%s3314_s8 + $0x28] sm:$0xff] }
  0x63   : > { %737 = vmatpush1.msra.mxu0 %v3383_v19  ;;  %806 = vmatpush1.msra.mxu1 %v3386_v20  ;;  %4522 = vst [vmem:[#allocation13_spill] sm:$0xff] %v3576_v18 }
  0x64   : > { %478 = vmatmul.mubr.f32.gmra.mxu0 %v235_v21  ;;  %591 = vmatmul.mubr.f32.gmra.mxu1 %v235_v21  ;;  %v3579_v21 = vld [vmem:[%s3314_s8 + $0x58] sm:$0xff] }
  0x65   : > { %738 = vmatprep.subr.mxu0 %v3394_v22  ;;  %807 = vmatprep.subr.mxu1 %v3397_v23  ;;  %4523 = vst [vmem:[#allocation14_spill] sm:$0xff] %v3579_v21 }
  0x66   : > { %739 = vmatpush1.msra.mxu0 %v3402_v24  ;;  %808 = vmatpush1.msra.mxu1 %v3405_v25 }
  0x67   : > { %740 = vmatprep.subr.mxu0 %v3408_v26  ;;  %809 = vmatprep.subr.mxu1 %v3411_v27 }
  0x68   : > { %483 = vmatprep.mubr.f32.mxu0 %v238_v28  ;;  %596 = vmatprep.mubr.f32.mxu1 %v238_v28  ;;  %v3584_v28 = vld [vmem:[%s3314_s8 + $0x20] sm:$0xff] }
  0x69   : > { %741 = vmatpush1.msra.mxu0 %v3421_v29  ;;  %810 = vmatpush1.msra.mxu1 %v3424_v30  ;;  %4524 = vst [vmem:[#allocation15_spill] sm:$0xff] %v3584_v28 }
  0x6a   : > { %484 = vmatmul.mubr.f32.gmra.mxu0 %v237_v31  ;;  %597 = vmatmul.mubr.f32.gmra.mxu1 %v237_v31  ;;  %v3587_v31 = vld [vmem:[%s3314_s8 + $0x50] sm:$0xff] }
  0x6b   : > { %742 = vmatprep.subr.mxu0 %v3432_v32  ;;  %811 = vmatprep.subr.mxu1 %v3435_v33  ;;  %4525 = vst [vmem:[#allocation16_spill] sm:$0xff] %v3587_v31 }
  0x6c   : > { %743 = vmatpush1.msra.mxu0 %v3440_v34  ;;  %812 = vmatpush1.msra.mxu1 %v3443_v35 }
  0x6d   : > { %744 = vmatprep.subr.mxu0 %v3446_v36  ;;  %813 = vmatprep.subr.mxu1 %v3449_v37 }
  0x6e   : > { %489 = vmatprep.mubr.f32.mxu0 %v240_v38  ;;  %602 = vmatprep.mubr.f32.mxu1 %v240_v38  ;;  %v3592_v38 = vld [vmem:[%s3314_s8 + $0x8] sm:$0xff] }
  0x6f   : > { %745 = vmatpush1.msra.mxu0 %v3459_v39  ;;  %814 = vmatpush1.msra.mxu1 %v3462_v40  ;;  %4526 = vst [vmem:[#allocation17_spill] sm:$0xff] %v3592_v38 }
  0x70   : > { %490 = vmatmul.mubr.f32.gmra.mxu0 %v239_v41  ;;  %603 = vmatmul.mubr.f32.gmra.mxu1 %v239_v41  ;;  %v3595_v41 = vld [vmem:[%s3314_s8 + $0x38] sm:$0xff] }
  0x71   : > { %746 = vmatprep.subr.mxu0 %v3470_v42  ;;  %815 = vmatprep.subr.mxu1 %v3473_v43  ;;  %4527 = vst [vmem:[#allocation18_spill] sm:$0xff] %v3595_v41 }
  0x72   : > { %747 = vmatpush1.msra.mxu0 %v3478_v44  ;;  %816 = vmatpush1.msra.mxu1 %v3481_v45 }
  0x73   : > { %748 = vmatprep.subr.mxu0 %v3484_v46  ;;  %817 = vmatprep.subr.mxu1 %v3487_v47 }
  0x74   : > { %495 = vmatprep.mubr.f32.mxu0 %v242_v48  ;;  %608 = vmatprep.mubr.f32.mxu1 %v242_v48  ;;  %v3600_v48 = vld [vmem:[%s3314_s8] sm:$0xff] }
  0x75   : > { %749 = vmatpush1.msra.mxu0 %v3497_v49  ;;  %818 = vmatpush1.msra.mxu1 %v3500_v50  ;;  %4528 = vst [vmem:[#allocation19_spill] sm:$0xff] %v3600_v48 }
  0x76   : > { %496 = vmatmul.mubr.f32.gmra.mxu0 %v241_v51  ;;  %609 = vmatmul.mubr.f32.gmra.mxu1 %v241_v51  ;;  %v3605_v51 = vld [vmem:[%s3314_s8 + $0x30] sm:$0xff] }
  0x77   : > { %750 = vmatprep.subr.mxu0 %v3508_v52  ;;  %819 = vmatprep.subr.mxu1 %v3511_v53  ;;  %4529 = vst [vmem:[#allocation20_spill] sm:$0xff] %v3605_v51 }
  0x78   : > { %751 = vmatpush1.msra.mxu0 %v3516_v54  ;;  %820 = vmatpush1.msra.mxu1 %v3519_v55 }
  0x79   : > { %752 = vmatprep.subr.mxu0 %v3522_v56  ;;  %821 = vmatprep.subr.mxu1 %v3525_v57 }
  0x7a   : > { %501 = vmatprep.mubr.f32.mxu0 %v244_v58  ;;  %614 = vmatprep.mubr.f32.mxu1 %v244_v58  ;;  %v3610_v58 = vld [vmem:[%s3314_s8 + $0x18] sm:$0xff] }
  0x7b   : > { %753 = vmatpush1.msra.mxu0 %v3535_v59  ;;  %822 = vmatpush1.msra.mxu1 %v3538_v60  ;;  %4530 = vst [vmem:[#allocation21_spill] sm:$0xff] %v3610_v58 }
  0x7c   : > { %502 = vmatmul.mubr.f32.gmra.mxu0 %v243_v61  ;;  %615 = vmatmul.mubr.f32.gmra.mxu1 %v243_v61  ;;  %v4454_v61 = vmov 0.0  }
  0x7d   : > { %754 = vmatprep.subr.mxu0 %v3546_v62  ;;  %823 = vmatprep.subr.mxu1 %v3549_v63 }
  0x7e   : > { %755 = vmatpush1.msra.mxu0 %v3554_v0  ;;  %824 = vmatpush1.msra.mxu1 %v3557_v1 }
  0x7f   : > { %756 = vmatprep.subr.mxu0 %v3560_v2  ;;  %825 = vmatprep.subr.mxu1 %v3563_v7 }
  0x80   : > { %757 = vmatpush1.msra.mxu0 %v3568_v9  ;;  %826 = vmatpush1.msra.mxu1 %v3571_v13 }
  0x81   : > { %758 = vmatprep.subr.mxu0 %v3576_v18  ;;  %827 = vmatprep.subr.mxu1 %v3579_v21  ;;  %v3615_v18 = vld [vmem:[%s3314_s8 + $0x10] sm:$0xff] }
  0x82   : > { %759 = vmatpush1.msra.mxu0 %v3584_v28  ;;  %828 = vmatpush1.msra.mxu1 %v3587_v31  ;;  %4531 = vst [vmem:[#allocation22_spill] sm:$0xff] %v3615_v18 }
  0x83   : > { %760 = vmatprep.subr.mxu0 %v3592_v38  ;;  %829 = vmatprep.subr.mxu1 %v3595_v41 }
  0x84   : > { %761 = vmatpush1.msra.mxu0 %v3600_v48  ;;  %794 = vmatprep.mubr.f32.mxu0 %v4454_v61 }
  0x85   : > { %830 = vmatpush1.msra.mxu1 %v3605_v51  ;;  %795 = vmatmul.mubr.f32.vlgmr.msra.gmra.mxu0 %v4454_v61 }
  0x86   : > { %831 = vmatprep.subr.mxu1 %v3610_v58  ;;  %865 = vmatprep.mubr.f32.mxu1 %v4454_v61 }
  0x87   : > { %832 = vmatpush1.msra.mxu1 %v3615_v18  ;;  %983 = vmatprep.subr.mxu0 %v3325_v3 }
  0x88   : > { %866 = vmatmul.mubr.f32.vlgmr.msra.gmra.mxu1 %v4454_v61  ;;  %1054 = vmatprep.subr.mxu1 %v3328_v4  ;;  %v4532_v61 = vld [vmem:[#allocation13_spill] sm:$0xff] }
  0x89   : > { %984 = vmatpush1.msra.mxu0 %v3331_v5  ;;  %1055 = vmatpush1.msra.mxu1 %v3334_v6 }
  0x8a   : > { %985 = vmatprep.subr.mxu0 %v3341_v8  ;;  %1056 = vmatprep.subr.mxu1 %v3356_v12 }
  0x8b   : > { %986 = vmatpush1.msra.mxu0 %v3349_v10  ;;  %1057 = vmatpush1.msra.mxu1 %v3367_v15 }
  0x8c   : > { %987 = vmatprep.subr.mxu0 %v3353_v11  ;;  %1058 = vmatprep.subr.mxu1 %v3375_v17 }
  0x8d   : > { %988 = vmatpush1.msra.mxu0 %v3364_v14  ;;  %1059 = vmatpush1.msra.mxu1 %v3386_v20 }
  0x8e   : > { %989 = vmatprep.subr.mxu0 %v3372_v16  ;;  %1060 = vmatprep.subr.mxu1 %v3397_v23 }
  0x8f   : > { %990 = vmatpush1.msra.mxu0 %v3383_v19  ;;  %1061 = vmatpush1.msra.mxu1 %v3405_v25 }
  0x90   : > { %991 = vmatprep.subr.mxu0 %v3394_v22  ;;  %1062 = vmatprep.subr.mxu1 %v3411_v27 }
  0x91   : > { %992 = vmatpush1.msra.mxu0 %v3402_v24  ;;  %1063 = vmatpush1.msra.mxu1 %v3424_v30 }
  0x92   : > { %993 = vmatprep.subr.mxu0 %v3408_v26  ;;  %1064 = vmatprep.subr.mxu1 %v3435_v33 }
  0x93   : > { %994 = vmatpush1.msra.mxu0 %v3421_v29  ;;  %1065 = vmatpush1.msra.mxu1 %v3443_v35 }
  0x94   : > { %995 = vmatprep.subr.mxu0 %v3432_v32  ;;  %1066 = vmatprep.subr.mxu1 %v3449_v37 }
  0x95   : > { %996 = vmatpush1.msra.mxu0 %v3440_v34  ;;  %1067 = vmatpush1.msra.mxu1 %v3462_v40 }
  0x96   : > { %997 = vmatprep.subr.mxu0 %v3446_v36  ;;  %1068 = vmatprep.subr.mxu1 %v3473_v43 }
  0x97   : > { %998 = vmatpush1.msra.mxu0 %v3459_v39  ;;  %1069 = vmatpush1.msra.mxu1 %v3481_v45 }
  0x98   : > { %999 = vmatprep.subr.mxu0 %v3470_v42  ;;  %1070 = vmatprep.subr.mxu1 %v3487_v47 }
  0x99   : > { %1000 = vmatpush1.msra.mxu0 %v3478_v44  ;;  %1071 = vmatpush1.msra.mxu1 %v3500_v50 }
  0x9a   : > { %1001 = vmatprep.subr.mxu0 %v3484_v46  ;;  %1072 = vmatprep.subr.mxu1 %v3511_v53 }
  0x9b   : > { %1002 = vmatpush1.msra.mxu0 %v3497_v49  ;;  %1073 = vmatpush1.msra.mxu1 %v3519_v55 }
  0x9c   : > { %1003 = vmatprep.subr.mxu0 %v3508_v52  ;;  %1074 = vmatprep.subr.mxu1 %v3525_v57 }
  0x9d   : > { %1004 = vmatpush1.msra.mxu0 %v3516_v54  ;;  %1075 = vmatpush1.msra.mxu1 %v3538_v60 }
  0x9e   : > { %1005 = vmatprep.subr.mxu0 %v3522_v56  ;;  %1076 = vmatprep.subr.mxu1 %v3549_v63 }
  0x9f   : > { %1006 = vmatpush1.msra.mxu0 %v3535_v59  ;;  %1077 = vmatpush1.msra.mxu1 %v3557_v1 }
  0xa0   : > { %1007 = vmatprep.subr.mxu0 %v3546_v62  ;;  %1078 = vmatprep.subr.mxu1 %v3563_v7 }
  0xa1   : > { %1008 = vmatpush1.msra.mxu0 %v3554_v0  ;;  %1079 = vmatpush1.msra.mxu1 %v3571_v13 }
  0xa2   : > { %1009 = vmatprep.subr.mxu0 %v3560_v2  ;;  %1080 = vmatprep.subr.mxu1 %v3579_v21  ;;  %v4533_v21 = vmov 0.0  }
  0xa3   : > { %1010 = vmatpush1.msra.mxu0 %v3568_v9  ;;  %1081 = vmatpush1.msra.mxu1 %v3587_v31 }
  0xa4   : > { %1011 = vmatprep.subr.mxu0 %v4532_v61  ;;  %1082 = vmatprep.subr.mxu1 %v3595_v41  ;;  %v375_v41 = vlaneseq }
  0xa5   : > { %1012 = vmatpush1.msra.mxu0 %v3584_v28  ;;  %1083 = vmatpush1.msra.mxu1 %v3605_v51 }
  0xa6   : > { %1013 = vmatprep.subr.mxu0 %v3592_v38  ;;  %1084 = vmatprep.subr.mxu1 %v3610_v58  ;;  %v376_v28 = vshrl.u32 %v375_v41, 7 }
  0xa7   : > { %1014 = vmatpush1.msra.mxu0 %v3600_v48  ;;  %1047 = vmatprep.mubr.f32.mxu0 %v4533_v21  ;;  %v373_v48 = vld [vmem:[%s228_s5] sm:$0xf]  ;;  %s2887_s5 = sshll.u32 %s4090_s30, 3 }
  0xa8   : > { %1085 = vmatpush1.msra.mxu1 %v3615_v18  ;;  %1118 = vmatprep.mubr.f32.mxu1 %v4533_v21  ;;  %v377_v58 = vsub.s32 0, %v376_v28  ;;  %v385_v38 = vsub.s32 2, %v376_v28  ;;  %v381_v51 = vsub.s32 1, %v376_v28  ;;  %v389_v61 = vsub.s32 3, %v376_v28  ;;  %s1162_s26 = sshra.s32 %s2887_s5, 3 }
  0xa9   : > { %1236 = vmatprep.subr.mxu0 %v3325_v3  ;;  %1307 = vmatprep.subr.mxu1 %v3328_v4  ;;  %s2933_s6 = sshll.u32 %s1162_s26, 5 }
  0xaa   : > { %v3695_v31 = vrot.slane %v373_v48, %v377_v58  ;;  %v3697_v18 = vrot.slane %v373_v48, %v385_v38  ;;  %v3699_v21 = vrot.slane %v373_v48, %v381_v51  ;;  %v3701_v3 = vrot.slane %v373_v48, %v389_v61  ;;  %s1166_s7 = scalar_lea.vmem [#allocation2], %s2933_s6 }
 0x117   : > { %v461_v4 = vpop.f32.mrf.mxu0  ;;  %v574_v9 = vpop.f32.mrf.mxu1 }
 0x118   : > { %v462_v41 = vadd.f32 %v461_v4, %v3695_v31  ;;  %v575_v2 = vadd.f32 %v574_v9, %v3697_v18 }
 0x119   : > { %v463_v13 = vpop.f32.mrf.mxu0  ;;  %v576_v0 = vpop.f32.mrf.mxu1 }
 0x11a   : > { %621 = vst [vmem:[#allocation2] sm:$0xff] %v462_v41  ;;  %623 = vst [vmem:[#allocation2 + $0x10] sm:$0xff] %v575_v2  ;;  %v464_v28 = vadd.f32 %v463_v13, %v3699_v21  ;;  %v577_v58 = vadd.f32 %v576_v0, %v3701_v3 }
 0x11b   : > { %v467_v38 = vpop.f32.mrf.mxu0  ;;  %v580_v7 = vpop.f32.mrf.mxu1 }
 0x11c   : > { %622 = vst [vmem:[#allocation2 + $0x8] sm:$0xff] %v464_v28  ;;  %624 = vst [vmem:[#allocation2 + $0x18] sm:$0xff] %v577_v58  ;;  %v468_v48 = vadd.f32 %v467_v38, %v3695_v31  ;;  %v581_v51 = vadd.f32 %v580_v7, %v3697_v18 }
 0x11d   : > { %v469_v61 = vpop.f32.mrf.mxu0  ;;  %v582_v4 = vpop.f32.mrf.mxu1 }
 0x11e   : > { %625 = vst [vmem:[#allocation2 + $0x20] sm:$0xff] %v468_v48  ;;  %627 = vst [vmem:[#allocation2 + $0x30] sm:$0xff] %v581_v51  ;;  %v470_v9 = vadd.f32 %v469_v61, %v3699_v21  ;;  %v583_v2 = vadd.f32 %v582_v4, %v3701_v3 }
 0x11f   : > { %v473_v41 = vpop.f32.mrf.mxu0  ;;  %v586_v13 = vpop.f32.mrf.mxu1 }
 0x120   : > { %626 = vst [vmem:[#allocation2 + $0x28] sm:$0xff] %v470_v9  ;;  %628 = vst [vmem:[#allocation2 + $0x38] sm:$0xff] %v583_v2  ;;  %v474_v0 = vadd.f32 %v473_v41, %v3695_v31  ;;  %v587_v28 = vadd.f32 %v586_v13, %v3697_v18 }
 0x121   : > { %v475_v58 = vpop.f32.mrf.mxu0  ;;  %v588_v38 = vpop.f32.mrf.mxu1 }
 0x122   : > { %629 = vst [vmem:[#allocation2 + $0x40] sm:$0xff] %v474_v0  ;;  %631 = vst [vmem:[#allocation2 + $0x50] sm:$0xff] %v587_v28  ;;  %v476_v7 = vadd.f32 %v475_v58, %v3699_v21  ;;  %v589_v48 = vadd.f32 %v588_v38, %v3701_v3 }
 0x124   : > { %630 = vst [vmem:[#allocation2 + $0x48] sm:$0xff] %v476_v7  ;;  %632 = vst [vmem:[#allocation2 + $0x58] sm:$0xff] %v589_v48  ;;  %v479_v51 = vpop.f32.mrf.mxu0  ;;  %v592_v61 = vpop.f32.mrf.mxu1 }
 0x125   : > { %v480_v4 = vadd.f32 %v479_v51, %v3695_v31  ;;  %v593_v9 = vadd.f32 %v592_v61, %v3697_v18 }
 0x126   : > { %v481_v2 = vpop.f32.mrf.mxu0  ;;  %v594_v41 = vpop.f32.mrf.mxu1 }
 0x127   : > { %633 = vst [vmem:[#allocation2 + $0x60] sm:$0xff] %v480_v4  ;;  %635 = vst [vmem:[#allocation2 + $0x70] sm:$0xff] %v593_v9  ;;  %v482_v13 = vadd.f32 %v481_v2, %v3699_v21  ;;  %v595_v0 = vadd.f32 %v594_v41, %v3701_v3 }
 0x129   : > { %634 = vst [vmem:[#allocation2 + $0x68] sm:$0xff] %v482_v13  ;;  %636 = vst [vmem:[#allocation2 + $0x78] sm:$0xff] %v595_v0 }
 0x12a   : > { %v485_v28 = vpop.f32.mrf.mxu0  ;;  %v598_v58 = vpop.f32.mrf.mxu1 }
 0x12b   : > { %v486_v38 = vadd.f32 %v485_v28, %v3695_v31  ;;  %v599_v7 = vadd.f32 %v598_v58, %v3697_v18 }
 0x12c   : > { %v487_v48 = vpop.f32.mrf.mxu0  ;;  %v600_v51 = vpop.f32.mrf.mxu1 }
 0x12d   : > { %637 = vst [vmem:[#allocation2 + $0x80] sm:$0xff] %v486_v38  ;;  %639 = vst [vmem:[#allocation2 + $0x90] sm:$0xff] %v599_v7  ;;  %v488_v61 = vadd.f32 %v487_v48, %v3699_v21  ;;  %v601_v4 = vadd.f32 %v600_v51, %v3701_v3 }
 0x12f   : > { %638 = vst [vmem:[#allocation2 + $0x88] sm:$0xff] %v488_v61  ;;  %640 = vst [vmem:[#allocation2 + $0x98] sm:$0xff] %v601_v4 }
 0x130   : > { %v491_v9 = vpop.f32.mrf.mxu0  ;;  %v604_v2 = vpop.f32.mrf.mxu1 }
 0x131   : > { %v492_v41 = vadd.f32 %v491_v9, %v3695_v31  ;;  %v605_v13 = vadd.f32 %v604_v2, %v3697_v18 }
 0x132   : > { %v493_v0 = vpop.f32.mrf.mxu0  ;;  %v606_v28 = vpop.f32.mrf.mxu1 }
 0x133   : > { %641 = vst [vmem:[#allocation2 + $0xa0] sm:$0xff] %v492_v41  ;;  %643 = vst [vmem:[#allocation2 + $0xb0] sm:$0xff] %v605_v13  ;;  %v494_v58 = vadd.f32 %v493_v0, %v3699_v21  ;;  %v607_v38 = vadd.f32 %v606_v28, %v3701_v3 }
 0x135   : > { %642 = vst [vmem:[#allocation2 + $0xa8] sm:$0xff] %v494_v58  ;;  %644 = vst [vmem:[#allocation2 + $0xb8] sm:$0xff] %v607_v38 }
 0x136   : > { %v497_v7 = vpop.f32.mrf.mxu0  ;;  %v610_v48 = vpop.f32.mrf.mxu1 }
 0x137   : > { %v498_v51 = vadd.f32 %v497_v7, %v3695_v31  ;;  %v611_v61 = vadd.f32 %v610_v48, %v3697_v18 }
 0x138   : > { %v499_v4 = vpop.f32.mrf.mxu0  ;;  %v612_v9 = vpop.f32.mrf.mxu1 }
 0x139   : > { %645 = vst [vmem:[#allocation2 + $0xc0] sm:$0xff] %v498_v51  ;;  %647 = vst [vmem:[#allocation2 + $0xd0] sm:$0xff] %v611_v61  ;;  %v500_v2 = vadd.f32 %v499_v4, %v3699_v21  ;;  %v613_v41 = vadd.f32 %v612_v9, %v3701_v3 }
 0x13b   : > { %646 = vst [vmem:[#allocation2 + $0xc8] sm:$0xff] %v500_v2  ;;  %648 = vst [vmem:[#allocation2 + $0xd8] sm:$0xff] %v613_v41 }
 0x13c   : > { %v503_v13 = vpop.f32.mrf.mxu0  ;;  %v616_v0 = vpop.f32.mrf.mxu1 }
 0x13d   : > { %v504_v28 = vadd.f32 %v503_v13, %v3695_v31  ;;  %v617_v58 = vadd.f32 %v616_v0, %v3697_v18 }
 0x13e   : > { %v505_v38 = vpop.f32.mrf.mxu0  ;;  %v618_v7 = vpop.f32.mrf.mxu1 }
 0x13f   : > { %649 = vst [vmem:[#allocation2 + $0xe0] sm:$0xff] %v504_v28  ;;  %651 = vst [vmem:[#allocation2 + $0xf0] sm:$0xff] %v617_v58  ;;  %v506_v48 = vadd.f32 %v505_v38, %v3699_v21  ;;  %v619_v51 = vadd.f32 %v618_v7, %v3701_v3 }
 0x141   : > { %650 = vst [vmem:[#allocation2 + $0xe8] sm:$0xff] %v506_v48  ;;  %652 = vst [vmem:[#allocation2 + $0xf8] sm:$0xff] %v619_v51 }
 0x145   : > { %v796_v61 = vpop.f32.mrf.mxu0 }
 0x147   : > { %v798_v31 = vpop.f32.mrf.mxu0 }
 0x148   : > { %v661_v4 = vld [vmem:[%s660_s9] sm:$0xff]  ;;  %v662_v9 = vld [vmem:[%s660_s9 + $0x8] sm:$0xff]  ;;  %v663_v0 = vld [vmem:[%s660_s9 + $0x10] sm:$0xff]  ;;  %v867_v21 = vpop.f32.mrf.mxu1 }
 0x149   : > { %v872_v2 = vadd.f32 %v796_v61, %v661_v4  ;;  %v873_v18 = vadd.f32 %v798_v31, %v662_v9  ;;  %v874_v28 = vadd.f32 %v867_v21, %v663_v0  ;;  %v664_v3 = vld [vmem:[%s660_s9 + $0x18] sm:$0xff]  ;;  %s1409_s9 = scalar_lea.vmem %s3742_s12, %s2887_s5 [#allocation5] }
 0x14a   : > { %v869_v58 = vpop.f32.mrf.mxu1 }
 0x14b   : > { %v2877_v41 = vmul.f32 -1.442695, %v872_v2  ;;  %v2878_v13 = vmul.f32 -1.442695, %v873_v18  ;;  %v2879_v38 = vmul.f32 -1.442695, %v874_v28  ;;  %v875_v7 = vadd.f32 %v869_v58, %v664_v3 }
 0x14c   : > { %v3831_v58 = vld [vmem:[%s3314_s8 + $0x1e8] sm:$0xff] }
 0x14d   : > { %2964 = vpow2.f32 %v2877_v41 }
 0x14e   : > { %2966 = vpow2.f32 %v2878_v13 }
 0x14f   : > { %2968 = vpow2.f32 %v2879_v38  ;;  %v3834_v38 = vld [vmem:[%s3314_s8 + $0x1f8] sm:$0xff] }
 0x150   : > { %2970 = vtanh.f32 %v875_v7  ;;  %v3839_v7 = vld [vmem:[%s3314_s8 + $0x1e0] sm:$0xff] }
 0x15a   : > { %v2965_v48 = vpop.eup %2964 }
 0x15b   : > { %v2967_v51 = vpop.eup %2966  ;;  %v885_v62 = vadd.f32 1.0, %v2965_v48  ;;  %v3842_v48 = vld [vmem:[%s3314_s8 + $0x1f0] sm:$0xff] }
 0x15c   : > { %v886_v1 = vadd.f32 1.0, %v2967_v51  ;;  %v2969_v61 = vpop.eup %2968  ;;  %v3847_v51 = vld [vmem:[%s3314_s8 + $0x1c8] sm:$0xff] }
 0x15d   : > { %2972 = vrcp.f32 %v885_v62  ;;  %v2971_v4 = vpop.eup %2970  ;;  %v887_v2 = vadd.f32 1.0, %v2969_v61  ;;  %v3850_v61 = vld [vmem:[%s3314_s8 + $0x1d8] sm:$0xff] }
 0x15e   : > { %2974 = vrcp.f32 %v886_v1 }
 0x15f   : > { %2976 = vrcp.f32 %v887_v2  ;;  %v3866_v2 = vld [vmem:[%s3314_s8 + $0x1b8] sm:$0xff] }
 0x16a   : > { %v2973_v9 = vpop.eup %2972 }
 0x16b   : > { %v2975_v31 = vpop.eup %2974  ;;  %v897_v18 = vmul.f32 %v2973_v9, %v2971_v4  ;;  %v3855_v4 = vld [vmem:[%s3314_s8 + $0x1c0] sm:$0xff]  ;;  %v3858_v9 = vld [vmem:[%s3314_s8 + $0x1d0] sm:$0xff] }
 0x16c   : > { %v896_v41 = vmul.f32 0.0, %v2975_v31  ;;  %v2977_v0 = vpop.eup %2976  ;;  %v3863_v31 = vld [vmem:[%s3314_s8 + $0x1a8] sm:$0xff] }
 0x16e   : > { %v3738_v13 = vadd.f32 %v897_v18, %v896_v41  ;;  %v3871_v18 = vld [vmem:[%s3314_s8 + $0x1a0] sm:$0xff]  ;;  %v3874_v41 = vld [vmem:[%s3314_s8 + $0x1b0] sm:$0xff] }
 0x170   : > { %2978 = vtanh.f32 %v3738_v13 }
 0x17d   : > { %v2979_v21 = vpop.eup %2978 }
 0x17e   : > { %v900_v62 = vmul.f32 %v2979_v21, %v2977_v0  ;;  %v3882_v0 = vld [vmem:[%s3314_s8 + $0x198] sm:$0xff]  ;;  %v3887_v21 = vld [vmem:[%s3314_s8 + $0x180] sm:$0xff] }
 0x180   : > { %904 = vst [vmem:[%s903_s13] sm:$0xff] %v900_v62  ;;  %1048 = vmatmul.mubr.f32.vlgmr.msra.gmra.mxu0 %v900_v62  ;;  %1119 = vmatmul.mubr.f32.vlgmr.msra.gmra.mxu1 %v900_v62  ;;  %v3890_v62 = vld [vmem:[%s3314_s8 + $0x190] sm:$0xff]  ;;  %s4170_s13 = sadd.s32 %s2893_s11, %s1411_s10 }
 0x181   : > { %1237 = vmatpush1.msra.mxu0 %v3331_v5  ;;  %1308 = vmatpush1.msra.mxu1 %v3334_v6  ;;  %v4534_v5 = vld [vmem:[#allocation8_spill] sm:$0xff]  ;;  %v4535_v6 = vld [vmem:[#allocation6_spill] sm:$0xff]  ;;  %s2894_s15 = sshll.u32 %s4170_s13, 3 }
 0x182   : > { %1238 = vmatprep.subr.mxu0 %v3341_v8  ;;  %1309 = vmatprep.subr.mxu1 %v3356_v12  ;;  %v4536_v8 = vld [vmem:[#allocation10_spill] sm:$0xff]  ;;  %v4539_v12 = vld [vmem:[#allocation9_spill] sm:$0xff]  ;;  %4552 = vst [vmem:[#allocation8_spill] sm:$0xff] %v3831_v58  ;;  %4553 = vst [vmem:[#allocation6_spill] sm:$0xff] %v3834_v38  ;;  %s1415_s17 = sshra.s32 %s2894_s15, 3  ;;  %s1662_s24 = scalar_lea.vmem %s3742_s12, %s2894_s15 [#allocation5] }
 0x183   : > { %1239 = vmatpush1.msra.mxu0 %v3349_v10  ;;  %1310 = vmatpush1.msra.mxu1 %v3367_v15  ;;  %v4537_v10 = vld [vmem:[#allocation7_spill] sm:$0xff]  ;;  %s2934_s20 = sshll.u32 %s1415_s17, 5 }
 0x184   : > { %1240 = vmatprep.subr.mxu0 %v3353_v11  ;;  %1311 = vmatprep.subr.mxu1 %v3375_v17  ;;  %v4538_v11 = vld [vmem:[#allocation12_spill] sm:$0xff]  ;;  %v4541_v15 = vld [vmem:[#allocation11_spill] sm:$0xff]  ;;  %v4543_v17 = vld [vmem:[#allocation13_spill] sm:$0xff]  ;;  %s1419_s21 = scalar_lea.vmem [#allocation2], %s2934_s20 }
 0x185   : > { %1241 = vmatpush1.msra.mxu0 %v3364_v14  ;;  %1312 = vmatpush1.msra.mxu1 %v3386_v20  ;;  %v4540_v14 = vld [vmem:[#allocation14_spill] sm:$0xff]  ;;  %v4545_v20 = vld [vmem:[#allocation15_spill] sm:$0xff] }
 0x186   : > { %1242 = vmatprep.subr.mxu0 %v3372_v16  ;;  %1313 = vmatprep.subr.mxu1 %v3397_v23  ;;  %v4542_v16 = vld [vmem:[#allocation16_spill] sm:$0xff]  ;;  %v4547_v23 = vld [vmem:[#allocation17_spill] sm:$0xff] }
 0x187   : > { %1243 = vmatpush1.msra.mxu0 %v3383_v19  ;;  %1314 = vmatpush1.msra.mxu1 %v3405_v25  ;;  %v4544_v19 = vld [vmem:[#allocation18_spill] sm:$0xff]  ;;  %v4549_v25 = vld [vmem:[#allocation19_spill] sm:$0xff] }
 0x188   : > { %1244 = vmatprep.subr.mxu0 %v3394_v22  ;;  %1315 = vmatprep.subr.mxu1 %v3411_v27  ;;  %v4546_v22 = vld [vmem:[#allocation20_spill] sm:$0xff]  ;;  %v4551_v27 = vld [vmem:[#allocation22_spill] sm:$0xff] }
 0x189   : > { %1245 = vmatpush1.msra.mxu0 %v3402_v24  ;;  %1316 = vmatpush1.msra.mxu1 %v3424_v30  ;;  %v4548_v24 = vld [vmem:[#allocation21_spill] sm:$0xff] }
 0x18a   : > { %1246 = vmatprep.subr.mxu0 %v3408_v26  ;;  %1317 = vmatprep.subr.mxu1 %v3435_v33  ;;  %v4550_v26 = vmov 0.0   ;;  %v915_v33 = vld [vmem:[%s913_s25 + $0x8] sm:$0xff] }
 0x18b   : > { %1247 = vmatpush1.msra.mxu0 %v3421_v29  ;;  %1318 = vmatpush1.msra.mxu1 %v3443_v35  ;;  %v914_v29 = vld [vmem:[%s913_s25] sm:$0xff] }
 0x18c   : > { %1248 = vmatprep.subr.mxu0 %v3432_v32  ;;  %1319 = vmatprep.subr.mxu1 %v3449_v37 }
 0x18d   : > { %1249 = vmatpush1.msra.mxu0 %v3440_v34  ;;  %1320 = vmatpush1.msra.mxu1 %v3462_v40  ;;  %v916_v40 = vld [vmem:[%s913_s25 + $0x10] sm:$0xff] }
 0x18e   : > { %1250 = vmatprep.subr.mxu0 %v3446_v36  ;;  %1321 = vmatprep.subr.mxu1 %v3473_v43 }
 0x18f   : > { %1251 = vmatpush1.msra.mxu0 %v3459_v39  ;;  %1322 = vmatpush1.msra.mxu1 %v3481_v45  ;;  %v917_v45 = vld [vmem:[%s913_s25 + $0x18] sm:$0xff]  ;;  %s1665_s25 = smul.u32 3, %s3155_s18 }
 0x190   : > { %1252 = vmatprep.subr.mxu0 %v3470_v42  ;;  %1323 = vmatprep.subr.mxu1 %v3487_v47 }
 0x191   : > { %1253 = vmatpush1.msra.mxu0 %v3478_v44  ;;  %1324 = vmatpush1.msra.mxu1 %v3500_v50 }
 0x192   : > { %1254 = vmatprep.subr.mxu0 %v3484_v46  ;;  %1325 = vmatprep.subr.mxu1 %v3511_v53 }
 0x193   : > { %1255 = vmatpush1.msra.mxu0 %v3497_v49  ;;  %1326 = vmatpush1.msra.mxu1 %v3519_v55 }
 0x194   : > { %1256 = vmatprep.subr.mxu0 %v3508_v52  ;;  %1327 = vmatprep.subr.mxu1 %v3525_v57 }
 0x195   : > { %1257 = vmatpush1.msra.mxu0 %v3516_v54  ;;  %1328 = vmatpush1.msra.mxu1 %v3538_v60 }
 0x196   : > { %1258 = vmatprep.subr.mxu0 %v3522_v56  ;;  %1329 = vmatprep.subr.mxu1 %v3549_v63 }
 0x197   : > { %1259 = vmatpush1.msra.mxu0 %v3535_v59  ;;  %1330 = vmatpush1.msra.mxu1 %v4534_v5  ;;  %v3895_v5 = vld [vmem:[%s3314_s8 + $0x168] sm:$0xff] }
 0x198   : > { %1260 = vmatprep.subr.mxu0 %v4535_v6  ;;  %1331 = vmatprep.subr.mxu1 %v4536_v8  ;;  %v3898_v6 = vld [vmem:[%s3314_s8 + $0x178] sm:$0xff]  ;;  %v3903_v8 = vld [vmem:[%s3314_s8 + $0x160] sm:$0xff] }
 0x199   : > { %1261 = vmatpush1.msra.mxu0 %v4537_v10  ;;  %1332 = vmatpush1.msra.mxu1 %v4538_v11  ;;  %v3906_v10 = vld [vmem:[%s3314_s8 + $0x170] sm:$0xff]  ;;  %v3911_v11 = vld [vmem:[%s3314_s8 + $0x148] sm:$0xff] }
 0x19a   : > { %1262 = vmatprep.subr.mxu0 %v4539_v12  ;;  %1333 = vmatprep.subr.mxu1 %v4540_v14  ;;  %v3914_v12 = vld [vmem:[%s3314_s8 + $0x158] sm:$0xff]  ;;  %v3919_v14 = vld [vmem:[%s3314_s8 + $0x140] sm:$0xff] }
 0x19b   : > { %1263 = vmatpush1.msra.mxu0 %v4541_v15  ;;  %1334 = vmatpush1.msra.mxu1 %v4542_v16  ;;  %v3922_v15 = vld [vmem:[%s3314_s8 + $0x150] sm:$0xff]  ;;  %v3927_v16 = vld [vmem:[%s3314_s8 + $0x128] sm:$0xff] }
 0x19c   : > { %1264 = vmatprep.subr.mxu0 %v4543_v17  ;;  %1335 = vmatprep.subr.mxu1 %v4544_v19  ;;  %v3930_v17 = vld [vmem:[%s3314_s8 + $0x138] sm:$0xff]  ;;  %v3935_v19 = vld [vmem:[%s3314_s8 + $0x120] sm:$0xff] }
 0x19d   : > { %1265 = vmatpush1.msra.mxu0 %v4545_v20  ;;  %1336 = vmatpush1.msra.mxu1 %v4546_v22  ;;  %v3938_v20 = vld [vmem:[%s3314_s8 + $0x130] sm:$0xff]  ;;  %v3941_v22 = vld [vmem:[%s3314_s8 + $0x108] sm:$0xff] }
 0x19e   : > { %1266 = vmatprep.subr.mxu0 %v4547_v23  ;;  %1337 = vmatprep.subr.mxu1 %v4548_v24  ;;  %v3946_v23 = vld [vmem:[%s3314_s8 + $0x118] sm:$0xff]  ;;  %v3949_v24 = vld [vmem:[%s3314_s8 + $0x100] sm:$0xff] }
 0x19f   : > { %1267 = vmatpush1.msra.mxu0 %v4549_v25  ;;  %1300 = vmatprep.mubr.f32.mxu0 %v4550_v26  ;;  %v3952_v25 = vld [vmem:[%s3314_s8 + $0x110] sm:$0xff] }
 0x1a0   : > { %1338 = vmatpush1.msra.mxu1 %v4551_v27  ;;  %1371 = vmatprep.mubr.f32.mxu1 %v4550_v26  ;;  %v3957_v27 = vld [vmem:[%s3314_s8 + $0xe8] sm:$0xff] }
 0x1a1   : > { %1489 = vmatprep.subr.mxu0 %v3831_v58  ;;  %1560 = vmatprep.subr.mxu1 %v3834_v38 }
 0x240   : > { %v1049_v30 = vpop.f32.mrf.mxu0  ;;  %v1120_v39 = vpop.f32.mrf.mxu1 }
 0x241   : > { %v1125_v32 = vadd.f32 %v1049_v30, %v914_v29  ;;  %v1127_v42 = vadd.f32 %v1120_v39, %v916_v40  ;;  %v3960_v29 = vld [vmem:[%s3314_s8 + $0xf8] sm:$0xff]  ;;  %v3963_v30 = vld [vmem:[%s3314_s8 + $0xe0] sm:$0xff] }
 0x242   : > { %v1051_v34 = vpop.f32.mrf.mxu0  ;;  %v1122_v43 = vpop.f32.mrf.mxu1  ;;  %v3990_v39 = vld [vmem:[%s3314_s8 + $0xb8] sm:$0xff]  ;;  %v3995_v40 = vld [vmem:[%s3314_s8 + $0xa0] sm:$0xff] }
 0x243   : > { %v2883_v35 = vmul.f32 -1.442695, %v1125_v32  ;;  %v1126_v36 = vadd.f32 %v1051_v34, %v915_v33  ;;  %v2885_v44 = vmul.f32 -1.442695, %v1127_v42  ;;  %v1128_v47 = vadd.f32 %v1122_v43, %v917_v45  ;;  %v3968_v32 = vld [vmem:[%s3314_s8 + $0xf0] sm:$0xff]  ;;  %v3971_v33 = vld [vmem:[%s3314_s8 + $0xc8] sm:$0xff] }
 0x244   : > { %v3974_v34 = vld [vmem:[%s3314_s8 + $0xd8] sm:$0xff]  ;;  %v3998_v42 = vld [vmem:[%s3314_s8 + $0xb0] sm:$0xff]  ;;  %v4003_v43 = vld [vmem:[%s3314_s8 + $0x88] sm:$0xff] }
 0x245   : > { %2980 = vpow2.f32 %v2883_v35  ;;  %v2884_v37 = vmul.f32 -1.442695, %v1126_v36  ;;  %v3979_v35 = vld [vmem:[%s3314_s8 + $0xc0] sm:$0xff]  ;;  %v3982_v36 = vld [vmem:[%s3314_s8 + $0xd0] sm:$0xff] }
 0x246   : > { %v4011_v45 = vld [vmem:[%s3314_s8 + $0x80] sm:$0xff] }
 0x247   : > { %2982 = vpow2.f32 %v2884_v37  ;;  %v3987_v37 = vld [vmem:[%s3314_s8 + $0xa8] sm:$0xff] }
 0x248   : > { %2984 = vpow2.f32 %v2885_v44  ;;  %v4006_v44 = vld [vmem:[%s3314_s8 + $0x98] sm:$0xff] }
 0x252   : > { %v2981_v46 = vpop.eup %2980 }
 0x253   : > { %v1138_v49 = vadd.f32 1.0, %v2981_v46  ;;  %v4014_v46 = vld [vmem:[%s3314_s8 + $0x90] sm:$0xff] }
 0x254   : > { %v2983_v50 = vpop.eup %2982  ;;  %4554 = vst [vmem:[#allocation10_spill] sm:$0xff] %v4014_v46 }
 0x255   : > { %2986 = vrcp.f32 %v1138_v49  ;;  %v1139_v52 = vadd.f32 1.0, %v2983_v50  ;;  %v2985_v53 = vpop.eup %2984  ;;  %v4022_v49 = vld [vmem:[%s3314_s8 + $0x78] sm:$0xff]  ;;  %v4027_v50 = vld [vmem:[%s3314_s8 + $0x60] sm:$0xff] }
 0x256   : > { %2988 = vtanh.f32 %v1128_v47  ;;  %v1140_v57 = vadd.f32 1.0, %v2985_v53  ;;  %v4019_v47 = vld [vmem:[%s3314_s8 + $0x68] sm:$0xff]  ;;  %4556 = vst [vmem:[#allocation12_spill] sm:$0xff] %v4022_v49  ;;  %4557 = vst [vmem:[#allocation9_spill] sm:$0xff] %v4027_v50 }
 0x257   : > { %2990 = vrcp.f32 %v1139_v52  ;;  %4555 = vst [vmem:[#allocation7_spill] sm:$0xff] %v4019_v47  ;;  %v4030_v52 = vld [vmem:[%s3314_s8 + $0x70] sm:$0xff]  ;;  %v4035_v53 = vld [vmem:[%s3314_s8 + $0x48] sm:$0xff] }
 0x258   : > { %2992 = vrcp.f32 %v1140_v57  ;;  %4558 = vst [vmem:[#allocation14_spill] sm:$0xff] %v4030_v52  ;;  %4559 = vst [vmem:[#allocation11_spill] sm:$0xff] %v4035_v53  ;;  %v4051_v57 = vld [vmem:[%s3314_s8 + $0x28] sm:$0xff] }
 0x259   : > { %4563 = vst [vmem:[#allocation15_spill] sm:$0xff] %v4051_v57 }
 0x262   : > { %v2987_v54 = vpop.eup %2986 }
 0x263   : > { %v2989_v55 = vpop.eup %2988 }
 0x264   : > { %v2991_v56 = vpop.eup %2990  ;;  %v1150_v60 = vmul.f32 %v2989_v55, %v2987_v54  ;;  %v4038_v54 = vld [vmem:[%s3314_s8 + $0x58] sm:$0xff]  ;;  %v4043_v55 = vld [vmem:[%s3314_s8 + $0x40] sm:$0xff] }
 0x265   : > { %v1149_v59 = vmul.f32 %v2991_v56, %v3738_v13  ;;  %v2993_v1 = vpop.eup %2992  ;;  %v3879_v13 = vld [vmem:[%s3314_s8 + $0x188] sm:$0xff]  ;;  %4560 = vst [vmem:[#allocation16_spill] sm:$0xff] %v4038_v54  ;;  %4561 = vst [vmem:[#allocation13_spill] sm:$0xff] %v4043_v55  ;;  %v4046_v56 = vld [vmem:[%s3314_s8 + $0x50] sm:$0xff] }
 0x266   : > { %4562 = vst [vmem:[#allocation18_spill] sm:$0xff] %v4046_v56 }
 0x267   : > { %v3822_v63 = vadd.f32 %v1150_v60, %v1149_v59  ;;  %v4054_v59 = vld [vmem:[%s3314_s8 + $0x38] sm:$0xff]  ;;  %v4059_v60 = vld [vmem:[%s3314_s8 + $0x20] sm:$0xff] }
 0x268   : > { %4564 = vst [vmem:[#allocation20_spill] sm:$0xff] %v4054_v59  ;;  %4565 = vst [vmem:[#allocation17_spill] sm:$0xff] %v4059_v60 }
 0x269   : > { %2994 = vtanh.f32 %v3822_v63 }
 0x276   : > { %v2995_v28 = vpop.eup %2994 }
 0x277   : > { %v1153_v3 = vmul.f32 %v2995_v28, %v2993_v1  ;;  %v4062_v1 = vld [vmem:[%s3314_s8 + $0x30] sm:$0xff]  ;;  %v4067_v28 = vld [vmem:[%s3314_s8 + $0x8] sm:$0xff] }
 0x278   : > { %4566 = vst [vmem:[#allocation21_spill] sm:$0xff] %v4062_v1  ;;  %4567 = vst [vmem:[#allocation19_spill] sm:$0xff] %v4067_v28 }
 0x279   : > { %1157 = vst [vmem:[%s1156_s27] sm:$0xff] %v1153_v3  ;;  %1301 = vmatmul.mubr.f32.vlgmr.msra.gmra.mxu0 %v1153_v3  ;;  %1372 = vmatmul.mubr.f32.vlgmr.msra.gmra.mxu1 %v1153_v3  ;;  %v4070_v3 = vld [vmem:[%s3314_s8 + $0x18] sm:$0xff]  ;;  %s2900_s27 = sshll.u32 %s3813_s14, 2 }
 0x27a   : > { %1553 = vmatprep.mubr.f32.mxu0 %v4550_v26  ;;  %1624 = vmatprep.mubr.f32.mxu1 %v4550_v26  ;;  %4568 = vst [vmem:[#allocation22_spill] sm:$0xff] %v4070_v3  ;;  %v4075_v26 = vld [vmem:[%s3314_s8] sm:$0xff]  ;;  %s4250_s28 = sadd.s32 %s2900_s27, %s1665_s25 }
 0x27b   : > { %1490 = vmatpush1.msra.mxu0 %v3839_v7  ;;  %1561 = vmatpush1.msra.mxu1 %v3842_v48  ;;  %4569 = vst [vmem:[#allocation23_spill] sm:$0xff] %v4075_v26  ;;  %s2901_s29 = sshll.u32 %s4250_s28, 3 }
 0x27c   : > { %1491 = vmatprep.subr.mxu0 %v3847_v51  ;;  %1562 = vmatprep.subr.mxu1 %v3850_v61  ;;  %s1668_s30 = sshra.s32 %s2901_s29, 3  ;;  %s1915_s6 = scalar_lea.vmem %s3742_s12, %s2901_s29 [#allocation5] }
 0x27d   : > { %1492 = vmatpush1.msra.mxu0 %v3855_v4  ;;  %1563 = vmatpush1.msra.mxu1 %v3858_v9  ;;  %s2935_s5 = sshll.u32 %s1668_s30, 5  ;;  %s2422_s30 = smul.u32 56, %s3813_s14 }
 0x27e   : > { %1493 = vmatprep.subr.mxu0 %v3863_v31  ;;  %1564 = vmatprep.subr.mxu1 %v3866_v2  ;;  %s1672_s26 = scalar_lea.vmem [#allocation2], %s2935_s5 }
 0x27f   : > { %1494 = vmatpush1.msra.mxu0 %v3871_v18  ;;  %1565 = vmatpush1.msra.mxu1 %v3874_v41  ;;  %s2423_s5 = sshra.s32 %s2422_s30, 3 }
 0x280   : > { %1495 = vmatprep.subr.mxu0 %v3879_v13  ;;  %1566 = vmatprep.subr.mxu1 %v3882_v0 }
 0x281   : > { %1496 = vmatpush1.msra.mxu0 %v3887_v21  ;;  %1567 = vmatpush1.msra.mxu1 %v3890_v62 }
 0x282   : > { %1497 = vmatprep.subr.mxu0 %v3895_v5  ;;  %1568 = vmatprep.subr.mxu1 %v3898_v6 }
 0x283   : > { %1498 = vmatpush1.msra.mxu0 %v3903_v8  ;;  %1569 = vmatpush1.msra.mxu1 %v3906_v10 }
 0x284   : > { %1499 = vmatprep.subr.mxu0 %v3911_v11  ;;  %1570 = vmatprep.subr.mxu1 %v3914_v12 }
 0x285   : > { %1500 = vmatpush1.msra.mxu0 %v3919_v14  ;;  %1571 = vmatpush1.msra.mxu1 %v3922_v15 }
 0x286   : > { %1501 = vmatprep.subr.mxu0 %v3927_v16  ;;  %1572 = vmatprep.subr.mxu1 %v3930_v17 }
 0x287   : > { %1502 = vmatpush1.msra.mxu0 %v3935_v19  ;;  %1573 = vmatpush1.msra.mxu1 %v3938_v20 }
 0x288   : > { %1503 = vmatprep.subr.mxu0 %v3941_v22  ;;  %1574 = vmatprep.subr.mxu1 %v3946_v23 }
 0x289   : > { %1504 = vmatpush1.msra.mxu0 %v3949_v24  ;;  %1575 = vmatpush1.msra.mxu1 %v3952_v25 }
 0x28a   : > { %1505 = vmatprep.subr.mxu0 %v3957_v27  ;;  %1576 = vmatprep.subr.mxu1 %v3960_v29 }
 0x28b   : > { %1506 = vmatpush1.msra.mxu0 %v3963_v30  ;;  %1577 = vmatpush1.msra.mxu1 %v3968_v32 }
 0x28c   : > { %1507 = vmatprep.subr.mxu0 %v3971_v33  ;;  %1578 = vmatprep.subr.mxu1 %v3974_v34 }
 0x28d   : > { %1508 = vmatpush1.msra.mxu0 %v3979_v35  ;;  %1579 = vmatpush1.msra.mxu1 %v3982_v36 }
 0x28e   : > { %1509 = vmatprep.subr.mxu0 %v3987_v37  ;;  %1580 = vmatprep.subr.mxu1 %v3990_v39 }
 0x28f   : > { %1510 = vmatpush1.msra.mxu0 %v3995_v40  ;;  %1581 = vmatpush1.msra.mxu1 %v3998_v42 }
 0x290   : > { %1511 = vmatprep.subr.mxu0 %v4003_v43  ;;  %1582 = vmatprep.subr.mxu1 %v4006_v44 }
 0x291   : > { %1512 = vmatpush1.msra.mxu0 %v4011_v45  ;;  %1583 = vmatpush1.msra.mxu1 %v4014_v46 }
 0x292   : > { %1513 = vmatprep.subr.mxu0 %v4019_v47  ;;  %1584 = vmatprep.subr.mxu1 %v4022_v49 }
 0x293   : > { %1514 = vmatpush1.msra.mxu0 %v4027_v50  ;;  %1585 = vmatpush1.msra.mxu1 %v4030_v52  ;;  %v1170_v52 = vld [vmem:[%s1166_s7 + $0x18] sm:$0xff] }
 0x294   : > { %1515 = vmatprep.subr.mxu0 %v4035_v53  ;;  %1586 = vmatprep.subr.mxu1 %v4038_v54  ;;  %v4078_v54 = vld [vmem:[%s3314_s8 + $0x10] sm:$0xff] }
 0x295   : > { %1516 = vmatpush1.msra.mxu0 %v4043_v55  ;;  %1587 = vmatpush1.msra.mxu1 %v4046_v56  ;;  %4570 = vst [vmem:[#allocation24_spill] sm:$0xff] %v4078_v54 }
 0x296   : > { %1517 = vmatprep.subr.mxu0 %v4051_v57  ;;  %1588 = vmatprep.subr.mxu1 %v4054_v59  ;;  %v1169_v57 = vld [vmem:[%s1166_s7 + $0x10] sm:$0xff] }
 0x297   : > { %1518 = vmatpush1.msra.mxu0 %v4059_v60  ;;  %1589 = vmatpush1.msra.mxu1 %v4062_v1  ;;  %v1168_v1 = vld [vmem:[%s1166_s7 + $0x8] sm:$0xff] }
 0x298   : > { %1519 = vmatprep.subr.mxu0 %v4067_v28  ;;  %1590 = vmatprep.subr.mxu1 %v4070_v3  ;;  %v1167_v3 = vld [vmem:[%s1166_s7] sm:$0xff]  ;;  %s1917_s7 = smul.u32 5, %s3813_s14 }
 0x299   : > { %1520 = vmatpush1.msra.mxu0 %v4075_v26  ;;  %1591 = vmatpush1.msra.mxu1 %v4078_v54 }
 0x29a   : > { %1742 = vmatprep.subr.mxu0 %v3831_v58  ;;  %1813 = vmatprep.subr.mxu1 %v3834_v38 }
 0x339   : > { %v1302_v28 = vpop.f32.mrf.mxu0  ;;  %v1373_v59 = vpop.f32.mrf.mxu1 }
 0x33a   : > { %v1378_v26 = vadd.f32 %v1302_v28, %v1167_v3  ;;  %v1380_v56 = vadd.f32 %v1373_v59, %v1169_v57  ;;  %v4577_v3 = vld [vmem:[#allocation16_spill] sm:$0xff] }
 0x33b   : > { %v1304_v54 = vpop.f32.mrf.mxu0  ;;  %v1375_v55 = vpop.f32.mrf.mxu1 }
 0x33c   : > { %v2890_v60 = vmul.f32 -1.442695, %v1378_v26  ;;  %v1379_v58 = vadd.f32 %v1304_v54, %v1168_v1  ;;  %v2892_v53 = vmul.f32 -1.442695, %v1380_v56  ;;  %v1381_v49 = vadd.f32 %v1375_v55, %v1170_v52  ;;  %v4573_v52 = vld [vmem:[#allocation12_spill] sm:$0xff]  ;;  %v4575_v55 = vld [vmem:[#allocation14_spill] sm:$0xff] }
 0x33d   : > { %v4576_v1 = vld [vmem:[#allocation11_spill] sm:$0xff] }
 0x33e   : > { %2996 = vpow2.f32 %v2890_v60  ;;  %v2891_v38 = vmul.f32 -1.442695, %v1379_v58 }
 0x340   : > { %2998 = vpow2.f32 %v2891_v38 }
 0x341   : > { %3000 = vpow2.f32 %v2892_v53  ;;  %v4574_v53 = vld [vmem:[#allocation9_spill] sm:$0xff] }
 0x34b   : > { %v2997_v50 = vpop.eup %2996 }
 0x34c   : > { %v1391_v47 = vadd.f32 1.0, %v2997_v50 }
 0x34d   : > { %v2999_v46 = vpop.eup %2998 }
 0x34e   : > { %3002 = vrcp.f32 %v1391_v47  ;;  %v1392_v28 = vadd.f32 1.0, %v2999_v46  ;;  %v3001_v26 = vpop.eup %3000 }
 0x34f   : > { %3004 = vtanh.f32 %v1381_v49  ;;  %v1393_v60 = vadd.f32 1.0, %v3001_v26  ;;  %v4572_v49 = vld [vmem:[#allocation7_spill] sm:$0xff]  ;;  %v4579_v26 = vld [vmem:[#allocation18_spill] sm:$0xff] }
 0x350   : > { %3006 = vrcp.f32 %v1392_v28  ;;  %v4578_v28 = vld [vmem:[#allocation13_spill] sm:$0xff] }
 0x351   : > { %3008 = vrcp.f32 %v1393_v60  ;;  %v4583_v60 = vld [vmem:[#allocation21_spill] sm:$0xff] }
 0x35b   : > { %v3003_v58 = vpop.eup %3002 }
 0x35c   : > { %v3005_v38 = vpop.eup %3004 }
 0x35d   : > { %v3007_v54 = vpop.eup %3006  ;;  %v1403_v56 = vmul.f32 %v3005_v38, %v3003_v58  ;;  %v4580_v58 = vld [vmem:[#allocation15_spill] sm:$0xff]  ;;  %v4581_v38 = vld [vmem:[#allocation20_spill] sm:$0xff] }
 0x35e   : > { %v1402_v57 = vmul.f32 %v3007_v54, %v3822_v63  ;;  %v3009_v50 = vpop.eup %3008  ;;  %v4571_v63 = vld [vmem:[#allocation10_spill] sm:$0xff]  ;;  %v4582_v54 = vld [vmem:[#allocation17_spill] sm:$0xff] }
 0x360   : > { %v4096_v59 = vadd.f32 %v1403_v56, %v1402_v57  ;;  %v4584_v57 = vld [vmem:[#allocation19_spill] sm:$0xff]  ;;  %v4585_v56 = vld [vmem:[#allocation22_spill] sm:$0xff] }
 0x362   : > { %3010 = vtanh.f32 %v4096_v59 }
 0x36f   : > { %v3011_v47 = vpop.eup %3010 }
 0x370   : > { %v1406_v46 = vmul.f32 %v3011_v47, %v3009_v50  ;;  %v4586_v50 = vld [vmem:[#allocation23_spill] sm:$0xff]  ;;  %v4587_v47 = vmov 0.0  }
 0x372   : > { %1410 = vst [vmem:[%s1409_s9] sm:$0xff] %v1406_v46  ;;  %1554 = vmatmul.mubr.f32.vlgmr.msra.gmra.mxu0 %v1406_v46  ;;  %1625 = vmatmul.mubr.f32.vlgmr.msra.gmra.mxu1 %v1406_v46  ;;  %v4588_v46 = vld [vmem:[#allocation24_spill] sm:$0xff]  ;;  %s2907_s9 = sshll.u32 %s3155_s18, 1 }
 0x373   : > { %1743 = vmatpush1.msra.mxu0 %v3839_v7  ;;  %1814 = vmatpush1.msra.mxu1 %v3842_v48  ;;  %s4328_s10 = sadd.s32 %s2907_s9, %s1917_s7  ;;  %s2670_s7 = scalar_lea.vmem %s3742_s12, %s2422_s30 [#allocation5] }
 0x374   : > { %1744 = vmatprep.subr.mxu0 %v3847_v51  ;;  %1815 = vmatprep.subr.mxu1 %v3850_v61  ;;  %s2908_s11 = sshll.u32 %s4328_s10, 3  ;;  %s2926_s9 = sshll.u32 (%p3167_p4), %s3155_s18, 3 }
 0x375   : > { %1745 = vmatpush1.msra.mxu0 %v3855_v4  ;;  %1816 = vmatpush1.msra.mxu1 %v3858_v9  ;;  %s1921_s13 = sshra.s32 %s2908_s11, 3  ;;  %s2168_s20 = scalar_lea.vmem %s3742_s12, %s2908_s11 [#allocation5] }
 0x376   : > { %1746 = vmatprep.subr.mxu0 %v3863_v31  ;;  %1817 = vmatprep.subr.mxu1 %v3866_v2  ;;  %s2936_s15 = sshll.u32 %s1921_s13, 5  ;;  %s2680_s11 = scalar_lea.vmem (%p3167_p4), %s4451_s4, %s2926_s9 }
 0x377   : > { %1747 = vmatpush1.msra.mxu0 %v3871_v18  ;;  %1818 = vmatpush1.msra.mxu1 %v3874_v41  ;;  %s1925_s17 = scalar_lea.vmem [#allocation2], %s2936_s15 }
 0x378   : > { %1748 = vmatprep.subr.mxu0 %v3879_v13  ;;  %1819 = vmatprep.subr.mxu1 %v3882_v0 }
 0x379   : > { %1749 = vmatpush1.msra.mxu0 %v3887_v21  ;;  %1820 = vmatpush1.msra.mxu1 %v3890_v62 }
 0x37a   : > { %1750 = vmatprep.subr.mxu0 %v3895_v5  ;;  %1821 = vmatprep.subr.mxu1 %v3898_v6 }
 0x37b   : > { %1751 = vmatpush1.msra.mxu0 %v3903_v8  ;;  %1822 = vmatpush1.msra.mxu1 %v3906_v10 }
 0x37c   : > { %1752 = vmatprep.subr.mxu0 %v3911_v11  ;;  %1823 = vmatprep.subr.mxu1 %v3914_v12 }
 0x37d   : > { %1753 = vmatpush1.msra.mxu0 %v3919_v14  ;;  %1824 = vmatpush1.msra.mxu1 %v3922_v15 }
 0x37e   : > { %1754 = vmatprep.subr.mxu0 %v3927_v16  ;;  %1825 = vmatprep.subr.mxu1 %v3930_v17 }
 0x37f   : > { %1755 = vmatpush1.msra.mxu0 %v3935_v19  ;;  %1826 = vmatpush1.msra.mxu1 %v3938_v20 }
 0x380   : > { %1756 = vmatprep.subr.mxu0 %v3941_v22  ;;  %1827 = vmatprep.subr.mxu1 %v3946_v23 }
 0x381   : > { %1757 = vmatpush1.msra.mxu0 %v3949_v24  ;;  %1828 = vmatpush1.msra.mxu1 %v3952_v25 }
 0x382   : > { %1758 = vmatprep.subr.mxu0 %v3957_v27  ;;  %1829 = vmatprep.subr.mxu1 %v3960_v29 }
 0x383   : > { %1759 = vmatpush1.msra.mxu0 %v3963_v30  ;;  %1830 = vmatpush1.msra.mxu1 %v3968_v32 }
 0x384   : > { %1760 = vmatprep.subr.mxu0 %v3971_v33  ;;  %1831 = vmatprep.subr.mxu1 %v3974_v34 }
 0x385   : > { %1761 = vmatpush1.msra.mxu0 %v3979_v35  ;;  %1832 = vmatpush1.msra.mxu1 %v3982_v36 }
 0x386   : > { %1762 = vmatprep.subr.mxu0 %v3987_v37  ;;  %1833 = vmatprep.subr.mxu1 %v3990_v39 }
 0x387   : > { %1763 = vmatpush1.msra.mxu0 %v3995_v40  ;;  %1834 = vmatpush1.msra.mxu1 %v3998_v42 }
 0x388   : > { %1764 = vmatprep.subr.mxu0 %v4003_v43  ;;  %1835 = vmatprep.subr.mxu1 %v4006_v44 }
 0x389   : > { %1765 = vmatpush1.msra.mxu0 %v4011_v45  ;;  %1836 = vmatpush1.msra.mxu1 %v4571_v63 }
 0x38a   : > { %1766 = vmatprep.subr.mxu0 %v4572_v49  ;;  %1837 = vmatprep.subr.mxu1 %v4573_v52 }
 0x38b   : > { %1767 = vmatpush1.msra.mxu0 %v4574_v53  ;;  %1838 = vmatpush1.msra.mxu1 %v4575_v55  ;;  %v1423_v55 = vld [vmem:[%s1419_s21 + $0x18] sm:$0xff] }
 0x38c   : > { %1768 = vmatprep.subr.mxu0 %v4576_v1  ;;  %1839 = vmatprep.subr.mxu1 %v4577_v3 }
 0x38d   : > { %1769 = vmatpush1.msra.mxu0 %v4578_v28  ;;  %1840 = vmatpush1.msra.mxu1 %v4579_v26  ;;  %v4589_v26 = vld [vmem:[#allocation8_spill] sm:$0xff] }
 0x38e   : > { %1770 = vmatprep.subr.mxu0 %v4580_v58  ;;  %1841 = vmatprep.subr.mxu1 %v4581_v38  ;;  %v4590_v58 = vld [vmem:[#allocation6_spill] sm:$0xff]  ;;  %v1422_v38 = vld [vmem:[%s1419_s21 + $0x10] sm:$0xff] }
 0x38f   : > { %1771 = vmatpush1.msra.mxu0 %v4582_v54  ;;  %1842 = vmatpush1.msra.mxu1 %v4583_v60 }
 0x390   : > { %1772 = vmatprep.subr.mxu0 %v4584_v57  ;;  %1843 = vmatprep.subr.mxu1 %v4585_v56  ;;  %v1421_v57 = vld [vmem:[%s1419_s21 + $0x8] sm:$0xff] }
 0x391   : > { %1773 = vmatpush1.msra.mxu0 %v4586_v50  ;;  %1806 = vmatprep.mubr.f32.mxu0 %v4587_v47  ;;  %v1420_v50 = vld [vmem:[%s1419_s21] sm:$0xff]  ;;  %s2170_s21 = smul.u32 6, %s3813_s14 }
 0x392   : > { %1844 = vmatpush1.msra.mxu1 %v4588_v46  ;;  %1877 = vmatprep.mubr.f32.mxu1 %v4587_v47 }
 0x393   : > { %1995 = vmatprep.subr.mxu0 %v4589_v26  ;;  %2066 = vmatprep.subr.mxu1 %v4590_v58 }
 0x432   : > { %v1555_v56 = vpop.f32.mrf.mxu0  ;;  %v1626_v54 = vpop.f32.mrf.mxu1 }
 0x433   : > { %v1631_v46 = vadd.f32 %v1555_v56, %v1420_v50  ;;  %v1633_v28 = vadd.f32 %v1626_v54, %v1422_v38 }
 0x434   : > { %v1557_v47 = vpop.f32.mrf.mxu0  ;;  %v1628_v3 = vpop.f32.mrf.mxu1 }
 0x435   : > { %v2897_v60 = vmul.f32 -1.442695, %v1631_v46  ;;  %v1632_v26 = vadd.f32 %v1557_v47, %v1421_v57  ;;  %v2899_v1 = vmul.f32 -1.442695, %v1633_v28  ;;  %v1634_v52 = vadd.f32 %v1628_v3, %v1423_v55  ;;  %v4593_v55 = vld [vmem:[#allocation12_spill] sm:$0xff]  ;;  %v4595_v3 = vld [vmem:[#allocation14_spill] sm:$0xff] }
 0x436   : > { %v4596_v47 = vld [vmem:[#allocation11_spill] sm:$0xff]  ;;  %v4597_v46 = vld [vmem:[#allocation16_spill] sm:$0xff] }
 0x437   : > { %3012 = vpow2.f32 %v2897_v60  ;;  %v2898_v58 = vmul.f32 -1.442695, %v1632_v26 }
 0x439   : > { %3014 = vpow2.f32 %v2898_v58 }
 0x43a   : > { %3016 = vpow2.f32 %v2899_v1  ;;  %v4594_v1 = vld [vmem:[#allocation9_spill] sm:$0xff] }
 0x444   : > { %v3013_v53 = vpop.eup %3012 }
 0x445   : > { %v1644_v49 = vadd.f32 1.0, %v3013_v53 }
 0x446   : > { %v3015_v63 = vpop.eup %3014 }
 0x447   : > { %3018 = vrcp.f32 %v1644_v49  ;;  %v1645_v56 = vadd.f32 1.0, %v3015_v63  ;;  %v3017_v60 = vpop.eup %3016 }
 0x448   : > { %3020 = vtanh.f32 %v1634_v52  ;;  %v1646_v50 = vadd.f32 1.0, %v3017_v60  ;;  %v4592_v52 = vld [vmem:[#allocation7_spill] sm:$0xff]  ;;  %v4599_v60 = vld [vmem:[#allocation18_spill] sm:$0xff] }
 0x449   : > { %3022 = vrcp.f32 %v1645_v56  ;;  %v4598_v56 = vld [vmem:[#allocation13_spill] sm:$0xff] }
 0x44a   : > { %3024 = vrcp.f32 %v1646_v50  ;;  %v4603_v50 = vld [vmem:[#allocation21_spill] sm:$0xff] }
 0x454   : > { %v3019_v26 = vpop.eup %3018 }
 0x455   : > { %v3021_v58 = vpop.eup %3020 }
 0x456   : > { %v3023_v57 = vpop.eup %3022  ;;  %v1656_v28 = vmul.f32 %v3021_v58, %v3019_v26  ;;  %v4600_v26 = vld [vmem:[#allocation15_spill] sm:$0xff]  ;;  %v4601_v58 = vld [vmem:[#allocation20_spill] sm:$0xff] }
 0x457   : > { %v1655_v38 = vmul.f32 %v3023_v57, %v4096_v59  ;;  %v3025_v53 = vpop.eup %3024  ;;  %v4591_v59 = vld [vmem:[#allocation10_spill] sm:$0xff]  ;;  %v4602_v57 = vld [vmem:[#allocation17_spill] sm:$0xff] }
 0x459   : > { %v4176_v54 = vadd.f32 %v1656_v28, %v1655_v38  ;;  %v4604_v38 = vld [vmem:[#allocation19_spill] sm:$0xff]  ;;  %v4605_v28 = vld [vmem:[#allocation22_spill] sm:$0xff] }
 0x45b   : > { %3026 = vtanh.f32 %v4176_v54 }
 0x468   : > { %v3027_v49 = vpop.eup %3026 }
 0x469   : > { %v1659_v63 = vmul.f32 %v3027_v49, %v3025_v53  ;;  %v4606_v53 = vld [vmem:[#allocation23_spill] sm:$0xff]  ;;  %v4607_v49 = vmov 0.0  }
 0x46b   : > { %1663 = vst [vmem:[%s1662_s24] sm:$0xff] %v1659_v63  ;;  %1807 = vmatmul.mubr.f32.vlgmr.msra.gmra.mxu0 %v1659_v63  ;;  %1878 = vmatmul.mubr.f32.vlgmr.msra.gmra.mxu1 %v1659_v63  ;;  %v4608_v63 = vld [vmem:[#allocation24_spill] sm:$0xff]  ;;  %s4408_s24 = sadd.s32 %s3155_s18, %s2170_s21 }
 0x46c   : > { %1996 = vmatpush1.msra.mxu0 %v3839_v7  ;;  %2067 = vmatpush1.msra.mxu1 %v3842_v48  ;;  %s2914_s25 = sshll.u32 %s4408_s24, 3 }
 0x46d   : > { %1997 = vmatprep.subr.mxu0 %v3847_v51  ;;  %2068 = vmatprep.subr.mxu1 %v3850_v61  ;;  %s2173_s27 = sshra.s32 %s2914_s25, 3 }
 0x46e   : > { %1998 = vmatpush1.msra.mxu0 %v3855_v4  ;;  %2069 = vmatpush1.msra.mxu1 %v3858_v9  ;;  %s2937_s28 = sshll.u32 %s2173_s27, 5 }
 0x46f   : > { %1999 = vmatprep.subr.mxu0 %v3863_v31  ;;  %2070 = vmatprep.subr.mxu1 %v3866_v2  ;;  %s2177_s29 = scalar_lea.vmem [#allocation2], %s2937_s28 }
 0x470   : > { %2000 = vmatpush1.msra.mxu0 %v3871_v18  ;;  %2071 = vmatpush1.msra.mxu1 %v3874_v41 }
 0x471   : > { %2001 = vmatprep.subr.mxu0 %v3879_v13  ;;  %2072 = vmatprep.subr.mxu1 %v3882_v0 }
 0x472   : > { %2002 = vmatpush1.msra.mxu0 %v3887_v21  ;;  %2073 = vmatpush1.msra.mxu1 %v3890_v62 }
 0x473   : > { %2003 = vmatprep.subr.mxu0 %v3895_v5  ;;  %2074 = vmatprep.subr.mxu1 %v3898_v6 }
 0x474   : > { %2004 = vmatpush1.msra.mxu0 %v3903_v8  ;;  %2075 = vmatpush1.msra.mxu1 %v3906_v10 }
 0x475   : > { %2005 = vmatprep.subr.mxu0 %v3911_v11  ;;  %2076 = vmatprep.subr.mxu1 %v3914_v12 }
 0x476   : > { %2006 = vmatpush1.msra.mxu0 %v3919_v14  ;;  %2077 = vmatpush1.msra.mxu1 %v3922_v15 }
 0x477   : > { %2007 = vmatprep.subr.mxu0 %v3927_v16  ;;  %2078 = vmatprep.subr.mxu1 %v3930_v17 }
 0x478   : > { %2008 = vmatpush1.msra.mxu0 %v3935_v19  ;;  %2079 = vmatpush1.msra.mxu1 %v3938_v20 }
 0x479   : > { %2009 = vmatprep.subr.mxu0 %v3941_v22  ;;  %2080 = vmatprep.subr.mxu1 %v3946_v23 }
 0x47a   : > { %2010 = vmatpush1.msra.mxu0 %v3949_v24  ;;  %2081 = vmatpush1.msra.mxu1 %v3952_v25 }
 0x47b   : > { %2011 = vmatprep.subr.mxu0 %v3957_v27  ;;  %2082 = vmatprep.subr.mxu1 %v3960_v29 }
 0x47c   : > { %2012 = vmatpush1.msra.mxu0 %v3963_v30  ;;  %2083 = vmatpush1.msra.mxu1 %v3968_v32 }
 0x47d   : > { %2013 = vmatprep.subr.mxu0 %v3971_v33  ;;  %2084 = vmatprep.subr.mxu1 %v3974_v34 }
 0x47e   : > { %2014 = vmatpush1.msra.mxu0 %v3979_v35  ;;  %2085 = vmatpush1.msra.mxu1 %v3982_v36 }
 0x47f   : > { %2015 = vmatprep.subr.mxu0 %v3987_v37  ;;  %2086 = vmatprep.subr.mxu1 %v3990_v39 }
 0x480   : > { %2016 = vmatpush1.msra.mxu0 %v3995_v40  ;;  %2087 = vmatpush1.msra.mxu1 %v3998_v42 }
 0x481   : > { %2017 = vmatprep.subr.mxu0 %v4003_v43  ;;  %2088 = vmatprep.subr.mxu1 %v4006_v44 }
 0x482   : > { %2018 = vmatpush1.msra.mxu0 %v4011_v45  ;;  %2089 = vmatpush1.msra.mxu1 %v4591_v59 }
 0x483   : > { %2019 = vmatprep.subr.mxu0 %v4592_v52  ;;  %2090 = vmatprep.subr.mxu1 %v4593_v55 }
 0x484   : > { %2020 = vmatpush1.msra.mxu0 %v4594_v1  ;;  %2091 = vmatpush1.msra.mxu1 %v4595_v3  ;;  %v1676_v3 = vld [vmem:[%s1672_s26 + $0x18] sm:$0xff] }
 0x485   : > { %2021 = vmatprep.subr.mxu0 %v4596_v47  ;;  %2092 = vmatprep.subr.mxu1 %v4597_v46 }
 0x486   : > { %2022 = vmatpush1.msra.mxu0 %v4598_v56  ;;  %2093 = vmatpush1.msra.mxu1 %v4599_v60  ;;  %v4609_v60 = vld [vmem:[#allocation8_spill] sm:$0xff] }
 0x487   : > { %2023 = vmatprep.subr.mxu0 %v4600_v26  ;;  %2094 = vmatprep.subr.mxu1 %v4601_v58  ;;  %v4610_v26 = vld [vmem:[#allocation6_spill] sm:$0xff]  ;;  %v1675_v58 = vld [vmem:[%s1672_s26 + $0x10] sm:$0xff] }
 0x488   : > { %2024 = vmatpush1.msra.mxu0 %v4602_v57  ;;  %2095 = vmatpush1.msra.mxu1 %v4603_v50 }
 0x489   : > { %2025 = vmatprep.subr.mxu0 %v4604_v38  ;;  %2096 = vmatprep.subr.mxu1 %v4605_v28  ;;  %v1674_v38 = vld [vmem:[%s1672_s26 + $0x8] sm:$0xff] }
 0x48a   : > { %2026 = vmatpush1.msra.mxu0 %v4606_v53  ;;  %2059 = vmatprep.mubr.f32.mxu0 %v4607_v49  ;;  %v1673_v53 = vld [vmem:[%s1672_s26] sm:$0xff]  ;;  %s2938_s26 = sshll.u32 %s2423_s5, 5 }
 0x48b   : > { %2097 = vmatpush1.msra.mxu1 %v4608_v63  ;;  %2130 = vmatprep.mubr.f32.mxu1 %v4607_v49 }
 0x48c   : > { %2247 = vmatprep.subr.mxu0 %v4609_v60  ;;  %2318 = vmatprep.subr.mxu1 %v4610_v26 }
 0x52b   : > { %v1808_v28 = vpop.f32.mrf.mxu0  ;;  %v1879_v57 = vpop.f32.mrf.mxu1 }
 0x52c   : > { %v1884_v63 = vadd.f32 %v1808_v28, %v1673_v53  ;;  %v1886_v56 = vadd.f32 %v1879_v57, %v1675_v58 }
 0x52d   : > { %v1810_v49 = vpop.f32.mrf.mxu0  ;;  %v1881_v46 = vpop.f32.mrf.mxu1 }
 0x52e   : > { %v2904_v50 = vmul.f32 -1.442695, %v1884_v63  ;;  %v1885_v60 = vadd.f32 %v1810_v49, %v1674_v38  ;;  %v2906_v47 = vmul.f32 -1.442695, %v1886_v56  ;;  %v1887_v55 = vadd.f32 %v1881_v46, %v1676_v3  ;;  %v2496_v46 = vld [vmem:[%s3314_s8 + $0x1f8] sm:$0xff] }
 0x530   : > { %3028 = vpow2.f32 %v2904_v50  ;;  %v2905_v26 = vmul.f32 -1.442695, %v1885_v60  ;;  %v2493_v60 = vld [vmem:[%s3314_s8 + $0x1e0] sm:$0xff] }
 0x532   : > { %3030 = vpow2.f32 %v2905_v26  ;;  %v2495_v26 = vld [vmem:[%s3314_s8 + $0x1f0] sm:$0xff] }
 0x533   : > { %3032 = vpow2.f32 %v2906_v47  ;;  %v2494_v47 = vld [vmem:[%s3314_s8 + $0x1e8] sm:$0xff] }
 0x53d   : > { %v3029_v1 = vpop.eup %3028 }
 0x53e   : > { %v1897_v52 = vadd.f32 1.0, %v3029_v1 }
 0x53f   : > { %v3031_v59 = vpop.eup %3030 }
 0x540   : > { %3034 = vrcp.f32 %v1897_v52  ;;  %v1898_v28 = vadd.f32 1.0, %v3031_v59  ;;  %v3033_v50 = vpop.eup %3032 }
 0x541   : > { %3036 = vtanh.f32 %v1887_v55  ;;  %v1899_v63 = vadd.f32 1.0, %v3033_v50  ;;  %v2492_v50 = vld [vmem:[%s3314_s8 + $0x1d8] sm:$0xff] }
 0x542   : > { %3038 = vrcp.f32 %v1898_v28  ;;  %v2490_v28 = vld [vmem:[%s3314_s8 + $0x1c8] sm:$0xff] }
 0x543   : > { %3040 = vrcp.f32 %v1899_v63  ;;  %v2488_v63 = vld [vmem:[%s3314_s8 + $0x1b8] sm:$0xff] }
 0x54d   : > { %v3035_v38 = vpop.eup %3034 }
 0x54e   : > { %v3037_v53 = vpop.eup %3036 }
 0x54f   : > { %v3039_v49 = vpop.eup %3038  ;;  %v1909_v56 = vmul.f32 %v3037_v53, %v3035_v38  ;;  %v2489_v38 = vld [vmem:[%s3314_s8 + $0x1c0] sm:$0xff]  ;;  %v2491_v53 = vld [vmem:[%s3314_s8 + $0x1d0] sm:$0xff] }
 0x550   : > { %v1908_v58 = vmul.f32 %v3039_v49, %v4176_v54  ;;  %v3041_v1 = vpop.eup %3040  ;;  %v2486_v49 = vld [vmem:[%s3314_s8 + $0x1a8] sm:$0xff] }
 0x552   : > { %v4256_v57 = vadd.f32 %v1909_v56, %v1908_v58  ;;  %v2485_v58 = vld [vmem:[%s3314_s8 + $0x1a0] sm:$0xff]  ;;  %v2487_v56 = vld [vmem:[%s3314_s8 + $0x1b0] sm:$0xff] }
 0x554   : > { %3042 = vtanh.f32 %v4256_v57 }
 0x561   : > { %v3043_v52 = vpop.eup %3042 }
 0x562   : > { %v1912_v59 = vmul.f32 %v3043_v52, %v3041_v1  ;;  %v2484_v1 = vld [vmem:[%s3314_s8 + $0x198] sm:$0xff]  ;;  %v2481_v52 = vld [vmem:[%s3314_s8 + $0x180] sm:$0xff] }
 0x564   : > { %1916 = vst [vmem:[%s1915_s6] sm:$0xff] %v1912_v59  ;;  %2060 = vmatmul.mubr.f32.vlgmr.msra.gmra.mxu0 %v1912_v59  ;;  %2131 = vmatmul.mubr.f32.vlgmr.msra.gmra.mxu1 %v1912_v59  ;;  %v2483_v59 = vld [vmem:[%s3314_s8 + $0x190] sm:$0xff]  ;;  %s2427_s6 = scalar_lea.vmem [#allocation2], %s2938_s26 }
 0x565   : > { %2248 = vmatpush1.msra.mxu0 %v3839_v7  ;;  %2319 = vmatpush1.msra.mxu1 %v3842_v48  ;;  %v4611_v7 = vld [vmem:[#allocation10_spill] sm:$0xff]  ;;  %v4612_v48 = vld [vmem:[#allocation7_spill] sm:$0xff] }
 0x566   : > { %2249 = vmatprep.subr.mxu0 %v3847_v51  ;;  %2320 = vmatprep.subr.mxu1 %v3850_v61  ;;  %v4613_v51 = vld [vmem:[#allocation12_spill] sm:$0xff]  ;;  %v4614_v61 = vld [vmem:[#allocation9_spill] sm:$0xff] }
 0x567   : > { %2250 = vmatpush1.msra.mxu0 %v3855_v4  ;;  %2321 = vmatpush1.msra.mxu1 %v3858_v9  ;;  %v4615_v4 = vld [vmem:[#allocation14_spill] sm:$0xff]  ;;  %v4616_v9 = vld [vmem:[#allocation11_spill] sm:$0xff] }
 0x568   : > { %2251 = vmatprep.subr.mxu0 %v3863_v31  ;;  %2322 = vmatprep.subr.mxu1 %v3866_v2  ;;  %v4617_v31 = vld [vmem:[#allocation16_spill] sm:$0xff]  ;;  %v4618_v2 = vld [vmem:[#allocation13_spill] sm:$0xff] }
 0x569   : > { %2252 = vmatpush1.msra.mxu0 %v3871_v18  ;;  %2323 = vmatpush1.msra.mxu1 %v3874_v41  ;;  %v4619_v18 = vld [vmem:[#allocation18_spill] sm:$0xff]  ;;  %v4620_v41 = vld [vmem:[#allocation15_spill] sm:$0xff] }
 0x56a   : > { %2253 = vmatprep.subr.mxu0 %v3879_v13  ;;  %2324 = vmatprep.subr.mxu1 %v3882_v0  ;;  %v4621_v13 = vld [vmem:[#allocation20_spill] sm:$0xff]  ;;  %v4622_v0 = vld [vmem:[#allocation17_spill] sm:$0xff] }
 0x56b   : > { %2254 = vmatpush1.msra.mxu0 %v3887_v21  ;;  %2325 = vmatpush1.msra.mxu1 %v3890_v62  ;;  %v4623_v21 = vld [vmem:[#allocation21_spill] sm:$0xff]  ;;  %v4624_v62 = vld [vmem:[#allocation19_spill] sm:$0xff] }
 0x56c   : > { %2255 = vmatprep.subr.mxu0 %v3895_v5  ;;  %2326 = vmatprep.subr.mxu1 %v3898_v6  ;;  %v4625_v5 = vld [vmem:[#allocation22_spill] sm:$0xff]  ;;  %v4626_v6 = vld [vmem:[#allocation23_spill] sm:$0xff] }
 0x56d   : > { %2256 = vmatpush1.msra.mxu0 %v3903_v8  ;;  %2327 = vmatpush1.msra.mxu1 %v3906_v10  ;;  %v4627_v8 = vmov 0.0   ;;  %v4628_v10 = vld [vmem:[#allocation24_spill] sm:$0xff] }
 0x56e   : > { %2257 = vmatprep.subr.mxu0 %v3911_v11  ;;  %2328 = vmatprep.subr.mxu1 %v3914_v12  ;;  %v1926_v11 = vld [vmem:[%s1925_s17] sm:$0xff] }
 0x56f   : > { %2258 = vmatpush1.msra.mxu0 %v3919_v14  ;;  %2329 = vmatpush1.msra.mxu1 %v3922_v15  ;;  %v1927_v15 = vld [vmem:[%s1925_s17 + $0x8] sm:$0xff] }
 0x570   : > { %2259 = vmatprep.subr.mxu0 %v3927_v16  ;;  %2330 = vmatprep.subr.mxu1 %v3930_v17 }
 0x571   : > { %2260 = vmatpush1.msra.mxu0 %v3935_v19  ;;  %2331 = vmatpush1.msra.mxu1 %v3938_v20 }
 0x572   : > { %2261 = vmatprep.subr.mxu0 %v3941_v22  ;;  %2332 = vmatprep.subr.mxu1 %v3946_v23  ;;  %v1928_v23 = vld [vmem:[%s1925_s17 + $0x10] sm:$0xff] }
 0x573   : > { %2262 = vmatpush1.msra.mxu0 %v3949_v24  ;;  %2333 = vmatpush1.msra.mxu1 %v3952_v25 }
 0x574   : > { %2263 = vmatprep.subr.mxu0 %v3957_v27  ;;  %2334 = vmatprep.subr.mxu1 %v3960_v29  ;;  %v1929_v29 = vld [vmem:[%s1925_s17 + $0x18] sm:$0xff] }
 0x575   : > { %2264 = vmatpush1.msra.mxu0 %v3963_v30  ;;  %2335 = vmatpush1.msra.mxu1 %v3968_v32 }
 0x576   : > { %2265 = vmatprep.subr.mxu0 %v3971_v33  ;;  %2336 = vmatprep.subr.mxu1 %v3974_v34 }
 0x577   : > { %2266 = vmatpush1.msra.mxu0 %v3979_v35  ;;  %2337 = vmatpush1.msra.mxu1 %v3982_v36 }
 0x578   : > { %2267 = vmatprep.subr.mxu0 %v3987_v37  ;;  %2338 = vmatprep.subr.mxu1 %v3990_v39 }
 0x579   : > { %2268 = vmatpush1.msra.mxu0 %v3995_v40  ;;  %2339 = vmatpush1.msra.mxu1 %v3998_v42 }
 0x57a   : > { %2269 = vmatprep.subr.mxu0 %v4003_v43  ;;  %2340 = vmatprep.subr.mxu1 %v4006_v44 }
 0x57b   : > { %2270 = vmatpush1.msra.mxu0 %v4011_v45  ;;  %2341 = vmatpush1.msra.mxu1 %v4611_v7  ;;  %v2478_v7 = vld [vmem:[%s3314_s8 + $0x168] sm:$0xff] }
 0x57c   : > { %2271 = vmatprep.subr.mxu0 %v4612_v48  ;;  %2342 = vmatprep.subr.mxu1 %v4613_v51  ;;  %v2480_v48 = vld [vmem:[%s3314_s8 + $0x178] sm:$0xff]  ;;  %v2477_v51 = vld [vmem:[%s3314_s8 + $0x160] sm:$0xff] }
 0x57d   : > { %2272 = vmatpush1.msra.mxu0 %v4614_v61  ;;  %2343 = vmatpush1.msra.mxu1 %v4615_v4  ;;  %v2479_v61 = vld [vmem:[%s3314_s8 + $0x170] sm:$0xff]  ;;  %v2474_v4 = vld [vmem:[%s3314_s8 + $0x148] sm:$0xff] }
 0x57e   : > { %2273 = vmatprep.subr.mxu0 %v4616_v9  ;;  %2344 = vmatprep.subr.mxu1 %v4617_v31  ;;  %v2476_v9 = vld [vmem:[%s3314_s8 + $0x158] sm:$0xff]  ;;  %v2473_v31 = vld [vmem:[%s3314_s8 + $0x140] sm:$0xff] }
 0x57f   : > { %2274 = vmatpush1.msra.mxu0 %v4618_v2  ;;  %2345 = vmatpush1.msra.mxu1 %v4619_v18  ;;  %v2475_v2 = vld [vmem:[%s3314_s8 + $0x150] sm:$0xff]  ;;  %v2470_v18 = vld [vmem:[%s3314_s8 + $0x128] sm:$0xff] }
 0x580   : > { %2275 = vmatprep.subr.mxu0 %v4620_v41  ;;  %2346 = vmatprep.subr.mxu1 %v4621_v13  ;;  %v2472_v41 = vld [vmem:[%s3314_s8 + $0x138] sm:$0xff]  ;;  %v2469_v13 = vld [vmem:[%s3314_s8 + $0x120] sm:$0xff] }
 0x581   : > { %2276 = vmatpush1.msra.mxu0 %v4622_v0  ;;  %2347 = vmatpush1.msra.mxu1 %v4623_v21  ;;  %v2471_v0 = vld [vmem:[%s3314_s8 + $0x130] sm:$0xff]  ;;  %v2466_v21 = vld [vmem:[%s3314_s8 + $0x108] sm:$0xff] }
 0x582   : > { %2277 = vmatprep.subr.mxu0 %v4624_v62  ;;  %2348 = vmatprep.subr.mxu1 %v4625_v5  ;;  %v2468_v62 = vld [vmem:[%s3314_s8 + $0x118] sm:$0xff]  ;;  %v2465_v5 = vld [vmem:[%s3314_s8 + $0x100] sm:$0xff] }
 0x583   : > { %2278 = vmatpush1.msra.mxu0 %v4626_v6  ;;  %2311 = vmatprep.mubr.f32.mxu0 %v4627_v8  ;;  %v2467_v6 = vld [vmem:[%s3314_s8 + $0x110] sm:$0xff] }
 0x584   : > { %2349 = vmatpush1.msra.mxu1 %v4628_v10  ;;  %2382 = vmatprep.mubr.f32.mxu1 %v4627_v8  ;;  %v2464_v10 = vld [vmem:[%s3314_s8 + $0xf8] sm:$0xff] }
 0x585   : > { %2497 = vmatprep.subr.mxu0 %v2494_v47  ;;  %2568 = vmatprep.subr.mxu1 %v2496_v46  ;;  %v2435_v47 = vld [vmem:[%s3314_s8 + $0x10] sm:$0xff]  ;;  %v2178_v46 = vld [vmem:[%s2177_s29] sm:$0xff] }
 0x624   : > { %v2061_v12 = vpop.f32.mrf.mxu0  ;;  %v2132_v22 = vpop.f32.mrf.mxu1 }
 0x625   : > { %v2137_v14 = vadd.f32 %v2061_v12, %v1926_v11  ;;  %v2139_v24 = vadd.f32 %v2132_v22, %v1928_v23  ;;  %v2461_v11 = vld [vmem:[%s3314_s8 + $0xe0] sm:$0xff]  ;;  %v2463_v12 = vld [vmem:[%s3314_s8 + $0xf0] sm:$0xff] }
 0x626   : > { %v2063_v16 = vpop.f32.mrf.mxu0  ;;  %v2134_v25 = vpop.f32.mrf.mxu1  ;;  %v2453_v22 = vld [vmem:[%s3314_s8 + $0xa0] sm:$0xff]  ;;  %v2455_v23 = vld [vmem:[%s3314_s8 + $0xb0] sm:$0xff] }
 0x627   : > { %v2911_v17 = vmul.f32 -1.442695, %v2137_v14  ;;  %v2138_v19 = vadd.f32 %v2063_v16, %v1927_v15  ;;  %v2913_v27 = vmul.f32 -1.442695, %v2139_v24  ;;  %v2140_v32 = vadd.f32 %v2134_v25, %v1929_v29  ;;  %v2458_v14 = vld [vmem:[%s3314_s8 + $0xc8] sm:$0xff]  ;;  %v2460_v15 = vld [vmem:[%s3314_s8 + $0xd8] sm:$0xff] }
 0x628   : > { %v2457_v16 = vld [vmem:[%s3314_s8 + $0xc0] sm:$0xff]  ;;  %v2450_v24 = vld [vmem:[%s3314_s8 + $0x88] sm:$0xff]  ;;  %v2452_v25 = vld [vmem:[%s3314_s8 + $0x98] sm:$0xff] }
 0x629   : > { %3044 = vpow2.f32 %v2911_v17  ;;  %v2912_v20 = vmul.f32 -1.442695, %v2138_v19  ;;  %v2459_v17 = vld [vmem:[%s3314_s8 + $0xd0] sm:$0xff]  ;;  %v2454_v19 = vld [vmem:[%s3314_s8 + $0xa8] sm:$0xff] }
 0x62a   : > { %v2451_v29 = vld [vmem:[%s3314_s8 + $0x90] sm:$0xff] }
 0x62b   : > { %3046 = vpow2.f32 %v2912_v20  ;;  %v2456_v20 = vld [vmem:[%s3314_s8 + $0xb8] sm:$0xff] }
 0x62c   : > { %3048 = vpow2.f32 %v2913_v27  ;;  %v2449_v27 = vld [vmem:[%s3314_s8 + $0x80] sm:$0xff] }
 0x636   : > { %v3045_v30 = vpop.eup %3044 }
 0x637   : > { %v2150_v33 = vadd.f32 1.0, %v3045_v30  ;;  %v2446_v30 = vld [vmem:[%s3314_s8 + $0x68] sm:$0xff] }
 0x638   : > { %v3047_v34 = vpop.eup %3046 }
 0x639   : > { %3050 = vrcp.f32 %v2150_v33  ;;  %v2151_v35 = vadd.f32 1.0, %v3047_v34  ;;  %v3049_v36 = vpop.eup %3048  ;;  %v2445_v33 = vld [vmem:[%s3314_s8 + $0x60] sm:$0xff]  ;;  %v2447_v34 = vld [vmem:[%s3314_s8 + $0x70] sm:$0xff] }
 0x63a   : > { %3052 = vtanh.f32 %v2140_v32  ;;  %v2152_v42 = vadd.f32 1.0, %v3049_v36  ;;  %v2448_v32 = vld [vmem:[%s3314_s8 + $0x78] sm:$0xff] }
 0x63b   : > { %3054 = vrcp.f32 %v2151_v35  ;;  %v2442_v35 = vld [vmem:[%s3314_s8 + $0x48] sm:$0xff]  ;;  %v2444_v36 = vld [vmem:[%s3314_s8 + $0x58] sm:$0xff] }
 0x63c   : > { %3056 = vrcp.f32 %v2152_v42  ;;  %v2440_v42 = vld [vmem:[%s3314_s8 + $0x38] sm:$0xff] }
 0x646   : > { %v3051_v37 = vpop.eup %3050 }
 0x647   : > { %v3053_v39 = vpop.eup %3052 }
 0x648   : > { %v3055_v40 = vpop.eup %3054  ;;  %v2162_v44 = vmul.f32 %v3053_v39, %v3051_v37  ;;  %v2441_v37 = vld [vmem:[%s3314_s8 + $0x40] sm:$0xff]  ;;  %v2443_v39 = vld [vmem:[%s3314_s8 + $0x50] sm:$0xff] }
 0x649   : > { %v2161_v43 = vmul.f32 %v3055_v40, %v4256_v57  ;;  %v3057_v54 = vpop.eup %3056  ;;  %v2482_v57 = vld [vmem:[%s3314_s8 + $0x188] sm:$0xff] }
 0x64a   : > { %v2438_v40 = vld [vmem:[%s3314_s8 + $0x28] sm:$0xff] }
 0x64b   : > { %v4334_v45 = vadd.f32 %v2162_v44, %v2161_v43  ;;  %v2437_v43 = vld [vmem:[%s3314_s8 + $0x20] sm:$0xff]  ;;  %v2439_v44 = vld [vmem:[%s3314_s8 + $0x30] sm:$0xff] }
 0x64d   : > { %3058 = vtanh.f32 %v4334_v45 }
 0x65a   : > { %v3059_v55 = vpop.eup %3058 }
 0x65b   : > { %v2165_v3 = vmul.f32 %v3059_v55, %v3057_v54  ;;  %v2434_v54 = vld [vmem:[%s3314_s8 + $0x8] sm:$0xff]  ;;  %v2436_v55 = vld [vmem:[%s3314_s8 + $0x18] sm:$0xff] }
 0x65d   : > { %2169 = vst [vmem:[%s2168_s20] sm:$0xff] %v2165_v3  ;;  %2312 = vmatmul.mubr.f32.vlgmr.msra.gmra.mxu0 %v2165_v3  ;;  %2383 = vmatmul.mubr.f32.vlgmr.msra.gmra.mxu1 %v2165_v3  ;;  %v2433_v3 = vld [vmem:[%s3314_s8] sm:$0xff] }
 0x65e   : > { %2561 = vmatprep.mubr.f32.mxu0 %v4627_v8  ;;  %2632 = vmatprep.mubr.f32.mxu1 %v4627_v8  ;;  %v2462_v8 = vld [vmem:[%s3314_s8 + $0xe8] sm:$0xff]  ;;  %s2420_s8 = scalar_lea.vmem %s3742_s12, %s2914_s25 [#allocation5] }
 0x65f   : > { %2498 = vmatpush1.msra.mxu0 %v2493_v60  ;;  %2569 = vmatpush1.msra.mxu1 %v2495_v26 }
 0x660   : > { %2499 = vmatprep.subr.mxu0 %v2490_v28  ;;  %2570 = vmatprep.subr.mxu1 %v2492_v50  ;;  %v2179_v28 = vld [vmem:[%s2177_s29 + $0x8] sm:$0xff] }
 0x661   : > { %2500 = vmatpush1.msra.mxu0 %v2489_v38  ;;  %2571 = vmatpush1.msra.mxu1 %v2491_v53 }
 0x662   : > { %2501 = vmatprep.subr.mxu0 %v2486_v49  ;;  %2572 = vmatprep.subr.mxu1 %v2488_v63 }
 0x663   : > { %2502 = vmatpush1.msra.mxu0 %v2485_v58  ;;  %2573 = vmatpush1.msra.mxu1 %v2487_v56  ;;  %v2180_v58 = vld [vmem:[%s2177_s29 + $0x10] sm:$0xff] }
 0x664   : > { %2503 = vmatprep.subr.mxu0 %v2482_v57  ;;  %2574 = vmatprep.subr.mxu1 %v2484_v1 }
 0x665   : > { %2504 = vmatpush1.msra.mxu0 %v2481_v52  ;;  %2575 = vmatpush1.msra.mxu1 %v2483_v59  ;;  %v2181_v52 = vld [vmem:[%s2177_s29 + $0x18] sm:$0xff] }
 0x666   : > { %2505 = vmatprep.subr.mxu0 %v2478_v7  ;;  %2576 = vmatprep.subr.mxu1 %v2480_v48 }
 0x667   : > { %2506 = vmatpush1.msra.mxu0 %v2477_v51  ;;  %2577 = vmatpush1.msra.mxu1 %v2479_v61 }
 0x668   : > { %2507 = vmatprep.subr.mxu0 %v2474_v4  ;;  %2578 = vmatprep.subr.mxu1 %v2476_v9 }
 0x669   : > { %2508 = vmatpush1.msra.mxu0 %v2473_v31  ;;  %2579 = vmatpush1.msra.mxu1 %v2475_v2 }
 0x66a   : > { %2509 = vmatprep.subr.mxu0 %v2470_v18  ;;  %2580 = vmatprep.subr.mxu1 %v2472_v41 }
 0x66b   : > { %2510 = vmatpush1.msra.mxu0 %v2469_v13  ;;  %2581 = vmatpush1.msra.mxu1 %v2471_v0 }
 0x66c   : > { %2511 = vmatprep.subr.mxu0 %v2466_v21  ;;  %2582 = vmatprep.subr.mxu1 %v2468_v62 }
 0x66d   : > { %2512 = vmatpush1.msra.mxu0 %v2465_v5  ;;  %2583 = vmatpush1.msra.mxu1 %v2467_v6  ;;  %v2428_v6 = vld [vmem:[%s2427_s6] sm:$0xff] }
 0x66e   : > { %2513 = vmatprep.subr.mxu0 %v2462_v8  ;;  %2584 = vmatprep.subr.mxu1 %v2464_v10  ;;  %v2429_v10 = vld [vmem:[%s2427_s6 + $0x8] sm:$0xff] }
 0x66f   : > { %2514 = vmatpush1.msra.mxu0 %v2461_v11  ;;  %2585 = vmatpush1.msra.mxu1 %v2463_v12 }
 0x670   : > { %2515 = vmatprep.subr.mxu0 %v2458_v14  ;;  %2586 = vmatprep.subr.mxu1 %v2460_v15 }
 0x671   : > { %2516 = vmatpush1.msra.mxu0 %v2457_v16  ;;  %2587 = vmatpush1.msra.mxu1 %v2459_v17  ;;  %v2430_v17 = vld [vmem:[%s2427_s6 + $0x10] sm:$0xff] }
 0x672   : > { %2517 = vmatprep.subr.mxu0 %v2454_v19  ;;  %2588 = vmatprep.subr.mxu1 %v2456_v20 }
 0x673   : > { %2518 = vmatpush1.msra.mxu0 %v2453_v22  ;;  %2589 = vmatpush1.msra.mxu1 %v2455_v23  ;;  %v2431_v23 = vld [vmem:[%s2427_s6 + $0x18] sm:$0xff] }
 0x674   : > { %2519 = vmatprep.subr.mxu0 %v2450_v24  ;;  %2590 = vmatprep.subr.mxu1 %v2452_v25 }
 0x675   : > { %2520 = vmatpush1.msra.mxu0 %v2449_v27  ;;  %2591 = vmatpush1.msra.mxu1 %v2451_v29 }
 0x676   : > { %2521 = vmatprep.subr.mxu0 %v2446_v30  ;;  %2592 = vmatprep.subr.mxu1 %v2448_v32 }
 0x677   : > { %2522 = vmatpush1.msra.mxu0 %v2445_v33  ;;  %2593 = vmatpush1.msra.mxu1 %v2447_v34 }
 0x678   : > { %2523 = vmatprep.subr.mxu0 %v2442_v35  ;;  %2594 = vmatprep.subr.mxu1 %v2444_v36 }
 0x679   : > { %2524 = vmatpush1.msra.mxu0 %v2441_v37  ;;  %2595 = vmatpush1.msra.mxu1 %v2443_v39 }
 0x67a   : > { %2525 = vmatprep.subr.mxu0 %v2438_v40  ;;  %2596 = vmatprep.subr.mxu1 %v2440_v42 }
 0x67b   : > { %2526 = vmatpush1.msra.mxu0 %v2437_v43  ;;  %2597 = vmatpush1.msra.mxu1 %v2439_v44 }
 0x67c   : > { %2527 = vmatprep.subr.mxu0 %v2434_v54  ;;  %2598 = vmatprep.subr.mxu1 %v2436_v55 }
 0x67d   : > { %2528 = vmatpush1.msra.mxu0 %v2433_v3  ;;  %2599 = vmatpush1.msra.mxu1 %v2435_v47 }
 0x71d   : > { %v2313_v60 = vpop.f32.mrf.mxu0  ;;  %v2384_v63 = vpop.f32.mrf.mxu1 }
 0x71e   : > { %v2389_v26 = vadd.f32 %v2313_v60, %v2178_v46  ;;  %v2391_v56 = vadd.f32 %v2384_v63, %v2180_v58 }
 0x71f   : > { %v2315_v50 = vpop.f32.mrf.mxu0  ;;  %v2386_v57 = vpop.f32.mrf.mxu1 }
 0x720   : > { %v2917_v38 = vmul.f32 -1.442695, %v2389_v26  ;;  %v2390_v53 = vadd.f32 %v2315_v50, %v2179_v28  ;;  %v2919_v1 = vmul.f32 -1.442695, %v2391_v56  ;;  %v2392_v7 = vadd.f32 %v2386_v57, %v2181_v52 }
 0x722   : > { %3060 = vpow2.f32 %v2917_v38  ;;  %v2918_v49 = vmul.f32 -1.442695, %v2390_v53 }
 0x724   : > { %3062 = vpow2.f32 %v2918_v49 }
 0x725   : > { %3064 = vpow2.f32 %v2919_v1 }
 0x72f   : > { %v3061_v59 = vpop.eup %3060 }
 0x730   : > { %v2402_v48 = vadd.f32 1.0, %v3061_v59 }
 0x731   : > { %v3063_v51 = vpop.eup %3062 }
 0x732   : > { %3066 = vrcp.f32 %v2402_v48  ;;  %v2403_v61 = vadd.f32 1.0, %v3063_v51  ;;  %v3065_v4 = vpop.eup %3064 }
 0x733   : > { %3068 = vtanh.f32 %v2392_v7  ;;  %v2404_v18 = vadd.f32 1.0, %v3065_v4 }
 0x734   : > { %3070 = vrcp.f32 %v2403_v61 }
 0x735   : > { %3072 = vrcp.f32 %v2404_v18 }
 0x73f   : > { %v3067_v9 = vpop.eup %3066 }
 0x740   : > { %v3069_v31 = vpop.eup %3068 }
 0x741   : > { %v3071_v2 = vpop.eup %3070  ;;  %v2414_v13 = vmul.f32 %v3069_v31, %v3067_v9 }
 0x742   : > { %v2413_v41 = vmul.f32 %v3071_v2, %v4334_v45  ;;  %v3073_v21 = vpop.eup %3072 }
 0x744   : > { %v2415_v0 = vadd.f32 %v2414_v13, %v2413_v41 }
 0x746   : > { %3074 = vtanh.f32 %v2415_v0 }
 0x753   : > { %v3075_v62 = vpop.eup %3074 }
 0x754   : > { %v2417_v5 = vmul.f32 %v3075_v62, %v3073_v21 }
 0x756   : > { %2421 = vst [vmem:[%s2420_s8] sm:$0xff] %v2417_v5  ;;  %2562 = vmatmul.mubr.f32.vlgmr.msra.gmra.mxu0 %v2417_v5  ;;  %2633 = vmatmul.mubr.f32.vlgmr.msra.gmra.mxu1 %v2417_v5 }
 0x816   : > { %v2563_v8 = vpop.f32.mrf.mxu0  ;;  %v2634_v16 = vpop.f32.mrf.mxu1 }
 0x817   : > { %v2639_v45 = vadd.f32 %v2563_v8, %v2428_v6  ;;  %v2641_v19 = vadd.f32 %v2634_v16, %v2430_v17 }
 0x818   : > { %v2565_v11 = vpop.f32.mrf.mxu0  ;;  %v2636_v20 = vpop.f32.mrf.mxu1 }
 0x819   : > { %v2922_v12 = vmul.f32 -1.442695, %v2639_v45  ;;  %v2640_v14 = vadd.f32 %v2565_v11, %v2429_v10  ;;  %v2924_v22 = vmul.f32 -1.442695, %v2641_v19  ;;  %v2642_v25 = vadd.f32 %v2636_v20, %v2431_v23 }
 0x81b   : > { %3076 = vpow2.f32 %v2922_v12  ;;  %v2923_v15 = vmul.f32 -1.442695, %v2640_v14 }
 0x81d   : > { %3078 = vpow2.f32 %v2923_v15 }
 0x81e   : > { %3080 = vpow2.f32 %v2924_v22 }
 0x828   : > { %v3077_v24 = vpop.eup %3076 }
 0x829   : > { %v2652_v27 = vadd.f32 1.0, %v3077_v24 }
 0x82a   : > { %v3079_v29 = vpop.eup %3078 }
 0x82b   : > { %3082 = vrcp.f32 %v2652_v27  ;;  %v2653_v30 = vadd.f32 1.0, %v3079_v29  ;;  %v3081_v32 = vpop.eup %3080 }
 0x82c   : > { %3084 = vtanh.f32 %v2642_v25  ;;  %v2654_v36 = vadd.f32 1.0, %v3081_v32 }
 0x82d   : > { %3086 = vrcp.f32 %v2653_v30 }
 0x82e   : > { %3088 = vrcp.f32 %v2654_v36 }
 0x838   : > { %v3083_v33 = vpop.eup %3082 }
 0x839   : > { %v3085_v34 = vpop.eup %3084 }
 0x83a   : > { %v3087_v35 = vpop.eup %3086  ;;  %v2664_v39 = vmul.f32 %v3085_v34, %v3083_v33 }
 0x83b   : > { %v2663_v37 = vmul.f32 %v3087_v35, %v2415_v0  ;;  %v3089_v42 = vpop.eup %3088 }
 0x83d   : > { %v2665_v40 = vadd.f32 %v2664_v39, %v2663_v37 }
 0x83f   : > { %3090 = vtanh.f32 %v2665_v40 }
 0x84b   : > { %2678 = sbr.rel (!%p3167_p4) target bundleno = 2140 (0x85c), region = 40 }
 0x84c   : > { %v3091_v43 = vpop.eup %3090 }
 0x84d   : > { %v2667_v44 = vmul.f32 %v3091_v43, %v3089_v42 }
 0x84f   : > { %2671 = vst [vmem:[%s2670_s7] sm:$0xff] %v2667_v44 }
 0x856   : > { %v2723_v54 = vld [vmem:[%s3742_s12] sm:$0xff]  ;;  %v2725_v55 = vld [vmem:[%s3742_s12 + $0x8] sm:$0xff]  ;;  %v2727_v3 = vld [vmem:[%s3742_s12 + $0x10] sm:$0xff] }
 0x857   : > { %v2729_v47 = vld [vmem:[%s3742_s12 + $0x18] sm:$0xff]  ;;  %v2731_v46 = vld [vmem:[%s3742_s12 + $0x20] sm:$0xff]  ;;  %v2733_v60 = vld [vmem:[%s3742_s12 + $0x28] sm:$0xff]  ;;  %2724 = vst [vmem:[%s2680_s11] sm:$0xff] %v2723_v54 }
 0x858   : > { %2726 = vst [vmem:[%s2680_s11 + $0x10] sm:$0xff] %v2725_v55  ;;  %2728 = vst [vmem:[%s2680_s11 + $0x20] sm:$0xff] %v2727_v3  ;;  %v2735_v26 = vld [vmem:[%s3742_s12 + $0x30] sm:$0xff]  ;;  %v2737_v28 = vld [vmem:[%s3742_s12 + $0x38] sm:$0xff] }
 0x859   : > { %2730 = vst [vmem:[%s2680_s11 + $0x30] sm:$0xff] %v2729_v47  ;;  %2732 = vst [vmem:[%s2680_s11 + $0x40] sm:$0xff] %v2731_v46 }
 0x85a   : > { %2734 = vst [vmem:[%s2680_s11 + $0x50] sm:$0xff] %v2733_v60  ;;  %2736 = vst [vmem:[%s2680_s11 + $0x60] sm:$0xff] %v2735_v26 }
 0x85b   : > { %2738 = vst [vmem:[%s2680_s11 + $0x70] sm:$0xff] %v2737_v28 }
 0x85c PF: > { %p11_p8 = scmp.ge.s32.totalorder %s3157_s19, 4   ;;  %s4629_s15 = smov %s3110_s16 }
 0x85d   : > { %s4630_s16 = smov %s3165_s22  ;;  %s4631_s17 = smov %s3157_s19 }
 0x85e   :  { %13 = sbr.rel (!%p11_p8) target bundleno = 2 (0x2), region = 126 }

</bundles_post_ra>
